<compile_context>
chip_gen: v5e
topology: v5e:2x2
jax: 0.10.0
libtpu: 0.0.40
codegen_flags: <defaults>
</compile_context>

<pallas_src>
import functools

import jax
import jax.numpy as jnp
from jax.experimental import pallas as pl
from jax.experimental.pallas import tpu as pltpu


def _round_up(x, m):
    return (x + m - 1) // m * m


# ----------------------------------------------------------------------------
# Pallas kernels
# ----------------------------------------------------------------------------
def _conv_mm_kernel(a_ref, b_ref, bias_ref, o_ref, acc_ref, *, lrelu):
    # a: (tm, tk) bf16, b: (tk, tn) bf16, bias: (1, tn) f32, o: (tm, tn), acc: f32.
    k = pl.program_id(2)

    @pl.when(k == 0)
    def _():
        acc_ref[...] = jnp.zeros_like(acc_ref)

    acc_ref[...] += jnp.dot(a_ref[...], b_ref[...],
                            preferred_element_type=jnp.float32)

    @pl.when(k == pl.num_programs(2) - 1)
    def _():
        acc = acc_ref[...] + bias_ref[...]
        if lrelu:
            acc = jnp.where(acc > 0, acc, 0.2 * acc)
        o_ref[...] = acc.astype(o_ref.dtype)


def _conv_matmul(patches, w2d, bias, *, lrelu, out_dtype):
    """patches: (M, K), w2d: (K, Cout), bias: (Cout,). Returns (M, Cout) out_dtype."""
    M, K = patches.shape
    _, Cout = w2d.shape

    tm = min(256, _round_up(M, 8))
    tn = min(512, _round_up(Cout, 128))
    tk = min(2048, _round_up(K, 128))
    m_pad = _round_up(M, tm)
    n_pad = _round_up(Cout, tn)
    k_pad = _round_up(K, tk)

    # Zero-pad to full tiles: lane-dense outputs (Cout -> mult of 128), full MXU K tiles.
    patches_p = jnp.pad(patches, ((0, m_pad - M), (0, k_pad - K))).astype(jnp.bfloat16)
    w2d_p = jnp.pad(w2d, ((0, k_pad - K), (0, n_pad - Cout))).astype(jnp.bfloat16)
    bias_p = jnp.pad(bias, (0, n_pad - Cout)).reshape(1, n_pad).astype(jnp.float32)

    grid = (m_pad // tm, n_pad // tn, k_pad // tk)
    out = pl.pallas_call(
        functools.partial(_conv_mm_kernel, lrelu=lrelu),
        out_shape=jax.ShapeDtypeStruct((m_pad, n_pad), out_dtype),
        grid_spec=pltpu.PrefetchScalarGridSpec(
            num_scalar_prefetch=0,
            grid=grid,
            in_specs=[
                pl.BlockSpec((tm, tk), lambda i, j, k: (i, k)),
                pl.BlockSpec((tk, tn), lambda i, j, k: (k, j)),
                pl.BlockSpec((1, tn), lambda i, j, k: (0, j)),
            ],
            out_specs=pl.BlockSpec((tm, tn), lambda i, j, k: (i, j)),
            scratch_shapes=[pltpu.VMEM((tm, tn), jnp.float32)],
        ),
        compiler_params=pltpu.CompilerParams(
            dimension_semantics=("parallel", "parallel", "arbitrary"),
            vmem_limit_bytes=32 * 1024 * 1024,
        ),
    )(patches_p, w2d_p, bias_p)
    return out[:M, :Cout]


def _in_lrelu_kernel(x_ref, o_ref):
    # x: (1, HW, 128) f32 -- InstanceNorm over HW per (n, c), then LeakyReLU(0.2).
    x = x_ref[...]
    mean = jnp.mean(x, axis=1, keepdims=True)
    c = x - mean
    var = jnp.mean(c * c, axis=1, keepdims=True)
    y = c * jax.lax.rsqrt(var + 1e-5)
    o_ref[...] = jnp.where(y > 0, y, 0.2 * y).astype(o_ref.dtype)


def _instance_norm_lrelu(x):
    # x: (N, HW, C) f32, C a multiple of 128. Gridded over (N, C/128), full-HW block.
    N, HW, C = x.shape
    tc = 128
    return pl.pallas_call(
        _in_lrelu_kernel,
        out_shape=jax.ShapeDtypeStruct((N, HW, C), jnp.bfloat16),
        grid_spec=pltpu.PrefetchScalarGridSpec(
            num_scalar_prefetch=0,
            grid=(N, C // tc),
            in_specs=[pl.BlockSpec((1, HW, tc), lambda n, c: (n, 0, c))],
            out_specs=pl.BlockSpec((1, HW, tc), lambda n, c: (n, 0, c)),
        ),
        compiler_params=pltpu.CompilerParams(
            dimension_semantics=("parallel", "parallel"),
            vmem_limit_bytes=32 * 1024 * 1024,
        ),
    )(x)


# ----------------------------------------------------------------------------
# Conv block (reflect pad + bf16 im2col glue in JAX, hot path in Pallas)
# ----------------------------------------------------------------------------
def _conv_block(x_nhwc, w, b, stride, use_in, use_lrelu):
    # w: (Cout, Cin, KH, KW) (PyTorch layout), b: (Cout,)
    N, H, W, Cin = x_nhwc.shape
    Cout, _, KH, KW = w.shape
    xp = jnp.pad(x_nhwc, ((0, 0), (1, 1), (1, 1), (0, 0)), mode="reflect")
    Hp, Wp = H + 2, W + 2
    OH = (Hp - KH) // stride + 1
    OW = (Wp - KW) // stride + 1

    # TODO(synk): fold the KH*KW taps into the matmul's K grid axis (slicing the padded
    # NHWC activation directly per tap) to avoid materializing the 16x im2col copy in
    # HBM; for now the im2col is materialized in bf16 (half the bytes of f32).
    cols = []
    for kh in range(KH):
        for kw in range(KW):
            cols.append(xp[:, kh:kh + stride * OH:stride,
                              kw:kw + stride * OW:stride, :])
    # (N, OH, OW, KH*KW, Cin) -> (N*OH*OW, KH*KW*Cin), tap-major / Cin-minor ordering.
    patches = jnp.stack(cols, axis=3).reshape(N * OH * OW, KH * KW * Cin)
    # weight -> (KH, KW, Cin, Cout) -> (KH*KW*Cin, Cout) to match the patch ordering.
    w2d = jnp.transpose(w, (2, 3, 1, 0)).reshape(KH * KW * Cin, Cout)

    # Layers followed by InstanceNorm keep f32 conv outputs (accurate mean/var);
    # other layers cast once to bf16 (final layer stays f32 for the module output).
    out_dtype = jnp.bfloat16 if (use_lrelu and not use_in) else jnp.float32
    out = _conv_matmul(patches, w2d, b,
                       lrelu=(use_lrelu and not use_in), out_dtype=out_dtype)
    out = out.reshape(N, OH * OW, Cout)
    if use_in:
        out = _instance_norm_lrelu(out)  # fused InstanceNorm + LeakyReLU, bf16 out
    return out.reshape(N, OH, OW, Cout)


# ----------------------------------------------------------------------------
# Discriminator forward
# ----------------------------------------------------------------------------
_LAYER_CFG = [
    # (Cin, Cout, stride, instance_norm, leaky_relu)
    (3,   64,  2, False, True),   # C64
    (64,  128, 2, True,  True),   # C128
    (128, 256, 2, True,  True),   # C256
    (256, 512, 1, True,  True),   # C512
    (512, 1,   1, False, False),  # out
]


def init_params(key):
    params = []
    for (cin, cout, _, _, _) in _LAYER_CFG:
        key, kw, kb = jax.random.split(key, 3)
        fan_in = cin * 4 * 4
        w = jax.random.normal(kw, (cout, cin, 4, 4), jnp.float32) / jnp.sqrt(fan_in)
        b = 0.01 * jax.random.normal(kb, (cout,), jnp.float32)
        params.append((w, b))
    return params


def discriminator_forward(x_nchw, params):
    # NCHW -> NHWC, activations carried in bf16 (MXU-native), conv accum in f32.
    x = jnp.transpose(x_nchw, (0, 2, 3, 1)).astype(jnp.bfloat16)
    for (w, b), (_, _, stride, use_in, use_lrelu) in zip(params, _LAYER_CFG):
        x = _conv_block(x, w, b, stride, use_in, use_lrelu)
    # NHWC -> NCHW
    return jnp.transpose(x, (0, 3, 1, 2)).astype(jnp.float32)


if __name__ == "__main__":
    key = jax.random.PRNGKey(0)
    kx, kp = jax.random.split(key)
    # Small PatchGAN-compatible input: (N=2, C=3, H=32, W=32) NCHW.
    x = jax.random.normal(kx, (2, 3, 32, 32), jnp.float32)
    params = init_params(kp)

    fwd = jax.jit(discriminator_forward)
    out = fwd(x, params)
    out = jax.block_until_ready(out)

    # 32 -> 16 -> 8 -> 4 -> 3 -> 2 spatial; single output channel.
    assert out.shape == (2, 1, 2, 2), out.shape
    assert bool(jnp.all(jnp.isfinite(out)))
    print("KERNEL_OK")
</pallas_src>

<mosaic_0001>
module attributes {stable_mosaic.version = 11 : i64} {
  func.func @_conv_mm_kernel(%arg0: i32, %arg1: i32, %arg2: i32, %arg3: memref<256x128xbf16, #tpu.memory_space<vmem>>, %arg4: memref<128x128xbf16, #tpu.memory_space<vmem>>, %arg5: memref<1x128xf32, #tpu.memory_space<vmem>>, %arg6: memref<256x128xbf16, #tpu.memory_space<vmem>>, %arg7: memref<256x128xf32, #tpu.memory_space<vmem>>) attributes {dimension_semantics = [#tpu.dimension_semantics<parallel>, #tpu.dimension_semantics<parallel>, #tpu.dimension_semantics<arbitrary>], iteration_bounds = array<i64: 2, 1, 1>, scalar_prefetch = 0 : i64, scratch_operands = 1 : i64, tpu.core_type = #tpu.core_type<tc>, window_params = [{transform_indices = @transform_0, window_bounds = array<i64: 256, 128>}, {transform_indices = @transform_1, window_bounds = array<i64: 128, 128>}, {transform_indices = @transform_2, window_bounds = array<i64: 1, 128>}, {transform_indices = @transform_3, window_bounds = array<i64: 256, 128>}]} {
    %c0_i32 = arith.constant 0 : i32
    %0 = arith.cmpi eq, %arg2, %c0_i32 : i32
    %1 = arith.extui %0 : i1 to i32
    %c0_i32_0 = arith.constant 0 : i32
    %2 = arith.cmpi ne, %1, %c0_i32_0 : i32
    scf.if %2 {
      %cst_10 = arith.constant 0.000000e+00 : f32
      %12 = vector.broadcast %cst_10 : f32 to vector<256x128xf32>
      %c0_11 = arith.constant 0 : index
      %c0_12 = arith.constant 0 : index
      %13 = vector.load %arg7[%c0_11, %c0_12] : memref<256x128xf32, #tpu.memory_space<vmem>>, vector<256x128xf32>
      tpu.vector_store %arg7[%c0_11, %c0_12], %12 {strides = array<i32>} : memref<256x128xf32, #tpu.memory_space<vmem>>, vector<256x128xf32>,
    } else {
    }
    %c0 = arith.constant 0 : index
    %c0_1 = arith.constant 0 : index
    %3 = vector.load %arg7[%c0, %c0_1] : memref<256x128xf32, #tpu.memory_space<vmem>>, vector<256x128xf32>
    %c0_2 = arith.constant 0 : index
    %c0_3 = arith.constant 0 : index
    %4 = vector.load %arg3[%c0_2, %c0_3] : memref<256x128xbf16, #tpu.memory_space<vmem>>, vector<256x128xbf16>
    %c0_4 = arith.constant 0 : index
    %c0_5 = arith.constant 0 : index
    %5 = vector.load %arg4[%c0_4, %c0_5] : memref<128x128xbf16, #tpu.memory_space<vmem>>, vector<128x128xbf16>
    %cst = arith.constant dense<0.000000e+00> : vector<256x128xf32>
    %6 = tpu.matmul %4, %5, %cst {dimension_numbers = #tpu.dot_dimension_numbers<[1], [0], [0], [1], [0, 0, 1, 1], [], []>} : vector<256x128xbf16>, vector<128x128xbf16>, vector<256x128xf32> -> vector<256x128xf32>
    %7 = arith.addf %3, %6 : vector<256x128xf32>
    %c0_6 = arith.constant 0 : index
    %c0_7 = arith.constant 0 : index
    %8 = vector.load %arg7[%c0_6, %c0_7] : memref<256x128xf32, #tpu.memory_space<vmem>>, vector<256x128xf32>
    tpu.vector_store %arg7[%c0_6, %c0_7], %7 {strides = array<i32>} : memref<256x128xf32, #tpu.memory_space<vmem>>, vector<256x128xf32>,
    %c0_i32_8 = arith.constant 0 : i32
    %9 = arith.cmpi eq, %arg2, %c0_i32_8 : i32
    %10 = arith.extui %9 : i1 to i32
    %c0_i32_9 = arith.constant 0 : i32
    %11 = arith.cmpi ne, %10, %c0_i32_9 : i32
    scf.if %11 {
      %c0_10 = arith.constant 0 : index
      %c0_11 = arith.constant 0 : index
      %12 = vector.load %arg7[%c0_10, %c0_11] : memref<256x128xf32, #tpu.memory_space<vmem>>, vector<256x128xf32>
      %c0_12 = arith.constant 0 : index
      %c0_13 = arith.constant 0 : index
      %13 = vector.load %arg5[%c0_12, %c0_13] : memref<1x128xf32, #tpu.memory_space<vmem>>, vector<1x128xf32>
      %14 = vector.broadcast %13 : vector<1x128xf32> to vector<256x128xf32>
      %15 = arith.addf %12, %14 : vector<256x128xf32>
      %cst_14 = arith.constant 0.000000e+00 : f32
      %16 = vector.broadcast %cst_14 : f32 to vector<256x128xf32>
      %17 = arith.cmpf ogt, %15, %16 : vector<256x128xf32>
      %cst_15 = arith.constant 2.000000e-01 : f32
      %18 = vector.broadcast %cst_15 : f32 to vector<256x128xf32>
      %19 = arith.mulf %18, %15 : vector<256x128xf32>
      %20 = arith.select %17, %15, %19 : vector<256x128xi1>, vector<256x128xf32>
      %21 = arith.truncf %20 : vector<256x128xf32> to vector<256x128xbf16>
      %c0_16 = arith.constant 0 : index
      %c0_17 = arith.constant 0 : index
      %22 = vector.load %arg6[%c0_16, %c0_17] : memref<256x128xbf16, #tpu.memory_space<vmem>>, vector<256x128xbf16>
      tpu.vector_store %arg6[%c0_16, %c0_17], %21 {strides = array<i32>} : memref<256x128xbf16, #tpu.memory_space<vmem>>, vector<256x128xbf16>,
    } else {
    }
    return
  }
  func.func @transform_0(%arg0: i32, %arg1: i32, %arg2: i32) -> (i32, i32) {
    %c0_i32 = arith.constant 0 : i32
    return %arg0, %arg2 : i32, i32
  }
  func.func @transform_1(%arg0: i32, %arg1: i32, %arg2: i32) -> (i32, i32) {
    %c0_i32 = arith.constant 0 : i32
    return %arg2, %arg1 : i32, i32
  }
  func.func @transform_2(%arg0: i32, %arg1: i32, %arg2: i32) -> (i32, i32) {
    %c0_i32 = arith.constant 0 : i32
    %c0_i32_0 = arith.constant 0 : i32
    return %c0_i32, %arg1 : i32, i32
  }
  func.func @transform_3(%arg0: i32, %arg1: i32, %arg2: i32) -> (i32, i32) {
    %c0_i32 = arith.constant 0 : i32
    return %arg0, %arg1 : i32, i32
  }
}

module attributes {stable_mosaic.version = 11 : i64} {
  func.func @_conv_mm_kernel(%arg0: i32, %arg1: i32, %arg2: i32, %arg3: memref<128x1024xbf16, #tpu.memory_space<vmem>>, %arg4: memref<1024x128xbf16, #tpu.memory_space<vmem>>, %arg5: memref<1x128xf32, #tpu.memory_space<vmem>>, %arg6: memref<128x128xf32, #tpu.memory_space<vmem>>, %arg7: memref<128x128xf32, #tpu.memory_space<vmem>>) attributes {dimension_semantics = [#tpu.dimension_semantics<parallel>, #tpu.dimension_semantics<parallel>, #tpu.dimension_semantics<arbitrary>], iteration_bounds = array<i64: 1, 1, 1>, scalar_prefetch = 0 : i64, scratch_operands = 1 : i64, tpu.core_type = #tpu.core_type<tc>, window_params = [{transform_indices = @transform_0, window_bounds = array<i64: 128, 1024>}, {transform_indices = @transform_1, window_bounds = array<i64: 1024, 128>}, {transform_indices = @transform_2, window_bounds = array<i64: 1, 128>}, {transform_indices = @transform_3, window_bounds = array<i64: 128, 128>}]} {
    %c0_i32 = arith.constant 0 : i32
    %0 = arith.cmpi eq, %arg2, %c0_i32 : i32
    %1 = arith.extui %0 : i1 to i32
    %c0_i32_0 = arith.constant 0 : i32
    %2 = arith.cmpi ne, %1, %c0_i32_0 : i32
    scf.if %2 {
      %cst_10 = arith.constant 0.000000e+00 : f32
      %12 = vector.broadcast %cst_10 : f32 to vector<128x128xf32>
      %c0_11 = arith.constant 0 : index
      %c0_12 = arith.constant 0 : index
      %13 = vector.load %arg7[%c0_11, %c0_12] : memref<128x128xf32, #tpu.memory_space<vmem>>, vector<128x128xf32>
      tpu.vector_store %arg7[%c0_11, %c0_12], %12 {strides = array<i32>} : memref<128x128xf32, #tpu.memory_space<vmem>>, vector<128x128xf32>,
    } else {
    }
    %c0 = arith.constant 0 : index
    %c0_1 = arith.constant 0 : index
    %3 = vector.load %arg7[%c0, %c0_1] : memref<128x128xf32, #tpu.memory_space<vmem>>, vector<128x128xf32>
    %c0_2 = arith.constant 0 : index
    %c0_3 = arith.constant 0 : index
    %4 = vector.load %arg3[%c0_2, %c0_3] : memref<128x1024xbf16, #tpu.memory_space<vmem>>, vector<128x1024xbf16>
    %c0_4 = arith.constant 0 : index
    %c0_5 = arith.constant 0 : index
    %5 = vector.load %arg4[%c0_4, %c0_5] : memref<1024x128xbf16, #tpu.memory_space<vmem>>, vector<1024x128xbf16>
    %cst = arith.constant dense<0.000000e+00> : vector<128x128xf32>
    %6 = tpu.matmul %4, %5, %cst {dimension_numbers = #tpu.dot_dimension_numbers<[1], [0], [0], [1], [0, 0, 1, 1], [], []>} : vector<128x1024xbf16>, vector<1024x128xbf16>, vector<128x128xf32> -> vector<128x128xf32>
    %7 = arith.addf %3, %6 : vector<128x128xf32>
    %c0_6 = arith.constant 0 : index
    %c0_7 = arith.constant 0 : index
    %8 = vector.load %arg7[%c0_6, %c0_7] : memref<128x128xf32, #tpu.memory_space<vmem>>, vector<128x128xf32>
    tpu.vector_store %arg7[%c0_6, %c0_7], %7 {strides = array<i32>} : memref<128x128xf32, #tpu.memory_space<vmem>>, vector<128x128xf32>,
    %c0_i32_8 = arith.constant 0 : i32
    %9 = arith.cmpi eq, %arg2, %c0_i32_8 : i32
    %10 = arith.extui %9 : i1 to i32
    %c0_i32_9 = arith.constant 0 : i32
    %11 = arith.cmpi ne, %10, %c0_i32_9 : i32
    scf.if %11 {
      %c0_10 = arith.constant 0 : index
      %c0_11 = arith.constant 0 : index
      %12 = vector.load %arg7[%c0_10, %c0_11] : memref<128x128xf32, #tpu.memory_space<vmem>>, vector<128x128xf32>
      %c0_12 = arith.constant 0 : index
      %c0_13 = arith.constant 0 : index
      %13 = vector.load %arg5[%c0_12, %c0_13] : memref<1x128xf32, #tpu.memory_space<vmem>>, vector<1x128xf32>
      %14 = vector.broadcast %13 : vector<1x128xf32> to vector<128x128xf32>
      %15 = arith.addf %12, %14 : vector<128x128xf32>
      %c0_14 = arith.constant 0 : index
      %c0_15 = arith.constant 0 : index
      %16 = vector.load %arg6[%c0_14, %c0_15] : memref<128x128xf32, #tpu.memory_space<vmem>>, vector<128x128xf32>
      tpu.vector_store %arg6[%c0_14, %c0_15], %15 {strides = array<i32>} : memref<128x128xf32, #tpu.memory_space<vmem>>, vector<128x128xf32>,
    } else {
    }
    return
  }
  func.func @transform_0(%arg0: i32, %arg1: i32, %arg2: i32) -> (i32, i32) {
    %c0_i32 = arith.constant 0 : i32
    return %arg0, %arg2 : i32, i32
  }
  func.func @transform_1(%arg0: i32, %arg1: i32, %arg2: i32) -> (i32, i32) {
    %c0_i32 = arith.constant 0 : i32
    return %arg2, %arg1 : i32, i32
  }
  func.func @transform_2(%arg0: i32, %arg1: i32, %arg2: i32) -> (i32, i32) {
    %c0_i32 = arith.constant 0 : i32
    %c0_i32_0 = arith.constant 0 : i32
    return %c0_i32, %arg1 : i32, i32
  }
  func.func @transform_3(%arg0: i32, %arg1: i32, %arg2: i32) -> (i32, i32) {
    %c0_i32 = arith.constant 0 : i32
    return %arg0, %arg1 : i32, i32
  }
}

module attributes {stable_mosaic.version = 11 : i64} {
  func.func @_in_lrelu_kernel(%arg0: i32, %arg1: i32, %arg2: memref<1x64x128xf32, #tpu.memory_space<vmem>>, %arg3: memref<1x64x128xbf16, #tpu.memory_space<vmem>>) attributes {dimension_semantics = [#tpu.dimension_semantics<parallel>, #tpu.dimension_semantics<parallel>], iteration_bounds = array<i64: 2, 1>, scalar_prefetch = 0 : i64, scratch_operands = 0 : i64, tpu.core_type = #tpu.core_type<tc>, window_params = [{transform_indices = @transform_0, window_bounds = array<i64: 1, 64, 128>}, {transform_indices = @transform_1, window_bounds = array<i64: 1, 64, 128>}]} {
    %c0 = arith.constant 0 : index
    %c0_0 = arith.constant 0 : index
    %c0_1 = arith.constant 0 : index
    %0 = vector.load %arg2[%c0, %c0_0, %c0_1] : memref<1x64x128xf32, #tpu.memory_space<vmem>>, vector<1x64x128xf32>
    %cst = arith.constant dense<0.000000e+00> : vector<1x128xf32>
    %1 = vector.multi_reduction <add>, %0, %cst [1] : vector<1x64x128xf32> to vector<1x128xf32>
    %2 = vector.shape_cast %1 : vector<1x128xf32> to vector<1x1x128xf32>
    %cst_2 = arith.constant 6.400000e+01 : f32
    %3 = vector.broadcast %cst_2 : f32 to vector<1x1x128xf32>
    %4 = arith.divf %2, %3 : vector<1x1x128xf32>
    %5 = vector.broadcast %4 : vector<1x1x128xf32> to vector<1x64x128xf32>
    %6 = arith.subf %0, %5 : vector<1x64x128xf32>
    %7 = arith.mulf %6, %6 : vector<1x64x128xf32>
    %cst_3 = arith.constant dense<0.000000e+00> : vector<1x128xf32>
    %8 = vector.multi_reduction <add>, %7, %cst_3 [1] : vector<1x64x128xf32> to vector<1x128xf32>
    %9 = vector.shape_cast %8 : vector<1x128xf32> to vector<1x1x128xf32>
    %cst_4 = arith.constant 6.400000e+01 : f32
    %10 = vector.broadcast %cst_4 : f32 to vector<1x1x128xf32>
    %11 = arith.divf %9, %10 : vector<1x1x128xf32>
    %cst_5 = arith.constant 9.99999974E-6 : f32
    %12 = vector.broadcast %cst_5 : f32 to vector<1x1x128xf32>
    %13 = arith.addf %11, %12 : vector<1x1x128xf32>
    %14 = math.rsqrt %13 : vector<1x1x128xf32>
    %15 = vector.broadcast %14 : vector<1x1x128xf32> to vector<1x64x128xf32>
    %16 = arith.mulf %6, %15 : vector<1x64x128xf32>
    %cst_6 = arith.constant 0.000000e+00 : f32
    %17 = vector.broadcast %cst_6 : f32 to vector<1x64x128xf32>
    %18 = arith.cmpf ogt, %16, %17 : vector<1x64x128xf32>
    %cst_7 = arith.constant 2.000000e-01 : f32
    %19 = vector.broadcast %cst_7 : f32 to vector<1x64x128xf32>
    %20 = arith.mulf %19, %16 : vector<1x64x128xf32>
    %21 = arith.select %18, %16, %20 : vector<1x64x128xi1>, vector<1x64x128xf32>
    %22 = arith.truncf %21 : vector<1x64x128xf32> to vector<1x64x128xbf16>
    %c0_8 = arith.constant 0 : index
    %c0_9 = arith.constant 0 : index
    %c0_10 = arith.constant 0 : index
    %23 = vector.load %arg3[%c0_8, %c0_9, %c0_10] : memref<1x64x128xbf16, #tpu.memory_space<vmem>>, vector<1x64x128xbf16>
    tpu.vector_store %arg3[%c0_8, %c0_9, %c0_10], %22 {strides = array<i32>} : memref<1x64x128xbf16, #tpu.memory_space<vmem>>, vector<1x64x128xbf16>,
    return
  }
  func.func @transform_0(%arg0: i32, %arg1: i32) -> (i32, i32, i32) {
    %c0_i32 = arith.constant 0 : i32
    %c0_i32_0 = arith.constant 0 : i32
    return %arg0, %c0_i32, %arg1 : i32, i32, i32
  }
  func.func @transform_1(%arg0: i32, %arg1: i32) -> (i32, i32, i32) {
    %c0_i32 = arith.constant 0 : i32
    %c0_i32_0 = arith.constant 0 : i32
    return %arg0, %c0_i32, %arg1 : i32, i32, i32
  }
}

module attributes {stable_mosaic.version = 11 : i64} {
  func.func @_in_lrelu_kernel(%arg0: i32, %arg1: i32, %arg2: memref<1x16x128xf32, #tpu.memory_space<vmem>>, %arg3: memref<1x16x128xbf16, #tpu.memory_space<vmem>>) attributes {dimension_semantics = [#tpu.dimension_semantics<parallel>, #tpu.dimension_semantics<parallel>], iteration_bounds = array<i64: 2, 2>, scalar_prefetch = 0 : i64, scratch_operands = 0 : i64, tpu.core_type = #tpu.core_type<tc>, window_params = [{transform_indices = @transform_0, window_bounds = array<i64: 1, 16, 128>}, {transform_indices = @transform_1, window_bounds = array<i64: 1, 16, 128>}]} {
    %c0 = arith.constant 0 : index
    %c0_0 = arith.constant 0 : index
    %c0_1 = arith.constant 0 : index
    %0 = vector.load %arg2[%c0, %c0_0, %c0_1] : memref<1x16x128xf32, #tpu.memory_space<vmem>>, vector<1x16x128xf32>
    %cst = arith.constant dense<0.000000e+00> : vector<1x128xf32>
    %1 = vector.multi_reduction <add>, %0, %cst [1] : vector<1x16x128xf32> to vector<1x128xf32>
    %2 = vector.shape_cast %1 : vector<1x128xf32> to vector<1x1x128xf32>
    %cst_2 = arith.constant 1.600000e+01 : f32
    %3 = vector.broadcast %cst_2 : f32 to vector<1x1x128xf32>
    %4 = arith.divf %2, %3 : vector<1x1x128xf32>
    %5 = vector.broadcast %4 : vector<1x1x128xf32> to vector<1x16x128xf32>
    %6 = arith.subf %0, %5 : vector<1x16x128xf32>
    %7 = arith.mulf %6, %6 : vector<1x16x128xf32>
    %cst_3 = arith.constant dense<0.000000e+00> : vector<1x128xf32>
    %8 = vector.multi_reduction <add>, %7, %cst_3 [1] : vector<1x16x128xf32> to vector<1x128xf32>
    %9 = vector.shape_cast %8 : vector<1x128xf32> to vector<1x1x128xf32>
    %cst_4 = arith.constant 1.600000e+01 : f32
    %10 = vector.broadcast %cst_4 : f32 to vector<1x1x128xf32>
    %11 = arith.divf %9, %10 : vector<1x1x128xf32>
    %cst_5 = arith.constant 9.99999974E-6 : f32
    %12 = vector.broadcast %cst_5 : f32 to vector<1x1x128xf32>
    %13 = arith.addf %11, %12 : vector<1x1x128xf32>
    %14 = math.rsqrt %13 : vector<1x1x128xf32>
    %15 = vector.broadcast %14 : vector<1x1x128xf32> to vector<1x16x128xf32>
    %16 = arith.mulf %6, %15 : vector<1x16x128xf32>
    %cst_6 = arith.constant 0.000000e+00 : f32
    %17 = vector.broadcast %cst_6 : f32 to vector<1x16x128xf32>
    %18 = arith.cmpf ogt, %16, %17 : vector<1x16x128xf32>
    %cst_7 = arith.constant 2.000000e-01 : f32
    %19 = vector.broadcast %cst_7 : f32 to vector<1x16x128xf32>
    %20 = arith.mulf %19, %16 : vector<1x16x128xf32>
    %21 = arith.select %18, %16, %20 : vector<1x16x128xi1>, vector<1x16x128xf32>
    %22 = arith.truncf %21 : vector<1x16x128xf32> to vector<1x16x128xbf16>
    %c0_8 = arith.constant 0 : index
    %c0_9 = arith.constant 0 : index
    %c0_10 = arith.constant 0 : index
    %23 = vector.load %arg3[%c0_8, %c0_9, %c0_10] : memref<1x16x128xbf16, #tpu.memory_space<vmem>>, vector<1x16x128xbf16>
    tpu.vector_store %arg3[%c0_8, %c0_9, %c0_10], %22 {strides = array<i32>} : memref<1x16x128xbf16, #tpu.memory_space<vmem>>, vector<1x16x128xbf16>,
    return
  }
  func.func @transform_0(%arg0: i32, %arg1: i32) -> (i32, i32, i32) {
    %c0_i32 = arith.constant 0 : i32
    %c0_i32_0 = arith.constant 0 : i32
    return %arg0, %c0_i32, %arg1 : i32, i32, i32
  }
  func.func @transform_1(%arg0: i32, %arg1: i32) -> (i32, i32, i32) {
    %c0_i32 = arith.constant 0 : i32
    %c0_i32_0 = arith.constant 0 : i32
    return %arg0, %c0_i32, %arg1 : i32, i32, i32
  }
}

module attributes {stable_mosaic.version = 11 : i64} {
  func.func @_conv_mm_kernel(%arg0: i32, %arg1: i32, %arg2: i32, %arg3: memref<32x2048xbf16, #tpu.memory_space<vmem>>, %arg4: memref<2048x256xbf16, #tpu.memory_space<vmem>>, %arg5: memref<1x256xf32, #tpu.memory_space<vmem>>, %arg6: memref<32x256xf32, #tpu.memory_space<vmem>>, %arg7: memref<32x256xf32, #tpu.memory_space<vmem>>) attributes {dimension_semantics = [#tpu.dimension_semantics<parallel>, #tpu.dimension_semantics<parallel>, #tpu.dimension_semantics<arbitrary>], iteration_bounds = array<i64: 1, 1, 1>, scalar_prefetch = 0 : i64, scratch_operands = 1 : i64, tpu.core_type = #tpu.core_type<tc>, window_params = [{transform_indices = @transform_0, window_bounds = array<i64: 32, 2048>}, {transform_indices = @transform_1, window_bounds = array<i64: 2048, 256>}, {transform_indices = @transform_2, window_bounds = array<i64: 1, 256>}, {transform_indices = @transform_3, window_bounds = array<i64: 32, 256>}]} {
    %c0_i32 = arith.constant 0 : i32
    %0 = arith.cmpi eq, %arg2, %c0_i32 : i32
    %1 = arith.extui %0 : i1 to i32
    %c0_i32_0 = arith.constant 0 : i32
    %2 = arith.cmpi ne, %1, %c0_i32_0 : i32
    scf.if %2 {
      %cst_10 = arith.constant 0.000000e+00 : f32
      %12 = vector.broadcast %cst_10 : f32 to vector<32x256xf32>
      %c0_11 = arith.constant 0 : index
      %c0_12 = arith.constant 0 : index
      %13 = vector.load %arg7[%c0_11, %c0_12] : memref<32x256xf32, #tpu.memory_space<vmem>>, vector<32x256xf32>
      tpu.vector_store %arg7[%c0_11, %c0_12], %12 {strides = array<i32>} : memref<32x256xf32, #tpu.memory_space<vmem>>, vector<32x256xf32>,
    } else {
    }
    %c0 = arith.constant 0 : index
    %c0_1 = arith.constant 0 : index
    %3 = vector.load %arg7[%c0, %c0_1] : memref<32x256xf32, #tpu.memory_space<vmem>>, vector<32x256xf32>
    %c0_2 = arith.constant 0 : index
    %c0_3 = arith.constant 0 : index
    %4 = vector.load %arg3[%c0_2, %c0_3] : memref<32x2048xbf16, #tpu.memory_space<vmem>>, vector<32x2048xbf16>
    %c0_4 = arith.constant 0 : index
    %c0_5 = arith.constant 0 : index
    %5 = vector.load %arg4[%c0_4, %c0_5] : memref<2048x256xbf16, #tpu.memory_space<vmem>>, vector<2048x256xbf16>
    %cst = arith.constant dense<0.000000e+00> : vector<32x256xf32>
    %6 = tpu.matmul %4, %5, %cst {dimension_numbers = #tpu.dot_dimension_numbers<[1], [0], [0], [1], [0, 0, 1, 1], [], []>} : vector<32x2048xbf16>, vector<2048x256xbf16>, vector<32x256xf32> -> vector<32x256xf32>
    %7 = arith.addf %3, %6 : vector<32x256xf32>
    %c0_6 = arith.constant 0 : index
    %c0_7 = arith.constant 0 : index
    %8 = vector.load %arg7[%c0_6, %c0_7] : memref<32x256xf32, #tpu.memory_space<vmem>>, vector<32x256xf32>
    tpu.vector_store %arg7[%c0_6, %c0_7], %7 {strides = array<i32>} : memref<32x256xf32, #tpu.memory_space<vmem>>, vector<32x256xf32>,
    %c0_i32_8 = arith.constant 0 : i32
    %9 = arith.cmpi eq, %arg2, %c0_i32_8 : i32
    %10 = arith.extui %9 : i1 to i32
    %c0_i32_9 = arith.constant 0 : i32
    %11 = arith.cmpi ne, %10, %c0_i32_9 : i32
    scf.if %11 {
      %c0_10 = arith.constant 0 : index
      %c0_11 = arith.constant 0 : index
      %12 = vector.load %arg7[%c0_10, %c0_11] : memref<32x256xf32, #tpu.memory_space<vmem>>, vector<32x256xf32>
      %c0_12 = arith.constant 0 : index
      %c0_13 = arith.constant 0 : index
      %13 = vector.load %arg5[%c0_12, %c0_13] : memref<1x256xf32, #tpu.memory_space<vmem>>, vector<1x256xf32>
      %14 = vector.broadcast %13 : vector<1x256xf32> to vector<32x256xf32>
      %15 = arith.addf %12, %14 : vector<32x256xf32>
      %c0_14 = arith.constant 0 : index
      %c0_15 = arith.constant 0 : index
      %16 = vector.load %arg6[%c0_14, %c0_15] : memref<32x256xf32, #tpu.memory_space<vmem>>, vector<32x256xf32>
      tpu.vector_store %arg6[%c0_14, %c0_15], %15 {strides = array<i32>} : memref<32x256xf32, #tpu.memory_space<vmem>>, vector<32x256xf32>,
    } else {
    }
    return
  }
  func.func @transform_0(%arg0: i32, %arg1: i32, %arg2: i32) -> (i32, i32) {
    %c0_i32 = arith.constant 0 : i32
    return %arg0, %arg2 : i32, i32
  }
  func.func @transform_1(%arg0: i32, %arg1: i32, %arg2: i32) -> (i32, i32) {
    %c0_i32 = arith.constant 0 : i32
    return %arg2, %arg1 : i32, i32
  }
  func.func @transform_2(%arg0: i32, %arg1: i32, %arg2: i32) -> (i32, i32) {
    %c0_i32 = arith.constant 0 : i32
    %c0_i32_0 = arith.constant 0 : i32
    return %c0_i32, %arg1 : i32, i32
  }
  func.func @transform_3(%arg0: i32, %arg1: i32, %arg2: i32) -> (i32, i32) {
    %c0_i32 = arith.constant 0 : i32
    return %arg0, %arg1 : i32, i32
  }
}

module attributes {stable_mosaic.version = 11 : i64} {
  func.func @_conv_mm_kernel(%arg0: i32, %arg1: i32, %arg2: i32, %arg3: memref<24x2048xbf16, #tpu.memory_space<vmem>>, %arg4: memref<2048x512xbf16, #tpu.memory_space<vmem>>, %arg5: memref<1x512xf32, #tpu.memory_space<vmem>>, %arg6: memref<24x512xf32, #tpu.memory_space<vmem>>, %arg7: memref<24x512xf32, #tpu.memory_space<vmem>>) attributes {dimension_semantics = [#tpu.dimension_semantics<parallel>, #tpu.dimension_semantics<parallel>, #tpu.dimension_semantics<arbitrary>], iteration_bounds = array<i64: 1, 1, 2>, scalar_prefetch = 0 : i64, scratch_operands = 1 : i64, tpu.core_type = #tpu.core_type<tc>, window_params = [{transform_indices = @transform_0, window_bounds = array<i64: 24, 2048>}, {transform_indices = @transform_1, window_bounds = array<i64: 2048, 512>}, {transform_indices = @transform_2, window_bounds = array<i64: 1, 512>}, {transform_indices = @transform_3, window_bounds = array<i64: 24, 512>}]} {
    %c0_i32 = arith.constant 0 : i32
    %0 = arith.cmpi eq, %arg2, %c0_i32 : i32
    %1 = arith.extui %0 : i1 to i32
    %c0_i32_0 = arith.constant 0 : i32
    %2 = arith.cmpi ne, %1, %c0_i32_0 : i32
    scf.if %2 {
      %cst_9 = arith.constant 0.000000e+00 : f32
      %12 = vector.broadcast %cst_9 : f32 to vector<24x512xf32>
      %c0_10 = arith.constant 0 : index
      %c0_11 = arith.constant 0 : index
      %13 = vector.load %arg7[%c0_10, %c0_11] : memref<24x512xf32, #tpu.memory_space<vmem>>, vector<24x512xf32>
      tpu.vector_store %arg7[%c0_10, %c0_11], %12 {strides = array<i32>} : memref<24x512xf32, #tpu.memory_space<vmem>>, vector<24x512xf32>,
    } else {
    }
    %c0 = arith.constant 0 : index
    %c0_1 = arith.constant 0 : index
    %3 = vector.load %arg7[%c0, %c0_1] : memref<24x512xf32, #tpu.memory_space<vmem>>, vector<24x512xf32>
    %c0_2 = arith.constant 0 : index
    %c0_3 = arith.constant 0 : index
    %4 = vector.load %arg3[%c0_2, %c0_3] : memref<24x2048xbf16, #tpu.memory_space<vmem>>, vector<24x2048xbf16>
    %c0_4 = arith.constant 0 : index
    %c0_5 = arith.constant 0 : index
    %5 = vector.load %arg4[%c0_4, %c0_5] : memref<2048x512xbf16, #tpu.memory_space<vmem>>, vector<2048x512xbf16>
    %cst = arith.constant dense<0.000000e+00> : vector<24x512xf32>
    %6 = tpu.matmul %4, %5, %cst {dimension_numbers = #tpu.dot_dimension_numbers<[1], [0], [0], [1], [0, 0, 1, 1], [], []>} : vector<24x2048xbf16>, vector<2048x512xbf16>, vector<24x512xf32> -> vector<24x512xf32>
    %7 = arith.addf %3, %6 : vector<24x512xf32>
    %c0_6 = arith.constant 0 : index
    %c0_7 = arith.constant 0 : index
    %8 = vector.load %arg7[%c0_6, %c0_7] : memref<24x512xf32, #tpu.memory_space<vmem>>, vector<24x512xf32>
    tpu.vector_store %arg7[%c0_6, %c0_7], %7 {strides = array<i32>} : memref<24x512xf32, #tpu.memory_space<vmem>>, vector<24x512xf32>,
    %c1_i32 = arith.constant 1 : i32
    %9 = arith.cmpi eq, %arg2, %c1_i32 : i32
    %10 = arith.extui %9 : i1 to i32
    %c0_i32_8 = arith.constant 0 : i32
    %11 = arith.cmpi ne, %10, %c0_i32_8 : i32
    scf.if %11 {
      %c0_9 = arith.constant 0 : index
      %c0_10 = arith.constant 0 : index
      %12 = vector.load %arg7[%c0_9, %c0_10] : memref<24x512xf32, #tpu.memory_space<vmem>>, vector<24x512xf32>
      %c0_11 = arith.constant 0 : index
      %c0_12 = arith.constant 0 : index
      %13 = vector.load %arg5[%c0_11, %c0_12] : memref<1x512xf32, #tpu.memory_space<vmem>>, vector<1x512xf32>
      %14 = vector.broadcast %13 : vector<1x512xf32> to vector<24x512xf32>
      %15 = arith.addf %12, %14 : vector<24x512xf32>
      %c0_13 = arith.constant 0 : index
      %c0_14 = arith.constant 0 : index
      %16 = vector.load %arg6[%c0_13, %c0_14] : memref<24x512xf32, #tpu.memory_space<vmem>>, vector<24x512xf32>
      tpu.vector_store %arg6[%c0_13, %c0_14], %15 {strides = array<i32>} : memref<24x512xf32, #tpu.memory_space<vmem>>, vector<24x512xf32>,
    } else {
    }
    return
  }
  func.func @transform_0(%arg0: i32, %arg1: i32, %arg2: i32) -> (i32, i32) {
    %c0_i32 = arith.constant 0 : i32
    return %arg0, %arg2 : i32, i32
  }
  func.func @transform_1(%arg0: i32, %arg1: i32, %arg2: i32) -> (i32, i32) {
    %c0_i32 = arith.constant 0 : i32
    return %arg2, %arg1 : i32, i32
  }
  func.func @transform_2(%arg0: i32, %arg1: i32, %arg2: i32) -> (i32, i32) {
    %c0_i32 = arith.constant 0 : i32
    %c0_i32_0 = arith.constant 0 : i32
    return %c0_i32, %arg1 : i32, i32
  }
  func.func @transform_3(%arg0: i32, %arg1: i32, %arg2: i32) -> (i32, i32) {
    %c0_i32 = arith.constant 0 : i32
    return %arg0, %arg1 : i32, i32
  }
}

module attributes {stable_mosaic.version = 11 : i64} {
  func.func @_in_lrelu_kernel(%arg0: i32, %arg1: i32, %arg2: memref<1x9x128xf32, #tpu.memory_space<vmem>>, %arg3: memref<1x9x128xbf16, #tpu.memory_space<vmem>>) attributes {dimension_semantics = [#tpu.dimension_semantics<parallel>, #tpu.dimension_semantics<parallel>], iteration_bounds = array<i64: 2, 4>, scalar_prefetch = 0 : i64, scratch_operands = 0 : i64, tpu.core_type = #tpu.core_type<tc>, window_params = [{transform_indices = @transform_0, window_bounds = array<i64: 1, 9, 128>}, {transform_indices = @transform_1, window_bounds = array<i64: 1, 9, 128>}]} {
    %c0 = arith.constant 0 : index
    %c0_0 = arith.constant 0 : index
    %c0_1 = arith.constant 0 : index
    %0 = vector.load %arg2[%c0, %c0_0, %c0_1] : memref<1x9x128xf32, #tpu.memory_space<vmem>>, vector<1x9x128xf32>
    %cst = arith.constant dense<0.000000e+00> : vector<1x128xf32>
    %1 = vector.multi_reduction <add>, %0, %cst [1] : vector<1x9x128xf32> to vector<1x128xf32>
    %2 = vector.shape_cast %1 : vector<1x128xf32> to vector<1x1x128xf32>
    %cst_2 = arith.constant 9.000000e+00 : f32
    %3 = vector.broadcast %cst_2 : f32 to vector<1x1x128xf32>
    %4 = arith.divf %2, %3 : vector<1x1x128xf32>
    %5 = vector.broadcast %4 : vector<1x1x128xf32> to vector<1x9x128xf32>
    %6 = arith.subf %0, %5 : vector<1x9x128xf32>
    %7 = arith.mulf %6, %6 : vector<1x9x128xf32>
    %cst_3 = arith.constant dense<0.000000e+00> : vector<1x128xf32>
    %8 = vector.multi_reduction <add>, %7, %cst_3 [1] : vector<1x9x128xf32> to vector<1x128xf32>
    %9 = vector.shape_cast %8 : vector<1x128xf32> to vector<1x1x128xf32>
    %cst_4 = arith.constant 9.000000e+00 : f32
    %10 = vector.broadcast %cst_4 : f32 to vector<1x1x128xf32>
    %11 = arith.divf %9, %10 : vector<1x1x128xf32>
    %cst_5 = arith.constant 9.99999974E-6 : f32
    %12 = vector.broadcast %cst_5 : f32 to vector<1x1x128xf32>
    %13 = arith.addf %11, %12 : vector<1x1x128xf32>
    %14 = math.rsqrt %13 : vector<1x1x128xf32>
    %15 = vector.broadcast %14 : vector<1x1x128xf32> to vector<1x9x128xf32>
    %16 = arith.mulf %6, %15 : vector<1x9x128xf32>
    %cst_6 = arith.constant 0.000000e+00 : f32
    %17 = vector.broadcast %cst_6 : f32 to vector<1x9x128xf32>
    %18 = arith.cmpf ogt, %16, %17 : vector<1x9x128xf32>
    %cst_7 = arith.constant 2.000000e-01 : f32
    %19 = vector.broadcast %cst_7 : f32 to vector<1x9x128xf32>
    %20 = arith.mulf %19, %16 : vector<1x9x128xf32>
    %21 = arith.select %18, %16, %20 : vector<1x9x128xi1>, vector<1x9x128xf32>
    %22 = arith.truncf %21 : vector<1x9x128xf32> to vector<1x9x128xbf16>
    %c0_8 = arith.constant 0 : index
    %c0_9 = arith.constant 0 : index
    %c0_10 = arith.constant 0 : index
    %23 = vector.load %arg3[%c0_8, %c0_9, %c0_10] : memref<1x9x128xbf16, #tpu.memory_space<vmem>>, vector<1x9x128xbf16>
    tpu.vector_store %arg3[%c0_8, %c0_9, %c0_10], %22 {strides = array<i32>} : memref<1x9x128xbf16, #tpu.memory_space<vmem>>, vector<1x9x128xbf16>,
    return
  }
  func.func @transform_0(%arg0: i32, %arg1: i32) -> (i32, i32, i32) {
    %c0_i32 = arith.constant 0 : i32
    %c0_i32_0 = arith.constant 0 : i32
    return %arg0, %c0_i32, %arg1 : i32, i32, i32
  }
  func.func @transform_1(%arg0: i32, %arg1: i32) -> (i32, i32, i32) {
    %c0_i32 = arith.constant 0 : i32
    %c0_i32_0 = arith.constant 0 : i32
    return %arg0, %c0_i32, %arg1 : i32, i32, i32
  }
}

module attributes {stable_mosaic.version = 11 : i64} {
  func.func @_conv_mm_kernel(%arg0: i32, %arg1: i32, %arg2: i32, %arg3: memref<8x2048xbf16, #tpu.memory_space<vmem>>, %arg4: memref<2048x128xbf16, #tpu.memory_space<vmem>>, %arg5: memref<1x128xf32, #tpu.memory_space<vmem>>, %arg6: memref<8x128xf32, #tpu.memory_space<vmem>>, %arg7: memref<8x128xf32, #tpu.memory_space<vmem>>) attributes {dimension_semantics = [#tpu.dimension_semantics<parallel>, #tpu.dimension_semantics<parallel>, #tpu.dimension_semantics<arbitrary>], iteration_bounds = array<i64: 1, 1, 4>, scalar_prefetch = 0 : i64, scratch_operands = 1 : i64, tpu.core_type = #tpu.core_type<tc>, window_params = [{transform_indices = @transform_0, window_bounds = array<i64: 8, 2048>}, {transform_indices = @transform_1, window_bounds = array<i64: 2048, 128>}, {transform_indices = @transform_2, window_bounds = array<i64: 1, 128>}, {transform_indices = @transform_3, window_bounds = array<i64: 8, 128>}]} {
    %c0_i32 = arith.constant 0 : i32
    %0 = arith.cmpi eq, %arg2, %c0_i32 : i32
    %1 = arith.extui %0 : i1 to i32
    %c0_i32_0 = arith.constant 0 : i32
    %2 = arith.cmpi ne, %1, %c0_i32_0 : i32
    scf.if %2 {
      %cst_9 = arith.constant 0.000000e+00 : f32
      %12 = vector.broadcast %cst_9 : f32 to vector<8x128xf32>
      %c0_10 = arith.constant 0 : index
      %c0_11 = arith.constant 0 : index
      %13 = vector.load %arg7[%c0_10, %c0_11] : memref<8x128xf32, #tpu.memory_space<vmem>>, vector<8x128xf32>
      tpu.vector_store %arg7[%c0_10, %c0_11], %12 {strides = array<i32>} : memref<8x128xf32, #tpu.memory_space<vmem>>, vector<8x128xf32>,
    } else {
    }
    %c0 = arith.constant 0 : index
    %c0_1 = arith.constant 0 : index
    %3 = vector.load %arg7[%c0, %c0_1] : memref<8x128xf32, #tpu.memory_space<vmem>>, vector<8x128xf32>
    %c0_2 = arith.constant 0 : index
    %c0_3 = arith.constant 0 : index
    %4 = vector.load %arg3[%c0_2, %c0_3] : memref<8x2048xbf16, #tpu.memory_space<vmem>>, vector<8x2048xbf16>
    %c0_4 = arith.constant 0 : index
    %c0_5 = arith.constant 0 : index
    %5 = vector.load %arg4[%c0_4, %c0_5] : memref<2048x128xbf16, #tpu.memory_space<vmem>>, vector<2048x128xbf16>
    %cst = arith.constant dense<0.000000e+00> : vector<8x128xf32>
    %6 = tpu.matmul %4, %5, %cst {dimension_numbers = #tpu.dot_dimension_numbers<[1], [0], [0], [1], [0, 0, 1, 1], [], []>} : vector<8x2048xbf16>, vector<2048x128xbf16>, vector<8x128xf32> -> vector<8x128xf32>
    %7 = arith.addf %3, %6 : vector<8x128xf32>
    %c0_6 = arith.constant 0 : index
    %c0_7 = arith.constant 0 : index
    %8 = vector.load %arg7[%c0_6, %c0_7] : memref<8x128xf32, #tpu.memory_space<vmem>>, vector<8x128xf32>
    tpu.vector_store %arg7[%c0_6, %c0_7], %7 {strides = array<i32>} : memref<8x128xf32, #tpu.memory_space<vmem>>, vector<8x128xf32>,
    %c3_i32 = arith.constant 3 : i32
    %9 = arith.cmpi eq, %arg2, %c3_i32 : i32
    %10 = arith.extui %9 : i1 to i32
    %c0_i32_8 = arith.constant 0 : i32
    %11 = arith.cmpi ne, %10, %c0_i32_8 : i32
    scf.if %11 {
      %c0_9 = arith.constant 0 : index
      %c0_10 = arith.constant 0 : index
      %12 = vector.load %arg7[%c0_9, %c0_10] : memref<8x128xf32, #tpu.memory_space<vmem>>, vector<8x128xf32>
      %c0_11 = arith.constant 0 : index
      %c0_12 = arith.constant 0 : index
      %13 = vector.load %arg5[%c0_11, %c0_12] : memref<1x128xf32, #tpu.memory_space<vmem>>, vector<1x128xf32>
      %14 = vector.broadcast %13 : vector<1x128xf32> to vector<8x128xf32>
      %15 = arith.addf %12, %14 : vector<8x128xf32>
      %c0_13 = arith.constant 0 : index
      %c0_14 = arith.constant 0 : index
      %16 = vector.load %arg6[%c0_13, %c0_14] : memref<8x128xf32, #tpu.memory_space<vmem>>, vector<8x128xf32>
      tpu.vector_store %arg6[%c0_13, %c0_14], %15 {strides = array<i32>} : memref<8x128xf32, #tpu.memory_space<vmem>>, vector<8x128xf32>,
    } else {
    }
    return
  }
  func.func @transform_0(%arg0: i32, %arg1: i32, %arg2: i32) -> (i32, i32) {
    %c0_i32 = arith.constant 0 : i32
    return %arg0, %arg2 : i32, i32
  }
  func.func @transform_1(%arg0: i32, %arg1: i32, %arg2: i32) -> (i32, i32) {
    %c0_i32 = arith.constant 0 : i32
    return %arg2, %arg1 : i32, i32
  }
  func.func @transform_2(%arg0: i32, %arg1: i32, %arg2: i32) -> (i32, i32) {
    %c0_i32 = arith.constant 0 : i32
    %c0_i32_0 = arith.constant 0 : i32
    return %c0_i32, %arg1 : i32, i32
  }
  func.func @transform_3(%arg0: i32, %arg1: i32, %arg2: i32) -> (i32, i32) {
    %c0_i32 = arith.constant 0 : i32
    return %arg0, %arg1 : i32, i32
  }
}

</mosaic_0001>

<bundles_post_ra>
// kernel: discriminator_forward.8
= control target key start
LH: loop header
LB: loop body
LE: loop exit
PB: predicated region body
PF: predicated region fallthrough
CT: control target
= control target key end

     0   :  { %s1335_s12 = smov 0   ;;  %s1337_s13 = smov 0   ;;  %s1475_s0 = inlined_call_operand.vmem [shape: bf16[512,128], index: 0, kind: input, shape index: {}]   ;;  %s1476_s1 = inlined_call_operand.vmem [shape: bf16[128,128], index: 1, kind: input, shape index: {}]   ;;  %s1477_s2 = inlined_call_operand.vmem [shape: f32[1,128], index: 2, kind: input, shape index: {}]   ;;  %s1478_s3 = inlined_call_operand.vmem [shape: bf16[512,128], index: 3, kind: output, shape index: {}]  }
   0x1   :  { %s1339_s14 = smov 0  }
   0x2 LB: > { %s32_s15 = sadd.s32 1, %s1309_s13  ;;  %p1020_p0 = scmp.ge.s32.totalorder %s1313_s14, 1  ;;  %s1313_s14 = sphi %s1339_s14, %s13_s14   ;;  %s1309_s13 = sphi %s1337_s13, %s1480_s13   ;;  %s1305_s12 = sphi %s1335_s12, %s1479_s12  }
   0x3   : > { %p34_p1 = scmp.ge.s32.totalorder %s32_s15, 2  ;;  %p188_p2 = scmp.lt.s32.totalorder %s1313_s14, 3 }
   0x5   : > { %s1482_s15 = smov (%p34_p1, %s32_s15), 0  ;;  %p189_p3 = pnand %p1020_p0, %p188_p2 }
   0x6   : > { %s1021_s24 = sshll.u32 (!%p189_p3), %s1305_s12, 5 }
   0x7   : > { %192 = sbr.rel (%p189_p3) target bundleno = 242 (0xf2), region = 32  ;;  %p230_p4 = scmp.lt.s32.totalorder (!%p189_p3), %s1021_s24, 63 }
   0xc   : > { %v1146_v0 = vld [vmem:[%s1476_s1 + $0x38] sm:$0xff]  ;;  %v1145_v1 = vld [vmem:[%s1476_s1 + $0x30] sm:$0xff]  ;;  %v1144_v2 = vld [vmem:[%s1476_s1 + $0x28] sm:$0xff]  ;;  %s1484_s24 = smov (!%p230_p4, %s1021_s24), 63 }
   0xd   : > { %519 = vmatpush.bf16.msra.mxu0 %v1146_v0  ;;  %1242 = vmatpush.bf16.msra.mxu1 %v1146_v0  ;;  %v1143_v3 = vld [vmem:[%s1476_s1 + $0x20] sm:$0xff]  ;;  %v1142_v4 = vld [vmem:[%s1476_s1 + $0x18] sm:$0xff]  ;;  %v1141_v5 = vld [vmem:[%s1476_s1 + $0x10] sm:$0xff]  ;;  %s1022_s4 = sshll.u32 %s1484_s24, 2 }
   0xe   : > { %1243 = vmatpush.bf16.msra.mxu2 %v1146_v0  ;;  %1244 = vmatpush.bf16.msra.mxu3 %v1146_v0  ;;  %v1140_v6 = vld [vmem:[%s1476_s1 + $0x8] sm:$0xff]  ;;  %v1139_v7 = vld [vmem:[%s1476_s1] sm:$0xff]  ;;  %s1388_s9 = scalar_lea.vmem %s1475_s0, %s1022_s4  ;;  %s1422_s17 = scalar_lea.vmem %s1478_s3, %s1022_s4 }
   0xf   : > { %v1123_v8 = vld [vmem:[%s1388_s9] sm:$0xff]  ;;  %v1124_v12 = vld [vmem:[%s1388_s9 + $0x8] sm:$0xff]  ;;  %v1125_v16 = vld [vmem:[%s1388_s9 + $0x10] sm:$0xff] }
  0x10   : > { %v1127_v9 = vld [vmem:[%s1388_s9 + $0x20] sm:$0xff]  ;;  %v1128_v13 = vld [vmem:[%s1388_s9 + $0x28] sm:$0xff]  ;;  %v1129_v17 = vld [vmem:[%s1388_s9 + $0x30] sm:$0xff] }
  0x11   : > { %520 = vmatpush.bf16.msra.mxu0 %v1145_v1  ;;  %1245 = vmatpush.bf16.msra.mxu1 %v1145_v1  ;;  %v1131_v10 = vld [vmem:[%s1388_s9 + $0x40] sm:$0xff]  ;;  %v1132_v14 = vld [vmem:[%s1388_s9 + $0x48] sm:$0xff]  ;;  %v1133_v18 = vld [vmem:[%s1388_s9 + $0x50] sm:$0xff] }
  0x12   : > { %1246 = vmatpush.bf16.msra.mxu2 %v1145_v1  ;;  %1247 = vmatpush.bf16.msra.mxu3 %v1145_v1  ;;  %v1135_v11 = vld [vmem:[%s1388_s9 + $0x60] sm:$0xff]  ;;  %v1136_v15 = vld [vmem:[%s1388_s9 + $0x68] sm:$0xff]  ;;  %v1137_v19 = vld [vmem:[%s1388_s9 + $0x70] sm:$0xff] }
  0x13   : > { %v1126_v20 = vld [vmem:[%s1388_s9 + $0x18] sm:$0xff]  ;;  %v1409_v26 = vld [vmem:[%s1477_s2] ss:$0 sm:$0xff] }
  0x14   : > { %v1130_v21 = vld [vmem:[%s1388_s9 + $0x38] sm:$0xff] }
  0x15   : > { %521 = vmatpush.bf16.msra.mxu0 %v1144_v2  ;;  %1248 = vmatpush.bf16.msra.mxu1 %v1144_v2  ;;  %v1134_v22 = vld [vmem:[%s1388_s9 + $0x58] sm:$0xff] }
  0x16   : > { %1249 = vmatpush.bf16.msra.mxu2 %v1144_v2  ;;  %1250 = vmatpush.bf16.msra.mxu3 %v1144_v2  ;;  %v1138_v23 = vld [vmem:[%s1388_s9 + $0x78] sm:$0xff] }
  0x19   : > { %522 = vmatpush.bf16.msra.mxu0 %v1143_v3  ;;  %1251 = vmatpush.bf16.msra.mxu1 %v1143_v3 }
  0x1a   : > { %1252 = vmatpush.bf16.msra.mxu2 %v1143_v3  ;;  %1253 = vmatpush.bf16.msra.mxu3 %v1143_v3 }
  0x1d   : > { %523 = vmatpush.bf16.msra.mxu0 %v1142_v4  ;;  %1254 = vmatpush.bf16.msra.mxu1 %v1142_v4 }
  0x1e   : > { %1255 = vmatpush.bf16.msra.mxu2 %v1142_v4  ;;  %1256 = vmatpush.bf16.msra.mxu3 %v1142_v4 }
  0x21   : > { %524 = vmatpush.bf16.msra.mxu0 %v1141_v5  ;;  %1257 = vmatpush.bf16.msra.mxu1 %v1141_v5 }
  0x22   : > { %1258 = vmatpush.bf16.msra.mxu2 %v1141_v5  ;;  %1259 = vmatpush.bf16.msra.mxu3 %v1141_v5 }
  0x25   : > { %525 = vmatpush.bf16.msra.mxu0 %v1140_v6  ;;  %1260 = vmatpush.bf16.msra.mxu1 %v1140_v6 }
  0x26   : > { %1261 = vmatpush.bf16.msra.mxu2 %v1140_v6  ;;  %1262 = vmatpush.bf16.msra.mxu3 %v1140_v6 }
  0x29   : > { %526 = vmatpush.bf16.msra.mxu0 %v1139_v7  ;;  %1263 = vmatpush.bf16.msra.mxu1 %v1139_v7 }
  0x2a   : > { %1264 = vmatpush.bf16.msra.mxu2 %v1139_v7  ;;  %1265 = vmatpush.bf16.msra.mxu3 %v1139_v7 }
  0x2c   : > { %527 = vmatmul.bf16.vlgmr.msra.gmra.mxu0 %v1123_v8  ;;  %547 = vmatmul.bf16.vlgmr.msra.gmra.mxu1 %v1127_v9 }
  0x2d   : > { %567 = vmatmul.bf16.vlgmr.msra.gmra.mxu2 %v1131_v10  ;;  %587 = vmatmul.bf16.vlgmr.msra.gmra.mxu3 %v1135_v11 }
  0x3c   : > { %532 = vmatmul.bf16.gmra.mxu0 %v1124_v12  ;;  %552 = vmatmul.bf16.gmra.mxu1 %v1128_v13 }
  0x3d   : > { %572 = vmatmul.bf16.gmra.mxu2 %v1132_v14  ;;  %592 = vmatmul.bf16.gmra.mxu3 %v1136_v15 }
  0x4c   : > { %537 = vmatmul.bf16.gmra.mxu0 %v1125_v16  ;;  %557 = vmatmul.bf16.gmra.mxu1 %v1129_v17 }
  0x4d   : > { %577 = vmatmul.bf16.gmra.mxu2 %v1133_v18  ;;  %597 = vmatmul.bf16.gmra.mxu3 %v1137_v19 }
  0x5c   : > { %542 = vmatmul.bf16.gmra.mxu0 %v1126_v20  ;;  %562 = vmatmul.bf16.gmra.mxu1 %v1130_v21 }
  0x5d   : > { %582 = vmatmul.bf16.gmra.mxu2 %v1134_v22  ;;  %602 = vmatmul.bf16.gmra.mxu3 %v1138_v23 }
  0xa9   : > { %v528_v24 = vpop.f32.mrf.mxu0  ;;  %v548_v25 = vpop.f32.mrf.mxu1 }
  0xaa   : > { %v711_v27 = vadd.f32 %v1409_v26, %v528_v24  ;;  %v719_v28 = vadd.f32 %v1409_v26, %v548_v25 }
  0xac   : > { %v775_v33 = vmul.f32 0.2, %v711_v27  ;;  %v783_v34 = vmul.f32 0.2, %v719_v28  ;;  %vm743_vm0 = vcmp.gt.f32.partialorder %v711_v27, 0.0  ;;  %vm751_vm1 = vcmp.gt.f32.partialorder %v719_v28, 0.0 }
  0xae   : > { %v807_v41 = vsel %vm743_vm0, %v711_v27, %v775_v33  ;;  %v815_v42 = vsel %vm751_vm1, %v719_v28, %v783_v34 }
  0xb0   : > { %v568_v29 = vpop.f32.mrf.mxu2  ;;  %v588_v30 = vpop.f32.mrf.mxu3 }
  0xb1   : > { %v530_v31 = vpop.f32.mrf.mxu0  ;;  %v550_v32 = vpop.f32.mrf.mxu1  ;;  %v727_v39 = vadd.f32 %v1409_v26, %v568_v29  ;;  %v735_v40 = vadd.f32 %v1409_v26, %v588_v30 }
  0xb2   : > { %v712_v35 = vadd.f32 %v1409_v26, %v530_v31  ;;  %v720_v36 = vadd.f32 %v1409_v26, %v550_v32 }
  0xb3   : > { %v791_v49 = vmul.f32 0.2, %v727_v39  ;;  %v799_v50 = vmul.f32 0.2, %v735_v40  ;;  %vm759_vm4 = vcmp.gt.f32.partialorder %v727_v39, 0.0  ;;  %vm767_vm5 = vcmp.gt.f32.partialorder %v735_v40, 0.0 }
  0xb4   : > { %vm744_vm2 = vcmp.gt.f32.partialorder %v712_v35, 0.0  ;;  %v776_v37 = vmul.f32 0.2, %v712_v35  ;;  %vm752_vm3 = vcmp.gt.f32.partialorder %v720_v36, 0.0  ;;  %v784_v38 = vmul.f32 0.2, %v720_v36 }
  0xb5   : > { %v823_v57 = vsel %vm759_vm4, %v727_v39, %v791_v49  ;;  %v831_v58 = vsel %vm767_vm5, %v735_v40, %v799_v50 }
  0xb6   : > { %v808_v43 = vsel %vm744_vm2, %v712_v35, %v776_v37  ;;  %v816_v44 = vsel %vm752_vm3, %v720_v36, %v784_v38 }
  0xb7   : > { %v1150_v45 = vpack.c.bf16 %v808_v43, %v807_v41  ;;  %v1170_v46 = vpack.c.bf16 %v816_v44, %v815_v42 }
  0xb8   : > { %v570_v47 = vpop.f32.mrf.mxu2  ;;  %v590_v48 = vpop.f32.mrf.mxu3 }
  0xb9   : > { %1151 = vst [vmem:[%s1422_s17] sm:$0xff] %v1150_v45   ;;  %v728_v51 = vadd.f32 %v1409_v26, %v570_v47  ;;  %v736_v52 = vadd.f32 %v1409_v26, %v590_v48  ;;  %v533_v53 = vpop.f32.mrf.mxu0  ;;  %v553_v54 = vpop.f32.mrf.mxu1 }
  0xba   : > { %1230 = vst [vmem:[%s1422_s17 + $0x20] sm:$0xff] %v1170_v46   ;;  %v713_v63 = vadd.f32 %v1409_v26, %v533_v53  ;;  %v721_v0 = vadd.f32 %v1409_v26, %v553_v54 }
  0xbb   : > { %vm760_vm6 = vcmp.gt.f32.partialorder %v728_v51, 0.0  ;;  %v792_v55 = vmul.f32 0.2, %v728_v51  ;;  %vm768_vm7 = vcmp.gt.f32.partialorder %v736_v52, 0.0  ;;  %v800_v56 = vmul.f32 0.2, %v736_v52 }
  0xbc   : > { %v777_v5 = vmul.f32 0.2, %v713_v63  ;;  %v785_v6 = vmul.f32 0.2, %v721_v0  ;;  %vm745_vm8 = vcmp.gt.f32.partialorder %v713_v63, 0.0  ;;  %vm753_vm9 = vcmp.gt.f32.partialorder %v721_v0, 0.0 }
  0xbd   : > { %v824_v59 = vsel %vm760_vm6, %v728_v51, %v792_v55  ;;  %v832_v60 = vsel %vm768_vm7, %v736_v52, %v800_v56 }
  0xbe   : > { %v1190_v61 = vpack.c.bf16 %v824_v59, %v823_v57  ;;  %v1210_v62 = vpack.c.bf16 %v832_v60, %v831_v58  ;;  %v809_v13 = vsel %vm745_vm8, %v713_v63, %v777_v5  ;;  %v817_v14 = vsel %vm753_vm9, %v721_v0, %v785_v6 }
  0xc0   : > { %1234 = vst [vmem:[%s1422_s17 + $0x40] sm:$0xff] %v1190_v61   ;;  %v573_v1 = vpop.f32.mrf.mxu2  ;;  %v593_v2 = vpop.f32.mrf.mxu3 }
  0xc1   : > { %1238 = vst [vmem:[%s1422_s17 + $0x60] sm:$0xff] %v1210_v62   ;;  %v535_v3 = vpop.f32.mrf.mxu0  ;;  %v555_v4 = vpop.f32.mrf.mxu1  ;;  %v729_v11 = vadd.f32 %v1409_v26, %v573_v1  ;;  %v737_v12 = vadd.f32 %v1409_v26, %v593_v2 }
  0xc2   : > { %v714_v7 = vadd.f32 %v1409_v26, %v535_v3  ;;  %v722_v8 = vadd.f32 %v1409_v26, %v555_v4 }
  0xc3   : > { %v793_v21 = vmul.f32 0.2, %v729_v11  ;;  %v801_v22 = vmul.f32 0.2, %v737_v12  ;;  %vm761_vm12 = vcmp.gt.f32.partialorder %v729_v11, 0.0  ;;  %vm769_vm13 = vcmp.gt.f32.partialorder %v737_v12, 0.0 }
  0xc4   : > { %vm746_vm10 = vcmp.gt.f32.partialorder %v714_v7, 0.0  ;;  %v778_v9 = vmul.f32 0.2, %v714_v7  ;;  %vm754_vm11 = vcmp.gt.f32.partialorder %v722_v8, 0.0  ;;  %v786_v10 = vmul.f32 0.2, %v722_v8 }
  0xc5   : > { %v825_v30 = vsel %vm761_vm12, %v729_v11, %v793_v21  ;;  %v833_v31 = vsel %vm769_vm13, %v737_v12, %v801_v22 }
  0xc6   : > { %v810_v15 = vsel %vm746_vm10, %v714_v7, %v778_v9  ;;  %v818_v16 = vsel %vm754_vm11, %v722_v8, %v786_v10 }
  0xc7   : > { %v1155_v17 = vpack.c.bf16 %v810_v15, %v809_v13  ;;  %v1175_v18 = vpack.c.bf16 %v818_v16, %v817_v14 }
  0xc8   : > { %v575_v19 = vpop.f32.mrf.mxu2  ;;  %v595_v20 = vpop.f32.mrf.mxu3 }
  0xc9   : > { %1227 = vst [vmem:[%s1422_s17 + $0x8] sm:$0xff] %v1155_v17   ;;  %v730_v23 = vadd.f32 %v1409_v26, %v575_v19  ;;  %v738_v24 = vadd.f32 %v1409_v26, %v595_v20  ;;  %v538_v25 = vpop.f32.mrf.mxu0  ;;  %v558_v27 = vpop.f32.mrf.mxu1 }
  0xca   : > { %1231 = vst [vmem:[%s1422_s17 + $0x28] sm:$0xff] %v1175_v18   ;;  %v715_v36 = vadd.f32 %v1409_v26, %v538_v25  ;;  %v723_v37 = vadd.f32 %v1409_v26, %v558_v27 }
  0xcb   : > { %vm762_vm14 = vcmp.gt.f32.partialorder %v730_v23, 0.0  ;;  %v794_v28 = vmul.f32 0.2, %v730_v23  ;;  %vm770_vm15 = vcmp.gt.f32.partialorder %v738_v24, 0.0  ;;  %v802_v29 = vmul.f32 0.2, %v738_v24 }
  0xcc   : > { %v779_v42 = vmul.f32 0.2, %v715_v36  ;;  %v787_v43 = vmul.f32 0.2, %v723_v37  ;;  %vm747_vm0 = vcmp.gt.f32.partialorder %v715_v36, 0.0  ;;  %vm755_vm1 = vcmp.gt.f32.partialorder %v723_v37, 0.0 }
  0xcd   : > { %v826_v32 = vsel %vm762_vm14, %v730_v23, %v794_v28  ;;  %v834_v33 = vsel %vm770_vm15, %v738_v24, %v802_v29 }
  0xce   : > { %v1195_v34 = vpack.c.bf16 %v826_v32, %v825_v30  ;;  %v1215_v35 = vpack.c.bf16 %v834_v33, %v833_v31  ;;  %v811_v50 = vsel %vm747_vm0, %v715_v36, %v779_v42  ;;  %v819_v51 = vsel %vm755_vm1, %v723_v37, %v787_v43 }
  0xd0   : > { %1235 = vst [vmem:[%s1422_s17 + $0x48] sm:$0xff] %v1195_v34   ;;  %v578_v38 = vpop.f32.mrf.mxu2  ;;  %v598_v39 = vpop.f32.mrf.mxu3 }
  0xd1   : > { %1239 = vst [vmem:[%s1422_s17 + $0x68] sm:$0xff] %v1215_v35   ;;  %v540_v40 = vpop.f32.mrf.mxu0  ;;  %v560_v41 = vpop.f32.mrf.mxu1  ;;  %v731_v48 = vadd.f32 %v1409_v26, %v578_v38  ;;  %v739_v49 = vadd.f32 %v1409_v26, %v598_v39 }
  0xd2   : > { %v716_v44 = vadd.f32 %v1409_v26, %v540_v40  ;;  %v724_v45 = vadd.f32 %v1409_v26, %v560_v41 }
  0xd3   : > { %v795_v58 = vmul.f32 0.2, %v731_v48  ;;  %v803_v59 = vmul.f32 0.2, %v739_v49  ;;  %vm763_vm4 = vcmp.gt.f32.partialorder %v731_v48, 0.0  ;;  %vm771_vm5 = vcmp.gt.f32.partialorder %v739_v49, 0.0 }
  0xd4   : > { %vm748_vm2 = vcmp.gt.f32.partialorder %v716_v44, 0.0  ;;  %v780_v46 = vmul.f32 0.2, %v716_v44  ;;  %vm756_vm3 = vcmp.gt.f32.partialorder %v724_v45, 0.0  ;;  %v788_v47 = vmul.f32 0.2, %v724_v45 }
  0xd5   : > { %v827_v2 = vsel %vm763_vm4, %v731_v48, %v795_v58  ;;  %v835_v3 = vsel %vm771_vm5, %v739_v49, %v803_v59 }
  0xd6   : > { %v812_v52 = vsel %vm748_vm2, %v716_v44, %v780_v46  ;;  %v820_v53 = vsel %vm756_vm3, %v724_v45, %v788_v47 }
  0xd7   : > { %v1160_v54 = vpack.c.bf16 %v812_v52, %v811_v50  ;;  %v1180_v55 = vpack.c.bf16 %v820_v53, %v819_v51 }
  0xd8   : > { %v580_v56 = vpop.f32.mrf.mxu2  ;;  %v600_v57 = vpop.f32.mrf.mxu3 }
  0xd9   : > { %1228 = vst [vmem:[%s1422_s17 + $0x10] sm:$0xff] %v1160_v54   ;;  %v732_v60 = vadd.f32 %v1409_v26, %v580_v56  ;;  %v740_v61 = vadd.f32 %v1409_v26, %v600_v57  ;;  %v543_v62 = vpop.f32.mrf.mxu0  ;;  %v563_v63 = vpop.f32.mrf.mxu1 }
  0xda   : > { %1232 = vst [vmem:[%s1422_s17 + $0x30] sm:$0xff] %v1180_v55   ;;  %v717_v8 = vadd.f32 %v1409_v26, %v543_v62  ;;  %v725_v9 = vadd.f32 %v1409_v26, %v563_v63 }
  0xdb   : > { %vm764_vm6 = vcmp.gt.f32.partialorder %v732_v60, 0.0  ;;  %v796_v0 = vmul.f32 0.2, %v732_v60  ;;  %vm772_vm7 = vcmp.gt.f32.partialorder %v740_v61, 0.0  ;;  %v804_v1 = vmul.f32 0.2, %v740_v61 }
  0xdc   : > { %v781_v14 = vmul.f32 0.2, %v717_v8  ;;  %v789_v15 = vmul.f32 0.2, %v725_v9  ;;  %vm749_vm8 = vcmp.gt.f32.partialorder %v717_v8, 0.0  ;;  %vm757_vm9 = vcmp.gt.f32.partialorder %v725_v9, 0.0 }
  0xdd   : > { %v828_v4 = vsel %vm764_vm6, %v732_v60, %v796_v0  ;;  %v836_v5 = vsel %vm772_vm7, %v740_v61, %v804_v1 }
  0xde   : > { %v1200_v6 = vpack.c.bf16 %v828_v4, %v827_v2  ;;  %v1220_v7 = vpack.c.bf16 %v836_v5, %v835_v3  ;;  %v813_v22 = vsel %vm749_vm8, %v717_v8, %v781_v14  ;;  %v821_v23 = vsel %vm757_vm9, %v725_v9, %v789_v15 }
  0xe0   : > { %1236 = vst [vmem:[%s1422_s17 + $0x50] sm:$0xff] %v1200_v6   ;;  %v583_v10 = vpop.f32.mrf.mxu2  ;;  %v603_v11 = vpop.f32.mrf.mxu3 }
  0xe1   : > { %1240 = vst [vmem:[%s1422_s17 + $0x70] sm:$0xff] %v1220_v7   ;;  %v545_v12 = vpop.f32.mrf.mxu0  ;;  %v565_v13 = vpop.f32.mrf.mxu1  ;;  %v733_v20 = vadd.f32 %v1409_v26, %v583_v10  ;;  %v741_v21 = vadd.f32 %v1409_v26, %v603_v11 }
  0xe2   : > { %v718_v16 = vadd.f32 %v1409_v26, %v545_v12  ;;  %v726_v17 = vadd.f32 %v1409_v26, %v565_v13 }
  0xe3   : > { %v797_v31 = vmul.f32 0.2, %v733_v20  ;;  %v805_v32 = vmul.f32 0.2, %v741_v21  ;;  %vm765_vm12 = vcmp.gt.f32.partialorder %v733_v20, 0.0  ;;  %vm773_vm13 = vcmp.gt.f32.partialorder %v741_v21, 0.0 }
  0xe4   : > { %vm750_vm10 = vcmp.gt.f32.partialorder %v718_v16, 0.0  ;;  %v782_v18 = vmul.f32 0.2, %v718_v16  ;;  %vm758_vm11 = vcmp.gt.f32.partialorder %v726_v17, 0.0  ;;  %v790_v19 = vmul.f32 0.2, %v726_v17 }
  0xe5   : > { %v829_v37 = vsel %vm765_vm12, %v733_v20, %v797_v31  ;;  %v837_v38 = vsel %vm773_vm13, %v741_v21, %v805_v32 }
  0xe6   : > { %v814_v24 = vsel %vm750_vm10, %v718_v16, %v782_v18  ;;  %v822_v25 = vsel %vm758_vm11, %v726_v17, %v790_v19 }
  0xe7   : > { %v1165_v27 = vpack.c.bf16 %v814_v24, %v813_v22  ;;  %v1185_v28 = vpack.c.bf16 %v822_v25, %v821_v23 }
  0xe8   : > { %v585_v29 = vpop.f32.mrf.mxu2  ;;  %v605_v30 = vpop.f32.mrf.mxu3 }
  0xe9   : > { %1229 = vst [vmem:[%s1422_s17 + $0x18] sm:$0xff] %v1165_v27   ;;  %v734_v33 = vadd.f32 %v1409_v26, %v585_v29  ;;  %v742_v34 = vadd.f32 %v1409_v26, %v605_v30 }
  0xea   : > { %1233 = vst [vmem:[%s1422_s17 + $0x38] sm:$0xff] %v1185_v28  }
  0xeb   : > { %vm766_vm14 = vcmp.gt.f32.partialorder %v734_v33, 0.0  ;;  %v798_v35 = vmul.f32 0.2, %v734_v33  ;;  %vm774_vm15 = vcmp.gt.f32.partialorder %v742_v34, 0.0  ;;  %v806_v36 = vmul.f32 0.2, %v742_v34 }
  0xed   : > { %v830_v39 = vsel %vm766_vm14, %v734_v33, %v798_v35  ;;  %v838_v40 = vsel %vm774_vm15, %v742_v34, %v806_v36 }
  0xee   : > { %v1205_v41 = vpack.c.bf16 %v830_v39, %v829_v37  ;;  %v1225_v42 = vpack.c.bf16 %v838_v40, %v837_v38 }
  0xf0   : > { %1237 = vst [vmem:[%s1422_s17 + $0x58] sm:$0xff] %v1205_v41  }
  0xf1   : > { %1241 = vst [vmem:[%s1422_s17 + $0x78] sm:$0xff] %v1225_v42  }
  0xf2 PF: > { %s13_s14 = sadd.s32 1, %s1313_s14   ;;  %s1479_s12 = smov %s1309_s13 }
  0xf3   : > { %p10_p5 = scmp.ge.s32.totalorder %s13_s14, 4   ;;  %s1480_s13 = smov %s1482_s15 }
  0xf5   :  { %12 = sbr.rel (!%p10_p5) target bundleno = 2 (0x2), region = 76 }

// kernel: discriminator_forward.10
= control target key start
LH: loop header
LB: loop body
LE: loop exit
PB: predicated region body
PF: predicated region fallthrough
CT: control target
= control target key end

     0   :  { %s449_s6 = smov 0   ;;  %s451_s7 = smov 0   ;;  %s486_s0 = inlined_call_operand.vmem [shape: f32[2,64,128], index: 0, kind: input, shape index: {}]   ;;  %s487_s1 = inlined_call_operand.vmem [shape: bf16[2,64,128], index: 1, kind: output, shape index: {}]  }
   0x1   :  { %s453_s8 = smov 0  }
   0x2 LB: > { %s23_s9 = sadd.s32 1, %s432_s7  ;;  %p353_p0 = scmp.ge.s32.totalorder %s436_s8, 1  ;;  %s436_s8 = sphi %s453_s8, %s11_s8   ;;  %s432_s7 = sphi %s451_s7, %s489_s7   ;;  %s428_s6 = sphi %s449_s6, %s488_s6  }
   0x3   : > { %p25_p1 = scmp.ge.s32.totalorder %s23_s9, 2  ;;  %p106_p2 = scmp.lt.s32.totalorder %s436_s8, 3 }
   0x5   : > { %s491_s9 = smov (%p25_p1, %s23_s9), 0  ;;  %p107_p3 = pnand %p353_p0, %p106_p2 }
   0x6   : > { %p132_p4 = scmp.lt.s32.totalorder (!%p107_p3), %s428_s6, 1 }
   0x7   : > { %110 = sbr.rel (%p107_p3) target bundleno = 109 (0x6d), region = 24 }
   0xc   : > { %s493_s6 = smov (!%p132_p4, %s428_s6), 1  ;;  %v438_v0 = vmov 64.0  }
   0xd   : > { %s360_s10 = sshll.u32 %s493_s6, 6  ;;  %410 = vrcp.f32 %v438_v0  ;;  %s361_s14 = sshll.u32 %s493_s6, 5 }
   0xe   : > { %s139_s13 = scalar_lea.vmem %s486_s0, %s360_s10  ;;  %s147_s17 = scalar_lea.vmem %s487_s1, %s361_s14 }
   0xf   : > { %v148_v1 = vld [vmem:[%s139_s13] sm:$0xff]  ;;  %v149_v2 = vld [vmem:[%s139_s13 + $0x8] sm:$0xff]  ;;  %v150_v3 = vld [vmem:[%s139_s13 + $0x10] sm:$0xff] }
  0x10   : > { %v156_v4 = vadd.f32 %v149_v2, %v148_v1  ;;  %v151_v5 = vld [vmem:[%s139_s13 + $0x18] sm:$0xff]  ;;  %v152_v7 = vld [vmem:[%s139_s13 + $0x20] sm:$0xff]  ;;  %v153_v10 = vld [vmem:[%s139_s13 + $0x28] sm:$0xff] }
  0x11   : > { %v154_v12 = vld [vmem:[%s139_s13 + $0x30] sm:$0xff]  ;;  %v155_v15 = vld [vmem:[%s139_s13 + $0x38] sm:$0xff] }
  0x12   : > { %v157_v6 = vadd.f32 %v156_v4, %v150_v3 }
  0x13   : > { %v411_v8 = vpop.eup %410 }
  0x14   : > { %v158_v9 = vadd.f32 %v157_v6, %v151_v5  ;;  %v170_v13 = vmul.f32 64.0, %v411_v8  ;;  %vm174_vm0 = vweird.f32 %v411_v8 }
  0x16   : > { %v159_v11 = vadd.f32 %v158_v9, %v152_v7  ;;  %v171_v17 = vsub.f32 1.0, %v170_v13 }
  0x18   : > { %v160_v14 = vadd.f32 %v159_v11, %v153_v10  ;;  %v172_v20 = vmul.f32 %v411_v8, %v171_v17 }
  0x1a   : > { %v161_v16 = vadd.f32 %v160_v14, %v154_v12  ;;  %v173_v23 = vadd.f32 %v411_v8, %v172_v20 }
  0x1c   : > { %v162_v18 = vadd.f32 %v161_v16, %v155_v15  ;;  %v175_v26 = vsel %vm174_vm0, %v411_v8, %v173_v23 }
  0x1e   : > { %v163_v19 = vrot.slane %v162_v18, 4 }
  0x20   : > { %v164_v21 = vadd.f32 %v163_v19, %v162_v18 }
  0x22   : > { %v165_v22 = vrot.slane %v164_v21, 2 }
  0x24   : > { %v166_v24 = vadd.f32 %v165_v22, %v164_v21 }
  0x26   : > { %v167_v25 = vrot.slane %v166_v24, 1 }
  0x28   : > { %v168_v27 = vadd.f32 %v167_v25, %v166_v24 }
  0x2a   : > { %v176_v28 = vmul.f32 %v175_v26, %v168_v27 }
  0x2c   : > { %v177_v29 = vsub.f32 %v148_v1, %v176_v28  ;;  %v178_v30 = vsub.f32 %v149_v2, %v176_v28  ;;  %v179_v31 = vsub.f32 %v150_v3, %v176_v28  ;;  %v180_v32 = vsub.f32 %v151_v5, %v176_v28 }
  0x2d   : > { %v181_v33 = vsub.f32 %v152_v7, %v176_v28  ;;  %v182_v37 = vsub.f32 %v153_v10, %v176_v28  ;;  %v183_v40 = vsub.f32 %v154_v12, %v176_v28  ;;  %v184_v43 = vsub.f32 %v155_v15, %v176_v28 }
  0x2e   : > { %v185_v34 = vmul.f32 %v177_v29, %v177_v29  ;;  %v186_v35 = vmul.f32 %v178_v30, %v178_v30  ;;  %v187_v36 = vmul.f32 %v179_v31, %v179_v31  ;;  %v188_v38 = vmul.f32 %v180_v32, %v180_v32 }
  0x2f   : > { %v189_v41 = vmul.f32 %v181_v33, %v181_v33  ;;  %v190_v44 = vmul.f32 %v182_v37, %v182_v37  ;;  %v191_v46 = vmul.f32 %v183_v40, %v183_v40  ;;  %v192_v48 = vmul.f32 %v184_v43, %v184_v43 }
  0x30   : > { %v193_v39 = vadd.f32 %v186_v35, %v185_v34 }
  0x32   : > { %v194_v42 = vadd.f32 %v193_v39, %v187_v36 }
  0x34   : > { %v195_v45 = vadd.f32 %v194_v42, %v188_v38 }
  0x36   : > { %v196_v47 = vadd.f32 %v195_v45, %v189_v41 }
  0x38   : > { %v197_v49 = vadd.f32 %v196_v47, %v190_v44 }
  0x3a   : > { %v198_v50 = vadd.f32 %v197_v49, %v191_v46 }
  0x3c   : > { %v199_v51 = vadd.f32 %v198_v50, %v192_v48 }
  0x3e   : > { %v200_v52 = vrot.slane %v199_v51, 4 }
  0x40   : > { %v201_v53 = vadd.f32 %v200_v52, %v199_v51 }
  0x42   : > { %v202_v54 = vrot.slane %v201_v53, 2 }
  0x44   : > { %v203_v55 = vadd.f32 %v202_v54, %v201_v53 }
  0x46   : > { %v204_v56 = vrot.slane %v203_v55, 1 }
  0x48   : > { %v205_v57 = vadd.f32 %v204_v56, %v203_v55 }
  0x4a   : > { %v206_v58 = vmul.f32 %v205_v57, %v175_v26 }
  0x4c   : > { %v207_v59 = vadd.f32 1e-05, %v206_v58 }
  0x4e   : > { %412 = vrsqrt.f32 %v207_v59  ;;  %vm214_vm1 = vweird.f32 %v207_v59 }
  0x54   : > { %v413_v60 = vpop.eup %412 }
  0x55   : > { %v209_v61 = vmul.f32 %v413_v60, %v207_v59  ;;  %vm215_vm2 = vweird.f32 %v413_v60 }
  0x56   : > { %vm216_vm3 = vmor %vm214_vm1, %vm215_vm2 }
  0x57   : > { %v210_v62 = vmul.f32 %v413_v60, %v209_v61 }
  0x59   : > { %v211_v63 = vmul.f32 0.5, %v210_v62 }
  0x5b   : > { %v212_v0 = vsub.f32 1.5, %v211_v63 }
  0x5d   : > { %v213_v1 = vmul.f32 %v413_v60, %v212_v0 }
  0x5f   : > { %v217_v2 = vsel %vm216_vm3, %v413_v60, %v213_v1 }
  0x60   : > { %v218_v3 = vmul.f32 %v217_v2, %v177_v29  ;;  %v219_v4 = vmul.f32 %v217_v2, %v178_v30  ;;  %v220_v5 = vmul.f32 %v217_v2, %v179_v31  ;;  %v221_v6 = vmul.f32 %v217_v2, %v180_v32 }
  0x61   : > { %v222_v7 = vmul.f32 %v217_v2, %v181_v33  ;;  %v223_v8 = vmul.f32 %v217_v2, %v182_v37  ;;  %v224_v9 = vmul.f32 %v217_v2, %v183_v40  ;;  %v225_v10 = vmul.f32 %v217_v2, %v184_v43 }
  0x62   : > { %vm226_vm4 = vcmp.gt.f32.partialorder %v218_v3, 0.0  ;;  %vm227_vm5 = vcmp.gt.f32.partialorder %v219_v4, 0.0  ;;  %v234_v11 = vmul.f32 0.2, %v218_v3  ;;  %v235_v12 = vmul.f32 0.2, %v219_v4 }
  0x63   : > { %vm228_vm6 = vcmp.gt.f32.partialorder %v220_v5, 0.0  ;;  %vm229_vm7 = vcmp.gt.f32.partialorder %v221_v6, 0.0  ;;  %v236_v13 = vmul.f32 0.2, %v220_v5  ;;  %v237_v14 = vmul.f32 0.2, %v221_v6 }
  0x64   : > { %v242_v15 = vsel %vm226_vm4, %v218_v3, %v234_v11  ;;  %v243_v16 = vsel %vm227_vm5, %v219_v4, %v235_v12  ;;  %vm230_vm8 = vcmp.gt.f32.partialorder %v222_v7, 0.0  ;;  %vm231_vm9 = vcmp.gt.f32.partialorder %v223_v8, 0.0 }
  0x65   : > { %v365_v17 = vpack.c.bf16 %v243_v16, %v242_v15  ;;  %v244_v18 = vsel %vm228_vm6, %v220_v5, %v236_v13  ;;  %v245_v19 = vsel %vm229_vm7, %v221_v6, %v237_v14  ;;  %v238_v20 = vmul.f32 0.2, %v222_v7 }
  0x66   : > { %v370_v21 = vpack.c.bf16 %v245_v19, %v244_v18  ;;  %v239_v22 = vmul.f32 0.2, %v223_v8  ;;  %vm232_vm10 = vcmp.gt.f32.partialorder %v224_v9, 0.0  ;;  %vm233_vm11 = vcmp.gt.f32.partialorder %v225_v10, 0.0 }
  0x67   : > { %366 = vst [vmem:[%s147_s17] sm:$0xff] %v365_v17   ;;  %v246_v23 = vsel %vm230_vm8, %v222_v7, %v238_v20  ;;  %v240_v24 = vmul.f32 0.2, %v224_v9  ;;  %v241_v25 = vmul.f32 0.2, %v225_v10 }
  0x68   : > { %382 = vst [vmem:[%s147_s17 + $0x8] sm:$0xff] %v370_v21   ;;  %v247_v26 = vsel %vm231_vm9, %v223_v8, %v239_v22 }
  0x69   : > { %v375_v27 = vpack.c.bf16 %v247_v26, %v246_v23  ;;  %v248_v28 = vsel %vm232_vm10, %v224_v9, %v240_v24  ;;  %v249_v29 = vsel %vm233_vm11, %v225_v10, %v241_v25 }
  0x6a   : > { %v380_v30 = vpack.c.bf16 %v249_v29, %v248_v28 }
  0x6b   : > { %383 = vst [vmem:[%s147_s17 + $0x10] sm:$0xff] %v375_v27  }
  0x6c   : > { %384 = vst [vmem:[%s147_s17 + $0x18] sm:$0xff] %v380_v30  }
  0x6d PF: > { %s11_s8 = sadd.s32 1, %s436_s8   ;;  %s488_s6 = smov %s432_s7 }
  0x6e   : > { %p8_p5 = scmp.ge.s32.totalorder %s11_s8, 4   ;;  %s489_s7 = smov %s491_s9 }
  0x70   :  { %10 = sbr.rel (!%p8_p5) target bundleno = 2 (0x2), region = 54 }

// kernel: discriminator_forward.9
= control target key start
LH: loop header
LB: loop body
LE: loop exit
PB: predicated region body
PF: predicated region fallthrough
CT: control target
= control target key end

     0   :  { %s2783_s1 = inlined_call_operand.vmem [shape: bf16[1024,128], index: 1, kind: input, shape index: {}]   ;;  %s2784_s0 = inlined_call_operand.vmem [shape: bf16[128,1024], index: 0, kind: input, shape index: {}]   ;;  %s2785_s2 = inlined_call_operand.vmem [shape: f32[1,128], index: 2, kind: input, shape index: {}]   ;;  %s2786_s3 = inlined_call_operand.vmem [shape: f32[128,128], index: 3, kind: output, shape index: {}]  }
   0x1   :  { %v2012_v0 = vld [vmem:[%s2783_s1 + $0x38] sm:$0xff]  ;;  %v2011_v4 = vld [vmem:[%s2783_s1 + $0x30] sm:$0xff]  ;;  %v2010_v8 = vld [vmem:[%s2783_s1 + $0x28] sm:$0xff] }
   0x2   :  { %v2020_v1 = vld [vmem:[%s2783_s1 + $0x78] sm:$0xff]  ;;  %946 = vmatpush.bf16.msra.mxu0 %v2012_v0  ;;  %v2019_v5 = vld [vmem:[%s2783_s1 + $0x70] sm:$0xff]  ;;  %v2018_v9 = vld [vmem:[%s2783_s1 + $0x68] sm:$0xff] }
   0x3   :  { %v2028_v2 = vld [vmem:[%s2783_s1 + $0xb8] sm:$0xff]  ;;  %995 = vmatpush.bf16.msra.mxu1 %v2020_v1  ;;  %v2027_v6 = vld [vmem:[%s2783_s1 + $0xb0] sm:$0xff]  ;;  %v2026_v10 = vld [vmem:[%s2783_s1 + $0xa8] sm:$0xff] }
   0x4   :  { %v2036_v3 = vld [vmem:[%s2783_s1 + $0xf8] sm:$0xff]  ;;  %1044 = vmatpush.bf16.msra.mxu2 %v2028_v2  ;;  %v2035_v7 = vld [vmem:[%s2783_s1 + $0xf0] sm:$0xff]  ;;  %v2034_v11 = vld [vmem:[%s2783_s1 + $0xe8] sm:$0xff] }
   0x5   :  { %1093 = vmatpush.bf16.msra.mxu3 %v2036_v3  ;;  %v2009_v12 = vld [vmem:[%s2783_s1 + $0x20] sm:$0xff]  ;;  %v2008_v16 = vld [vmem:[%s2783_s1 + $0x18] sm:$0xff]  ;;  %v2007_v20 = vld [vmem:[%s2783_s1 + $0x10] sm:$0xff] }
   0x6   :  { %947 = vmatpush.bf16.msra.mxu0 %v2011_v4  ;;  %v2017_v13 = vld [vmem:[%s2783_s1 + $0x60] sm:$0xff]  ;;  %v2016_v17 = vld [vmem:[%s2783_s1 + $0x58] sm:$0xff]  ;;  %v2015_v21 = vld [vmem:[%s2783_s1 + $0x50] sm:$0xff] }
   0x7   :  { %996 = vmatpush.bf16.msra.mxu1 %v2019_v5  ;;  %v2025_v14 = vld [vmem:[%s2783_s1 + $0xa0] sm:$0xff]  ;;  %v2024_v18 = vld [vmem:[%s2783_s1 + $0x98] sm:$0xff]  ;;  %v2023_v22 = vld [vmem:[%s2783_s1 + $0x90] sm:$0xff] }
   0x8   :  { %1045 = vmatpush.bf16.msra.mxu2 %v2027_v6  ;;  %v2033_v15 = vld [vmem:[%s2783_s1 + $0xe0] sm:$0xff]  ;;  %v2032_v19 = vld [vmem:[%s2783_s1 + $0xd8] sm:$0xff]  ;;  %v2031_v23 = vld [vmem:[%s2783_s1 + $0xd0] sm:$0xff] }
   0x9   :  { %1094 = vmatpush.bf16.msra.mxu3 %v2035_v7  ;;  %v2006_v24 = vld [vmem:[%s2783_s1 + $0x8] sm:$0xff]  ;;  %v2005_v28 = vld [vmem:[%s2783_s1] sm:$0xff]  ;;  %v2060_v40 = vld [vmem:[%s2783_s1 + $0x1b8] sm:$0xff] }
   0xa   :  { %948 = vmatpush.bf16.msra.mxu0 %v2010_v8  ;;  %v2014_v25 = vld [vmem:[%s2783_s1 + $0x48] sm:$0xff]  ;;  %v2013_v29 = vld [vmem:[%s2783_s1 + $0x40] sm:$0xff]  ;;  %v2044_v41 = vld [vmem:[%s2783_s1 + $0x138] sm:$0xff] }
   0xb   :  { %997 = vmatpush.bf16.msra.mxu1 %v2018_v9  ;;  %v2022_v26 = vld [vmem:[%s2783_s1 + $0x88] sm:$0xff]  ;;  %v2021_v30 = vld [vmem:[%s2783_s1 + $0x80] sm:$0xff]  ;;  %v2068_v46 = vld [vmem:[%s2783_s1 + $0x1f8] sm:$0xff] }
   0xc   :  { %1046 = vmatpush.bf16.msra.mxu2 %v2026_v10  ;;  %v2030_v27 = vld [vmem:[%s2783_s1 + $0xc8] sm:$0xff]  ;;  %v2029_v31 = vld [vmem:[%s2783_s1 + $0xc0] sm:$0xff]  ;;  %v2052_v47 = vld [vmem:[%s2783_s1 + $0x178] sm:$0xff] }
   0xd   :  { %1095 = vmatpush.bf16.msra.mxu3 %v2034_v11  ;;  %v1431_v32 = vld [vmem:[%s2784_s0] sm:$0xf]  ;;  %v1941_v34 = vld [vmem:[%s2784_s0 + $0x4] sm:$0xf]  ;;  %v1439_v36 = vld [vmem:[%s2784_s0 + $0x8] sm:$0xf] }
   0xe   :  { %949 = vmatpush.bf16.msra.mxu0 %v2009_v12  ;;  %v1945_v33 = vld [vmem:[%s2784_s0 + $0x1c] sm:$0xf0]  ;;  %v1433_v35 = vld [vmem:[%s2784_s0 + $0x20] sm:$0xf0]  ;;  %v1946_v37 = vld [vmem:[%s2784_s0 + $0x24] sm:$0xf0] }
   0xf   :  { %998 = vmatpush.bf16.msra.mxu1 %v2017_v13  ;;  %v1942_v38 = vld [vmem:[%s2784_s0 + $0xc] sm:$0xf]  ;;  %v1432_v42 = vor.u32 %v1945_v33, %v1431_v32  ;;  %v1436_v43 = vor.u32 %v1941_v34, %v1433_v35  ;;  %v1440_v44 = vor.u32 %v1946_v37, %v1439_v36  ;;  %v2059_v48 = vld [vmem:[%s2783_s1 + $0x1b0] sm:$0xff]  ;;  %v1463_v56 = vld [vmem:[%s2784_s0 + $0x40] sm:$0xf] }
  0x10   :  { %1047 = vmatpush.bf16.msra.mxu2 %v2025_v14  ;;  %v1441_v39 = vld [vmem:[%s2784_s0 + $0x28] sm:$0xf0]  ;;  %v2043_v49 = vld [vmem:[%s2783_s1 + $0x130] sm:$0xff]  ;;  %v1953_v57 = vld [vmem:[%s2784_s0 + $0x5c] sm:$0xf0] }
  0x11   :  { %1096 = vmatpush.bf16.msra.mxu3 %v2033_v15  ;;  %v1444_v45 = vor.u32 %v1942_v38, %v1441_v39  ;;  %v2067_v50 = vld [vmem:[%s2783_s1 + $0x1f0] sm:$0xff]  ;;  %v2058_v52 = vld [vmem:[%s2783_s1 + $0x1a8] sm:$0xff]  ;;  %v1949_v58 = vld [vmem:[%s2784_s0 + $0x44] sm:$0xf]  ;;  %v1464_v0 = vor.u32 %v1953_v57, %v1463_v56 }
  0x12   :  { %950 = vmatpush.bf16.msra.mxu0 %v2008_v16  ;;  %v2051_v51 = vld [vmem:[%s2783_s1 + $0x170] sm:$0xff]  ;;  %v2042_v53 = vld [vmem:[%s2783_s1 + $0x128] sm:$0xff]  ;;  %v1465_v59 = vld [vmem:[%s2784_s0 + $0x60] sm:$0xf0] }
  0x13   :  { %999 = vmatpush.bf16.msra.mxu1 %v2016_v17  ;;  %v2066_v54 = vld [vmem:[%s2783_s1 + $0x1e8] sm:$0xff]  ;;  %v1468_v1 = vor.u32 %v1949_v58, %v1465_v59  ;;  %v2057_v4 = vld [vmem:[%s2783_s1 + $0x1a0] sm:$0xff]  ;;  %v2055_v36 = vld [vmem:[%s2783_s1 + $0x190] sm:$0xff] }
  0x14   :  { %1048 = vmatpush.bf16.msra.mxu2 %v2024_v18  ;;  %v2050_v55 = vld [vmem:[%s2783_s1 + $0x168] sm:$0xff]  ;;  %v2041_v5 = vld [vmem:[%s2783_s1 + $0x120] sm:$0xff]  ;;  %v2039_v37 = vld [vmem:[%s2783_s1 + $0x110] sm:$0xff] }
  0x15   :  { %1097 = vmatpush.bf16.msra.mxu3 %v2032_v19  ;;  %v1471_v60 = vld [vmem:[%s2784_s0 + $0x48] sm:$0xf]  ;;  %v1950_v62 = vld [vmem:[%s2784_s0 + $0x4c] sm:$0xf]  ;;  %v2065_v6 = vld [vmem:[%s2783_s1 + $0x1e0] sm:$0xff] }
  0x16   :  { %951 = vmatpush.bf16.msra.mxu0 %v2007_v20  ;;  %v1954_v61 = vld [vmem:[%s2784_s0 + $0x64] sm:$0xf0]  ;;  %v1473_v63 = vld [vmem:[%s2784_s0 + $0x68] sm:$0xf0]  ;;  %v2049_v7 = vld [vmem:[%s2783_s1 + $0x160] sm:$0xff] }
  0x17   :  { %1000 = vmatpush.bf16.msra.mxu1 %v2015_v21  ;;  %v1472_v2 = vor.u32 %v1954_v61, %v1471_v60  ;;  %v1476_v3 = vor.u32 %v1950_v62, %v1473_v63  ;;  %v1495_v8 = vld [vmem:[%s2784_s0 + $0x80] sm:$0xf]  ;;  %v1957_v10 = vld [vmem:[%s2784_s0 + $0x84] sm:$0xf]  ;;  %v1503_v12 = vld [vmem:[%s2784_s0 + $0x88] sm:$0xf] }
  0x18   :  { %1049 = vmatpush.bf16.msra.mxu2 %v2023_v22  ;;  %v1961_v9 = vld [vmem:[%s2784_s0 + $0x9c] sm:$0xf0]  ;;  %v1497_v11 = vld [vmem:[%s2784_s0 + $0xa0] sm:$0xf0]  ;;  %v1962_v13 = vld [vmem:[%s2784_s0 + $0xa4] sm:$0xf0] }
  0x19   :  { %1098 = vmatpush.bf16.msra.mxu3 %v2031_v23  ;;  %v1958_v14 = vld [vmem:[%s2784_s0 + $0x8c] sm:$0xf]  ;;  %v1496_v16 = vor.u32 %v1961_v9, %v1495_v8  ;;  %v1500_v17 = vor.u32 %v1957_v10, %v1497_v11  ;;  %v1504_v18 = vor.u32 %v1962_v13, %v1503_v12  ;;  %v2056_v20 = vld [vmem:[%s2783_s1 + $0x198] sm:$0xff]  ;;  %v2063_v38 = vld [vmem:[%s2783_s1 + $0x1d0] sm:$0xff] }
  0x1a   :  { %952 = vmatpush.bf16.msra.mxu0 %v2006_v24  ;;  %v1505_v15 = vld [vmem:[%s2784_s0 + $0xa8] sm:$0xf0]  ;;  %v2040_v21 = vld [vmem:[%s2783_s1 + $0x118] sm:$0xff]  ;;  %v1527_v24 = vld [vmem:[%s2784_s0 + $0xc0] sm:$0xf] }
  0x1b   :  { %1001 = vmatpush.bf16.msra.mxu1 %v2014_v25  ;;  %v1508_v19 = vor.u32 %v1958_v14, %v1505_v15  ;;  %v2064_v22 = vld [vmem:[%s2783_s1 + $0x1d8] sm:$0xff]  ;;  %v1969_v25 = vld [vmem:[%s2784_s0 + $0xdc] sm:$0xf0]  ;;  %v2047_v39 = vld [vmem:[%s2783_s1 + $0x150] sm:$0xff] }
  0x1c   :  { %1050 = vmatpush.bf16.msra.mxu2 %v2022_v26  ;;  %v2048_v23 = vld [vmem:[%s2783_s1 + $0x158] sm:$0xff]  ;;  %v1965_v26 = vld [vmem:[%s2784_s0 + $0xc4] sm:$0xf]  ;;  %v1528_v32 = vor.u32 %v1969_v25, %v1527_v24  ;;  %v1591_v56 = vld [vmem:[%s2784_s0 + $0x140] sm:$0xf] }
  0x1d   :  { %1099 = vmatpush.bf16.msra.mxu3 %v2030_v27  ;;  %v1529_v27 = vld [vmem:[%s2784_s0 + $0xe0] sm:$0xf0]  ;;  %v1985_v57 = vld [vmem:[%s2784_s0 + $0x15c] sm:$0xf0]  ;;  %v1599_v60 = vld [vmem:[%s2784_s0 + $0x148] sm:$0xf] }
  0x1e   :  { %953 = vmatpush.bf16.msra.mxu0 %v2005_v28  ;;  %v1535_v28 = vld [vmem:[%s2784_s0 + $0xc8] sm:$0xf]  ;;  %v1532_v33 = vor.u32 %v1965_v26, %v1529_v27  ;;  %v1981_v58 = vld [vmem:[%s2784_s0 + $0x144] sm:$0xf]  ;;  %v1982_v62 = vld [vmem:[%s2784_s0 + $0x14c] sm:$0xf] }
  0x1f   :  { %1002 = vmatpush.bf16.msra.mxu1 %v2013_v29  ;;  %v1970_v29 = vld [vmem:[%s2784_s0 + $0xe4] sm:$0xf0]  ;;  %v1593_v59 = vld [vmem:[%s2784_s0 + $0x160] sm:$0xf0]  ;;  %v1601_v63 = vld [vmem:[%s2784_s0 + $0x168] sm:$0xf0] }
  0x20   :  { %1051 = vmatpush.bf16.msra.mxu2 %v2021_v30  ;;  %v1966_v30 = vld [vmem:[%s2784_s0 + $0xcc] sm:$0xf]  ;;  %v1536_v34 = vor.u32 %v1970_v29, %v1535_v28  ;;  %v1986_v61 = vld [vmem:[%s2784_s0 + $0x164] sm:$0xf0]  ;;  %v1623_v8 = vld [vmem:[%s2784_s0 + $0x180] sm:$0xf] }
  0x21   :  { %1100 = vmatpush.bf16.msra.mxu3 %v2029_v31  ;;  %954 = vmatmul.bf16.vlgmr.msra.gmra.mxu0 %v1432_v42  ;;  %v1537_v31 = vld [vmem:[%s2784_s0 + $0xe8] sm:$0xf0]  ;;  %v1973_v42 = vld [vmem:[%s2784_s0 + $0x104] sm:$0xf]  ;;  %v1993_v9 = vld [vmem:[%s2784_s0 + $0x19c] sm:$0xf0] }
  0x22   :  { %1142 = vmatpush.bf16.msrb.mxu0 %v2044_v41  ;;  %1003 = vmatmul.bf16.vlgmr.msra.gmra.mxu1 %v1436_v43  ;;  %v1540_v35 = vor.u32 %v1966_v30, %v1537_v31  ;;  %v1977_v41 = vld [vmem:[%s2784_s0 + $0x11c] sm:$0xf0]  ;;  %v1561_v43 = vld [vmem:[%s2784_s0 + $0x120] sm:$0xf0]  ;;  %v1631_v12 = vld [vmem:[%s2784_s0 + $0x188] sm:$0xf] }
  0x23   :  { %1052 = vmatmul.bf16.vlgmr.msra.gmra.mxu2 %v1440_v44  ;;  %1191 = vmatpush.bf16.msrb.mxu1 %v2052_v47  ;;  %v1567_v44 = vld [vmem:[%s2784_s0 + $0x108] sm:$0xf]  ;;  %v1569_v47 = vld [vmem:[%s2784_s0 + $0x128] sm:$0xf0]  ;;  %v1989_v10 = vld [vmem:[%s2784_s0 + $0x184] sm:$0xf] }
  0x24   :  { %1240 = vmatpush.bf16.msrb.mxu2 %v2060_v40  ;;  %1101 = vmatmul.bf16.vlgmr.msra.gmra.mxu3 %v1444_v45  ;;  %v1559_v40 = vld [vmem:[%s2784_s0 + $0x100] sm:$0xf]  ;;  %v1978_v45 = vld [vmem:[%s2784_s0 + $0x124] sm:$0xf0]  ;;  %v1625_v11 = vld [vmem:[%s2784_s0 + $0x1a0] sm:$0xf0] }
  0x25   :  { %1289 = vmatpush.bf16.msrb.mxu3 %v2068_v46  ;;  %v1974_v46 = vld [vmem:[%s2784_s0 + $0x10c] sm:$0xf]  ;;  %v1994_v13 = vld [vmem:[%s2784_s0 + $0x1a4] sm:$0xf0] }
  0x26   :  { %1143 = vmatpush.bf16.msrb.mxu0 %v2043_v49  ;;  %v1564_v49 = vor.u32 %v1973_v42, %v1561_v43  ;;  %v1990_v14 = vld [vmem:[%s2784_s0 + $0x18c] sm:$0xf]  ;;  %v1663_v24 = vld [vmem:[%s2784_s0 + $0x1c8] sm:$0xf] }
  0x27   :  { %1192 = vmatpush.bf16.msrb.mxu1 %v2051_v51  ;;  %v1572_v51 = vor.u32 %v1974_v46, %v1569_v47  ;;  %v1633_v15 = vld [vmem:[%s2784_s0 + $0x1a8] sm:$0xf0]  ;;  %v2002_v25 = vld [vmem:[%s2784_s0 + $0x1e4] sm:$0xf0] }
  0x28   :  { %1241 = vmatpush.bf16.msrb.mxu2 %v2059_v48  ;;  %v1560_v48 = vor.u32 %v1977_v41, %v1559_v40  ;;  %v1998_v26 = vld [vmem:[%s2784_s0 + $0x1cc] sm:$0xf]  ;;  %v1664_v30 = vor.u32 %v2002_v25, %v1663_v24 }
  0x29   :  { %1290 = vmatpush.bf16.msrb.mxu3 %v2067_v50  ;;  %v1568_v50 = vor.u32 %v1978_v45, %v1567_v44  ;;  %v1665_v27 = vld [vmem:[%s2784_s0 + $0x1e8] sm:$0xf0] }
  0x2a   :  { %1144 = vmatpush.bf16.msrb.mxu0 %v2042_v53  ;;  %v2038_v53 = vld [vmem:[%s2783_s1 + $0x108] sm:$0xff]  ;;  %v1668_v31 = vor.u32 %v1998_v26, %v1665_v27 }
  0x2b   :  { %1193 = vmatpush.bf16.msrb.mxu1 %v2050_v55  ;;  %v2046_v55 = vld [vmem:[%s2783_s1 + $0x148] sm:$0xff] }
  0x2c   :  { %1242 = vmatpush.bf16.msrb.mxu2 %v2058_v52  ;;  %v2054_v52 = vld [vmem:[%s2783_s1 + $0x188] sm:$0xff] }
  0x2d   :  { %1291 = vmatpush.bf16.msrb.mxu3 %v2066_v54  ;;  %v2062_v54 = vld [vmem:[%s2783_s1 + $0x1c8] sm:$0xff] }
  0x2e   :  { %1145 = vmatpush.bf16.msrb.mxu0 %v2041_v5  ;;  %v2037_v5 = vld [vmem:[%s2783_s1 + $0x100] sm:$0xff] }
  0x2f   :  { %1194 = vmatpush.bf16.msrb.mxu1 %v2049_v7  ;;  %v2045_v7 = vld [vmem:[%s2783_s1 + $0x140] sm:$0xff] }
  0x30   :  { %1243 = vmatpush.bf16.msrb.mxu2 %v2057_v4  ;;  %v2053_v4 = vld [vmem:[%s2783_s1 + $0x180] sm:$0xff] }
  0x31   :  { %959 = vmatmul.bf16.gmra.mxu0 %v1464_v0  ;;  %1292 = vmatpush.bf16.msrb.mxu3 %v2065_v6  ;;  %v1592_v0 = vor.u32 %v1985_v57, %v1591_v56  ;;  %v2061_v6 = vld [vmem:[%s2783_s1 + $0x1c0] sm:$0xff]  ;;  %v1951_v56 = vld [vmem:[%s2784_s0 + $0x54] sm:$0xf] }
  0x32   :  { %1008 = vmatmul.bf16.gmra.mxu1 %v1468_v1  ;;  %1146 = vmatpush.bf16.msrb.mxu0 %v2040_v21  ;;  %v1596_v1 = vor.u32 %v1981_v58, %v1593_v59  ;;  %v2001_v21 = vld [vmem:[%s2784_s0 + $0x1dc] sm:$0xf0]  ;;  %v1481_v57 = vld [vmem:[%s2784_s0 + $0x70] sm:$0xf0]  ;;  %v1487_v58 = vld [vmem:[%s2784_s0 + $0x58] sm:$0xf] }
  0x33   :  { %1057 = vmatmul.bf16.gmra.mxu2 %v1472_v2  ;;  %1195 = vmatpush.bf16.msrb.mxu1 %v2048_v23  ;;  %v1600_v2 = vor.u32 %v1986_v61, %v1599_v60  ;;  %v1657_v23 = vld [vmem:[%s2784_s0 + $0x1e0] sm:$0xf0]  ;;  %v1956_v59 = vld [vmem:[%s2784_s0 + $0x74] sm:$0xf0]  ;;  %v1952_v60 = vld [vmem:[%s2784_s0 + $0x5c] sm:$0xf] }
  0x34   :  { %1106 = vmatmul.bf16.gmra.mxu3 %v1476_v3  ;;  %1244 = vmatpush.bf16.msrb.mxu2 %v2056_v20  ;;  %v1604_v3 = vor.u32 %v1982_v62, %v1601_v63  ;;  %v1655_v20 = vld [vmem:[%s2784_s0 + $0x1c0] sm:$0xf]  ;;  %v1489_v61 = vld [vmem:[%s2784_s0 + $0x78] sm:$0xf0] }
  0x35   :  { %1293 = vmatpush.bf16.msrb.mxu3 %v2064_v22  ;;  %v1997_v22 = vld [vmem:[%s2784_s0 + $0x1c4] sm:$0xf]  ;;  %v1656_v28 = vor.u32 %v2001_v21, %v1655_v20  ;;  %v1519_v20 = vld [vmem:[%s2784_s0 + $0x98] sm:$0xf] }
  0x36   :  { %1147 = vmatpush.bf16.msrb.mxu0 %v2039_v37  ;;  %v1660_v29 = vor.u32 %v1997_v22, %v1657_v23  ;;  %v1948_v37 = vld [vmem:[%s2784_s0 + $0x34] sm:$0xf0]  ;;  %v1960_v22 = vld [vmem:[%s2784_s0 + $0x9c] sm:$0xf] }
  0x37   :  { %1196 = vmatpush.bf16.msrb.mxu1 %v2047_v39  ;;  %v1457_v39 = vld [vmem:[%s2784_s0 + $0x38] sm:$0xf0]  ;;  %v1964_v21 = vld [vmem:[%s2784_s0 + $0xb4] sm:$0xf0] }
  0x38   :  { %1245 = vmatpush.bf16.msrb.mxu2 %v2055_v36  ;;  %v1455_v36 = vld [vmem:[%s2784_s0 + $0x18] sm:$0xf]  ;;  %v1521_v23 = vld [vmem:[%s2784_s0 + $0xb8] sm:$0xf0] }
  0x39   :  { %1294 = vmatpush.bf16.msrb.mxu3 %v2063_v38  ;;  %v1944_v38 = vld [vmem:[%s2784_s0 + $0x1c] sm:$0xf]  ;;  %v1456_v44 = vor.u32 %v1948_v37, %v1455_v36 }
  0x3a   :  { %1148 = vmatpush.bf16.msrb.mxu0 %v2038_v53  ;;  %v1460_v45 = vor.u32 %v1944_v38, %v1457_v39 }
  0x3b   :  { %1197 = vmatpush.bf16.msrb.mxu1 %v2046_v55  ;;  %v1955_v55 = vld [vmem:[%s2784_s0 + $0x6c] sm:$0xf0] }
  0x3c   :  { %1246 = vmatpush.bf16.msrb.mxu2 %v2054_v52 }
  0x3d   :  { %1295 = vmatpush.bf16.msrb.mxu3 %v2062_v54  ;;  %v1479_v54 = vld [vmem:[%s2784_s0 + $0x50] sm:$0xf] }
  0x3e   :  { %1149 = vmatpush.bf16.msrb.mxu0 %v2037_v5  ;;  %v1488_v5 = vor.u32 %v1956_v59, %v1487_v58 }
  0x3f   :  { %1198 = vmatpush.bf16.msrb.mxu1 %v2045_v7 }
  0x40   :  { %1247 = vmatpush.bf16.msrb.mxu2 %v2053_v4 }
  0x41   :  { %964 = vmatmul.bf16.gmra.mxu0 %v1496_v16  ;;  %1296 = vmatpush.bf16.msrb.mxu3 %v2061_v6  ;;  %v1624_v16 = vor.u32 %v1993_v9, %v1623_v8  ;;  %v1492_v6 = vor.u32 %v1952_v60, %v1489_v61 }
  0x42   :  { %1013 = vmatmul.bf16.gmra.mxu1 %v1500_v17  ;;  %v1628_v17 = vor.u32 %v1989_v10, %v1625_v11 }
  0x43   :  { %1062 = vmatmul.bf16.gmra.mxu2 %v1504_v18  ;;  %v1632_v18 = vor.u32 %v1994_v13, %v1631_v12 }
  0x44   :  { %1111 = vmatmul.bf16.gmra.mxu3 %v1508_v19  ;;  %v1636_v19 = vor.u32 %v1990_v14, %v1633_v15 }
  0x51   :  { %969 = vmatmul.bf16.gmra.mxu0 %v1528_v32  ;;  %v1447_v32 = vld [vmem:[%s2784_s0 + $0x10] sm:$0xf] }
  0x52   :  { %1018 = vmatmul.bf16.gmra.mxu1 %v1532_v33  ;;  %v1947_v33 = vld [vmem:[%s2784_s0 + $0x2c] sm:$0xf0] }
  0x53   :  { %1067 = vmatmul.bf16.gmra.mxu2 %v1536_v34  ;;  %v1943_v34 = vld [vmem:[%s2784_s0 + $0x14] sm:$0xf]  ;;  %v1448_v40 = vor.u32 %v1947_v33, %v1447_v32  ;;  %v1524_v32 = vor.u32 %v1960_v22, %v1521_v23 }
  0x54   :  { %1116 = vmatmul.bf16.gmra.mxu3 %v1540_v35  ;;  %v1449_v35 = vld [vmem:[%s2784_s0 + $0x30] sm:$0xf0] }
  0x55   :  { %v1452_v41 = vor.u32 %v1943_v34, %v1449_v35 }
  0x61   :  { %974 = vmatmul.bf16.gmra.mxu0 %v1560_v48 }
  0x62   :  { %1023 = vmatmul.bf16.gmra.mxu1 %v1564_v49 }
  0x63   :  { %1072 = vmatmul.bf16.gmra.mxu2 %v1568_v50 }
  0x64   :  { %1121 = vmatmul.bf16.gmra.mxu3 %v1572_v51 }
  0x71   :  { %979 = vmatmul.bf16.gmra.mxu0 %v1592_v0  ;;  %v1480_v0 = vor.u32 %v1955_v55, %v1479_v54 }
  0x72   :  { %1028 = vmatmul.bf16.gmra.mxu1 %v1596_v1  ;;  %v1484_v1 = vor.u32 %v1951_v56, %v1481_v57 }
  0x73   :  { %1077 = vmatmul.bf16.gmra.mxu2 %v1600_v2 }
  0x74   :  { %1126 = vmatmul.bf16.gmra.mxu3 %v1604_v3 }
  0x81   :  { %984 = vmatmul.bf16.gmra.mxu0 %v1624_v16  ;;  %v1511_v16 = vld [vmem:[%s2784_s0 + $0x90] sm:$0xf] }
  0x82   :  { %1033 = vmatmul.bf16.gmra.mxu1 %v1628_v17  ;;  %v1963_v17 = vld [vmem:[%s2784_s0 + $0xac] sm:$0xf0] }
  0x83   :  { %1082 = vmatmul.bf16.gmra.mxu2 %v1632_v18  ;;  %v1959_v18 = vld [vmem:[%s2784_s0 + $0x94] sm:$0xf]  ;;  %v1512_v26 = vor.u32 %v1963_v17, %v1511_v16 }
  0x84   :  { %1131 = vmatmul.bf16.gmra.mxu3 %v1636_v19  ;;  %v1513_v19 = vld [vmem:[%s2784_s0 + $0xb0] sm:$0xf0] }
  0x85   :  { %v1516_v27 = vor.u32 %v1959_v18, %v1513_v19 }
  0x91   :  { %989 = vmatmul.bf16.gmra.mxu0 %v1656_v28 }
  0x92   :  { %1038 = vmatmul.bf16.gmra.mxu1 %v1660_v29 }
  0x93   :  { %1087 = vmatmul.bf16.gmra.mxu2 %v1664_v30 }
  0x94   :  { %1136 = vmatmul.bf16.gmra.mxu3 %v1668_v31  ;;  %v1520_v31 = vor.u32 %v1964_v21, %v1519_v20 }
  0x9e   :  { %v955_v42 = vpop.f32.mrf.mxu0 }
  0x9f   :  { %v1004_v43 = vpop.f32.mrf.mxu1 }
  0xa0   :  { %v1005_v46 = vadd.f32 %v1004_v43, %v955_v42  ;;  %v1543_v42 = vld [vmem:[%s2784_s0 + $0xd0] sm:$0xf] }
  0xa1   :  { %1150 = vmatmul.bf16.vlgmr.msrb.gmra.mxu0 %v1448_v40  ;;  %v1971_v43 = vld [vmem:[%s2784_s0 + $0xec] sm:$0xf0] }
  0xa2   :  { %1199 = vmatmul.bf16.vlgmr.msrb.gmra.mxu1 %v1452_v41 }
  0xa3   :  { %1248 = vmatmul.bf16.vlgmr.msrb.gmra.mxu2 %v1456_v44  ;;  %v1967_v44 = vld [vmem:[%s2784_s0 + $0xd4] sm:$0xf] }
  0xa4   :  { %1297 = vmatmul.bf16.vlgmr.msrb.gmra.mxu3 %v1460_v45  ;;  %v1545_v45 = vld [vmem:[%s2784_s0 + $0xf0] sm:$0xf0] }
  0xa5   :  { %v1548_v54 = vor.u32 %v1967_v44, %v1545_v45 }
  0xa6   :  { %v1053_v47 = vpop.f32.mrf.mxu2  ;;  %v957_v50 = vpop.f32.mrf.mxu0 }
  0xa7   :  { %v1102_v48 = vpop.f32.mrf.mxu3  ;;  %v1054_v49 = vadd.f32 %v1053_v47, %v1005_v46  ;;  %v1006_v51 = vpop.f32.mrf.mxu1  ;;  %v1551_v46 = vld [vmem:[%s2784_s0 + $0xd8] sm:$0xf] }
  0xa8   :  { %v1007_v52 = vadd.f32 %v1006_v51, %v957_v50  ;;  %v1972_v47 = vld [vmem:[%s2784_s0 + $0xf4] sm:$0xf0] }
  0xa9   :  { %v2498_v53 = vadd.f32 %v1102_v48, %v1054_v49  ;;  %v1968_v48 = vld [vmem:[%s2784_s0 + $0xdc] sm:$0xf]  ;;  %v1552_v58 = vor.u32 %v1972_v47, %v1551_v46 }
  0xaa   :  { %v1553_v49 = vld [vmem:[%s2784_s0 + $0xf8] sm:$0xf0] }
  0xab   :  { %v1556_v59 = vor.u32 %v1968_v48, %v1553_v49 }
  0xae   :  { %v1055_v62 = vpop.f32.mrf.mxu2  ;;  %v960_v3 = vpop.f32.mrf.mxu0 }
  0xaf   :  { %v1104_v63 = vpop.f32.mrf.mxu3  ;;  %v1056_v2 = vadd.f32 %v1055_v62, %v1007_v52  ;;  %v1009_v4 = vpop.f32.mrf.mxu1  ;;  %v1544_v52 = vor.u32 %v1971_v43, %v1543_v42  ;;  %v1617_v42 = vld [vmem:[%s2784_s0 + $0x178] sm:$0xf0] }
  0xb0   :  { %v1010_v7 = vadd.f32 %v1009_v4, %v960_v3 }
  0xb1   :  { %v2524_v8 = vadd.f32 %v1104_v63, %v1056_v2  ;;  %1155 = vmatmul.bf16.gmra.mxu0 %v1480_v0 }
  0xb2   :  { %1204 = vmatmul.bf16.gmra.mxu1 %v1484_v1 }
  0xb3   :  { %1253 = vmatmul.bf16.gmra.mxu2 %v1488_v5  ;;  %v1575_v5 = vld [vmem:[%s2784_s0 + $0x110] sm:$0xf] }
  0xb4   :  { %1302 = vmatmul.bf16.gmra.mxu3 %v1492_v6  ;;  %v1979_v6 = vld [vmem:[%s2784_s0 + $0x12c] sm:$0xf0] }
  0xb5   :  { %v1576_v17 = vor.u32 %v1979_v6, %v1575_v5  ;;  %v1996_v5 = vld [vmem:[%s2784_s0 + $0x1b4] sm:$0xf0]  ;;  %v1992_v6 = vld [vmem:[%s2784_s0 + $0x19c] sm:$0xf] }
  0xb6   :  { %v1058_v9 = vpop.f32.mrf.mxu2  ;;  %v962_v12 = vpop.f32.mrf.mxu0 }
  0xb7   :  { %v1107_v10 = vpop.f32.mrf.mxu3  ;;  %v1059_v11 = vadd.f32 %v1058_v9, %v1010_v7  ;;  %v1011_v13 = vpop.f32.mrf.mxu1  ;;  %v1975_v7 = vld [vmem:[%s2784_s0 + $0x114] sm:$0xf] }
  0xb8   :  { %v1012_v14 = vadd.f32 %v1011_v13, %v962_v12  ;;  %v1577_v9 = vld [vmem:[%s2784_s0 + $0x130] sm:$0xf0]  ;;  %v1976_v12 = vld [vmem:[%s2784_s0 + $0x11c] sm:$0xf] }
  0xb9   :  { %v2526_v15 = vadd.f32 %v1107_v10, %v1059_v11  ;;  %v1583_v10 = vld [vmem:[%s2784_s0 + $0x118] sm:$0xf]  ;;  %v1585_v13 = vld [vmem:[%s2784_s0 + $0x138] sm:$0xf0]  ;;  %v1580_v18 = vor.u32 %v1975_v7, %v1577_v9 }
  0xba   :  { %v1980_v11 = vld [vmem:[%s2784_s0 + $0x134] sm:$0xf0]  ;;  %v1588_v23 = vor.u32 %v1976_v12, %v1585_v13  ;;  %v1649_v7 = vld [vmem:[%s2784_s0 + $0x1b8] sm:$0xf0] }
  0xbb   :  { %v1584_v22 = vor.u32 %v1980_v11, %v1583_v10 }
  0xbe   :  { %v1060_v24 = vpop.f32.mrf.mxu2  ;;  %v965_v29 = vpop.f32.mrf.mxu0 }
  0xbf   :  { %v1109_v25 = vpop.f32.mrf.mxu3  ;;  %v1061_v28 = vadd.f32 %v1060_v24, %v1012_v14  ;;  %v1014_v30 = vpop.f32.mrf.mxu1 }
  0xc0   :  { %v1015_v33 = vadd.f32 %v1014_v30, %v965_v29 }
  0xc1   :  { %v2552_v34 = vadd.f32 %v1109_v25, %v1061_v28  ;;  %1160 = vmatmul.bf16.gmra.mxu0 %v1512_v26 }
  0xc2   :  { %1209 = vmatmul.bf16.gmra.mxu1 %v1516_v27 }
  0xc3   :  { %1258 = vmatmul.bf16.gmra.mxu2 %v1520_v31 }
  0xc4   :  { %1307 = vmatmul.bf16.gmra.mxu3 %v1524_v32 }
  0xc6   :  { %v1063_v35 = vpop.f32.mrf.mxu2  ;;  %v967_v38 = vpop.f32.mrf.mxu0 }
  0xc7   :  { %v1112_v36 = vpop.f32.mrf.mxu3  ;;  %v1064_v37 = vadd.f32 %v1063_v35, %v1015_v33  ;;  %v1016_v39 = vpop.f32.mrf.mxu1  ;;  %v1607_v33 = vld [vmem:[%s2784_s0 + $0x150] sm:$0xf] }
  0xc8   :  { %v1017_v40 = vadd.f32 %v1016_v39, %v967_v38  ;;  %v1987_v35 = vld [vmem:[%s2784_s0 + $0x16c] sm:$0xf0]  ;;  %v1615_v38 = vld [vmem:[%s2784_s0 + $0x158] sm:$0xf] }
  0xc9   :  { %v2554_v41 = vadd.f32 %v1112_v36, %v1064_v37  ;;  %v1983_v36 = vld [vmem:[%s2784_s0 + $0x154] sm:$0xf]  ;;  %v1988_v39 = vld [vmem:[%s2784_s0 + $0x174] sm:$0xf0]  ;;  %v1608_v45 = vor.u32 %v1987_v35, %v1607_v33 }
  0xca   :  { %v1609_v37 = vld [vmem:[%s2784_s0 + $0x170] sm:$0xf0]  ;;  %v1679_v35 = vld [vmem:[%s2784_s0 + $0x1d8] sm:$0xf] }
  0xcb   :  { %v1612_v46 = vor.u32 %v1983_v36, %v1609_v37  ;;  %v1673_v33 = vld [vmem:[%s2784_s0 + $0x1f0] sm:$0xf0]  ;;  %v2004_v36 = vld [vmem:[%s2784_s0 + $0x1f4] sm:$0xf0]  ;;  %v2000_v37 = vld [vmem:[%s2784_s0 + $0x1dc] sm:$0xf] }
  0xce   :  { %v1065_v50 = vpop.f32.mrf.mxu2  ;;  %v970_v56 = vpop.f32.mrf.mxu0 }
  0xcf   :  { %v1114_v51 = vpop.f32.mrf.mxu3  ;;  %v1066_v55 = vadd.f32 %v1065_v50, %v1017_v40  ;;  %v1019_v57 = vpop.f32.mrf.mxu1  ;;  %v1984_v40 = vld [vmem:[%s2784_s0 + $0x15c] sm:$0xf]  ;;  %v1616_v50 = vor.u32 %v1988_v39, %v1615_v38 }
  0xd0   :  { %v1020_v60 = vadd.f32 %v1019_v57, %v970_v56  ;;  %v1681_v38 = vld [vmem:[%s2784_s0 + $0x1f8] sm:$0xf0] }
  0xd1   :  { %v2580_v61 = vadd.f32 %v1114_v51, %v1066_v55  ;;  %1165 = vmatmul.bf16.gmra.mxu0 %v1544_v52  ;;  %v1620_v51 = vor.u32 %v1984_v40, %v1617_v42 }
  0xd2   :  { %1214 = vmatmul.bf16.gmra.mxu1 %v1548_v54 }
  0xd3   :  { %1263 = vmatmul.bf16.gmra.mxu2 %v1552_v58 }
  0xd4   :  { %1312 = vmatmul.bf16.gmra.mxu3 %v1556_v59 }
  0xd6   :  { %v1068_v62 = vpop.f32.mrf.mxu2  ;;  %v972_v1 = vpop.f32.mrf.mxu0 }
  0xd7   :  { %v1117_v63 = vpop.f32.mrf.mxu3  ;;  %v1069_v0 = vadd.f32 %v1068_v62, %v1020_v60  ;;  %v1021_v2 = vpop.f32.mrf.mxu1 }
  0xd8   :  { %v1022_v3 = vadd.f32 %v1021_v2, %v972_v1  ;;  %v1991_v1 = vld [vmem:[%s2784_s0 + $0x194] sm:$0xf] }
  0xd9   :  { %v2582_v4 = vadd.f32 %v1117_v63, %v1069_v0  ;;  %v1639_v63 = vld [vmem:[%s2784_s0 + $0x190] sm:$0xf]  ;;  %v1641_v2 = vld [vmem:[%s2784_s0 + $0x1b0] sm:$0xf0] }
  0xda   :  { %v1995_v0 = vld [vmem:[%s2784_s0 + $0x1ac] sm:$0xf0]  ;;  %v1644_v12 = vor.u32 %v1991_v1, %v1641_v2 }
  0xdb   :  { %v1640_v11 = vor.u32 %v1995_v0, %v1639_v63 }
  0xde   :  { %v1070_v14 = vpop.f32.mrf.mxu2  ;;  %v975_v20 = vpop.f32.mrf.mxu0 }
  0xdf   :  { %v1119_v16 = vpop.f32.mrf.mxu3  ;;  %v1071_v19 = vadd.f32 %v1070_v14, %v1022_v3  ;;  %v1024_v21 = vpop.f32.mrf.mxu1  ;;  %v1647_v3 = vld [vmem:[%s2784_s0 + $0x198] sm:$0xf] }
  0xe0   :  { %v1025_v24 = vadd.f32 %v1024_v21, %v975_v20 }
  0xe1   :  { %v2608_v25 = vadd.f32 %v1119_v16, %v1071_v19  ;;  %1170 = vmatmul.bf16.gmra.mxu0 %v1576_v17  ;;  %v1648_v17 = vor.u32 %v1996_v5, %v1647_v3 }
  0xe2   :  { %1219 = vmatmul.bf16.gmra.mxu1 %v1580_v18  ;;  %v1652_v18 = vor.u32 %v1992_v6, %v1649_v7 }
  0xe3   :  { %1268 = vmatmul.bf16.gmra.mxu2 %v1584_v22 }
  0xe4   :  { %1317 = vmatmul.bf16.gmra.mxu3 %v1588_v23 }
  0xe6   :  { %v1073_v26 = vpop.f32.mrf.mxu2  ;;  %v977_v29 = vpop.f32.mrf.mxu0 }
  0xe7   :  { %v1122_v27 = vpop.f32.mrf.mxu3  ;;  %v1074_v28 = vadd.f32 %v1073_v26, %v1025_v24  ;;  %v1026_v30 = vpop.f32.mrf.mxu1 }
  0xe8   :  { %v1027_v31 = vadd.f32 %v1026_v30, %v977_v29  ;;  %v1671_v29 = vld [vmem:[%s2784_s0 + $0x1d0] sm:$0xf] }
  0xe9   :  { %v2610_v32 = vadd.f32 %v1122_v27, %v1074_v28  ;;  %v2003_v30 = vld [vmem:[%s2784_s0 + $0x1ec] sm:$0xf0] }
  0xea   :  { %v1672_v42 = vor.u32 %v2003_v30, %v1671_v29 }
  0xee   :  { %v1075_v43 = vpop.f32.mrf.mxu2  ;;  %v980_v48 = vpop.f32.mrf.mxu0 }
  0xef   :  { %v1124_v44 = vpop.f32.mrf.mxu3  ;;  %v1076_v47 = vadd.f32 %v1075_v43, %v1027_v31  ;;  %v1029_v49 = vpop.f32.mrf.mxu1  ;;  %v1999_v31 = vld [vmem:[%s2784_s0 + $0x1d4] sm:$0xf] }
  0xf0   :  { %v1030_v52 = vadd.f32 %v1029_v49, %v980_v48  ;;  %v1676_v43 = vor.u32 %v1999_v31, %v1673_v33  ;;  %v1684_v48 = vor.u32 %v2000_v37, %v1681_v38 }
  0xf1   :  { %v2636_v54 = vadd.f32 %v1124_v44, %v1076_v47  ;;  %1175 = vmatmul.bf16.gmra.mxu0 %v1608_v45  ;;  %v1680_v47 = vor.u32 %v2004_v36, %v1679_v35 }
  0xf2   :  { %1224 = vmatmul.bf16.gmra.mxu1 %v1612_v46 }
  0xf3   :  { %1273 = vmatmul.bf16.gmra.mxu2 %v1616_v50 }
  0xf4   :  { %1322 = vmatmul.bf16.gmra.mxu3 %v1620_v51 }
  0xf6   :  { %v1078_v55 = vpop.f32.mrf.mxu2  ;;  %v982_v58 = vpop.f32.mrf.mxu0 }
  0xf7   :  { %v1127_v56 = vpop.f32.mrf.mxu3  ;;  %v1079_v57 = vadd.f32 %v1078_v55, %v1030_v52  ;;  %v1031_v59 = vpop.f32.mrf.mxu1 }
  0xf8   :  { %v1032_v60 = vadd.f32 %v1031_v59, %v982_v58 }
  0xf9   :  { %v2638_v62 = vadd.f32 %v1127_v56, %v1079_v57 }
  0xfe   :  { %v1080_v9 = vpop.f32.mrf.mxu2  ;;  %v985_v14 = vpop.f32.mrf.mxu0 }
  0xff   :  { %v1129_v10 = vpop.f32.mrf.mxu3  ;;  %v1081_v13 = vadd.f32 %v1080_v9, %v1032_v60  ;;  %v1034_v16 = vpop.f32.mrf.mxu1 }
 0x100   :  { %v1035_v19 = vadd.f32 %v1034_v16, %v985_v14 }
 0x101   :  { %v2664_v20 = vadd.f32 %v1129_v10, %v1081_v13  ;;  %1180 = vmatmul.bf16.gmra.mxu0 %v1640_v11  ;;  %v2702_v11 = vld [vmem:[%s2785_s2] ss:$0 sm:$0xff] }
 0x102   :  { %1229 = vmatmul.bf16.gmra.mxu1 %v1644_v12 }
 0x103   :  { %1278 = vmatmul.bf16.gmra.mxu2 %v1648_v17 }
 0x104   :  { %1327 = vmatmul.bf16.gmra.mxu3 %v1652_v18 }
 0x106   :  { %v1083_v21 = vpop.f32.mrf.mxu2  ;;  %v987_v24 = vpop.f32.mrf.mxu0 }
 0x107   :  { %v1132_v22 = vpop.f32.mrf.mxu3  ;;  %v1084_v23 = vadd.f32 %v1083_v21, %v1035_v19  ;;  %v1036_v26 = vpop.f32.mrf.mxu1 }
 0x108   :  { %v1037_v27 = vadd.f32 %v1036_v26, %v987_v24 }
 0x109   :  { %v2666_v28 = vadd.f32 %v1132_v22, %v1084_v23 }
 0x10e   :  { %v1085_v39 = vpop.f32.mrf.mxu2  ;;  %v990_v45 = vpop.f32.mrf.mxu0 }
 0x10f   :  { %v1134_v40 = vpop.f32.mrf.mxu3  ;;  %v1086_v44 = vadd.f32 %v1085_v39, %v1037_v27  ;;  %v1039_v46 = vpop.f32.mrf.mxu1 }
 0x110   :  { %v1040_v49 = vadd.f32 %v1039_v46, %v990_v45 }
 0x111   :  { %v2692_v50 = vadd.f32 %v1134_v40, %v1086_v44  ;;  %1185 = vmatmul.bf16.gmra.mxu0 %v1672_v42 }
 0x112   :  { %1234 = vmatmul.bf16.gmra.mxu1 %v1676_v43 }
 0x113   :  { %1283 = vmatmul.bf16.gmra.mxu2 %v1680_v47 }
 0x114   :  { %1332 = vmatmul.bf16.gmra.mxu3 %v1684_v48 }
 0x116   :  { %v1088_v51 = vpop.f32.mrf.mxu2  ;;  %v992_v56 = vpop.f32.mrf.mxu0 }
 0x117   :  { %v1137_v52 = vpop.f32.mrf.mxu3  ;;  %v1089_v55 = vadd.f32 %v1088_v51, %v1040_v49  ;;  %v1041_v57 = vpop.f32.mrf.mxu1 }
 0x118   :  { %v1042_v58 = vadd.f32 %v1041_v57, %v992_v56 }
 0x119   :  { %v2694_v59 = vadd.f32 %v1137_v52, %v1089_v55 }
 0x11e   :  { %v1090_v60 = vpop.f32.mrf.mxu2  ;;  %v1151_v1 = vpop.f32.mrf.mxu0 }
 0x11f   :  { %v1139_v63 = vpop.f32.mrf.mxu3  ;;  %v1091_v0 = vadd.f32 %v1090_v60, %v1042_v58  ;;  %v1200_v2 = vpop.f32.mrf.mxu1  ;;  %v1152_v5 = vadd.f32 %v1151_v1, %v2498_v53 }
 0x121   :  { %v2696_v3 = vadd.f32 %v1139_v63, %v1091_v0  ;;  %v1201_v6 = vadd.f32 %v1200_v2, %v1152_v5 }
 0x126   :  { %v1249_v7 = vpop.f32.mrf.mxu2  ;;  %v1153_v12 = vpop.f32.mrf.mxu0 }
 0x127   :  { %v1298_v9 = vpop.f32.mrf.mxu3  ;;  %v1250_v10 = vadd.f32 %v1249_v7, %v1201_v6  ;;  %v1202_v13 = vpop.f32.mrf.mxu1  ;;  %v1154_v16 = vadd.f32 %v1153_v12, %v2524_v8 }
 0x129   :  { %v1299_v14 = vadd.f32 %v1298_v9, %v1250_v10  ;;  %v1203_v53 = vadd.f32 %v1202_v13, %v1154_v16 }
 0x12b   :  { %v1393_v17 = vadd.f32 %v2702_v11, %v1299_v14 }
 0x12d   :  { %1409 = vst [vmem:[%s2786_s3] sm:$0xff] %v1393_v17 }
 0x12e   :  { %v1251_v18 = vpop.f32.mrf.mxu2  ;;  %v1156_v22 = vpop.f32.mrf.mxu0 }
 0x12f   :  { %v1300_v19 = vpop.f32.mrf.mxu3  ;;  %v1252_v21 = vadd.f32 %v1251_v18, %v1203_v53  ;;  %v1205_v23 = vpop.f32.mrf.mxu1  ;;  %v1157_v26 = vadd.f32 %v1156_v22, %v2526_v15 }
 0x131   :  { %v1301_v24 = vadd.f32 %v1300_v19, %v1252_v21  ;;  %v1206_v8 = vadd.f32 %v1205_v23, %v1157_v26 }
 0x133   :  { %v1394_v27 = vadd.f32 %v2702_v11, %v1301_v24 }
 0x135   :  { %1410 = vst [vmem:[%s2786_s3 + $0x8] sm:$0xff] %v1394_v27 }
 0x136   :  { %v1254_v29 = vpop.f32.mrf.mxu2  ;;  %v1158_v33 = vpop.f32.mrf.mxu0 }
 0x137   :  { %v1303_v30 = vpop.f32.mrf.mxu3  ;;  %v1255_v31 = vadd.f32 %v1254_v29, %v1206_v8  ;;  %v1207_v35 = vpop.f32.mrf.mxu1  ;;  %v1159_v37 = vadd.f32 %v1158_v33, %v2552_v34 }
 0x139   :  { %v1304_v36 = vadd.f32 %v1303_v30, %v1255_v31  ;;  %v1208_v15 = vadd.f32 %v1207_v35, %v1159_v37 }
 0x13b   :  { %v1395_v38 = vadd.f32 %v2702_v11, %v1304_v36 }
 0x13d   :  { %1411 = vst [vmem:[%s2786_s3 + $0x10] sm:$0xff] %v1395_v38 }
 0x13e   :  { %v1256_v39 = vpop.f32.mrf.mxu2  ;;  %v1161_v43 = vpop.f32.mrf.mxu0 }
 0x13f   :  { %v1305_v40 = vpop.f32.mrf.mxu3  ;;  %v1257_v42 = vadd.f32 %v1256_v39, %v1208_v15  ;;  %v1210_v44 = vpop.f32.mrf.mxu1  ;;  %v1162_v46 = vadd.f32 %v1161_v43, %v2554_v41 }
 0x141   :  { %v1306_v45 = vadd.f32 %v1305_v40, %v1257_v42  ;;  %v1211_v34 = vadd.f32 %v1210_v44, %v1162_v46 }
 0x143   :  { %v1396_v47 = vadd.f32 %v2702_v11, %v1306_v45 }
 0x145   :  { %1412 = vst [vmem:[%s2786_s3 + $0x18] sm:$0xff] %v1396_v47 }
 0x146   :  { %v1259_v48 = vpop.f32.mrf.mxu2  ;;  %v1163_v52 = vpop.f32.mrf.mxu0 }
 0x147   :  { %v1308_v49 = vpop.f32.mrf.mxu3  ;;  %v1260_v51 = vadd.f32 %v1259_v48, %v1211_v34  ;;  %v1212_v55 = vpop.f32.mrf.mxu1  ;;  %v1164_v57 = vadd.f32 %v1163_v52, %v2580_v61 }
 0x149   :  { %v1309_v56 = vadd.f32 %v1308_v49, %v1260_v51  ;;  %v1213_v41 = vadd.f32 %v1212_v55, %v1164_v57 }
 0x14b   :  { %v1397_v58 = vadd.f32 %v2702_v11, %v1309_v56 }
 0x14d   :  { %1413 = vst [vmem:[%s2786_s3 + $0x20] sm:$0xff] %v1397_v58 }
 0x14e   :  { %v1261_v60 = vpop.f32.mrf.mxu2  ;;  %v1166_v1 = vpop.f32.mrf.mxu0 }
 0x14f   :  { %v1310_v63 = vpop.f32.mrf.mxu3  ;;  %v1262_v0 = vadd.f32 %v1261_v60, %v1213_v41  ;;  %v1215_v2 = vpop.f32.mrf.mxu1  ;;  %v1167_v6 = vadd.f32 %v1166_v1, %v2582_v4 }
 0x151   :  { %v1311_v5 = vadd.f32 %v1310_v63, %v1262_v0  ;;  %v1216_v61 = vadd.f32 %v1215_v2, %v1167_v6 }
 0x153   :  { %v1398_v7 = vadd.f32 %v2702_v11, %v1311_v5 }
 0x155   :  { %1414 = vst [vmem:[%s2786_s3 + $0x28] sm:$0xff] %v1398_v7 }
 0x156   :  { %v1264_v9 = vpop.f32.mrf.mxu2  ;;  %v1168_v13 = vpop.f32.mrf.mxu0 }
 0x157   :  { %v1313_v10 = vpop.f32.mrf.mxu3  ;;  %v1265_v12 = vadd.f32 %v1264_v9, %v1216_v61  ;;  %v1217_v14 = vpop.f32.mrf.mxu1  ;;  %v1169_v17 = vadd.f32 %v1168_v13, %v2608_v25 }
 0x159   :  { %v1314_v16 = vadd.f32 %v1313_v10, %v1265_v12  ;;  %v1218_v4 = vadd.f32 %v1217_v14, %v1169_v17 }
 0x15b   :  { %v1399_v53 = vadd.f32 %v2702_v11, %v1314_v16 }
 0x15d   :  { %1415 = vst [vmem:[%s2786_s3 + $0x30] sm:$0xff] %v1399_v53 }
 0x15e   :  { %v1266_v18 = vpop.f32.mrf.mxu2  ;;  %v1171_v22 = vpop.f32.mrf.mxu0 }
 0x15f   :  { %v1315_v19 = vpop.f32.mrf.mxu3  ;;  %v1267_v21 = vadd.f32 %v1266_v18, %v1218_v4  ;;  %v1220_v23 = vpop.f32.mrf.mxu1  ;;  %v1172_v26 = vadd.f32 %v1171_v22, %v2610_v32 }
 0x161   :  { %v1316_v24 = vadd.f32 %v1315_v19, %v1267_v21  ;;  %v1221_v25 = vadd.f32 %v1220_v23, %v1172_v26 }
 0x163   :  { %v1400_v27 = vadd.f32 %v2702_v11, %v1316_v24 }
 0x165   :  { %1416 = vst [vmem:[%s2786_s3 + $0x38] sm:$0xff] %v1400_v27 }
 0x166   :  { %v1269_v8 = vpop.f32.mrf.mxu2  ;;  %v1173_v31 = vpop.f32.mrf.mxu0 }
 0x167   :  { %v1318_v29 = vpop.f32.mrf.mxu3  ;;  %v1270_v30 = vadd.f32 %v1269_v8, %v1221_v25  ;;  %v1222_v33 = vpop.f32.mrf.mxu1  ;;  %v1174_v36 = vadd.f32 %v1173_v31, %v2636_v54 }
 0x169   :  { %v1319_v35 = vadd.f32 %v1318_v29, %v1270_v30  ;;  %v1223_v32 = vadd.f32 %v1222_v33, %v1174_v36 }
 0x16b   :  { %v1401_v37 = vadd.f32 %v2702_v11, %v1319_v35 }
 0x16d   :  { %1417 = vst [vmem:[%s2786_s3 + $0x40] sm:$0xff] %v1401_v37 }
 0x16e   :  { %v1271_v38 = vpop.f32.mrf.mxu2  ;;  %v1176_v40 = vpop.f32.mrf.mxu0 }
 0x16f   :  { %v1320_v15 = vpop.f32.mrf.mxu3  ;;  %v1272_v39 = vadd.f32 %v1271_v38, %v1223_v32  ;;  %v1225_v42 = vpop.f32.mrf.mxu1  ;;  %v1177_v44 = vadd.f32 %v1176_v40, %v2638_v62 }
 0x171   :  { %v1321_v43 = vadd.f32 %v1320_v15, %v1272_v39  ;;  %v1226_v54 = vadd.f32 %v1225_v42, %v1177_v44 }
 0x173   :  { %v1402_v45 = vadd.f32 %v2702_v11, %v1321_v43 }
 0x175   :  { %1418 = vst [vmem:[%s2786_s3 + $0x48] sm:$0xff] %v1402_v45 }
 0x176   :  { %v1274_v46 = vpop.f32.mrf.mxu2  ;;  %v1178_v48 = vpop.f32.mrf.mxu0 }
 0x177   :  { %v1323_v47 = vpop.f32.mrf.mxu3  ;;  %v1275_v34 = vadd.f32 %v1274_v46, %v1226_v54  ;;  %v1227_v49 = vpop.f32.mrf.mxu1  ;;  %v1179_v52 = vadd.f32 %v1178_v48, %v2664_v20 }
 0x179   :  { %v1324_v51 = vadd.f32 %v1323_v47, %v1275_v34  ;;  %v1228_v62 = vadd.f32 %v1227_v49, %v1179_v52 }
 0x17b   :  { %v1403_v55 = vadd.f32 %v2702_v11, %v1324_v51 }
 0x17d   :  { %1419 = vst [vmem:[%s2786_s3 + $0x50] sm:$0xff] %v1403_v55 }
 0x17e   :  { %v1276_v56 = vpop.f32.mrf.mxu2  ;;  %v1181_v41 = vpop.f32.mrf.mxu0 }
 0x17f   :  { %v1325_v57 = vpop.f32.mrf.mxu3  ;;  %v1277_v58 = vadd.f32 %v1276_v56, %v1228_v62  ;;  %v1230_v60 = vpop.f32.mrf.mxu1  ;;  %v1182_v0 = vadd.f32 %v1181_v41, %v2666_v28 }
 0x181   :  { %v1326_v63 = vadd.f32 %v1325_v57, %v1277_v58  ;;  %v1231_v20 = vadd.f32 %v1230_v60, %v1182_v0 }
 0x183   :  { %v1404_v1 = vadd.f32 %v2702_v11, %v1326_v63 }
 0x185   :  { %1420 = vst [vmem:[%s2786_s3 + $0x58] sm:$0xff] %v1404_v1 }
 0x186   :  { %v1279_v2 = vpop.f32.mrf.mxu2  ;;  %v1183_v7 = vpop.f32.mrf.mxu0 }
 0x187   :  { %v1328_v5 = vpop.f32.mrf.mxu3  ;;  %v1280_v6 = vadd.f32 %v1279_v2, %v1231_v20  ;;  %v1232_v61 = vpop.f32.mrf.mxu1  ;;  %v1184_v10 = vadd.f32 %v1183_v7, %v2692_v50 }
 0x189   :  { %v1329_v9 = vadd.f32 %v1328_v5, %v1280_v6  ;;  %v1233_v28 = vadd.f32 %v1232_v61, %v1184_v10 }
 0x18b   :  { %v1405_v12 = vadd.f32 %v2702_v11, %v1329_v9 }
 0x18d   :  { %1421 = vst [vmem:[%s2786_s3 + $0x60] sm:$0xff] %v1405_v12 }
 0x18e   :  { %v1281_v13 = vpop.f32.mrf.mxu2  ;;  %v1186_v17 = vpop.f32.mrf.mxu0 }
 0x18f   :  { %v1330_v14 = vpop.f32.mrf.mxu3  ;;  %v1282_v16 = vadd.f32 %v1281_v13, %v1233_v28  ;;  %v1187_v4 = vadd.f32 %v1186_v17, %v2694_v59  ;;  %v1235_v18 = vpop.f32.mrf.mxu1 }
 0x191   :  { %v1331_v53 = vadd.f32 %v1330_v14, %v1282_v16  ;;  %v1236_v50 = vadd.f32 %v1235_v18, %v1187_v4 }
 0x193   :  { %v1406_v19 = vadd.f32 %v2702_v11, %v1331_v53 }
 0x195   :  { %1422 = vst [vmem:[%s2786_s3 + $0x68] sm:$0xff] %v1406_v19 }
 0x196   :  { %v1284_v21 = vpop.f32.mrf.mxu2  ;;  %v1188_v24 = vpop.f32.mrf.mxu0 }
 0x197   :  { %v1333_v22 = vpop.f32.mrf.mxu3  ;;  %v1285_v23 = vadd.f32 %v1284_v21, %v1236_v50  ;;  %v1189_v27 = vadd.f32 %v1188_v24, %v2696_v3  ;;  %v1237_v8 = vpop.f32.mrf.mxu1 }
 0x199   :  { %v1334_v26 = vadd.f32 %v1333_v22, %v1285_v23  ;;  %v1238_v59 = vadd.f32 %v1237_v8, %v1189_v27 }
 0x19b   :  { %v1407_v25 = vadd.f32 %v2702_v11, %v1334_v26 }
 0x19d   :  { %1423 = vst [vmem:[%s2786_s3 + $0x70] sm:$0xff] %v1407_v25 }
 0x19e   :  { %v1286_v29 = vpop.f32.mrf.mxu2 }
 0x19f   :  { %v1287_v30 = vadd.f32 %v1286_v29, %v1238_v59  ;;  %v1335_v31 = vpop.f32.mrf.mxu3 }
 0x1a1   :  { %v1336_v33 = vadd.f32 %v1335_v31, %v1287_v30 }
 0x1a3   :  { %v1408_v35 = vadd.f32 %v2702_v11, %v1336_v33 }
 0x1a5   :  { %1424 = vst [vmem:[%s2786_s3 + $0x78] sm:$0xff] %v1408_v35 }

// kernel: discriminator_forward.12
= control target key start
LH: loop header
LB: loop body
LE: loop exit
PB: predicated region body
PF: predicated region fallthrough
CT: control target
= control target key end

     0   :  { %s496_s6 = smov 0   ;;  %s498_s7 = smov 0   ;;  %s596_s0 = inlined_call_operand.vmem [shape: f32[2,16,256], index: 0, kind: input, shape index: {}]   ;;  %s597_s1 = inlined_call_operand.vmem [shape: bf16[2,16,256], index: 1, kind: output, shape index: {}]  }
   0x1   :  { %s500_s8 = smov 0   ;;  %s502_s9 = smov 0  }
   0x2   :  { %s504_s10 = smov 0   ;;  %s506_s11 = smov 0  }
   0x3   :  { %s508_s12 = smov 0  }
   0x4 LB: > { %s20_s13 = sadd.s32 1, %s475_s10  ;;  %s23_s14 = sadd.s32 1, %s479_s11  ;;  %s483_s12 = sphi %s508_s12, %s11_s12   ;;  %s479_s11 = sphi %s506_s11, %s604_s11   ;;  %s475_s10 = sphi %s504_s10, %s603_s10   ;;  %s471_s9 = sphi %s502_s9, %s602_s9   ;;  %s467_s8 = sphi %s500_s8, %s601_s8   ;;  %s463_s7 = sphi %s498_s7, %s600_s7   ;;  %s459_s6 = sphi %s496_s6, %s599_s6  }
   0x5   : > { %p21_p0 = scmp.ge.s32.totalorder %s20_s13, 2  ;;  %s348_s15 = sadd.s32 4294967295, %s483_s12  }
   0x6   : > { %p39_p1 = scmp.ne.s32.totalorder %s463_s7, %s459_s6  ;;  %p40_p2 = scmp.eq.s32.totalorder %s483_s12, 0 }
   0x7   : > { %s606_s13 = smov (%p21_p0, %s20_s13), 0  ;;  %s608_s14 = smov (!%p21_p0, %s23_s14), %s479_s11 }
   0x8   : > { %p25_p3 = scmp.ge.s32.totalorder %s608_s14, 2  ;;  %p71_p4 = scmp.eq.s32.totalorder %s348_s15, 3 }
   0x9   : > { %s28_s16 = ssub.s32 %s475_s10, %s606_s13  ;;  %p41_p5 = por %p40_p2, %p39_p1 }
   0xa   : > { %s610_s14 = smov (%p25_p3, %s608_s14), 0  ;;  %p544_p6 = por %p71_p4, %p39_p1 }
   0xb   : > { %s27_s18 = ssub.s32 %s479_s11, %s610_s14  ;;  %s32_s20 = sadd.s32 1, %s463_s7 }
   0xc   : > { %s29_s19 = sor.u32 %s28_s16, %s27_s18  ;;  %p351_p8 = scmp.ge.s32.totalorder %s483_s12, 4 }
   0xd   : > { %p30_p7 = scmp.eq.s32.totalorder %s29_s19, 0 }
   0xe   : > { %93 = sbr.rel (%p351_p8) target bundleno = 27 (0x1b), region = 16 }
   0xf   : > { %s552_s21 = scalar_select %p30_p7, %s463_s7, %s32_s20  }
  0x13   : > { %96 = sbr.rel (!%p41_p5) target bundleno = 27 (0x1b), region = 20  ;;  %s98_s22 = sand.u32 (%p41_p5), 1, %s463_s7  }
  0x14   : > { %s353_s23 = sshll.u32 (%p41_p5), %s479_s11, 2  ;;  %s352_s24 = sshll.u32 (%p41_p5), %s98_s22, 4 }
  0x15   : > { %s102_s25 = sadd.s32 (%p41_p5), %s475_s10, %s353_s23  ;;  %s100_s30 = scalar_lea.vmem (%p41_p5), [#allocation2], %s352_s24 }
  0x16   : > { %s354_s26 = sshll.u32 (%p41_p5), %s102_s25, 3 }
  0x17   : > { %s104_s29 = scalar_lea.vmem (%p41_p5), %s596_s0, %s354_s26 }
  0x18   : > { %v135_v0 = vld [vmem:[%s104_s29] sm:$0xff]  ;;  %v137_v1 = vld [vmem:[%s104_s29 + $0x10] sm:$0xff] }
  0x19   : > { %136 = vst [vmem:[%s100_s30] sm:$0xff] %v135_v0 }
  0x1a   : > { %138 = vst [vmem:[%s100_s30 + $0x8] sm:$0xff] %v137_v1 }
  0x1b PF: > { %p355_p9 = scmp.ge.s32.totalorder %s483_s12, 1  ;;  %p143_p10 = scmp.lt.s32.totalorder %s483_s12, 5 }
  0x1d   : > { %p144_p11 = pnand %p355_p9, %p143_p10 }
  0x1e   : > { %s150_s2 = sand.u32 (!%p144_p11), 1, %s459_s6  }
  0x1f   : > { %147 = sbr.rel (%p144_p11) target bundleno = 112 (0x70), region = 58  ;;  %s356_s3 = sshll.u32 (!%p144_p11), %s150_s2, 4 }
  0x20   : > { %s152_s4 = scalar_lea.vmem (!%p144_p11), [#allocation2], %s356_s3  ;;  %s357_s5 = sshll.u32 (!%p144_p11), %s150_s2, 3 }
  0x21   : > { %s167_s15 = scalar_lea.vmem (!%p144_p11), [#allocation3], %s357_s5 }
  0x24   : > { %v485_v2 = vmov 16.0   ;;  %v168_v3 = vld [vmem:[%s152_s4] sm:$0xff]  ;;  %v169_v4 = vld [vmem:[%s152_s4 + $0x8] sm:$0xff]  ;;  %s359_s16 = sshll.u32 (%p544_p6), %s471_s9, 2 }
  0x25   : > { %425 = vrcp.f32 %v485_v2  ;;  %v170_v5 = vadd.f32 %v169_v4, %v168_v3  ;;  %s228_s18 = sadd.s32 (%p544_p6), %s467_s8, %s359_s16 }
  0x26   : > { %s360_s19 = sshll.u32 (%p544_p6), %s228_s18, 2 }
  0x27   : > { %v171_v6 = vrot.slane %v170_v5, 4  ;;  %s230_s22 = scalar_lea.vmem (%p544_p6), %s597_s1, %s360_s19 }
  0x29   : > { %v172_v8 = vadd.f32 %v171_v6, %v170_v5 }
  0x2b   : > { %v426_v7 = vpop.eup %425  ;;  %v173_v10 = vrot.slane %v172_v8, 2 }
  0x2c   : > { %v178_v9 = vmul.f32 16.0, %v426_v7  ;;  %vm182_vm0 = vweird.f32 %v426_v7 }
  0x2d   : > { %v174_v12 = vadd.f32 %v173_v10, %v172_v8 }
  0x2e   : > { %v179_v11 = vsub.f32 1.0, %v178_v9 }
  0x2f   : > { %v175_v14 = vrot.slane %v174_v12, 1 }
  0x30   : > { %v180_v13 = vmul.f32 %v426_v7, %v179_v11 }
  0x31   : > { %v176_v16 = vadd.f32 %v175_v14, %v174_v12 }
  0x32   : > { %v181_v15 = vadd.f32 %v426_v7, %v180_v13 }
  0x34   : > { %v183_v17 = vsel %vm182_vm0, %v426_v7, %v181_v15 }
  0x35   : > { %v184_v18 = vmul.f32 %v183_v17, %v176_v16 }
  0x37   : > { %v185_v19 = vsub.f32 %v168_v3, %v184_v18  ;;  %v186_v20 = vsub.f32 %v169_v4, %v184_v18 }
  0x39   : > { %v187_v21 = vmul.f32 %v185_v19, %v185_v19  ;;  %v188_v22 = vmul.f32 %v186_v20, %v186_v20 }
  0x3b   : > { %v189_v23 = vadd.f32 %v188_v22, %v187_v21 }
  0x3d   : > { %v190_v24 = vrot.slane %v189_v23, 4 }
  0x3f   : > { %v191_v25 = vadd.f32 %v190_v24, %v189_v23 }
  0x41   : > { %v192_v26 = vrot.slane %v191_v25, 2 }
  0x43   : > { %v193_v27 = vadd.f32 %v192_v26, %v191_v25 }
  0x45   : > { %v194_v28 = vrot.slane %v193_v27, 1 }
  0x47   : > { %v195_v29 = vadd.f32 %v194_v28, %v193_v27 }
  0x49   : > { %v196_v30 = vmul.f32 %v195_v29, %v183_v17 }
  0x4b   : > { %v197_v31 = vadd.f32 1e-05, %v196_v30 }
  0x4d   : > { %427 = vrsqrt.f32 %v197_v31  ;;  %vm204_vm1 = vweird.f32 %v197_v31 }
  0x53   : > { %v428_v32 = vpop.eup %427 }
  0x54   : > { %v199_v33 = vmul.f32 %v428_v32, %v197_v31  ;;  %vm205_vm2 = vweird.f32 %v428_v32 }
  0x55   : > { %vm206_vm3 = vmor %vm204_vm1, %vm205_vm2 }
  0x56   : > { %v200_v34 = vmul.f32 %v428_v32, %v199_v33 }
  0x58   : > { %v201_v35 = vmul.f32 0.5, %v200_v34 }
  0x5a   : > { %v202_v36 = vsub.f32 1.5, %v201_v35 }
  0x5c   : > { %v203_v37 = vmul.f32 %v428_v32, %v202_v36 }
  0x5e   : > { %v207_v38 = vsel %vm206_vm3, %v428_v32, %v203_v37 }
  0x5f   : > { %v208_v39 = vmul.f32 %v207_v38, %v185_v19  ;;  %v209_v40 = vmul.f32 %v207_v38, %v186_v20 }
  0x61   : > { %vm210_vm4 = vcmp.gt.f32.partialorder %v208_v39, 0.0  ;;  %vm211_vm5 = vcmp.gt.f32.partialorder %v209_v40, 0.0  ;;  %v212_v41 = vmul.f32 0.2, %v208_v39  ;;  %v213_v42 = vmul.f32 0.2, %v209_v40 }
  0x62   : > { %226 = sbr.rel (!%p544_p6) target bundleno = 112 (0x70), region = 66 }
  0x63   : > { %v214_v43 = vsel %vm210_vm4, %v208_v39, %v212_v41  ;;  %v215_v44 = vsel %vm211_vm5, %v209_v40, %v213_v42 }
  0x64   : > { %v366_v45 = vpack.c.bf16 %v215_v44, %v214_v43 }
  0x66   : > { %367 = vst [vmem:[%s167_s15] sm:$0xff] %v366_v45  }
  0x6d   : > { %v247_v46 = vld [vmem:[%s167_s15] sm:$0xf]  ;;  %v249_v47 = vld [vmem:[%s167_s15 + $0x4] sm:$0xf] }
  0x6e   : > { %248 = vst [vmem:[%s230_s22] sm:$0xf] %v247_v46 }
  0x6f   : > { %250 = vst [vmem:[%s230_s22 + $0x8] sm:$0xf] %v249_v47 }
  0x70 PF: > { %s11_s12 = sadd.s32 1, %s483_s12   ;;  %s599_s6 = smov %s463_s7 }
  0x71   : > { %p8_p12 = scmp.ge.s32.totalorder %s11_s12, 6   ;;  %s600_s7 = smov %s552_s21 }
  0x72   : > { %s601_s8 = smov %s475_s10  ;;  %s602_s9 = smov %s479_s11 }
  0x73   : > { %s603_s10 = smov %s606_s13  ;;  %s604_s11 = smov %s610_s14 }
  0x74   :  { %10 = sbr.rel (!%p8_p12) target bundleno = 4 (0x4), region = 138 }

// kernel: discriminator_forward.11
= control target key start
LH: loop header
LB: loop body
LE: loop exit
PB: predicated region body
PF: predicated region fallthrough
CT: control target
= control target key end

     0   :  { %s5860_s1 = inlined_call_operand.vmem [shape: bf16[2048,256], index: 1, kind: input, shape index: {}]   ;;  %s5861_s0 = inlined_call_operand.vmem [shape: bf16[32,2048], index: 0, kind: input, shape index: {}]   ;;  %s5862_s2 = inlined_call_operand.vmem [shape: f32[1,256], index: 2, kind: input, shape index: {}]   ;;  %s5863_s3 = inlined_call_operand.vmem [shape: f32[32,256], index: 3, kind: output, shape index: {}]  }
   0x1   :  { %v2609_v0 = vld [vmem:[%s5860_s1 + $0x70] sm:$0xf]  ;;  %v3622_v1 = vld [vmem:[%s5860_s1 + $0x74] sm:$0xf0]  ;;  %v2601_v11 = vld [vmem:[%s5860_s1 + $0x60] sm:$0xf] }
   0x2   :  { %v2673_v2 = vld [vmem:[%s5860_s1 + $0xf0] sm:$0xf]  ;;  %v2610_v3 = vor.u32 %v3622_v1, %v2609_v0  ;;  %v3638_v4 = vld [vmem:[%s5860_s1 + $0xf4] sm:$0xf0]  ;;  %v3620_v13 = vld [vmem:[%s5860_s1 + $0x64] sm:$0xf0] }
   0x3   :  { %v2737_v5 = vld [vmem:[%s5860_s1 + $0x170] sm:$0xf]  ;;  %v3654_v6 = vld [vmem:[%s5860_s1 + $0x174] sm:$0xf0]  ;;  %v2674_v7 = vor.u32 %v3638_v4, %v2673_v2  ;;  %v2665_v14 = vld [vmem:[%s5860_s1 + $0xe0] sm:$0xf]  ;;  %v2602_v16 = vor.u32 %v3620_v13, %v2601_v11 }
   0x4   :  { %v2738_v8 = vor.u32 %v3654_v6, %v2737_v5  ;;  %v2801_v9 = vld [vmem:[%s5860_s1 + $0x1f0] sm:$0xf]  ;;  %v3670_v10 = vld [vmem:[%s5860_s1 + $0x1f4] sm:$0xf0]  ;;  %1762 = vmatpush.bf16.msra.mxu0 %v2610_v3  ;;  %v3636_v15 = vld [vmem:[%s5860_s1 + $0xe4] sm:$0xf0] }
   0x5   :  { %v2802_v12 = vor.u32 %v3670_v10, %v2801_v9  ;;  %1781 = vmatpush.bf16.msra.mxu1 %v2674_v7  ;;  %v2666_v17 = vor.u32 %v3636_v15, %v2665_v14  ;;  %v2729_v18 = vld [vmem:[%s5860_s1 + $0x160] sm:$0xf]  ;;  %v3652_v19 = vld [vmem:[%s5860_s1 + $0x164] sm:$0xf0]  ;;  %v2593_v23 = vld [vmem:[%s5860_s1 + $0x50] sm:$0xf] }
   0x6   :  { %1800 = vmatpush.bf16.msra.mxu2 %v2738_v8  ;;  %v2793_v20 = vld [vmem:[%s5860_s1 + $0x1e0] sm:$0xf]  ;;  %v2730_v21 = vor.u32 %v3652_v19, %v2729_v18  ;;  %v3668_v22 = vld [vmem:[%s5860_s1 + $0x1e4] sm:$0xf0]  ;;  %v3618_v24 = vld [vmem:[%s5860_s1 + $0x54] sm:$0xf0] }
   0x7   :  { %1819 = vmatpush.bf16.msra.mxu3 %v2802_v12  ;;  %v2794_v25 = vor.u32 %v3668_v22, %v2793_v20  ;;  %v2657_v26 = vld [vmem:[%s5860_s1 + $0xd0] sm:$0xf]  ;;  %v3634_v27 = vld [vmem:[%s5860_s1 + $0xd4] sm:$0xf0]  ;;  %v2594_v29 = vor.u32 %v3618_v24, %v2593_v23  ;;  %v2585_v35 = vld [vmem:[%s5860_s1 + $0x40] sm:$0xf] }
   0x8   :  { %v2721_v28 = vld [vmem:[%s5860_s1 + $0x150] sm:$0xf]  ;;  %1763 = vmatpush.bf16.msra.mxu0 %v2602_v16  ;;  %v3650_v30 = vld [vmem:[%s5860_s1 + $0x154] sm:$0xf0]  ;;  %v2658_v33 = vor.u32 %v3634_v27, %v2657_v26  ;;  %v3616_v36 = vld [vmem:[%s5860_s1 + $0x44] sm:$0xf0] }
   0x9   :  { %v2785_v31 = vld [vmem:[%s5860_s1 + $0x1d0] sm:$0xf]  ;;  %v3666_v32 = vld [vmem:[%s5860_s1 + $0x1d4] sm:$0xf0]  ;;  %1782 = vmatpush.bf16.msra.mxu1 %v2666_v17  ;;  %v2722_v34 = vor.u32 %v3650_v30, %v2721_v28  ;;  %v2649_v37 = vld [vmem:[%s5860_s1 + $0xc0] sm:$0xf]  ;;  %v2586_v44 = vor.u32 %v3616_v36, %v2585_v35 }
   0xa   :  { %1801 = vmatpush.bf16.msra.mxu2 %v2730_v21  ;;  %v2786_v38 = vor.u32 %v3666_v32, %v2785_v31  ;;  %v3632_v39 = vld [vmem:[%s5860_s1 + $0xc4] sm:$0xf0]  ;;  %v2713_v40 = vld [vmem:[%s5860_s1 + $0x140] sm:$0xf]  ;;  %v2577_v47 = vld [vmem:[%s5860_s1 + $0x30] sm:$0xf] }
   0xb   :  { %1820 = vmatpush.bf16.msra.mxu3 %v2794_v25  ;;  %v3648_v41 = vld [vmem:[%s5860_s1 + $0x144] sm:$0xf0]  ;;  %v2777_v42 = vld [vmem:[%s5860_s1 + $0x1c0] sm:$0xf]  ;;  %v2650_v45 = vor.u32 %v3632_v39, %v2649_v37  ;;  %v3614_v48 = vld [vmem:[%s5860_s1 + $0x34] sm:$0xf0] }
   0xc   :  { %v3664_v43 = vld [vmem:[%s5860_s1 + $0x1c4] sm:$0xf0]  ;;  %1764 = vmatpush.bf16.msra.mxu0 %v2594_v29  ;;  %v2714_v46 = vor.u32 %v3648_v41, %v2713_v40  ;;  %v2641_v49 = vld [vmem:[%s5860_s1 + $0xb0] sm:$0xf]  ;;  %v3630_v51 = vld [vmem:[%s5860_s1 + $0xb4] sm:$0xf0]  ;;  %v2578_v56 = vor.u32 %v3614_v48, %v2577_v47 }
   0xd   :  { %1783 = vmatpush.bf16.msra.mxu1 %v2658_v33  ;;  %v2778_v50 = vor.u32 %v3664_v43, %v2777_v42  ;;  %v2705_v52 = vld [vmem:[%s5860_s1 + $0x130] sm:$0xf]  ;;  %v3646_v53 = vld [vmem:[%s5860_s1 + $0x134] sm:$0xf0]  ;;  %v2642_v57 = vor.u32 %v3630_v51, %v2641_v49  ;;  %v2569_v59 = vld [vmem:[%s5860_s1 + $0x20] sm:$0xf] }
   0xe   :  { %1802 = vmatpush.bf16.msra.mxu2 %v2722_v34  ;;  %v2769_v54 = vld [vmem:[%s5860_s1 + $0x1b0] sm:$0xf]  ;;  %v3662_v55 = vld [vmem:[%s5860_s1 + $0x1b4] sm:$0xf0]  ;;  %v2706_v58 = vor.u32 %v3646_v53, %v2705_v52  ;;  %v3612_v60 = vld [vmem:[%s5860_s1 + $0x24] sm:$0xf0] }
   0xf   :  { %1821 = vmatpush.bf16.msra.mxu3 %v2786_v38  ;;  %v2633_v61 = vld [vmem:[%s5860_s1 + $0xa0] sm:$0xf]  ;;  %v2770_v62 = vor.u32 %v3662_v55, %v2769_v54  ;;  %v3628_v63 = vld [vmem:[%s5860_s1 + $0xa4] sm:$0xf0]  ;;  %v2570_v4 = vor.u32 %v3612_v60, %v2569_v59  ;;  %v2561_v7 = vld [vmem:[%s5860_s1 + $0x10] sm:$0xf] }
  0x10   :  { %1765 = vmatpush.bf16.msra.mxu0 %v2586_v44  ;;  %v2697_v0 = vld [vmem:[%s5860_s1 + $0x120] sm:$0xf]  ;;  %v3644_v1 = vld [vmem:[%s5860_s1 + $0x124] sm:$0xf0]  ;;  %v2634_v5 = vor.u32 %v3628_v63, %v2633_v61  ;;  %v3610_v8 = vld [vmem:[%s5860_s1 + $0x14] sm:$0xf0] }
  0x11   :  { %1784 = vmatpush.bf16.msra.mxu1 %v2650_v45  ;;  %v2761_v2 = vld [vmem:[%s5860_s1 + $0x1a0] sm:$0xf]  ;;  %v3660_v3 = vld [vmem:[%s5860_s1 + $0x1a4] sm:$0xf0]  ;;  %v2698_v6 = vor.u32 %v3644_v1, %v2697_v0  ;;  %v2625_v9 = vld [vmem:[%s5860_s1 + $0x90] sm:$0xf]  ;;  %v2562_v17 = vor.u32 %v3610_v8, %v2561_v7 }
  0x12   :  { %1803 = vmatpush.bf16.msra.mxu2 %v2714_v46  ;;  %v2762_v10 = vor.u32 %v3660_v3, %v2761_v2  ;;  %v3626_v11 = vld [vmem:[%s5860_s1 + $0x94] sm:$0xf0]  ;;  %v2689_v12 = vld [vmem:[%s5860_s1 + $0x110] sm:$0xf]  ;;  %v2553_v16 = vld [vmem:[%s5860_s1] sm:$0xf] }
  0x13   :  { %1822 = vmatpush.bf16.msra.mxu3 %v2778_v50  ;;  %v3642_v13 = vld [vmem:[%s5860_s1 + $0x114] sm:$0xf0]  ;;  %v2753_v14 = vld [vmem:[%s5860_s1 + $0x190] sm:$0xf]  ;;  %v3608_v18 = vld [vmem:[%s5860_s1 + $0x4] sm:$0xf0]  ;;  %v2626_v21 = vor.u32 %v3626_v11, %v2625_v9 }
  0x14   :  { %1766 = vmatpush.bf16.msra.mxu0 %v2578_v56  ;;  %v3658_v15 = vld [vmem:[%s5860_s1 + $0x194] sm:$0xf0]  ;;  %v2617_v19 = vld [vmem:[%s5860_s1 + $0x80] sm:$0xf]  ;;  %v3624_v20 = vld [vmem:[%s5860_s1 + $0x84] sm:$0xf0]  ;;  %v2690_v22 = vor.u32 %v3642_v13, %v2689_v12  ;;  %v2554_v34 = vor.u32 %v3608_v18, %v2553_v16 }
  0x15   :  { %1785 = vmatpush.bf16.msra.mxu1 %v2642_v57  ;;  %v2681_v23 = vld [vmem:[%s5860_s1 + $0x100] sm:$0xf]  ;;  %v3640_v24 = vld [vmem:[%s5860_s1 + $0x104] sm:$0xf0]  ;;  %v2754_v26 = vor.u32 %v3658_v15, %v2753_v14  ;;  %v3575_v30 = vld [vmem:[%s5861_s0 + $0x4] sm:$0xf]  ;;  %v2618_v38 = vor.u32 %v3624_v20, %v2617_v19 }
  0x16   :  { %1804 = vmatpush.bf16.msra.mxu2 %v2706_v58  ;;  %v2745_v25 = vld [vmem:[%s5860_s1 + $0x180] sm:$0xf]  ;;  %v3656_v27 = vld [vmem:[%s5860_s1 + $0x184] sm:$0xf0]  ;;  %v2427_v31 = vld [vmem:[%s5861_s0 + $0x40] sm:$0xf0]  ;;  %v2682_v39 = vor.u32 %v3640_v24, %v2681_v23 }
  0x17   :  { %1823 = vmatpush.bf16.msra.mxu3 %v2770_v62  ;;  %v2425_v28 = vld [vmem:[%s5861_s0] sm:$0xf]  ;;  %v2993_v32 = vld [vmem:[%s5860_s1 + $0x370] sm:$0xf]  ;;  %v3718_v33 = vld [vmem:[%s5860_s1 + $0x374] sm:$0xf0]  ;;  %v2746_v43 = vor.u32 %v3656_v27, %v2745_v25  ;;  %v4131_v53 = vor.u32 %v3575_v30, %v2427_v31 }
  0x18   :  { %1767 = vmatpush.bf16.msra.mxu0 %v2570_v4  ;;  %v3583_v29 = vld [vmem:[%s5861_s0 + $0x3c] sm:$0xf0]  ;;  %v2433_v35 = vld [vmem:[%s5861_s0 + $0x8] sm:$0xf]  ;;  %v2929_v36 = vld [vmem:[%s5860_s1 + $0x2f0] sm:$0xf]  ;;  %v2994_v44 = vor.u32 %v3718_v33, %v2993_v32 }
  0x19   :  { %1786 = vmatpush.bf16.msra.mxu1 %v2634_v5  ;;  %v3702_v37 = vld [vmem:[%s5860_s1 + $0x2f4] sm:$0xf0]  ;;  %v3584_v40 = vld [vmem:[%s5861_s0 + $0x44] sm:$0xf0]  ;;  %v3576_v41 = vld [vmem:[%s5861_s0 + $0xc] sm:$0xf]  ;;  %v4120_v48 = vor.u32 %v3583_v29, %v2425_v28 }
  0x1a   :  { %1805 = vmatpush.bf16.msra.mxu2 %v2698_v6  ;;  %v2435_v42 = vld [vmem:[%s5861_s0 + $0x48] sm:$0xf0]  ;;  %v2865_v45 = vld [vmem:[%s5860_s1 + $0x270] sm:$0xf]  ;;  %v3686_v46 = vld [vmem:[%s5860_s1 + $0x274] sm:$0xf0]  ;;  %v2930_v49 = vor.u32 %v3702_v37, %v2929_v36  ;;  %v4133_v54 = vor.u32 %v3584_v40, %v2433_v35 }
  0x1b   :  { %1824 = vmatpush.bf16.msra.mxu3 %v2762_v10  ;;  %v3057_v47 = vld [vmem:[%s5860_s1 + $0x3f0] sm:$0xf]  ;;  %v3734_v50 = vld [vmem:[%s5860_s1 + $0x3f4] sm:$0xf0]  ;;  %v2985_v51 = vld [vmem:[%s5860_s1 + $0x360] sm:$0xf]  ;;  %v4141_v57 = vor.u32 %v3576_v41, %v2435_v42  ;;  %v2866_v58 = vor.u32 %v3686_v46, %v2865_v45 }
  0x1c   :  { %1768 = vmatpush.bf16.msra.mxu0 %v2562_v17  ;;  %v3716_v52 = vld [vmem:[%s5860_s1 + $0x364] sm:$0xf0]  ;;  %v2921_v55 = vld [vmem:[%s5860_s1 + $0x2e0] sm:$0xf]  ;;  %v3058_v59 = vor.u32 %v3734_v50, %v3057_v47  ;;  %v2977_v2 = vld [vmem:[%s5860_s1 + $0x350] sm:$0xf] }
  0x1d   :  { %1787 = vmatpush.bf16.msra.mxu1 %v2626_v21  ;;  %v3700_v56 = vld [vmem:[%s5860_s1 + $0x2e4] sm:$0xf0]  ;;  %v2986_v60 = vor.u32 %v3716_v52, %v2985_v51  ;;  %v2857_v61 = vld [vmem:[%s5860_s1 + $0x260] sm:$0xf]  ;;  %v3714_v3 = vld [vmem:[%s5860_s1 + $0x354] sm:$0xf0] }
  0x1e   :  { %1806 = vmatpush.bf16.msra.mxu2 %v2690_v22  ;;  %v3684_v62 = vld [vmem:[%s5860_s1 + $0x264] sm:$0xf0]  ;;  %v3049_v63 = vld [vmem:[%s5860_s1 + $0x3e0] sm:$0xf]  ;;  %v2922_v0 = vor.u32 %v3700_v56, %v2921_v55  ;;  %v2913_v4 = vld [vmem:[%s5860_s1 + $0x2d0] sm:$0xf]  ;;  %v2978_v8 = vor.u32 %v3714_v3, %v2977_v2 }
  0x1f   :  { %1825 = vmatpush.bf16.msra.mxu3 %v2754_v26  ;;  %v3732_v1 = vld [vmem:[%s5860_s1 + $0x3e4] sm:$0xf0]  ;;  %v3698_v5 = vld [vmem:[%s5860_s1 + $0x2d4] sm:$0xf0]  ;;  %v2858_v6 = vor.u32 %v3684_v62, %v2857_v61  ;;  %v2849_v9 = vld [vmem:[%s5860_s1 + $0x250] sm:$0xf] }
  0x20   :  { %1769 = vmatpush.bf16.msra.mxu0 %v2554_v34  ;;  %v3050_v7 = vor.u32 %v3732_v1, %v3049_v63  ;;  %v3682_v10 = vld [vmem:[%s5860_s1 + $0x254] sm:$0xf0]  ;;  %v3041_v11 = vld [vmem:[%s5860_s1 + $0x3d0] sm:$0xf]  ;;  %v2914_v12 = vor.u32 %v3698_v5, %v2913_v4  ;;  %v2969_v14 = vld [vmem:[%s5860_s1 + $0x340] sm:$0xf] }
  0x21   :  { %1788 = vmatpush.bf16.msra.mxu1 %v2618_v38  ;;  %v3730_v13 = vld [vmem:[%s5860_s1 + $0x3d4] sm:$0xf0]  ;;  %v3712_v15 = vld [vmem:[%s5860_s1 + $0x344] sm:$0xf0]  ;;  %v2905_v16 = vld [vmem:[%s5860_s1 + $0x2c0] sm:$0xf]  ;;  %v2850_v18 = vor.u32 %v3682_v10, %v2849_v9 }
  0x22   :  { %1807 = vmatpush.bf16.msra.mxu2 %v2682_v39  ;;  %v3696_v17 = vld [vmem:[%s5860_s1 + $0x2c4] sm:$0xf0]  ;;  %v2841_v19 = vld [vmem:[%s5860_s1 + $0x240] sm:$0xf]  ;;  %v3042_v22 = vor.u32 %v3730_v13, %v3041_v11  ;;  %v2970_v23 = vor.u32 %v3712_v15, %v2969_v14  ;;  %v3591_v28 = vld [vmem:[%s5861_s0 + $0x84] sm:$0xf] }
  0x23   :  { %1826 = vmatpush.bf16.msra.mxu3 %v2746_v43  ;;  %1770 = vmatmul.bf16.vlgmr.msra.gmra.mxu0 %v4120_v48  ;;  %v3680_v20 = vld [vmem:[%s5860_s1 + $0x244] sm:$0xf0]  ;;  %v3033_v21 = vld [vmem:[%s5860_s1 + $0x3c0] sm:$0xf]  ;;  %v2906_v27 = vor.u32 %v3696_v17, %v2905_v16  ;;  %v2491_v29 = vld [vmem:[%s5861_s0 + $0xc0] sm:$0xf0] }
  0x24   :  { %1789 = vmatmul.bf16.vlgmr.msra.gmra.mxu1 %v4131_v53  ;;  %1838 = vmatpush.bf16.msrb.mxu0 %v2866_v58  ;;  %v3728_v24 = vld [vmem:[%s5860_s1 + $0x3c4] sm:$0xf0]  ;;  %v2489_v25 = vld [vmem:[%s5861_s0 + $0x80] sm:$0xf]  ;;  %v2961_v30 = vld [vmem:[%s5860_s1 + $0x330] sm:$0xf]  ;;  %v2842_v35 = vor.u32 %v3680_v20, %v2841_v19  ;;  %v4263_v50 = vor.u32 %v3591_v28, %v2491_v29 }
  0x25   :  { %1857 = vmatpush.bf16.msrb.mxu1 %v2930_v49  ;;  %1808 = vmatmul.bf16.vlgmr.msra.gmra.mxu2 %v4133_v54  ;;  %v3599_v26 = vld [vmem:[%s5861_s0 + $0xbc] sm:$0xf0]  ;;  %v3710_v31 = vld [vmem:[%s5860_s1 + $0x334] sm:$0xf0]  ;;  %v2497_v32 = vld [vmem:[%s5861_s0 + $0x88] sm:$0xf]  ;;  %v3034_v39 = vor.u32 %v3728_v24, %v3033_v21 }
  0x26   :  { %1876 = vmatpush.bf16.msrb.mxu2 %v2994_v44  ;;  %1827 = vmatmul.bf16.vlgmr.msra.gmra.mxu3 %v4141_v57  ;;  %v2897_v33 = vld [vmem:[%s5860_s1 + $0x2b0] sm:$0xf]  ;;  %v3694_v34 = vld [vmem:[%s5860_s1 + $0x2b4] sm:$0xf0]  ;;  %v3600_v36 = vld [vmem:[%s5861_s0 + $0xc4] sm:$0xf0]  ;;  %v2962_v40 = vor.u32 %v3710_v31, %v2961_v30  ;;  %v4252_v44 = vor.u32 %v3599_v26, %v2489_v25 }
  0x27   :  { %1895 = vmatpush.bf16.msrb.mxu3 %v3058_v59  ;;  %v3592_v37 = vld [vmem:[%s5861_s0 + $0x8c] sm:$0xf]  ;;  %v2833_v41 = vld [vmem:[%s5860_s1 + $0x230] sm:$0xf]  ;;  %v3678_v42 = vld [vmem:[%s5860_s1 + $0x234] sm:$0xf0]  ;;  %v2898_v45 = vor.u32 %v3694_v34, %v2897_v33  ;;  %v4265_v51 = vor.u32 %v3600_v36, %v2497_v32 }
  0x28   :  { %1839 = vmatpush.bf16.msrb.mxu0 %v2858_v6  ;;  %v2499_v38 = vld [vmem:[%s5861_s0 + $0xc8] sm:$0xf0]  ;;  %v3025_v43 = vld [vmem:[%s5860_s1 + $0x3b0] sm:$0xf]  ;;  %v3726_v46 = vld [vmem:[%s5860_s1 + $0x3b4] sm:$0xf0]  ;;  %v2834_v58 = vor.u32 %v3678_v42, %v2833_v41 }
  0x29   :  { %1858 = vmatpush.bf16.msrb.mxu1 %v2922_v0  ;;  %v2953_v47 = vld [vmem:[%s5860_s1 + $0x320] sm:$0xf]  ;;  %v3708_v49 = vld [vmem:[%s5860_s1 + $0x324] sm:$0xf0]  ;;  %v4273_v56 = vor.u32 %v3592_v37, %v2499_v38  ;;  %v3026_v59 = vor.u32 %v3726_v46, %v3025_v43  ;;  %v2945_v2 = vld [vmem:[%s5860_s1 + $0x310] sm:$0xf] }
  0x2a   :  { %1877 = vmatpush.bf16.msrb.mxu2 %v2986_v60  ;;  %v2889_v52 = vld [vmem:[%s5860_s1 + $0x2a0] sm:$0xf]  ;;  %v3692_v55 = vld [vmem:[%s5860_s1 + $0x2a4] sm:$0xf0]  ;;  %v2954_v60 = vor.u32 %v3708_v49, %v2953_v47  ;;  %v3706_v3 = vld [vmem:[%s5860_s1 + $0x314] sm:$0xf0] }
  0x2b   :  { %1896 = vmatpush.bf16.msrb.mxu3 %v3050_v7  ;;  %v2825_v61 = vld [vmem:[%s5860_s1 + $0x220] sm:$0xf]  ;;  %v3676_v62 = vld [vmem:[%s5860_s1 + $0x224] sm:$0xf0]  ;;  %v2890_v0 = vor.u32 %v3692_v55, %v2889_v52  ;;  %v2881_v4 = vld [vmem:[%s5860_s1 + $0x290] sm:$0xf]  ;;  %v2946_v9 = vor.u32 %v3706_v3, %v2945_v2 }
  0x2c   :  { %1840 = vmatpush.bf16.msrb.mxu0 %v2850_v18  ;;  %v3017_v63 = vld [vmem:[%s5860_s1 + $0x3a0] sm:$0xf]  ;;  %v3724_v1 = vld [vmem:[%s5860_s1 + $0x3a4] sm:$0xf0]  ;;  %v3690_v5 = vld [vmem:[%s5860_s1 + $0x294] sm:$0xf0]  ;;  %v2826_v6 = vor.u32 %v3676_v62, %v2825_v61 }
  0x2d   :  { %1859 = vmatpush.bf16.msrb.mxu1 %v2914_v12  ;;  %v2817_v7 = vld [vmem:[%s5860_s1 + $0x210] sm:$0xf]  ;;  %v3674_v10 = vld [vmem:[%s5860_s1 + $0x214] sm:$0xf0]  ;;  %v2882_v13 = vor.u32 %v3690_v5, %v2881_v4  ;;  %v2937_v14 = vld [vmem:[%s5860_s1 + $0x300] sm:$0xf] }
  0x2e   :  { %1878 = vmatpush.bf16.msrb.mxu2 %v2978_v8  ;;  %v3018_v8 = vor.u32 %v3724_v1, %v3017_v63  ;;  %v3009_v11 = vld [vmem:[%s5860_s1 + $0x390] sm:$0xf]  ;;  %v3722_v12 = vld [vmem:[%s5860_s1 + $0x394] sm:$0xf0]  ;;  %v3704_v15 = vld [vmem:[%s5860_s1 + $0x304] sm:$0xf0]  ;;  %v2818_v20 = vor.u32 %v3674_v10, %v2817_v7 }
  0x2f   :  { %1897 = vmatpush.bf16.msrb.mxu3 %v3042_v22  ;;  %v2873_v16 = vld [vmem:[%s5860_s1 + $0x280] sm:$0xf]  ;;  %v3688_v17 = vld [vmem:[%s5860_s1 + $0x284] sm:$0xf0]  ;;  %v3249_v18 = vld [vmem:[%s5860_s1 + $0x570] sm:$0xf]  ;;  %v3010_v24 = vor.u32 %v3722_v12, %v3009_v11  ;;  %v2938_v25 = vor.u32 %v3704_v15, %v2937_v14 }
  0x30   :  { %1841 = vmatpush.bf16.msrb.mxu0 %v2842_v35  ;;  %v3782_v19 = vld [vmem:[%s5860_s1 + $0x574] sm:$0xf0]  ;;  %v2809_v21 = vld [vmem:[%s5860_s1 + $0x200] sm:$0xf]  ;;  %v3185_v22 = vld [vmem:[%s5860_s1 + $0x4f0] sm:$0xf]  ;;  %v2874_v29 = vor.u32 %v3688_v17, %v2873_v16 }
  0x31   :  { %1860 = vmatpush.bf16.msrb.mxu1 %v2906_v27  ;;  %v3672_v26 = vld [vmem:[%s5860_s1 + $0x204] sm:$0xf0]  ;;  %v3001_v27 = vld [vmem:[%s5860_s1 + $0x380] sm:$0xf]  ;;  %v2441_v30 = vld [vmem:[%s5861_s0 + $0x10] sm:$0xf]  ;;  %v3250_v34 = vor.u32 %v3782_v19, %v3249_v18 }
  0x32   :  { %1879 = vmatpush.bf16.msrb.mxu2 %v2970_v23  ;;  %v3766_v23 = vld [vmem:[%s5860_s1 + $0x4f4] sm:$0xf0]  ;;  %v3720_v28 = vld [vmem:[%s5860_s1 + $0x384] sm:$0xf0]  ;;  %v3585_v31 = vld [vmem:[%s5861_s0 + $0x4c] sm:$0xf0]  ;;  %v2810_v42 = vor.u32 %v3672_v26, %v2809_v21 }
  0x33   :  { %1898 = vmatpush.bf16.msrb.mxu3 %v3034_v39  ;;  %1775 = vmatmul.bf16.gmra.mxu0 %v4252_v44  ;;  %v3577_v32 = vld [vmem:[%s5861_s0 + $0x14] sm:$0xf]  ;;  %v3121_v35 = vld [vmem:[%s5860_s1 + $0x470] sm:$0xf]  ;;  %v3750_v36 = vld [vmem:[%s5860_s1 + $0x474] sm:$0xf0]  ;;  %v3186_v38 = vor.u32 %v3766_v23, %v3185_v22  ;;  %v3002_v47 = vor.u32 %v3720_v28, %v3001_v27 }
  0x34   :  { %1794 = vmatmul.bf16.gmra.mxu1 %v4263_v50  ;;  %1842 = vmatpush.bf16.msrb.mxu0 %v2834_v58  ;;  %v2443_v33 = vld [vmem:[%s5861_s0 + $0x50] sm:$0xf0]  ;;  %v3313_v37 = vld [vmem:[%s5860_s1 + $0x5f0] sm:$0xf]  ;;  %v3798_v39 = vld [vmem:[%s5860_s1 + $0x5f4] sm:$0xf0]  ;;  %v3122_v52 = vor.u32 %v3750_v36, %v3121_v35 }
  0x35   :  { %1861 = vmatpush.bf16.msrb.mxu1 %v2898_v45  ;;  %1813 = vmatmul.bf16.gmra.mxu2 %v4265_v51  ;;  %v3780_v41 = vld [vmem:[%s5860_s1 + $0x564] sm:$0xf0]  ;;  %v2449_v43 = vld [vmem:[%s5861_s0 + $0x18] sm:$0xf]  ;;  %v3578_v46 = vld [vmem:[%s5861_s0 + $0x1c] sm:$0xf]  ;;  %v4410_v1 = vor.u32 %v3577_v32, %v2443_v33 }
  0x36   :  { %1880 = vmatpush.bf16.msrb.mxu2 %v2962_v40  ;;  %1832 = vmatmul.bf16.gmra.mxu3 %v4273_v56  ;;  %v3241_v40 = vld [vmem:[%s5860_s1 + $0x560] sm:$0xf]  ;;  %v3586_v45 = vld [vmem:[%s5861_s0 + $0x54] sm:$0xf0]  ;;  %v2451_v49 = vld [vmem:[%s5861_s0 + $0x58] sm:$0xf0] }
  0x37   :  { %1899 = vmatpush.bf16.msrb.mxu3 %v3026_v59  ;;  %v3113_v55 = vld [vmem:[%s5860_s1 + $0x460] sm:$0xf]  ;;  %v3748_v58 = vld [vmem:[%s5860_s1 + $0x464] sm:$0xf0]  ;;  %v3314_v59 = vor.u32 %v3798_v39, %v3313_v37  ;;  %v3233_v3 = vld [vmem:[%s5860_s1 + $0x550] sm:$0xf]  ;;  %v4421_v5 = vor.u32 %v3586_v45, %v2449_v43 }
  0x38   :  { %1843 = vmatpush.bf16.msrb.mxu0 %v2826_v6  ;;  %v3177_v61 = vld [vmem:[%s5860_s1 + $0x4e0] sm:$0xf]  ;;  %v3764_v62 = vld [vmem:[%s5860_s1 + $0x4e4] sm:$0xf0]  ;;  %v3778_v4 = vld [vmem:[%s5860_s1 + $0x554] sm:$0xf0]  ;;  %v4423_v6 = vor.u32 %v3578_v46, %v2451_v49  ;;  %v3114_v7 = vor.u32 %v3748_v58, %v3113_v55 }
  0x39   :  { %1862 = vmatpush.bf16.msrb.mxu1 %v2890_v0  ;;  %v3305_v63 = vld [vmem:[%s5860_s1 + $0x5e0] sm:$0xf]  ;;  %v4408_v0 = vor.u32 %v3585_v31, %v2441_v30  ;;  %v3796_v2 = vld [vmem:[%s5860_s1 + $0x5e4] sm:$0xf0]  ;;  %v3746_v10 = vld [vmem:[%s5860_s1 + $0x454] sm:$0xf0]  ;;  %v3234_v12 = vor.u32 %v3778_v4, %v3233_v3 }
  0x3a   :  { %1881 = vmatpush.bf16.msrb.mxu2 %v2954_v60  ;;  %v3242_v60 = vor.u32 %v3780_v41, %v3241_v40  ;;  %v3306_v11 = vor.u32 %v3796_v2, %v3305_v63  ;;  %v3762_v14 = vld [vmem:[%s5860_s1 + $0x4d4] sm:$0xf0]  ;;  %v3297_v15 = vld [vmem:[%s5860_s1 + $0x5d0] sm:$0xf]  ;;  %v3225_v17 = vld [vmem:[%s5860_s1 + $0x540] sm:$0xf] }
  0x3b   :  { %1900 = vmatpush.bf16.msrb.mxu3 %v3018_v8  ;;  %v3178_v8 = vor.u32 %v3764_v62, %v3177_v61  ;;  %v3794_v16 = vld [vmem:[%s5860_s1 + $0x5d4] sm:$0xf0]  ;;  %v3776_v18 = vld [vmem:[%s5860_s1 + $0x544] sm:$0xf0]  ;;  %v3097_v21 = vld [vmem:[%s5860_s1 + $0x440] sm:$0xf] }
  0x3c   :  { %1844 = vmatpush.bf16.msrb.mxu0 %v2818_v20  ;;  %v3744_v22 = vld [vmem:[%s5860_s1 + $0x444] sm:$0xf0]  ;;  %v3298_v23 = vor.u32 %v3794_v16, %v3297_v15  ;;  %v3289_v27 = vld [vmem:[%s5860_s1 + $0x5c0] sm:$0xf]  ;;  %v3774_v30 = vld [vmem:[%s5860_s1 + $0x534] sm:$0xf0] }
  0x3d   :  { %1863 = vmatpush.bf16.msrb.mxu1 %v2882_v13  ;;  %v3169_v13 = vld [vmem:[%s5860_s1 + $0x4d0] sm:$0xf]  ;;  %v3760_v26 = vld [vmem:[%s5860_s1 + $0x4c4] sm:$0xf0]  ;;  %v3098_v31 = vor.u32 %v3744_v22, %v3097_v21  ;;  %v2507_v39 = vld [vmem:[%s5861_s0 + $0xd0] sm:$0xf0] }
  0x3e   :  { %1882 = vmatpush.bf16.msrb.mxu2 %v2946_v9  ;;  %v3105_v9 = vld [vmem:[%s5860_s1 + $0x450] sm:$0xf]  ;;  %v3170_v20 = vor.u32 %v3762_v14, %v3169_v13  ;;  %v3792_v28 = vld [vmem:[%s5860_s1 + $0x5c4] sm:$0xf0]  ;;  %v3790_v45 = vld [vmem:[%s5860_s1 + $0x5b4] sm:$0xf0] }
  0x3f   :  { %1901 = vmatpush.bf16.msrb.mxu3 %v3010_v24  ;;  %v3106_v19 = vor.u32 %v3746_v10, %v3105_v9  ;;  %v3226_v24 = vor.u32 %v3776_v18, %v3225_v17  ;;  %v3089_v33 = vld [vmem:[%s5860_s1 + $0x430] sm:$0xf]  ;;  %v3290_v35 = vor.u32 %v3792_v28, %v3289_v27  ;;  %v3209_v46 = vld [vmem:[%s5860_s1 + $0x520] sm:$0xf]  ;;  %v2513_v49 = vld [vmem:[%s5861_s0 + $0x98] sm:$0xf] }
  0x40   :  { %1845 = vmatpush.bf16.msrb.mxu0 %v2810_v42  ;;  %v2505_v36 = vld [vmem:[%s5861_s0 + $0x90] sm:$0xf]  ;;  %v3758_v42 = vld [vmem:[%s5860_s1 + $0x4b4] sm:$0xf0]  ;;  %v3594_v55 = vld [vmem:[%s5861_s0 + $0x9c] sm:$0xf] }
  0x41   :  { %1864 = vmatpush.bf16.msrb.mxu1 %v2874_v29  ;;  %v3217_v29 = vld [vmem:[%s5860_s1 + $0x530] sm:$0xf]  ;;  %v2515_v58 = vld [vmem:[%s5861_s0 + $0xd8] sm:$0xf0]  ;;  %v3081_v61 = vld [vmem:[%s5860_s1 + $0x420] sm:$0xf] }
  0x42   :  { %1883 = vmatpush.bf16.msrb.mxu2 %v2938_v25  ;;  %v3161_v25 = vld [vmem:[%s5860_s1 + $0x4c0] sm:$0xf]  ;;  %v3601_v37 = vld [vmem:[%s5861_s0 + $0xcc] sm:$0xf0]  ;;  %v3218_v40 = vor.u32 %v3774_v30, %v3217_v29  ;;  %v3740_v62 = vld [vmem:[%s5860_s1 + $0x424] sm:$0xf0]  ;;  %v4555_v14 = vor.u32 %v3594_v55, %v2515_v58 }
  0x43   :  { %1902 = vmatpush.bf16.msrb.mxu3 %v3002_v47  ;;  %1846 = vmatmul.bf16.vlgmr.msrb.gmra.mxu0 %v4408_v0  ;;  %v3162_v32 = vor.u32 %v3760_v26, %v3161_v25  ;;  %v3153_v41 = vld [vmem:[%s5860_s1 + $0x4b0] sm:$0xf]  ;;  %v3772_v47 = vld [vmem:[%s5860_s1 + $0x524] sm:$0xf0]  ;;  %v3145_v3 = vld [vmem:[%s5860_s1 + $0x4a0] sm:$0xf]  ;;  %v3082_v15 = vor.u32 %v3740_v62, %v3081_v61 }
  0x44   :  { %1914 = vmatpush.bf16.msra.mxu0 %v3122_v52  ;;  %1865 = vmatmul.bf16.vlgmr.msrb.gmra.mxu1 %v4410_v1  ;;  %v3281_v43 = vld [vmem:[%s5860_s1 + $0x5b0] sm:$0xf]  ;;  %v3602_v52 = vld [vmem:[%s5861_s0 + $0xd4] sm:$0xf0]  ;;  %v3210_v2 = vor.u32 %v3772_v47, %v3209_v46  ;;  %v3756_v4 = vld [vmem:[%s5860_s1 + $0x4a4] sm:$0xf0] }
  0x45   :  { %1933 = vmatpush.bf16.msra.mxu1 %v3186_v38  ;;  %1884 = vmatmul.bf16.vlgmr.msrb.gmra.mxu2 %v4421_v5  ;;  %v3593_v38 = vld [vmem:[%s5861_s0 + $0x94] sm:$0xf]  ;;  %v3282_v63 = vor.u32 %v3790_v45, %v3281_v43  ;;  %v3788_v10 = vld [vmem:[%s5860_s1 + $0x5a4] sm:$0xf0]  ;;  %v4553_v13 = vor.u32 %v3602_v52, %v2513_v49  ;;  %v3146_v16 = vor.u32 %v3756_v4, %v3145_v3  ;;  %v3073_v17 = vld [vmem:[%s5860_s1 + $0x410] sm:$0xf] }
  0x46   :  { %1952 = vmatpush.bf16.msra.mxu2 %v3250_v34  ;;  %1903 = vmatmul.bf16.vlgmr.msrb.gmra.mxu3 %v4423_v6  ;;  %v3742_v34 = vld [vmem:[%s5860_s1 + $0x434] sm:$0xf0]  ;;  %v4542_v9 = vor.u32 %v3593_v38, %v2507_v39  ;;  %v3137_v21 = vld [vmem:[%s5860_s1 + $0x490] sm:$0xf]  ;;  %v3193_v25 = vld [vmem:[%s5860_s1 + $0x500] sm:$0xf] }
  0x47   :  { %1971 = vmatpush.bf16.msra.mxu3 %v3314_v59  ;;  %v3090_v59 = vor.u32 %v3742_v34, %v3089_v33  ;;  %v3738_v18 = vld [vmem:[%s5860_s1 + $0x414] sm:$0xf0]  ;;  %v3768_v26 = vld [vmem:[%s5860_s1 + $0x504] sm:$0xf0]  ;;  %v3505_v27 = vld [vmem:[%s5860_s1 + $0x770] sm:$0xf] }
  0x48   :  { %1915 = vmatpush.bf16.msra.mxu0 %v3114_v7  ;;  %v3273_v7 = vld [vmem:[%s5860_s1 + $0x5a0] sm:$0xf]  ;;  %v3754_v22 = vld [vmem:[%s5860_s1 + $0x494] sm:$0xf0]  ;;  %v3074_v29 = vor.u32 %v3738_v18, %v3073_v17  ;;  %v3784_v38 = vld [vmem:[%s5860_s1 + $0x584] sm:$0xf0] }
  0x49   :  { %1934 = vmatpush.bf16.msra.mxu1 %v3178_v8  ;;  %v4540_v8 = vor.u32 %v3601_v37, %v2505_v36  ;;  %v3846_v28 = vld [vmem:[%s5860_s1 + $0x774] sm:$0xf0]  ;;  %v3138_v30 = vor.u32 %v3754_v22, %v3137_v21  ;;  %v3129_v33 = vld [vmem:[%s5860_s1 + $0x480] sm:$0xf]  ;;  %v3752_v36 = vld [vmem:[%s5860_s1 + $0x484] sm:$0xf0] }
  0x4a   :  { %1953 = vmatpush.bf16.msra.mxu2 %v3242_v60  ;;  %v3154_v60 = vor.u32 %v3758_v42, %v3153_v41  ;;  %v3257_v37 = vld [vmem:[%s5860_s1 + $0x580] sm:$0xf]  ;;  %v3506_v39 = vor.u32 %v3846_v28, %v3505_v27  ;;  %v3814_v41 = vld [vmem:[%s5860_s1 + $0x674] sm:$0xf0]  ;;  %v3441_v42 = vld [vmem:[%s5860_s1 + $0x6f0] sm:$0xf]  ;;  %v3130_v49 = vor.u32 %v3752_v36, %v3129_v33 }
  0x4b   :  { %1972 = vmatpush.bf16.msra.mxu3 %v3306_v11  ;;  %v3201_v11 = vld [vmem:[%s5860_s1 + $0x510] sm:$0xf]  ;;  %v3830_v43 = vld [vmem:[%s5860_s1 + $0x6f4] sm:$0xf0]  ;;  %v3497_v52 = vld [vmem:[%s5860_s1 + $0x760] sm:$0xf]  ;;  %v3258_v58 = vor.u32 %v3784_v38, %v3257_v37 }
  0x4c   :  { %1916 = vmatpush.bf16.msra.mxu0 %v3106_v19  ;;  %v3274_v19 = vor.u32 %v3788_v10, %v3273_v7  ;;  %v3569_v45 = vld [vmem:[%s5860_s1 + $0x7f0] sm:$0xf]  ;;  %v3862_v46 = vld [vmem:[%s5860_s1 + $0x7f4] sm:$0xf0]  ;;  %v3844_v55 = vld [vmem:[%s5860_s1 + $0x764] sm:$0xf0] }
  0x4d   :  { %1935 = vmatpush.bf16.msra.mxu1 %v3170_v20  ;;  %v3579_v61 = vld [vmem:[%s5861_s0 + $0x24] sm:$0xf]  ;;  %v3570_v3 = vor.u32 %v3862_v46, %v3569_v45  ;;  %v3369_v4 = vld [vmem:[%s5860_s1 + $0x660] sm:$0xf]  ;;  %v3812_v7 = vld [vmem:[%s5860_s1 + $0x664] sm:$0xf0] }
  0x4e   :  { %1954 = vmatpush.bf16.msra.mxu2 %v3234_v12  ;;  %v3770_v12 = vld [vmem:[%s5860_s1 + $0x514] sm:$0xf0]  ;;  %v2465_v10 = vld [vmem:[%s5861_s0 + $0x28] sm:$0xf]  ;;  %v3433_v17 = vld [vmem:[%s5860_s1 + $0x6e0] sm:$0xf] }
  0x4f   :  { %1973 = vmatpush.bf16.msra.mxu3 %v3298_v23  ;;  %v3202_v20 = vor.u32 %v3770_v12, %v3201_v11  ;;  %v3265_v23 = vld [vmem:[%s5860_s1 + $0x590] sm:$0xf]  ;;  %v3588_v11 = vld [vmem:[%s5861_s0 + $0x64] sm:$0xf0]  ;;  %v3580_v12 = vld [vmem:[%s5861_s0 + $0x2c] sm:$0xf] }
  0x50   :  { %1917 = vmatpush.bf16.msra.mxu0 %v3098_v31  ;;  %v3065_v31 = vld [vmem:[%s5860_s1 + $0x400] sm:$0xf]  ;;  %v3828_v18 = vld [vmem:[%s5860_s1 + $0x6e4] sm:$0xf0]  ;;  %v3489_v22 = vld [vmem:[%s5860_s1 + $0x750] sm:$0xf]  ;;  %v4691_v28 = vor.u32 %v3588_v11, %v2465_v10 }
  0x51   :  { %1936 = vmatpush.bf16.msra.mxu1 %v3162_v32  ;;  %v3736_v32 = vld [vmem:[%s5860_s1 + $0x404] sm:$0xf0]  ;;  %v3810_v27 = vld [vmem:[%s5860_s1 + $0x654] sm:$0xf0]  ;;  %v3553_v36 = vld [vmem:[%s5860_s1 + $0x7d0] sm:$0xf] }
  0x52   :  { %1955 = vmatpush.bf16.msra.mxu2 %v3226_v24  ;;  %v3786_v24 = vld [vmem:[%s5860_s1 + $0x594] sm:$0xf0]  ;;  %v3066_v47 = vor.u32 %v3736_v32, %v3065_v31  ;;  %v3860_v21 = vld [vmem:[%s5860_s1 + $0x7e4] sm:$0xf0]  ;;  %v3425_v32 = vld [vmem:[%s5860_s1 + $0x6d0] sm:$0xf] }
  0x53   :  { %1974 = vmatpush.bf16.msra.mxu3 %v3290_v35  ;;  %1851 = vmatmul.bf16.gmra.mxu0 %v4540_v8  ;;  %v3266_v34 = vor.u32 %v3786_v24, %v3265_v23  ;;  %v3194_v35 = vor.u32 %v3768_v26, %v3193_v25  ;;  %v3842_v25 = vld [vmem:[%s5860_s1 + $0x754] sm:$0xf0]  ;;  %v3361_v26 = vld [vmem:[%s5860_s1 + $0x650] sm:$0xf]  ;;  %v3481_v38 = vld [vmem:[%s5860_s1 + $0x740] sm:$0xf] }
  0x54   :  { %1918 = vmatpush.bf16.msra.mxu0 %v3090_v59  ;;  %1870 = vmatmul.bf16.gmra.mxu1 %v4542_v9  ;;  %v2457_v59 = vld [vmem:[%s5861_s0 + $0x20] sm:$0xf]  ;;  %v3826_v33 = vld [vmem:[%s5860_s1 + $0x6d4] sm:$0xf0]  ;;  %v3824_v46 = vld [vmem:[%s5860_s1 + $0x6c4] sm:$0xf0] }
  0x55   :  { %1937 = vmatpush.bf16.msra.mxu1 %v3154_v60  ;;  %1889 = vmatmul.bf16.gmra.mxu2 %v4553_v13  ;;  %v3587_v60 = vld [vmem:[%s5861_s0 + $0x5c] sm:$0xf0]  ;;  %v3858_v37 = vld [vmem:[%s5860_s1 + $0x7d4] sm:$0xf0]  ;;  %v3595_v10 = vld [vmem:[%s5861_s0 + $0xa4] sm:$0xf] }
  0x56   :  { %1956 = vmatpush.bf16.msra.mxu2 %v3218_v40  ;;  %1908 = vmatmul.bf16.gmra.mxu3 %v4555_v14  ;;  %v3377_v40 = vld [vmem:[%s5860_s1 + $0x670] sm:$0xf]  ;;  %v4678_v23 = vor.u32 %v3587_v60, %v2457_v59  ;;  %v3417_v45 = vld [vmem:[%s5860_s1 + $0x6c0] sm:$0xf]  ;;  %v3838_v59 = vld [vmem:[%s5860_s1 + $0x734] sm:$0xf0] }
  0x57   :  { %1975 = vmatpush.bf16.msra.mxu3 %v3282_v63  ;;  %v3378_v62 = vor.u32 %v3814_v41, %v3377_v40  ;;  %v2459_v63 = vld [vmem:[%s5861_s0 + $0x60] sm:$0xf0]  ;;  %v3353_v40 = vld [vmem:[%s5860_s1 + $0x640] sm:$0xf]  ;;  %v3808_v41 = vld [vmem:[%s5860_s1 + $0x644] sm:$0xf0] }
  0x58   :  { %1919 = vmatpush.bf16.msra.mxu0 %v3082_v15  ;;  %v3498_v15 = vor.u32 %v3844_v55, %v3497_v52  ;;  %v4680_v24 = vor.u32 %v3579_v61, %v2459_v63  ;;  %v3545_v52 = vld [vmem:[%s5860_s1 + $0x7c0] sm:$0xf]  ;;  %v3856_v55 = vld [vmem:[%s5860_s1 + $0x7c4] sm:$0xf0]  ;;  %v3345_v60 = vld [vmem:[%s5860_s1 + $0x630] sm:$0xf] }
  0x59   :  { %1938 = vmatpush.bf16.msra.mxu1 %v3146_v16  ;;  %v2467_v16 = vld [vmem:[%s5861_s0 + $0x68] sm:$0xf0]  ;;  %v3806_v61 = vld [vmem:[%s5860_s1 + $0x634] sm:$0xf0]  ;;  %v3546_v63 = vor.u32 %v3856_v55, %v3545_v52  ;;  %v2523_v11 = vld [vmem:[%s5861_s0 + $0xe0] sm:$0xf0] }
  0x5a   :  { %1957 = vmatpush.bf16.msra.mxu2 %v3210_v2  ;;  %v3442_v2 = vor.u32 %v3830_v43, %v3441_v42  ;;  %v3426_v42 = vor.u32 %v3826_v33, %v3425_v32  ;;  %v3554_v43 = vor.u32 %v3858_v37, %v3553_v36  ;;  %v3401_v32 = vld [vmem:[%s5860_s1 + $0x6a0] sm:$0xf]  ;;  %v3820_v33 = vld [vmem:[%s5860_s1 + $0x6a4] sm:$0xf0]  ;;  %v3393_v52 = vld [vmem:[%s5860_s1 + $0x690] sm:$0xf] }
  0x5b   :  { %1976 = vmatpush.bf16.msra.mxu3 %v3274_v19  ;;  %v3370_v19 = vor.u32 %v3812_v7, %v3369_v4  ;;  %v2521_v4 = vld [vmem:[%s5861_s0 + $0xa0] sm:$0xf]  ;;  %v3852_v37 = vld [vmem:[%s5860_s1 + $0x7a4] sm:$0xf0]  ;;  %v3818_v55 = vld [vmem:[%s5860_s1 + $0x694] sm:$0xf0] }
  0x5c   :  { %1920 = vmatpush.bf16.msra.mxu0 %v3074_v29  ;;  %v4693_v29 = vor.u32 %v3580_v12, %v2467_v16  ;;  %v3603_v7 = vld [vmem:[%s5861_s0 + $0xdc] sm:$0xf0]  ;;  %v3537_v16 = vld [vmem:[%s5860_s1 + $0x7b0] sm:$0xf] }
  0x5d   :  { %1939 = vmatpush.bf16.msra.mxu1 %v3138_v30  ;;  %v3434_v30 = vor.u32 %v3828_v18, %v3433_v17  ;;  %v3854_v17 = vld [vmem:[%s5860_s1 + $0x7b4] sm:$0xf0]  ;;  %v3465_v18 = vld [vmem:[%s5860_s1 + $0x720] sm:$0xf] }
  0x5e   :  { %1958 = vmatpush.bf16.msra.mxu2 %v3202_v20  ;;  %v3561_v20 = vld [vmem:[%s5860_s1 + $0x7e0] sm:$0xf] }
  0x5f   :  { %1977 = vmatpush.bf16.msra.mxu3 %v3266_v34  ;;  %v3562_v31 = vor.u32 %v3860_v21, %v3561_v20  ;;  %v3490_v34 = vor.u32 %v3842_v25, %v3489_v22  ;;  %v3337_v20 = vld [vmem:[%s5860_s1 + $0x620] sm:$0xf]  ;;  %v3804_v21 = vld [vmem:[%s5860_s1 + $0x624] sm:$0xf0] }
  0x60   :  { %1921 = vmatpush.bf16.msra.mxu0 %v3066_v47  ;;  %v2529_v22 = vld [vmem:[%s5861_s0 + $0xa8] sm:$0xf]  ;;  %v3529_v36 = vld [vmem:[%s5860_s1 + $0x7a0] sm:$0xf] }
  0x61   :  { %1940 = vmatpush.bf16.msra.mxu1 %v3130_v49  ;;  %v3354_v49 = vor.u32 %v3808_v41, %v3353_v40  ;;  %v3604_v25 = vld [vmem:[%s5861_s0 + $0xe4] sm:$0xf0]  ;;  %v4812_v40 = vor.u32 %v3595_v10, %v2523_v11  ;;  %v3834_v41 = vld [vmem:[%s5860_s1 + $0x714] sm:$0xf0]  ;;  %v3621_v10 = vld [vmem:[%s5860_s1 + $0x74] sm:$0xf] }
  0x62   :  { %1959 = vmatpush.bf16.msra.mxu2 %v3194_v35  ;;  %v3362_v35 = vor.u32 %v3810_v27, %v3361_v26  ;;  %v3596_v26 = vld [vmem:[%s5861_s0 + $0xac] sm:$0xf]  ;;  %v2611_v11 = vld [vmem:[%s5860_s1 + $0x78] sm:$0xf0] }
  0x63   :  { %1978 = vmatpush.bf16.msra.mxu3 %v3258_v58  ;;  %1922 = vmatmul.bf16.vlgmr.msra.gmra.mxu0 %v4678_v23  ;;  %v3473_v58 = vld [vmem:[%s5860_s1 + $0x730] sm:$0xf]  ;;  %v2531_v27 = vld [vmem:[%s5861_s0 + $0xe8] sm:$0xf0] }
  0x64   :  { %1990 = vmatpush.bf16.msrb.mxu0 %v3378_v62  ;;  %1941 = vmatmul.bf16.vlgmr.msra.gmra.mxu1 %v4680_v24  ;;  %v3418_v62 = vor.u32 %v3824_v46, %v3417_v45  ;;  %v3474_v12 = vor.u32 %v3838_v59, %v3473_v58  ;;  %v4823_v45 = vor.u32 %v3604_v25, %v2529_v22  ;;  %v3521_v58 = vld [vmem:[%s5860_s1 + $0x790] sm:$0xf]  ;;  %v3637_v22 = vld [vmem:[%s5860_s1 + $0xf4] sm:$0xf]  ;;  %v2675_v25 = vld [vmem:[%s5860_s1 + $0xf8] sm:$0xf0] }
  0x65   :  { %2009 = vmatpush.bf16.msrb.mxu1 %v3442_v2  ;;  %1960 = vmatmul.bf16.vlgmr.msra.gmra.mxu2 %v4691_v28  ;;  %v3409_v2 = vld [vmem:[%s5860_s1 + $0x6b0] sm:$0xf]  ;;  %v4825_v46 = vor.u32 %v3596_v26, %v2531_v27  ;;  %v2614_v27 = vor.u32 %v3621_v10, %v2611_v11 }
  0x66   :  { %2028 = vmatpush.bf16.msrb.mxu2 %v3506_v39  ;;  %v3840_v39 = vld [vmem:[%s5860_s1 + $0x744] sm:$0xf0]  ;;  %1979 = vmatmul.bf16.vlgmr.msra.gmra.mxu3 %v4693_v29 }
  0x67   :  { %2047 = vmatpush.bf16.msrb.mxu3 %v3570_v3  ;;  %v3482_v47 = vor.u32 %v3840_v39, %v3481_v38  ;;  %v3822_v3 = vld [vmem:[%s5860_s1 + $0x6b4] sm:$0xf0]  ;;  %v3457_v38 = vld [vmem:[%s5860_s1 + $0x710] sm:$0xf]  ;;  %v4810_v39 = vor.u32 %v3603_v7, %v2521_v4  ;;  %v3653_v4 = vld [vmem:[%s5860_s1 + $0x174] sm:$0xf] }
  0x68   :  { %1991 = vmatpush.bf16.msrb.mxu0 %v3370_v19  ;;  %v3836_v19 = vld [vmem:[%s5860_s1 + $0x724] sm:$0xf0]  ;;  %v3458_v59 = vor.u32 %v3834_v41, %v3457_v38  ;;  %v2739_v7 = vld [vmem:[%s5860_s1 + $0x178] sm:$0xf0]  ;;  %v2473_v38 = vld [vmem:[%s5861_s0 + $0x30] sm:$0xf] }
  0x69   :  { %2010 = vmatpush.bf16.msrb.mxu1 %v3434_v30  ;;  %v3410_v30 = vor.u32 %v3822_v3, %v3409_v2  ;;  %v3321_v2 = vld [vmem:[%s5860_s1 + $0x600] sm:$0xf]  ;;  %v3800_v3 = vld [vmem:[%s5860_s1 + $0x604] sm:$0xf0]  ;;  %v2742_v26 = vor.u32 %v3653_v4, %v2739_v7  ;;  %v3589_v41 = vld [vmem:[%s5861_s0 + $0x6c] sm:$0xf0] }
  0x6a   :  { %2029 = vmatpush.bf16.msrb.mxu2 %v3498_v15  ;;  %v3346_v15 = vor.u32 %v3806_v61, %v3345_v60  ;;  %v3850_v61 = vld [vmem:[%s5860_s1 + $0x794] sm:$0xf0]  ;;  %v3649_v4 = vld [vmem:[%s5860_s1 + $0x154] sm:$0xf]  ;;  %v2723_v7 = vld [vmem:[%s5860_s1 + $0x158] sm:$0xf0] }
  0x6b   :  { %2048 = vmatpush.bf16.msrb.mxu3 %v3562_v31  ;;  %v3538_v31 = vor.u32 %v3854_v17, %v3537_v16  ;;  %v3385_v16 = vld [vmem:[%s5860_s1 + $0x680] sm:$0xf]  ;;  %v3816_v17 = vld [vmem:[%s5860_s1 + $0x684] sm:$0xf0] }
  0x6c   :  { %1992 = vmatpush.bf16.msrb.mxu0 %v3362_v35  ;;  %v3338_v35 = vor.u32 %v3804_v21, %v3337_v20  ;;  %v3322_v20 = vor.u32 %v3800_v3, %v3321_v2  ;;  %v3848_v21 = vld [vmem:[%s5860_s1 + $0x784] sm:$0xf0]  ;;  %v3582_v2 = vld [vmem:[%s5861_s0 + $0x3c] sm:$0xf] }
  0x6d   :  { %2011 = vmatpush.bf16.msrb.mxu1 %v3426_v42  ;;  %v3329_v42 = vld [vmem:[%s5860_s1 + $0x610] sm:$0xf]  ;;  %v2483_v3 = vld [vmem:[%s5861_s0 + $0x78] sm:$0xf0] }
  0x6e   :  { %2030 = vmatpush.bf16.msrb.mxu2 %v3490_v34  ;;  %v3466_v34 = vor.u32 %v3836_v19, %v3465_v18  ;;  %v3513_v18 = vld [vmem:[%s5860_s1 + $0x780] sm:$0xf] }
  0x6f   :  { %2049 = vmatpush.bf16.msrb.mxu3 %v3554_v43  ;;  %v3802_v43 = vld [vmem:[%s5860_s1 + $0x614] sm:$0xf0] }
  0x70   :  { %1993 = vmatpush.bf16.msrb.mxu0 %v3354_v49  ;;  %v3530_v49 = vor.u32 %v3852_v37, %v3529_v36  ;;  %v3330_v60 = vor.u32 %v3802_v43, %v3329_v42  ;;  %v3386_v36 = vor.u32 %v3816_v17, %v3385_v16  ;;  %v3514_v37 = vor.u32 %v3848_v21, %v3513_v18  ;;  %v3581_v42 = vld [vmem:[%s5861_s0 + $0x34] sm:$0xf]  ;;  %v2787_v21 = vld [vmem:[%s5860_s1 + $0x1d8] sm:$0xf0] }
  0x71   :  { %2012 = vmatpush.bf16.msrb.mxu1 %v3418_v62  ;;  %v3449_v62 = vld [vmem:[%s5860_s1 + $0x700] sm:$0xf]  ;;  %v2475_v43 = vld [vmem:[%s5861_s0 + $0x70] sm:$0xf0]  ;;  %v4954_v17 = vor.u32 %v3589_v41, %v2473_v38  ;;  %v3663_v38 = vld [vmem:[%s5860_s1 + $0x1c4] sm:$0xf] }
  0x72   :  { %2031 = vmatpush.bf16.msrb.mxu2 %v3482_v47  ;;  %v3402_v47 = vor.u32 %v3820_v33, %v3401_v32  ;;  %v3651_v32 = vld [vmem:[%s5860_s1 + $0x164] sm:$0xf]  ;;  %v2731_v33 = vld [vmem:[%s5860_s1 + $0x168] sm:$0xf0]  ;;  %v3633_v16 = vld [vmem:[%s5860_s1 + $0xd4] sm:$0xf]  ;;  %v4956_v18 = vor.u32 %v3581_v42, %v2475_v43 }
  0x73   :  { %2050 = vmatpush.bf16.msrb.mxu3 %v3546_v63  ;;  %v3832_v63 = vld [vmem:[%s5860_s1 + $0x704] sm:$0xf0]  ;;  %1927 = vmatmul.bf16.gmra.mxu0 %v4810_v39  ;;  %v2779_v41 = vld [vmem:[%s5860_s1 + $0x1c8] sm:$0xf0] }
  0x74   :  { %1994 = vmatpush.bf16.msrb.mxu0 %v3346_v15  ;;  %1946 = vmatmul.bf16.gmra.mxu1 %v4812_v40  ;;  %v3522_v15 = vor.u32 %v3850_v61, %v3521_v58  ;;  %v3450_v19 = vor.u32 %v3832_v63, %v3449_v62  ;;  %v2795_v61 = vld [vmem:[%s5860_s1 + $0x1e8] sm:$0xf0]  ;;  %v2481_v62 = vld [vmem:[%s5861_s0 + $0x38] sm:$0xf] }
  0x75   :  { %2013 = vmatpush.bf16.msrb.mxu1 %v3410_v30  ;;  %1965 = vmatmul.bf16.gmra.mxu2 %v4823_v45  ;;  %v3669_v30 = vld [vmem:[%s5860_s1 + $0x1f4] sm:$0xf]  ;;  %v3590_v63 = vld [vmem:[%s5861_s0 + $0x74] sm:$0xf0] }
  0x76   :  { %2032 = vmatpush.bf16.msrb.mxu2 %v3474_v12  ;;  %1984 = vmatmul.bf16.gmra.mxu3 %v4825_v46  ;;  %v3394_v12 = vor.u32 %v3818_v55, %v3393_v52  ;;  %v3635_v52 = vld [vmem:[%s5860_s1 + $0xe4] sm:$0xf]  ;;  %v2734_v55 = vor.u32 %v3651_v32, %v2731_v33 }
  0x77   :  { %2051 = vmatpush.bf16.msrb.mxu3 %v3538_v31  ;;  %v2803_v31 = vld [vmem:[%s5860_s1 + $0x1f8] sm:$0xf0] }
  0x78   :  { %1995 = vmatpush.bf16.msrb.mxu0 %v3338_v35  ;;  %v2603_v35 = vld [vmem:[%s5860_s1 + $0x68] sm:$0xf0] }
  0x79   :  { %2014 = vmatpush.bf16.msrb.mxu1 %v3402_v47  ;;  %v2678_v47 = vor.u32 %v3637_v22, %v2675_v25  ;;  %v4967_v22 = vor.u32 %v3590_v63, %v2481_v62  ;;  %v4969_v25 = vor.u32 %v3582_v2, %v2483_v3  ;;  %v3661_v62 = vld [vmem:[%s5860_s1 + $0x1b4] sm:$0xf]  ;;  %v2771_v63 = vld [vmem:[%s5860_s1 + $0x1b8] sm:$0xf0] }
  0x7a   :  { %2033 = vmatpush.bf16.msrb.mxu2 %v3466_v34  ;;  %v3619_v34 = vld [vmem:[%s5860_s1 + $0x64] sm:$0xf] }
  0x7b   :  { %2052 = vmatpush.bf16.msrb.mxu3 %v3530_v49  ;;  %v2806_v49 = vor.u32 %v3669_v30, %v2803_v31  ;;  %v2606_v58 = vor.u32 %v3619_v34, %v2603_v35  ;;  %v3647_v30 = vld [vmem:[%s5860_s1 + $0x144] sm:$0xf]  ;;  %v2715_v31 = vld [vmem:[%s5860_s1 + $0x148] sm:$0xf0] }
  0x7c   :  { %1996 = vmatpush.bf16.msrb.mxu0 %v3330_v60  ;;  %v3667_v60 = vld [vmem:[%s5860_s1 + $0x1e4] sm:$0xf]  ;;  %v2587_v35 = vld [vmem:[%s5860_s1 + $0x48] sm:$0xf0]  ;;  %v2718_v42 = vor.u32 %v3647_v30, %v2715_v31 }
  0x7d   :  { %2015 = vmatpush.bf16.msrb.mxu1 %v3394_v12  ;;  %v2798_v11 = vor.u32 %v3667_v60, %v2795_v61  ;;  %v3617_v12 = vld [vmem:[%s5860_s1 + $0x54] sm:$0xf]  ;;  %v3615_v34 = vld [vmem:[%s5860_s1 + $0x44] sm:$0xf]  ;;  %v2643_v61 = vld [vmem:[%s5860_s1 + $0xb8] sm:$0xf0] }
  0x7e   :  { %2034 = vmatpush.bf16.msrb.mxu2 %v3458_v59  ;;  %v2667_v59 = vld [vmem:[%s5860_s1 + $0xe8] sm:$0xf0]  ;;  %v2590_v43 = vor.u32 %v3615_v34, %v2587_v35  ;;  %v3629_v60 = vld [vmem:[%s5860_s1 + $0xb4] sm:$0xf]  ;;  %v3659_v30 = vld [vmem:[%s5860_s1 + $0x1a4] sm:$0xf] }
  0x7f   :  { %2053 = vmatpush.bf16.msrb.mxu3 %v3522_v15  ;;  %v2670_v10 = vor.u32 %v3635_v52, %v2667_v59  ;;  %v2595_v15 = vld [vmem:[%s5860_s1 + $0x58] sm:$0xf0]  ;;  %v2763_v31 = vld [vmem:[%s5860_s1 + $0x1a8] sm:$0xf0] }
  0x80   :  { %1997 = vmatpush.bf16.msrb.mxu0 %v3322_v20  ;;  %v3665_v20 = vld [vmem:[%s5860_s1 + $0x1d4] sm:$0xf]  ;;  %v2579_v59 = vld [vmem:[%s5860_s1 + $0x38] sm:$0xf0] }
  0x81   :  { %2016 = vmatpush.bf16.msrb.mxu1 %v3386_v36  ;;  %v2790_v33 = vor.u32 %v3665_v20, %v2787_v21  ;;  %v3631_v36 = vld [vmem:[%s5860_s1 + $0xc4] sm:$0xf]  ;;  %v2571_v21 = vld [vmem:[%s5860_s1 + $0x28] sm:$0xf0]  ;;  %v3598_v34 = vld [vmem:[%s5861_s0 + $0xbc] sm:$0xf] }
  0x82   :  { %2035 = vmatpush.bf16.msrb.mxu2 %v3450_v19  ;;  %v2659_v19 = vld [vmem:[%s5860_s1 + $0xd8] sm:$0xf0]  ;;  %v3611_v20 = vld [vmem:[%s5860_s1 + $0x24] sm:$0xf] }
  0x83   :  { %2054 = vmatpush.bf16.msrb.mxu3 %v3514_v37  ;;  %v2662_v32 = vor.u32 %v3633_v16, %v2659_v19  ;;  %1998 = vmatmul.bf16.vlgmr.msrb.gmra.mxu0 %v4954_v17  ;;  %v2651_v37 = vld [vmem:[%s5860_s1 + $0xc8] sm:$0xf0]  ;;  %v2646_v16 = vor.u32 %v3629_v60, %v2643_v61  ;;  %v2774_v19 = vor.u32 %v3661_v62, %v2771_v63  ;;  %v2547_v35 = vld [vmem:[%s5861_s0 + $0xf8] sm:$0xf0]  ;;  %v3657_v60 = vld [vmem:[%s5860_s1 + $0x194] sm:$0xf] }
  0x84   :  { %2066 = vmatpush.bf16.msra.mxu0 %v2614_v27  ;;  %v2598_v27 = vor.u32 %v3617_v12, %v2595_v15  ;;  %2017 = vmatmul.bf16.vlgmr.msrb.gmra.mxu1 %v4956_v18  ;;  %v2654_v52 = vor.u32 %v3631_v36, %v2651_v37  ;;  %v3597_v12 = vld [vmem:[%s5861_s0 + $0xb4] sm:$0xf]  ;;  %v2574_v37 = vor.u32 %v3611_v20, %v2571_v21  ;;  %v2755_v61 = vld [vmem:[%s5860_s1 + $0x198] sm:$0xf0]  ;;  %v3655_v20 = vld [vmem:[%s5860_s1 + $0x184] sm:$0xf] }
  0x85   :  { %2085 = vmatpush.bf16.msra.mxu1 %v2678_v47  ;;  %2036 = vmatmul.bf16.vlgmr.msrb.gmra.mxu2 %v4967_v22  ;;  %v3645_v47 = vld [vmem:[%s5860_s1 + $0x134] sm:$0xf]  ;;  %v5101_v63 = vor.u32 %v3598_v34, %v2547_v35  ;;  %v2747_v21 = vld [vmem:[%s5860_s1 + $0x188] sm:$0xf0]  ;;  %v2931_v35 = vld [vmem:[%s5860_s1 + $0x2f8] sm:$0xf0] }
  0x86   :  { %2104 = vmatpush.bf16.msra.mxu2 %v2742_v26  ;;  %v2726_v26 = vor.u32 %v3649_v4, %v2723_v7  ;;  %2055 = vmatmul.bf16.vlgmr.msrb.gmra.mxu3 %v4969_v25  ;;  %v3643_v4 = vld [vmem:[%s5860_s1 + $0x124] sm:$0xf]  ;;  %v2699_v7 = vld [vmem:[%s5860_s1 + $0x128] sm:$0xf0]  ;;  %v2539_v15 = vld [vmem:[%s5861_s0 + $0xf0] sm:$0xf0] }
  0x87   :  { %2123 = vmatpush.bf16.msra.mxu3 %v2806_v49  ;;  %v2707_v49 = vld [vmem:[%s5860_s1 + $0x138] sm:$0xf0]  ;;  %v2702_v36 = vor.u32 %v3643_v4, %v2699_v7  ;;  %v2683_v7 = vld [vmem:[%s5860_s1 + $0x108] sm:$0xf0] }
  0x88   :  { %2067 = vmatpush.bf16.msra.mxu0 %v2606_v58  ;;  %v3613_v58 = vld [vmem:[%s5860_s1 + $0x34] sm:$0xf]  ;;  %v2710_v2 = vor.u32 %v3645_v47, %v2707_v49  ;;  %v2563_v49 = vld [vmem:[%s5860_s1 + $0x18] sm:$0xf0] }
  0x89   :  { %2086 = vmatpush.bf16.msra.mxu1 %v2670_v10  ;;  %v2582_v3 = vor.u32 %v3613_v58, %v2579_v59  ;;  %v2537_v10 = vld [vmem:[%s5861_s0 + $0xb0] sm:$0xf]  ;;  %v3609_v47 = vld [vmem:[%s5860_s1 + $0x14] sm:$0xf]  ;;  %v5088_v58 = vor.u32 %v3597_v12, %v2539_v15  ;;  %v2627_v59 = vld [vmem:[%s5860_s1 + $0x98] sm:$0xf0]  ;;  %v2758_v15 = vor.u32 %v3657_v60, %v2755_v61 }
  0x8a   :  { %2105 = vmatpush.bf16.msra.mxu2 %v2734_v55  ;;  %v2782_v55 = vor.u32 %v3663_v38, %v2779_v41  ;;  %v3641_v38 = vld [vmem:[%s5860_s1 + $0x114] sm:$0xf]  ;;  %v2691_v41 = vld [vmem:[%s5860_s1 + $0x118] sm:$0xf0]  ;;  %v2566_v4 = vor.u32 %v3609_v47, %v2563_v49  ;;  %v3715_v47 = vld [vmem:[%s5860_s1 + $0x364] sm:$0xf] }
  0x8b   :  { %2124 = vmatpush.bf16.msra.mxu3 %v2798_v11  ;;  %v3605_v11 = vld [vmem:[%s5861_s0 + $0xec] sm:$0xf0]  ;;  %v2987_v49 = vld [vmem:[%s5860_s1 + $0x368] sm:$0xf0]  ;;  %v3683_v60 = vld [vmem:[%s5860_s1 + $0x264] sm:$0xf] }
  0x8c   :  { %2068 = vmatpush.bf16.msra.mxu0 %v2598_v27  ;;  %v2635_v27 = vld [vmem:[%s5860_s1 + $0xa8] sm:$0xf0] }
  0x8d   :  { %2087 = vmatpush.bf16.msra.mxu1 %v2662_v32  ;;  %v2545_v32 = vld [vmem:[%s5861_s0 + $0xb8] sm:$0xf]  ;;  %v2859_v61 = vld [vmem:[%s5860_s1 + $0x268] sm:$0xf0] }
  0x8e   :  { %2106 = vmatpush.bf16.msra.mxu2 %v2726_v26  ;;  %v3627_v26 = vld [vmem:[%s5860_s1 + $0xa4] sm:$0xf] }
  0x8f   :  { %2125 = vmatpush.bf16.msra.mxu3 %v2790_v33  ;;  %v3606_v33 = vld [vmem:[%s5861_s0 + $0xf4] sm:$0xf0] }
  0x90   :  { %2069 = vmatpush.bf16.msra.mxu0 %v2590_v43  ;;  %v2766_v43 = vor.u32 %v3659_v30, %v2763_v31  ;;  %v5099_v62 = vor.u32 %v3606_v33, %v2545_v32  ;;  %v3685_v30 = vld [vmem:[%s5860_s1 + $0x274] sm:$0xf]  ;;  %v2867_v31 = vld [vmem:[%s5860_s1 + $0x278] sm:$0xf0] }
  0x91   :  { %2088 = vmatpush.bf16.msra.mxu1 %v2654_v52  ;;  %v3625_v52 = vld [vmem:[%s5860_s1 + $0x94] sm:$0xf] }
  0x92   :  { %2107 = vmatpush.bf16.msra.mxu2 %v2718_v42  ;;  %v2638_v42 = vor.u32 %v3627_v26, %v2635_v27  ;;  %v2630_v12 = vor.u32 %v3625_v52, %v2627_v59  ;;  %v3717_v26 = vld [vmem:[%s5860_s1 + $0x374] sm:$0xf]  ;;  %v2995_v27 = vld [vmem:[%s5860_s1 + $0x378] sm:$0xf0] }
  0x93   :  { %2126 = vmatpush.bf16.msra.mxu3 %v2782_v55  ;;  %v5086_v55 = vor.u32 %v3605_v11, %v2537_v10  ;;  %v3607_v10 = vld [vmem:[%s5860_s1 + $0x4] sm:$0xf]  ;;  %v2555_v11 = vld [vmem:[%s5860_s1 + $0x8] sm:$0xf0]  ;;  %v3701_v32 = vld [vmem:[%s5860_s1 + $0x2f4] sm:$0xf] }
  0x94   :  { %2070 = vmatpush.bf16.msra.mxu0 %v2582_v3  ;;  %v2694_v3 = vor.u32 %v3641_v38, %v2691_v41  ;;  %2022 = vmatmul.bf16.gmra.mxu1 %v5088_v58  ;;  %v2558_v34 = vor.u32 %v3607_v10, %v2555_v11  ;;  %v2750_v41 = vor.u32 %v3655_v20, %v2747_v21  ;;  %v3681_v20 = vld [vmem:[%s5860_s1 + $0x254] sm:$0xf]  ;;  %v2851_v21 = vld [vmem:[%s5860_s1 + $0x258] sm:$0xf0] }
  0x95   :  { %2089 = vmatpush.bf16.msra.mxu1 %v2646_v16  ;;  %v3623_v16 = vld [vmem:[%s5860_s1 + $0x84] sm:$0xf]  ;;  %2003 = vmatmul.bf16.gmra.mxu0 %v5086_v55  ;;  %v2934_v52 = vor.u32 %v3701_v32, %v2931_v35  ;;  %v2990_v10 = vor.u32 %v3715_v47, %v2987_v49  ;;  %v2862_v11 = vor.u32 %v3683_v60, %v2859_v61  ;;  %v3043_v32 = vld [vmem:[%s5860_s1 + $0x3d8] sm:$0xf0]  ;;  %v2843_v47 = vld [vmem:[%s5860_s1 + $0x248] sm:$0xf0] }
  0x96   :  { %2108 = vmatpush.bf16.msra.mxu2 %v2710_v2  ;;  %v3639_v2 = vld [vmem:[%s5860_s1 + $0x104] sm:$0xf]  ;;  %2060 = vmatmul.bf16.gmra.mxu3 %v5101_v63  ;;  %v3035_v60 = vld [vmem:[%s5860_s1 + $0x3c8] sm:$0xf0]  ;;  %v3709_v61 = vld [vmem:[%s5860_s1 + $0x334] sm:$0xf] }
  0x97   :  { %2127 = vmatpush.bf16.msra.mxu3 %v2774_v19  ;;  %v2619_v19 = vld [vmem:[%s5860_s1 + $0x88] sm:$0xf0]  ;;  %2041 = vmatmul.bf16.gmra.mxu2 %v5099_v62  ;;  %v2686_v33 = vor.u32 %v3639_v2, %v2683_v7  ;;  %v3699_v2 = vld [vmem:[%s5860_s1 + $0x2e4] sm:$0xf] }
  0x98   :  { %2071 = vmatpush.bf16.msra.mxu0 %v2574_v37  ;;  %v3059_v37 = vld [vmem:[%s5860_s1 + $0x3f8] sm:$0xf0]  ;;  %v2622_v38 = vor.u32 %v3623_v16, %v2619_v19  ;;  %v3051_v7 = vld [vmem:[%s5860_s1 + $0x3e8] sm:$0xf0]  ;;  %v3713_v16 = vld [vmem:[%s5860_s1 + $0x354] sm:$0xf] }
  0x99   :  { %2090 = vmatpush.bf16.msra.mxu1 %v2638_v42  ;;  %v2998_v42 = vor.u32 %v3717_v26, %v2995_v27  ;;  %v2979_v19 = vld [vmem:[%s5860_s1 + $0x358] sm:$0xf0]  ;;  %v3697_v26 = vld [vmem:[%s5860_s1 + $0x2d4] sm:$0xf]  ;;  %v3695_v49 = vld [vmem:[%s5860_s1 + $0x2c4] sm:$0xf] }
  0x9a   :  { %2109 = vmatpush.bf16.msra.mxu2 %v2702_v36  ;;  %v3733_v36 = vld [vmem:[%s5860_s1 + $0x3f4] sm:$0xf]  ;;  %v2982_v35 = vor.u32 %v3713_v16, %v2979_v19  ;;  %v2899_v16 = vld [vmem:[%s5860_s1 + $0x2b8] sm:$0xf0] }
  0x9b   :  { %2128 = vmatpush.bf16.msra.mxu3 %v2766_v43  ;;  %v2870_v43 = vor.u32 %v3685_v30, %v2867_v31  ;;  %v3062_v59 = vor.u32 %v3733_v36, %v3059_v37  ;;  %v2915_v30 = vld [vmem:[%s5860_s1 + $0x2d8] sm:$0xf0]  ;;  %v3729_v31 = vld [vmem:[%s5860_s1 + $0x3d4] sm:$0xf]  ;;  %v2854_v36 = vor.u32 %v3681_v20, %v2851_v21  ;;  %v3711_v37 = vld [vmem:[%s5860_s1 + $0x344] sm:$0xf] }
  0x9c   :  { %2072 = vmatpush.bf16.msra.mxu0 %v2566_v4  ;;  %v3731_v4 = vld [vmem:[%s5860_s1 + $0x3e4] sm:$0xf]  ;;  %v3725_v19 = vld [vmem:[%s5860_s1 + $0x3b4] sm:$0xf]  ;;  %v3027_v20 = vld [vmem:[%s5860_s1 + $0x3b8] sm:$0xf0] }
  0x9d   :  { %2091 = vmatpush.bf16.msra.mxu1 %v2630_v12 }
  0x9e   :  { %2110 = vmatpush.bf16.msra.mxu2 %v2694_v3  ;;  %v2923_v3 = vld [vmem:[%s5860_s1 + $0x2e8] sm:$0xf0] }
  0x9f   :  { %2129 = vmatpush.bf16.msra.mxu3 %v2758_v15  ;;  %v2926_v12 = vor.u32 %v3699_v2, %v2923_v3  ;;  %v3054_v15 = vor.u32 %v3731_v4, %v3051_v7  ;;  %v2963_v2 = vld [vmem:[%s5860_s1 + $0x338] sm:$0xf0] }
  0xa0   :  { %2073 = vmatpush.bf16.msra.mxu0 %v2558_v34  ;;  %v1771_v27 = vpop.f32.mrf.mxu0 }
  0xa1   :  { %2092 = vmatpush.bf16.msra.mxu1 %v2622_v38  ;;  %v2971_v38 = vld [vmem:[%s5860_s1 + $0x348] sm:$0xf0] }
  0xa2   :  { %2111 = vmatpush.bf16.msra.mxu2 %v2686_v33  ;;  %v1790_v33 = vpop.f32.mrf.mxu1 }
  0xa3   :  { %2130 = vmatpush.bf16.msra.mxu3 %v2750_v41  ;;  %v1791_v34 = vadd.f32 %v1790_v33, %v1771_v27  ;;  %v2918_v41 = vor.u32 %v3697_v26, %v2915_v30  ;;  %v2966_v26 = vor.u32 %v3709_v61, %v2963_v2  ;;  %v2955_v33 = vld [vmem:[%s5860_s1 + $0x328] sm:$0xf0]  ;;  %v3673_v61 = vld [vmem:[%s5860_s1 + $0x214] sm:$0xf]  ;;  %v2819_v2 = vld [vmem:[%s5860_s1 + $0x218] sm:$0xf0] }
  0xa4   :  { %2142 = vmatpush.bf16.msrb.mxu0 %v2870_v43  ;;  %v3679_v43 = vld [vmem:[%s5860_s1 + $0x244] sm:$0xf]  ;;  %2093 = vmatmul.bf16.vlgmr.msra.gmra.mxu1 %v4131_v53 }
  0xa5   :  { %2161 = vmatpush.bf16.msrb.mxu1 %v2934_v52  ;;  %2074 = vmatmul.bf16.vlgmr.msra.gmra.mxu0 %v4120_v48  ;;  %v2907_v52 = vld [vmem:[%s5860_s1 + $0x2c8] sm:$0xf0]  ;;  %v2974_v48 = vor.u32 %v3711_v37, %v2971_v38  ;;  %v2846_v53 = vor.u32 %v3679_v43, %v2843_v47  ;;  %v3691_v38 = vld [vmem:[%s5860_s1 + $0x2a4] sm:$0xf] }
  0xa6   :  { %2180 = vmatpush.bf16.msrb.mxu2 %v2998_v42  ;;  %v3046_v42 = vor.u32 %v3729_v31, %v3043_v32  ;;  %2131 = vmatmul.bf16.vlgmr.msra.gmra.mxu3 %v4141_v57  ;;  %v2910_v4 = vor.u32 %v3695_v49, %v2907_v52  ;;  %v2835_v57 = vld [vmem:[%s5860_s1 + $0x238] sm:$0xf0]  ;;  %v3707_v32 = vld [vmem:[%s5860_s1 + $0x324] sm:$0xf]  ;;  %v2827_v37 = vld [vmem:[%s5860_s1 + $0x228] sm:$0xf0] }
  0xa7   :  { %2199 = vmatpush.bf16.msrb.mxu3 %v3062_v59  ;;  %v3727_v59 = vld [vmem:[%s5860_s1 + $0x3c4] sm:$0xf]  ;;  %2112 = vmatmul.bf16.vlgmr.msra.gmra.mxu2 %v4133_v54  ;;  %v3677_v54 = vld [vmem:[%s5860_s1 + $0x234] sm:$0xf]  ;;  %v3019_v43 = vld [vmem:[%s5860_s1 + $0x3a8] sm:$0xf0]  ;;  %v2958_v47 = vor.u32 %v3707_v32, %v2955_v33 }
  0xa8   :  { %2143 = vmatpush.bf16.msrb.mxu0 %v2862_v11  ;;  %v1809_v3 = vpop.f32.mrf.mxu2  ;;  %v3038_v7 = vor.u32 %v3727_v59, %v3035_v60  ;;  %v2838_v31 = vor.u32 %v3677_v54, %v2835_v57  ;;  %v3705_v52 = vld [vmem:[%s5860_s1 + $0x314] sm:$0xf]  ;;  %v2947_v59 = vld [vmem:[%s5860_s1 + $0x318] sm:$0xf0] }
  0xa9   :  { %2162 = vmatpush.bf16.msrb.mxu1 %v2926_v12  ;;  %v1810_v11 = vadd.f32 %v1809_v3, %v1791_v34  ;;  %v1828_v12 = vpop.f32.mrf.mxu3  ;;  %v3689_v3 = vld [vmem:[%s5860_s1 + $0x294] sm:$0xf]  ;;  %v2883_v57 = vld [vmem:[%s5860_s1 + $0x298] sm:$0xf0] }
  0xaa   :  { %2181 = vmatpush.bf16.msrb.mxu2 %v2990_v10  ;;  %v3693_v10 = vld [vmem:[%s5860_s1 + $0x2b4] sm:$0xf]  ;;  %v1792_v21 = vpop.f32.mrf.mxu1  ;;  %v2886_v32 = vor.u32 %v3689_v3, %v2883_v57 }
  0xab   :  { %2200 = vmatpush.bf16.msrb.mxu3 %v3054_v15  ;;  %v1773_v15 = vpop.f32.mrf.mxu0  ;;  %v5255_v27 = vadd.f32 %v1828_v12, %v1810_v11  ;;  %v2902_v34 = vor.u32 %v3693_v10, %v2899_v16  ;;  %v3721_v10 = vld [vmem:[%s5860_s1 + $0x394] sm:$0xf]  ;;  %v3011_v11 = vld [vmem:[%s5860_s1 + $0x398] sm:$0xf0]  ;;  %v3703_v16 = vld [vmem:[%s5860_s1 + $0x304] sm:$0xf] }
  0xac   :  { %2144 = vmatpush.bf16.msrb.mxu0 %v2854_v36  ;;  %v1793_v30 = vadd.f32 %v1792_v21, %v1773_v15  ;;  %v3675_v36 = vld [vmem:[%s5860_s1 + $0x224] sm:$0xf]  ;;  %v2950_v15 = vor.u32 %v3705_v52, %v2947_v59  ;;  %v2822_v21 = vor.u32 %v3673_v61, %v2819_v2  ;;  %v3014_v33 = vor.u32 %v3721_v10, %v3011_v11 }
  0xad   :  { %2163 = vmatpush.bf16.msrb.mxu1 %v2918_v41  ;;  %v2891_v41 = vld [vmem:[%s5860_s1 + $0x2a8] sm:$0xf0]  ;;  %v2830_v49 = vor.u32 %v3675_v36, %v2827_v37  ;;  %v3719_v36 = vld [vmem:[%s5860_s1 + $0x384] sm:$0xf] }
  0xae   :  { %2182 = vmatpush.bf16.msrb.mxu2 %v2982_v35  ;;  %v3030_v35 = vor.u32 %v3725_v19, %v3027_v20  ;;  %v3003_v37 = vld [vmem:[%s5860_s1 + $0x388] sm:$0xf0]  ;;  %v3747_v11 = vld [vmem:[%s5860_s1 + $0x464] sm:$0xf] }
  0xaf   :  { %2201 = vmatpush.bf16.msrb.mxu3 %v3046_v42  ;;  %v3723_v42 = vld [vmem:[%s5860_s1 + $0x3a4] sm:$0xf] }
  0xb0   :  { %2145 = vmatpush.bf16.msrb.mxu0 %v2846_v53  ;;  %v1811_v60 = vpop.f32.mrf.mxu2  ;;  %v3022_v53 = vor.u32 %v3723_v42, %v3019_v43  ;;  %v3765_v42 = vld [vmem:[%s5860_s1 + $0x4f4] sm:$0xf] }
  0xb1   :  { %2164 = vmatpush.bf16.msrb.mxu1 %v2910_v4  ;;  %v1812_v4 = vadd.f32 %v1811_v60, %v1793_v30  ;;  %v3671_v30 = vld [vmem:[%s5860_s1 + $0x204] sm:$0xf]  ;;  %v3006_v60 = vor.u32 %v3719_v36, %v3003_v37  ;;  %v3235_v36 = vld [vmem:[%s5860_s1 + $0x558] sm:$0xf0] }
  0xb2   :  { %2183 = vmatpush.bf16.msrb.mxu2 %v2974_v48  ;;  %v2894_v48 = vor.u32 %v3691_v38, %v2891_v41  ;;  %v1795_v12 = vpop.f32.mrf.mxu1  ;;  %v3781_v38 = vld [vmem:[%s5860_s1 + $0x574] sm:$0xf]  ;;  %v3251_v41 = vld [vmem:[%s5860_s1 + $0x578] sm:$0xf0] }
  0xb3   :  { %2202 = vmatpush.bf16.msrb.mxu3 %v3038_v7  ;;  %v1830_v7 = vpop.f32.mrf.mxu3  ;;  %v1776_v54 = vpop.f32.mrf.mxu0  ;;  %v3254_v2 = vor.u32 %v3781_v38, %v3251_v41  ;;  %v3745_v38 = vld [vmem:[%s5860_s1 + $0x454] sm:$0xf]  ;;  %v3107_v41 = vld [vmem:[%s5860_s1 + $0x458] sm:$0xf0] }
  0xb4   :  { %2146 = vmatpush.bf16.msrb.mxu0 %v2838_v31  ;;  %v5308_v19 = vadd.f32 %v1830_v7, %v1812_v4  ;;  %v1796_v20 = vadd.f32 %v1795_v12, %v1776_v54  ;;  %v2811_v31 = vld [vmem:[%s5860_s1 + $0x208] sm:$0xf0]  ;;  %2098 = vmatmul.bf16.gmra.mxu1 %v4263_v50  ;;  %v3123_v50 = vld [vmem:[%s5860_s1 + $0x478] sm:$0xf0]  ;;  %v3779_v4 = vld [vmem:[%s5860_s1 + $0x564] sm:$0xf] }
  0xb5   :  { %2165 = vmatpush.bf16.msrb.mxu1 %v2902_v34  ;;  %v3687_v34 = vld [vmem:[%s5860_s1 + $0x284] sm:$0xf]  ;;  %2079 = vmatmul.bf16.gmra.mxu0 %v4252_v44  ;;  %v3749_v44 = vld [vmem:[%s5860_s1 + $0x474] sm:$0xf]  ;;  %v3243_v7 = vld [vmem:[%s5860_s1 + $0x568] sm:$0xf0] }
  0xb6   :  { %2184 = vmatpush.bf16.msrb.mxu2 %v2966_v26  ;;  %v2939_v26 = vld [vmem:[%s5860_s1 + $0x308] sm:$0xf0]  ;;  %2136 = vmatmul.bf16.gmra.mxu3 %v4273_v56  ;;  %v3797_v56 = vld [vmem:[%s5860_s1 + $0x5f4] sm:$0xf]  ;;  %v3126_v3 = vor.u32 %v3749_v44, %v3123_v50 }
  0xb7   :  { %2203 = vmatpush.bf16.msrb.mxu3 %v3030_v35  ;;  %v2875_v35 = vld [vmem:[%s5860_s1 + $0x288] sm:$0xf0]  ;;  %2117 = vmatmul.bf16.gmra.mxu2 %v4265_v51  ;;  %v2942_v43 = vor.u32 %v3703_v16, %v2939_v26  ;;  %v3187_v51 = vld [vmem:[%s5860_s1 + $0x4f8] sm:$0xf0]  ;;  %v3795_v26 = vld [vmem:[%s5860_s1 + $0x5e4] sm:$0xf] }
  0xb8   :  { %2147 = vmatpush.bf16.msrb.mxu0 %v2830_v49  ;;  %v3315_v49 = vld [vmem:[%s5860_s1 + $0x5f8] sm:$0xf0]  ;;  %v1814_v52 = vpop.f32.mrf.mxu2  ;;  %v2878_v59 = vor.u32 %v3687_v34, %v2875_v35  ;;  %v3190_v57 = vor.u32 %v3765_v42, %v3187_v51  ;;  %v3115_v12 = vld [vmem:[%s5860_s1 + $0x468] sm:$0xf0]  ;;  %v3777_v35 = vld [vmem:[%s5860_s1 + $0x554] sm:$0xf] }
  0xb9   :  { %2166 = vmatpush.bf16.msrb.mxu1 %v2894_v48  ;;  %v1815_v48 = vadd.f32 %v1814_v52, %v1796_v20  ;;  %v3318_v10 = vor.u32 %v3797_v56, %v3315_v49  ;;  %v3761_v44 = vld [vmem:[%s5860_s1 + $0x4d4] sm:$0xf]  ;;  %v3299_v51 = vld [vmem:[%s5860_s1 + $0x5d8] sm:$0xf0] }
  0xba   :  { %2185 = vmatpush.bf16.msrb.mxu2 %v2958_v47  ;;  %v2814_v47 = vor.u32 %v3671_v30, %v2811_v31  ;;  %v1797_v54 = vpop.f32.mrf.mxu1  ;;  %v3307_v30 = vld [vmem:[%s5860_s1 + $0x5e8] sm:$0xf0]  ;;  %v3246_v31 = vor.u32 %v3779_v4, %v3243_v7  ;;  %v3759_v7 = vld [vmem:[%s5860_s1 + $0x4c4] sm:$0xf] }
  0xbb   :  { %2204 = vmatpush.bf16.msrb.mxu3 %v3022_v53  ;;  %v1833_v53 = vpop.f32.mrf.mxu3  ;;  %v1778_v61 = vpop.f32.mrf.mxu0  ;;  %v3310_v34 = vor.u32 %v3795_v26, %v3307_v30  ;;  %v3099_v4 = vld [vmem:[%s5860_s1 + $0x448] sm:$0xf0] }
  0xbc   :  { %2148 = vmatpush.bf16.msrb.mxu0 %v2822_v21  ;;  %v5374_v16 = vadd.f32 %v1833_v53, %v1815_v48  ;;  %v1798_v20 = vadd.f32 %v1797_v54, %v1778_v61  ;;  %v3179_v21 = vld [vmem:[%s5860_s1 + $0x4e8] sm:$0xf0]  ;;  %v3775_v48 = vld [vmem:[%s5860_s1 + $0x544] sm:$0xf] }
  0xbd   :  { %2167 = vmatpush.bf16.msrb.mxu1 %v2886_v32  ;;  %v3118_v32 = vor.u32 %v3747_v11, %v3115_v12  ;;  %v3227_v53 = vld [vmem:[%s5860_s1 + $0x548] sm:$0xf0]  ;;  %v3773_v11 = vld [vmem:[%s5860_s1 + $0x534] sm:$0xf]  ;;  %v3219_v12 = vld [vmem:[%s5860_s1 + $0x538] sm:$0xf0] }
  0xbe   :  { %2186 = vmatpush.bf16.msrb.mxu2 %v2950_v15  ;;  %v3763_v15 = vld [vmem:[%s5860_s1 + $0x4e4] sm:$0xf]  ;;  %v3163_v54 = vld [vmem:[%s5860_s1 + $0x4c8] sm:$0xf0] }
  0xbf   :  { %2205 = vmatpush.bf16.msrb.mxu3 %v3014_v33  ;;  %v3182_v33 = vor.u32 %v3763_v15, %v3179_v21  ;;  %v3166_v15 = vor.u32 %v3759_v7, %v3163_v54  ;;  %v3757_v21 = vld [vmem:[%s5860_s1 + $0x4b4] sm:$0xf]  ;;  %v3075_v54 = vld [vmem:[%s5860_s1 + $0x418] sm:$0xf0] }
  0xc0   :  { %2149 = vmatpush.bf16.msrb.mxu0 %v2814_v47  ;;  %v1816_v37 = vpop.f32.mrf.mxu2  ;;  %v3793_v47 = vld [vmem:[%s5860_s1 + $0x5d4] sm:$0xf] }
  0xc1   :  { %2168 = vmatpush.bf16.msrb.mxu1 %v2878_v59  ;;  %v1817_v50 = vadd.f32 %v1816_v37, %v1798_v20  ;;  %v3238_v59 = vor.u32 %v3777_v35, %v3235_v36  ;;  %v3222_v36 = vor.u32 %v3773_v11, %v3219_v12  ;;  %v3737_v7 = vld [vmem:[%s5860_s1 + $0x414] sm:$0xf]  ;;  %v3267_v12 = vld [vmem:[%s5860_s1 + $0x598] sm:$0xf0] }
  0xc2   :  { %2187 = vmatpush.bf16.msrb.mxu2 %v2942_v43  ;;  %v3171_v43 = vld [vmem:[%s5860_s1 + $0x4d8] sm:$0xf0]  ;;  %v5411_v49 = vpop.f32.mrf.mxu1  ;;  %v3785_v11 = vld [vmem:[%s5860_s1 + $0x594] sm:$0xf] }
  0xc3   :  { %2206 = vmatpush.bf16.msrb.mxu3 %v3006_v60  ;;  %v1835_v42 = vpop.f32.mrf.mxu3  ;;  %v5409_v56 = vpop.f32.mrf.mxu0  ;;  %v3110_v60 = vor.u32 %v3745_v38, %v3107_v41  ;;  %v3174_v61 = vor.u32 %v3761_v44, %v3171_v43  ;;  %v3771_v38 = vld [vmem:[%s5860_s1 + $0x524] sm:$0xf]  ;;  %v3211_v41 = vld [vmem:[%s5860_s1 + $0x528] sm:$0xf0] }
  0xc4   :  { %2218 = vmatpush.bf16.msra.mxu0 %v3126_v3  ;;  %v5413_v52 = vadd.f32 %v1835_v42, %v1817_v50  ;;  %v3743_v3 = vld [vmem:[%s5860_s1 + $0x444] sm:$0xf]  ;;  %2169 = vmatmul.bf16.vlgmr.msrb.gmra.mxu1 %v4410_v1  ;;  %v3083_v43 = vld [vmem:[%s5860_s1 + $0x428] sm:$0xf0] }
  0xc5   :  { %2237 = vmatpush.bf16.msra.mxu1 %v3190_v57  ;;  %2150 = vmatmul.bf16.vlgmr.msrb.gmra.mxu0 %v4408_v0  ;;  %v3791_v57 = vld [vmem:[%s5860_s1 + $0x5c4] sm:$0xf]  ;;  %v3230_v0 = vor.u32 %v3775_v48, %v3227_v53  ;;  %v3102_v1 = vor.u32 %v3743_v3, %v3099_v4  ;;  %v3214_v48 = vor.u32 %v3771_v38, %v3211_v41  ;;  %v3131_v41 = vld [vmem:[%s5860_s1 + $0x488] sm:$0xf0] }
  0xc6   :  { %2256 = vmatpush.bf16.msra.mxu2 %v3254_v2  ;;  %v3302_v2 = vor.u32 %v3793_v47, %v3299_v51  ;;  %2207 = vmatmul.bf16.vlgmr.msrb.gmra.mxu3 %v4423_v6  ;;  %v3091_v6 = vld [vmem:[%s5860_s1 + $0x438] sm:$0xf0]  ;;  %v3739_v42 = vld [vmem:[%s5860_s1 + $0x424] sm:$0xf]  ;;  %v3147_v51 = vld [vmem:[%s5860_s1 + $0x4a8] sm:$0xf0] }
  0xc7   :  { %2275 = vmatpush.bf16.msra.mxu3 %v3318_v10  ;;  %v3291_v10 = vld [vmem:[%s5860_s1 + $0x5c8] sm:$0xf0]  ;;  %2188 = vmatmul.bf16.vlgmr.msrb.gmra.mxu2 %v4421_v5  ;;  %v3741_v5 = vld [vmem:[%s5860_s1 + $0x434] sm:$0xf]  ;;  %v3755_v47 = vld [vmem:[%s5860_s1 + $0x4a4] sm:$0xf]  ;;  %v3086_v53 = vor.u32 %v3739_v42, %v3083_v43 }
  0xc8   :  { %2219 = vmatpush.bf16.msra.mxu0 %v3118_v32  ;;  %v3294_v20 = vor.u32 %v3791_v57, %v3291_v10  ;;  %v5458_v26 = vpop.f32.mrf.mxu2  ;;  %v3789_v32 = vld [vmem:[%s5860_s1 + $0x5b4] sm:$0xf]  ;;  %v3094_v37 = vor.u32 %v3741_v5, %v3091_v6  ;;  %v3150_v3 = vor.u32 %v3755_v47, %v3147_v51  ;;  %v3767_v5 = vld [vmem:[%s5860_s1 + $0x504] sm:$0xf]  ;;  %v3507_v43 = vld [vmem:[%s5860_s1 + $0x778] sm:$0xf0] }
  0xc9   :  { %2238 = vmatpush.bf16.msra.mxu1 %v3182_v33  ;;  %v3283_v33 = vld [vmem:[%s5860_s1 + $0x5b8] sm:$0xf0]  ;;  %v3753_v57 = vld [vmem:[%s5860_s1 + $0x494] sm:$0xf]  ;;  %v3751_v38 = vld [vmem:[%s5860_s1 + $0x484] sm:$0xf] }
  0xca   :  { %2257 = vmatpush.bf16.msra.mxu2 %v3246_v31  ;;  %v3155_v31 = vld [vmem:[%s5860_s1 + $0x4b8] sm:$0xf0]  ;;  %v5473_v35 = vpop.f32.mrf.mxu1  ;;  %v3286_v50 = vor.u32 %v3789_v32, %v3283_v33  ;;  %v3735_v32 = vld [vmem:[%s5860_s1 + $0x404] sm:$0xf]  ;;  %v3067_v33 = vld [vmem:[%s5860_s1 + $0x408] sm:$0xf0] }
  0xcb   :  { %2276 = vmatpush.bf16.msra.mxu3 %v3310_v34  ;;  %v5460_v30 = vpop.f32.mrf.mxu3  ;;  %v5471_v34 = vpop.f32.mrf.mxu0  ;;  %v3158_v44 = vor.u32 %v3757_v21, %v3155_v31  ;;  %v3078_v21 = vor.u32 %v3737_v7, %v3075_v54  ;;  %v3195_v31 = vld [vmem:[%s5860_s1 + $0x508] sm:$0xf0]  ;;  %v3845_v42 = vld [vmem:[%s5860_s1 + $0x774] sm:$0xf]  ;;  %v3843_v7 = vld [vmem:[%s5860_s1 + $0x764] sm:$0xf] }
  0xcc   :  { %2220 = vmatpush.bf16.msra.mxu0 %v3110_v60  ;;  %v3275_v60 = vld [vmem:[%s5860_s1 + $0x5a8] sm:$0xf0]  ;;  %v3829_v47 = vld [vmem:[%s5860_s1 + $0x6f4] sm:$0xf]  ;;  %v3198_v51 = vor.u32 %v3767_v5, %v3195_v31  ;;  %v3811_v5 = vld [vmem:[%s5860_s1 + $0x664] sm:$0xf] }
  0xcd   :  { %2239 = vmatpush.bf16.msra.mxu1 %v3174_v61  ;;  %v3769_v61 = vld [vmem:[%s5860_s1 + $0x514] sm:$0xf]  ;;  %v3499_v54 = vld [vmem:[%s5860_s1 + $0x768] sm:$0xf0] }
  0xce   :  { %2258 = vmatpush.bf16.msra.mxu2 %v3238_v59  ;;  %v3787_v59 = vld [vmem:[%s5860_s1 + $0x5a4] sm:$0xf]  ;;  %v3435_v31 = vld [vmem:[%s5860_s1 + $0x6e8] sm:$0xf0] }
  0xcf   :  { %2277 = vmatpush.bf16.msra.mxu3 %v3302_v2  ;;  %v3203_v2 = vld [vmem:[%s5860_s1 + $0x518] sm:$0xf0]  ;;  %v3278_v4 = vor.u32 %v3787_v59, %v3275_v60  ;;  %v3070_v59 = vor.u32 %v3735_v32, %v3067_v33  ;;  %v3859_v32 = vld [vmem:[%s5860_s1 + $0x7e4] sm:$0xf]  ;;  %v3563_v33 = vld [vmem:[%s5860_s1 + $0x7e8] sm:$0xf0] }
  0xd0   :  { %2221 = vmatpush.bf16.msra.mxu0 %v3102_v1  ;;  %v5514_v10 = vpop.f32.mrf.mxu2  ;;  %v3139_v1 = vld [vmem:[%s5860_s1 + $0x498] sm:$0xf0]  ;;  %v3206_v6 = vor.u32 %v3769_v61, %v3203_v2 }
  0xd1   :  { %2240 = vmatpush.bf16.msra.mxu1 %v3166_v15  ;;  %v3571_v60 = vld [vmem:[%s5860_s1 + $0x7f8] sm:$0xf0] }
  0xd2   :  { %2259 = vmatpush.bf16.msra.mxu2 %v3230_v0 }
  0xd3   :  { %2278 = vmatpush.bf16.msra.mxu3 %v3294_v20  ;;  %v5516_v0 = vpop.f32.mrf.mxu3  ;;  %v5527_v15 = vpop.f32.mrf.mxu0 }
  0xd4   :  { %2222 = vmatpush.bf16.msra.mxu0 %v3094_v37  ;;  %v5529_v20 = vpop.f32.mrf.mxu1  ;;  %v3270_v37 = vor.u32 %v3785_v11, %v3267_v12  ;;  %2174 = vmatmul.bf16.gmra.mxu1 %v4542_v9  ;;  %v3379_v9 = vld [vmem:[%s5860_s1 + $0x678] sm:$0xf0] }
  0xd5   :  { %2241 = vmatpush.bf16.msra.mxu1 %v3158_v44  ;;  %v3783_v44 = vld [vmem:[%s5860_s1 + $0x584] sm:$0xf]  ;;  %2155 = vmatmul.bf16.gmra.mxu0 %v4540_v8  ;;  %v3813_v8 = vld [vmem:[%s5860_s1 + $0x674] sm:$0xf] }
  0xd6   :  { %2260 = vmatpush.bf16.msra.mxu2 %v3222_v36  ;;  %v3142_v36 = vor.u32 %v3753_v57, %v3139_v1  ;;  %2212 = vmatmul.bf16.gmra.mxu3 %v4555_v14  ;;  %v3861_v14 = vld [vmem:[%s5860_s1 + $0x7f4] sm:$0xf] }
  0xd7   :  { %2279 = vmatpush.bf16.msra.mxu3 %v3286_v50  ;;  %v3259_v50 = vld [vmem:[%s5860_s1 + $0x588] sm:$0xf0]  ;;  %2193 = vmatmul.bf16.gmra.mxu2 %v4553_v13  ;;  %v3443_v13 = vld [vmem:[%s5860_s1 + $0x6f8] sm:$0xf0]  ;;  %v3574_v12 = vor.u32 %v3861_v14, %v3571_v60 }
  0xd8   :  { %2223 = vmatpush.bf16.msra.mxu0 %v3086_v53  ;;  %v3262_v53 = vor.u32 %v3783_v44, %v3259_v50  ;;  %v5583_v61 = vpop.f32.mrf.mxu2  ;;  %v3446_v11 = vor.u32 %v3829_v47, %v3443_v13  ;;  %v3841_v44 = vld [vmem:[%s5860_s1 + $0x754] sm:$0xf]  ;;  %v3491_v50 = vld [vmem:[%s5860_s1 + $0x758] sm:$0xf0] }
  0xd9   :  { %2242 = vmatpush.bf16.msra.mxu1 %v3150_v3  ;;  %v3510_v3 = vor.u32 %v3845_v42, %v3507_v43  ;;  %v3809_v42 = vld [vmem:[%s5860_s1 + $0x654] sm:$0xf]  ;;  %v3363_v43 = vld [vmem:[%s5860_s1 + $0x658] sm:$0xf0] }
  0xda   :  { %2261 = vmatpush.bf16.msra.mxu2 %v3214_v48  ;;  %v3134_v48 = vor.u32 %v3751_v38, %v3131_v41  ;;  %v3566_v41 = vor.u32 %v3859_v32, %v3563_v33  ;;  %v3555_v13 = vld [vmem:[%s5860_s1 + $0x7d8] sm:$0xf0]  ;;  %v3837_v32 = vld [vmem:[%s5860_s1 + $0x734] sm:$0xf] }
  0xdb   :  { %2280 = vmatpush.bf16.msra.mxu3 %v3278_v4  ;;  %v5585_v2 = vpop.f32.mrf.mxu3  ;;  %v3382_v4 = vor.u32 %v3813_v8, %v3379_v9  ;;  %v5593_v57 = vpop.f32.mrf.mxu0  ;;  %v3825_v8 = vld [vmem:[%s5860_s1 + $0x6d4] sm:$0xf]  ;;  %v3475_v33 = vld [vmem:[%s5860_s1 + $0x738] sm:$0xf0] }
  0xdc   :  { %2224 = vmatpush.bf16.msra.mxu0 %v3078_v21  ;;  %v5595_v1 = vpop.f32.mrf.mxu1  ;;  %v3827_v21 = vld [vmem:[%s5860_s1 + $0x6e4] sm:$0xf] }
  0xdd   :  { %2243 = vmatpush.bf16.msra.mxu1 %v3142_v36  ;;  %v3502_v36 = vor.u32 %v3843_v7, %v3499_v54  ;;  %v3438_v38 = vor.u32 %v3827_v21, %v3435_v31  ;;  %v3855_v21 = vld [vmem:[%s5860_s1 + $0x7c4] sm:$0xf]  ;;  %v3547_v31 = vld [vmem:[%s5860_s1 + $0x7c8] sm:$0xf0] }
  0xde   :  { %2262 = vmatpush.bf16.msra.mxu2 %v3206_v6  ;;  %v3371_v6 = vld [vmem:[%s5860_s1 + $0x668] sm:$0xf0] }
  0xdf   :  { %2281 = vmatpush.bf16.msra.mxu3 %v3270_v37  ;;  %v3374_v37 = vor.u32 %v3811_v5, %v3371_v6  ;;  %v3823_v5 = vld [vmem:[%s5860_s1 + $0x6c4] sm:$0xf]  ;;  %v3419_v6 = vld [vmem:[%s5860_s1 + $0x6c8] sm:$0xf0] }
  0xe0   :  { %2225 = vmatpush.bf16.msra.mxu0 %v3070_v59  ;;  %v5630_v9 = vpop.f32.mrf.mxu2  ;;  %v3857_v59 = vld [vmem:[%s5860_s1 + $0x7d4] sm:$0xf] }
  0xe1   :  { %2244 = vmatpush.bf16.msra.mxu1 %v3134_v48  ;;  %v3494_v48 = vor.u32 %v3841_v44, %v3491_v50  ;;  %v3558_v54 = vor.u32 %v3857_v59, %v3555_v13  ;;  %v3411_v50 = vld [vmem:[%s5860_s1 + $0x6b8] sm:$0xf0]  ;;  %v3478_v59 = vor.u32 %v3837_v32, %v3475_v33 }
  0xe2   :  { %2263 = vmatpush.bf16.msra.mxu2 %v3198_v51  ;;  %v3427_v51 = vld [vmem:[%s5860_s1 + $0x6d8] sm:$0xf0] }
  0xe3   :  { %2282 = vmatpush.bf16.msra.mxu3 %v3262_v53  ;;  %v5632_v47 = vpop.f32.mrf.mxu3  ;;  %v5643_v14 = vpop.f32.mrf.mxu0  ;;  %v3366_v53 = vor.u32 %v3809_v42, %v3363_v43  ;;  %v3430_v7 = vor.u32 %v3825_v8, %v3427_v51  ;;  %v3853_v42 = vld [vmem:[%s5860_s1 + $0x7b4] sm:$0xf]  ;;  %v3539_v43 = vld [vmem:[%s5860_s1 + $0x7b8] sm:$0xf0] }
  0xe4   :  { %2294 = vmatpush.bf16.msrb.mxu0 %v3382_v4  ;;  %v5645_v60 = vpop.f32.mrf.mxu1  ;;  %v3483_v4 = vld [vmem:[%s5860_s1 + $0x748] sm:$0xf0]  ;;  %2245 = vmatmul.bf16.vlgmr.msra.gmra.mxu1 %v4680_v24 }
  0xe5   :  { %2313 = vmatpush.bf16.msrb.mxu1 %v3446_v11  ;;  %v3807_v11 = vld [vmem:[%s5860_s1 + $0x644] sm:$0xf]  ;;  %2226 = vmatmul.bf16.vlgmr.msra.gmra.mxu0 %v4678_v23 }
  0xe6   :  { %2332 = vmatpush.bf16.msrb.mxu2 %v3510_v3  ;;  %v3839_v3 = vld [vmem:[%s5860_s1 + $0x744] sm:$0xf]  ;;  %2283 = vmatmul.bf16.vlgmr.msra.gmra.mxu3 %v4693_v29  ;;  %v3347_v29 = vld [vmem:[%s5860_s1 + $0x638] sm:$0xf0] }
  0xe7   :  { %2351 = vmatpush.bf16.msrb.mxu3 %v3574_v12  ;;  %v3355_v12 = vld [vmem:[%s5860_s1 + $0x648] sm:$0xf0]  ;;  %2264 = vmatmul.bf16.vlgmr.msra.gmra.mxu2 %v4691_v28  ;;  %v3486_v23 = vor.u32 %v3839_v3, %v3483_v4  ;;  %v3805_v28 = vld [vmem:[%s5860_s1 + $0x634] sm:$0xf]  ;;  %v1848_v3 = vadd.f32 %v5409_v56, %v5255_v27  ;;  %v3851_v56 = vld [vmem:[%s5860_s1 + $0x7a4] sm:$0xf] }
  0xe8   :  { %2295 = vmatpush.bf16.msrb.mxu0 %v3374_v37  ;;  %v3358_v24 = vor.u32 %v3807_v11, %v3355_v12  ;;  %v3550_v37 = vor.u32 %v3855_v21, %v3547_v31  ;;  %v3350_v13 = vor.u32 %v3805_v28, %v3347_v29  ;;  %v3339_v11 = vld [vmem:[%s5860_s1 + $0x628] sm:$0xf0]  ;;  %v3819_v12 = vld [vmem:[%s5860_s1 + $0x6a4] sm:$0xf]  ;;  %v3833_v31 = vld [vmem:[%s5860_s1 + $0x714] sm:$0xf] }
  0xe9   :  { %2314 = vmatpush.bf16.msrb.mxu1 %v3438_v38  ;;  %v3821_v38 = vld [vmem:[%s5860_s1 + $0x6b4] sm:$0xf]  ;;  %v3403_v27 = vld [vmem:[%s5860_s1 + $0x6a8] sm:$0xf0] }
  0xea   :  { %2333 = vmatpush.bf16.msrb.mxu2 %v3502_v36  ;;  %v3422_v36 = vor.u32 %v3823_v5, %v3419_v6  ;;  %v3414_v4 = vor.u32 %v3821_v38, %v3411_v50  ;;  %v3531_v5 = vld [vmem:[%s5860_s1 + $0x7a8] sm:$0xf0]  ;;  %v3406_v32 = vor.u32 %v3819_v12, %v3403_v27  ;;  %v3817_v28 = vld [vmem:[%s5860_s1 + $0x694] sm:$0xf]  ;;  %v3847_v27 = vld [vmem:[%s5860_s1 + $0x784] sm:$0xf] }
  0xeb   :  { %2352 = vmatpush.bf16.msrb.mxu3 %v3566_v41  ;;  %v5690_v41 = vpop.f32.mrf.mxu2  ;;  %v5692_v44 = vpop.f32.mrf.mxu3  ;;  %v3534_v33 = vor.u32 %v3851_v56, %v3531_v5  ;;  %v3849_v50 = vld [vmem:[%s5860_s1 + $0x794] sm:$0xf]  ;;  %v3387_v12 = vld [vmem:[%s5860_s1 + $0x688] sm:$0xf0] }
  0xec   :  { %2296 = vmatpush.bf16.msrb.mxu0 %v3366_v53  ;;  %v5703_v8 = vpop.f32.mrf.mxu0  ;;  %v5705_v51 = vpop.f32.mrf.mxu1  ;;  %v3467_v53 = vld [vmem:[%s5860_s1 + $0x728] sm:$0xf0] }
  0xed   :  { %2315 = vmatpush.bf16.msrb.mxu1 %v3430_v7  ;;  %v3542_v7 = vor.u32 %v3853_v42, %v3539_v43  ;;  %v3523_v42 = vld [vmem:[%s5860_s1 + $0x798] sm:$0xf0]  ;;  %v3515_v56 = vld [vmem:[%s5860_s1 + $0x788] sm:$0xf0] }
  0xee   :  { %2334 = vmatpush.bf16.msrb.mxu2 %v3494_v48  ;;  %v3835_v48 = vld [vmem:[%s5860_s1 + $0x724] sm:$0xf] }
  0xef   :  { %2353 = vmatpush.bf16.msrb.mxu3 %v3558_v54  ;;  %v3803_v54 = vld [vmem:[%s5860_s1 + $0x624] sm:$0xf]  ;;  %v3470_v6 = vor.u32 %v3835_v48, %v3467_v53  ;;  %v1850_v48 = vadd.f32 %v5471_v34, %v5308_v19  ;;  %v3323_v34 = vld [vmem:[%s5860_s1 + $0x608] sm:$0xf0] }
  0xf0   :  { %2297 = vmatpush.bf16.msrb.mxu0 %v3358_v24  ;;  %v3342_v21 = vor.u32 %v3803_v54, %v3339_v11  ;;  %v1867_v24 = vadd.f32 %v5411_v49, %v1848_v3  ;;  %v3395_v49 = vld [vmem:[%s5860_s1 + $0x698] sm:$0xf0]  ;;  %v3526_v54 = vor.u32 %v3849_v50, %v3523_v42  ;;  %v3799_v19 = vld [vmem:[%s5860_s1 + $0x604] sm:$0xf] }
  0xf1   :  { %2316 = vmatpush.bf16.msrb.mxu1 %v3422_v36  ;;  %v3801_v36 = vld [vmem:[%s5860_s1 + $0x614] sm:$0xf]  ;;  %v3815_v11 = vld [vmem:[%s5860_s1 + $0x684] sm:$0xf] }
  0xf2   :  { %2335 = vmatpush.bf16.msrb.mxu2 %v3486_v23  ;;  %v3459_v23 = vld [vmem:[%s5860_s1 + $0x718] sm:$0xf0]  ;;  %v1886_v43 = vadd.f32 %v5458_v26, %v1867_v24  ;;  %v3398_v26 = vor.u32 %v3817_v28, %v3395_v49 }
  0xf3   :  { %2354 = vmatpush.bf16.msrb.mxu3 %v3550_v37  ;;  %v3331_v37 = vld [vmem:[%s5860_s1 + $0x618] sm:$0xf0]  ;;  %v5749_v29 = vpop.f32.mrf.mxu2  ;;  %v5751_v38 = vpop.f32.mrf.mxu3  ;;  %v3462_v53 = vor.u32 %v3833_v31, %v3459_v23  ;;  %v3390_v31 = vor.u32 %v3815_v11, %v3387_v12  ;;  %v3518_v23 = vor.u32 %v3847_v27, %v3515_v56 }
  0xf4   :  { %2298 = vmatpush.bf16.msrb.mxu0 %v3350_v13  ;;  %v5765_v13 = vpop.f32.mrf.mxu1  ;;  %v3334_v3 = vor.u32 %v3801_v36, %v3331_v37  ;;  %2250 = vmatmul.bf16.gmra.mxu1 %v4812_v40  ;;  %v1905_v5 = vadd.f32 %v5460_v30, %v1886_v43 }
  0xf5   :  { %2317 = vmatpush.bf16.msrb.mxu1 %v3414_v4  ;;  %v3831_v4 = vld [vmem:[%s5860_s1 + $0x704] sm:$0xf]  ;;  %2231 = vmatmul.bf16.gmra.mxu0 %v4810_v39  ;;  %v1869_v39 = vadd.f32 %v5473_v35, %v1850_v48 }
  0xf6   :  { %2336 = vmatpush.bf16.msrb.mxu2 %v3478_v59  ;;  %v5763_v59 = vpop.f32.mrf.mxu0  ;;  %2288 = vmatmul.bf16.gmra.mxu3 %v4825_v46  ;;  %v1853_v46 = vadd.f32 %v5527_v15, %v5374_v16  ;;  %v1855_v15 = vadd.f32 %v5593_v57, %v5413_v52 }
  0xf7   :  { %2355 = vmatpush.bf16.msrb.mxu3 %v3542_v7  ;;  %v3451_v7 = vld [vmem:[%s5860_s1 + $0x708] sm:$0xf0]  ;;  %2269 = vmatmul.bf16.gmra.mxu2 %v4823_v45  ;;  %v1888_v30 = vadd.f32 %v5514_v10, %v1869_v39 }
  0xf8   :  { %2299 = vmatpush.bf16.msrb.mxu0 %v3342_v21  ;;  %v3454_v40 = vor.u32 %v3831_v4, %v3451_v7  ;;  %v1924_v21 = vadd.f32 %v5643_v14, %v1905_v5  ;;  %v1872_v37 = vadd.f32 %v5529_v20, %v1853_v46  ;;  %v1874_v52 = vadd.f32 %v5595_v1, %v1855_v15 }
  0xf9   :  { %2318 = vmatpush.bf16.msrb.mxu1 %v3406_v32  ;;  %v1907_v14 = vadd.f32 %v5516_v0, %v1888_v30 }
  0xfa   :  { %2337 = vmatpush.bf16.msrb.mxu2 %v3470_v6  ;;  %v3326_v6 = vor.u32 %v3799_v19, %v3323_v34  ;;  %v1943_v35 = vadd.f32 %v5645_v60, %v1924_v21  ;;  %v1891_v50 = vadd.f32 %v5583_v61, %v1872_v37  ;;  %v5822_v61 = vld [vmem:[%s5862_s2] sm:$0x3] }
  0xfb   :  { %2356 = vmatpush.bf16.msrb.mxu3 %v3534_v33  ;;  %v1966_v24 = vpop.f32.mrf.mxu2  ;;  %v1985_v32 = vpop.f32.mrf.mxu3  ;;  %v1926_v28 = vadd.f32 %v5703_v8, %v1907_v14 }
  0xfc   :  { %2300 = vmatpush.bf16.msrb.mxu0 %v3334_v3  ;;  %v1949_v45 = vpop.f32.mrf.mxu1  ;;  %v1962_v36 = vadd.f32 %v5690_v41, %v1943_v35  ;;  %v1910_v20 = vadd.f32 %v5585_v2, %v1891_v50  ;;  %v1893_v2 = vadd.f32 %v5630_v9, %v1874_v52 }
  0xfd   :  { %2319 = vmatpush.bf16.msrb.mxu1 %v3398_v26  ;;  %v1945_v60 = vadd.f32 %v5705_v51, %v1926_v28 }
  0xfe   :  { %2338 = vmatpush.bf16.msrb.mxu2 %v3462_v53  ;;  %v1930_v33 = vpop.f32.mrf.mxu0  ;;  %v1981_v42 = vadd.f32 %v5692_v44, %v1962_v36  ;;  %v1929_v57 = vadd.f32 %v5763_v59, %v1910_v20  ;;  %v1912_v1 = vadd.f32 %v5632_v47, %v1893_v2 }
  0xff   :  { %2357 = vmatpush.bf16.msrb.mxu3 %v3526_v54  ;;  %v1964_v41 = vadd.f32 %v5749_v29, %v1945_v60 }
 0x100   :  { %2301 = vmatpush.bf16.msrb.mxu0 %v3326_v6  ;;  %v1948_v48 = vadd.f32 %v5765_v13, %v1929_v57  ;;  %v1931_v7 = vadd.f32 %v1930_v33, %v1912_v1 }
 0x101   :  { %2320 = vmatpush.bf16.msrb.mxu1 %v3390_v31  ;;  %v1983_v8 = vadd.f32 %v5751_v38, %v1964_v41 }
 0x102   :  { %2339 = vmatpush.bf16.msrb.mxu2 %v3454_v40  ;;  %v1967_v4 = vadd.f32 %v1966_v24, %v1948_v48  ;;  %v1950_v12 = vadd.f32 %v1949_v45, %v1931_v7 }
 0x103   :  { %2358 = vmatpush.bf16.msrb.mxu3 %v3518_v23  ;;  %v1968_v10 = vpop.f32.mrf.mxu2  ;;  %v1987_v49 = vpop.f32.mrf.mxu3 }
 0x104   :  { %v2018_v16 = vpop.f32.mrf.mxu1  ;;  %2321 = vmatmul.bf16.vlgmr.msrb.gmra.mxu1 %v4956_v18  ;;  %v1986_v54 = vadd.f32 %v1985_v32, %v1967_v4  ;;  %v1969_v47 = vadd.f32 %v1968_v10, %v1950_v12 }
 0x105   :  { %2302 = vmatmul.bf16.vlgmr.msrb.gmra.mxu0 %v4954_v17 }
 0x106   :  { %v1999_v43 = vpop.f32.mrf.mxu0  ;;  %2359 = vmatmul.bf16.vlgmr.msrb.gmra.mxu3 %v4969_v25  ;;  %v1988_v6 = vadd.f32 %v1987_v49, %v1969_v47 }
 0x107   :  { %v2000_v0 = vadd.f32 %v1999_v43, %v1981_v42  ;;  %2340 = vmatmul.bf16.vlgmr.msrb.gmra.mxu2 %v4967_v22  ;;  %v2399_v22 = vperm.slane %v5822_v61, 0 }
 0x109   :  { %v2019_v17 = vadd.f32 %v2018_v16, %v2000_v0 }
 0x10b   :  { %v2037_v44 = vpop.f32.mrf.mxu2  ;;  %v2056_v18 = vpop.f32.mrf.mxu3 }
 0x10c   :  { %v2038_v51 = vadd.f32 %v2037_v44, %v2019_v17  ;;  %v2020_v29 = vpop.f32.mrf.mxu1 }
 0x10e   :  { %v2001_v25 = vpop.f32.mrf.mxu0  ;;  %v2057_v53 = vadd.f32 %v2056_v18, %v2038_v51 }
 0x10f   :  { %v2002_v3 = vadd.f32 %v2001_v25, %v1983_v8 }
 0x110   :  { %v2403_v59 = vadd.f32 %v2399_v22, %v2057_v53 }
 0x111   :  { %v2021_v9 = vadd.f32 %v2020_v29, %v2002_v3 }
 0x112   :  { %2411 = vst [vmem:[%s5863_s3] sm:$0xff] %v2403_v59 }
 0x113   :  { %v2039_v38 = vpop.f32.mrf.mxu2  ;;  %v2058_v26 = vpop.f32.mrf.mxu3 }
 0x114   :  { %v2040_v19 = vadd.f32 %v2039_v38, %v2021_v9  ;;  %v2023_v11 = vpop.f32.mrf.mxu1  ;;  %2326 = vmatmul.bf16.gmra.mxu1 %v5088_v58 }
 0x115   :  { %2307 = vmatmul.bf16.gmra.mxu0 %v5086_v55 }
 0x116   :  { %v2004_v34 = vpop.f32.mrf.mxu0  ;;  %v2059_v13 = vadd.f32 %v2058_v26, %v2040_v19  ;;  %2364 = vmatmul.bf16.gmra.mxu3 %v5101_v63 }
 0x117   :  { %v2005_v27 = vadd.f32 %v2004_v34, %v1986_v54  ;;  %2345 = vmatmul.bf16.gmra.mxu2 %v5099_v62 }
 0x118   :  { %v2405_v56 = vadd.f32 %v2399_v22, %v2059_v13 }
 0x119   :  { %v2024_v5 = vadd.f32 %v2023_v11, %v2005_v27 }
 0x11a   :  { %2413 = vst [vmem:[%s5863_s3 + $0x10] sm:$0xff] %v2405_v56 }
 0x11b   :  { %v2042_v39 = vpop.f32.mrf.mxu2  ;;  %v2061_v40 = vpop.f32.mrf.mxu3 }
 0x11c   :  { %v2043_v21 = vadd.f32 %v2042_v39, %v2024_v5  ;;  %v2025_v23 = vpop.f32.mrf.mxu1 }
 0x11e   :  { %v2006_v31 = vpop.f32.mrf.mxu0  ;;  %v2062_v55 = vadd.f32 %v2061_v40, %v2043_v21 }
 0x11f   :  { %v2007_v24 = vadd.f32 %v2006_v31, %v1988_v6 }
 0x120   :  { %v2407_v58 = vadd.f32 %v2399_v22, %v2062_v55 }
 0x121   :  { %v2026_v62 = vadd.f32 %v2025_v23, %v2007_v24 }
 0x122   :  { %2415 = vst [vmem:[%s5863_s3 + $0x20] sm:$0xff] %v2407_v58 }
 0x123   :  { %v2044_v63 = vpop.f32.mrf.mxu2  ;;  %v2063_v32 = vpop.f32.mrf.mxu3 }
 0x124   :  { %v2045_v30 = vadd.f32 %v2044_v63, %v2026_v62  ;;  %v2094_v45 = vpop.f32.mrf.mxu1 }
 0x126   :  { %v2075_v33 = vpop.f32.mrf.mxu0  ;;  %v2064_v35 = vadd.f32 %v2063_v32, %v2045_v30 }
 0x127   :  { %v2095_v46 = vadd.f32 %v2094_v45, %v2075_v33 }
 0x128   :  { %v2409_v14 = vadd.f32 %v2399_v22, %v2064_v35 }
 0x12a   :  { %2417 = vst [vmem:[%s5863_s3 + $0x30] sm:$0xff] %v2409_v14 }
 0x12b   :  { %v2113_v36 = vpop.f32.mrf.mxu2  ;;  %v2132_v37 = vpop.f32.mrf.mxu3 }
 0x12c   :  { %v2114_v28 = vadd.f32 %v2113_v36, %v2095_v46  ;;  %v2096_v49 = vpop.f32.mrf.mxu1 }
 0x12e   :  { %v2077_v10 = vpop.f32.mrf.mxu0  ;;  %v2133_v42 = vadd.f32 %v2132_v37, %v2114_v28 }
 0x12f   :  { %v2097_v50 = vadd.f32 %v2096_v49, %v2077_v10 }
 0x133   :  { %v2115_v43 = vpop.f32.mrf.mxu2  ;;  %v2134_v16 = vpop.f32.mrf.mxu3 }
 0x134   :  { %v2116_v15 = vadd.f32 %v2115_v43, %v2097_v50  ;;  %v2099_v0 = vpop.f32.mrf.mxu1 }
 0x136   :  { %v2080_v60 = vpop.f32.mrf.mxu0  ;;  %v2135_v41 = vadd.f32 %v2134_v16, %v2116_v15 }
 0x137   :  { %v2100_v20 = vadd.f32 %v2099_v0, %v2080_v60 }
 0x13b   :  { %v2118_v52 = vpop.f32.mrf.mxu2  ;;  %v2137_v57 = vpop.f32.mrf.mxu3 }
 0x13c   :  { %v2119_v17 = vadd.f32 %v2118_v52, %v2100_v20  ;;  %v2101_v18 = vpop.f32.mrf.mxu1 }
 0x13e   :  { %v2082_v44 = vpop.f32.mrf.mxu0  ;;  %v2138_v8 = vadd.f32 %v2137_v57, %v2119_v17 }
 0x13f   :  { %v2102_v2 = vadd.f32 %v2101_v18, %v2082_v44 }
 0x143   :  { %v2120_v51 = vpop.f32.mrf.mxu2  ;;  %v2139_v22 = vpop.f32.mrf.mxu3 }
 0x144   :  { %v2121_v25 = vadd.f32 %v2120_v51, %v2102_v2  ;;  %v2170_v48 = vpop.f32.mrf.mxu1 }
 0x146   :  { %v2151_v29 = vpop.f32.mrf.mxu0  ;;  %v2140_v53 = vadd.f32 %v2139_v22, %v2121_v25 }
 0x147   :  { %v2152_v6 = vadd.f32 %v2151_v29, %v2133_v42 }
 0x149   :  { %v2171_v21 = vadd.f32 %v2170_v48, %v2152_v6  ;;  %v2400_v48 = vperm.slane %v5822_v61, 1 }
 0x14b   :  { %v2189_v3 = vpop.f32.mrf.mxu2  ;;  %v2208_v1 = vpop.f32.mrf.mxu3 }
 0x14c   :  { %v2172_v59 = vpop.f32.mrf.mxu1  ;;  %v2190_v55 = vadd.f32 %v2189_v3, %v2171_v21 }
 0x14e   :  { %v2153_v4 = vpop.f32.mrf.mxu0  ;;  %v2209_v63 = vadd.f32 %v2208_v1, %v2190_v55 }
 0x14f   :  { %v2154_v62 = vadd.f32 %v2153_v4, %v2135_v41 }
 0x151   :  { %v2173_v32 = vadd.f32 %v2172_v59, %v2154_v62 }
 0x153   :  { %v2191_v7 = vpop.f32.mrf.mxu2  ;;  %v2210_v9 = vpop.f32.mrf.mxu3 }
 0x154   :  { %v2175_v26 = vpop.f32.mrf.mxu1  ;;  %v2192_v46 = vadd.f32 %v2191_v7, %v2173_v32 }
 0x156   :  { %v2156_v38 = vpop.f32.mrf.mxu0  ;;  %v2211_v28 = vadd.f32 %v2210_v9, %v2192_v46 }
 0x157   :  { %v2157_v36 = vadd.f32 %v2156_v38, %v2138_v8 }
 0x159   :  { %v2176_v49 = vadd.f32 %v2175_v26, %v2157_v36 }
 0x15b   :  { %v2194_v54 = vpop.f32.mrf.mxu2  ;;  %v2213_v19 = vpop.f32.mrf.mxu3 }
 0x15c   :  { %v2177_v11 = vpop.f32.mrf.mxu1  ;;  %v2195_v16 = vadd.f32 %v2194_v54, %v2176_v49 }
 0x15e   :  { %v2158_v34 = vpop.f32.mrf.mxu0  ;;  %v2214_v57 = vadd.f32 %v2213_v19, %v2195_v16 }
 0x15f   :  { %v2159_v20 = vadd.f32 %v2158_v34, %v2140_v53 }
 0x161   :  { %v2178_v44 = vadd.f32 %v2177_v11, %v2159_v20 }
 0x163   :  { %v2196_v12 = vpop.f32.mrf.mxu2  ;;  %v2215_v13 = vpop.f32.mrf.mxu3 }
 0x164   :  { %v2246_v47 = vpop.f32.mrf.mxu1  ;;  %v2197_v22 = vadd.f32 %v2196_v12, %v2178_v44 }
 0x166   :  { %v2227_v27 = vpop.f32.mrf.mxu0  ;;  %v2216_v53 = vadd.f32 %v2215_v13, %v2197_v22 }
 0x167   :  { %v2228_v30 = vadd.f32 %v2227_v27, %v2209_v63 }
 0x169   :  { %v2247_v37 = vadd.f32 %v2246_v47, %v2228_v30 }
 0x16b   :  { %v2265_v56 = vpop.f32.mrf.mxu2  ;;  %v2284_v5 = vpop.f32.mrf.mxu3 }
 0x16c   :  { %v2248_v40 = vpop.f32.mrf.mxu1  ;;  %v2266_v10 = vadd.f32 %v2265_v56, %v2247_v37 }
 0x16e   :  { %v2229_v39 = vpop.f32.mrf.mxu0  ;;  %v2285_v15 = vadd.f32 %v2284_v5, %v2266_v10 }
 0x16f   :  { %v2230_v50 = vadd.f32 %v2229_v39, %v2211_v28 }
 0x171   :  { %v2249_v41 = vadd.f32 %v2248_v40, %v2230_v50 }
 0x173   :  { %v2267_v31 = vpop.f32.mrf.mxu2  ;;  %v2286_v23 = vpop.f32.mrf.mxu3 }
 0x174   :  { %v2251_v58 = vpop.f32.mrf.mxu1  ;;  %v2268_v17 = vadd.f32 %v2267_v31, %v2249_v41 }
 0x176   :  { %v2232_v24 = vpop.f32.mrf.mxu0  ;;  %v2287_v25 = vadd.f32 %v2286_v23, %v2268_v17 }
 0x177   :  { %v2233_v18 = vadd.f32 %v2232_v24, %v2214_v57 }
 0x179   :  { %v2252_v4 = vadd.f32 %v2251_v58, %v2233_v18 }
 0x17b   :  { %v2270_v33 = vpop.f32.mrf.mxu2  ;;  %v2289_v45 = vpop.f32.mrf.mxu3 }
 0x17c   :  { %v2253_v14 = vpop.f32.mrf.mxu1  ;;  %v2271_v9 = vadd.f32 %v2270_v33, %v2252_v4 }
 0x17e   :  { %v2234_v35 = vpop.f32.mrf.mxu0  ;;  %v2290_v11 = vadd.f32 %v2289_v45, %v2271_v9 }
 0x17f   :  { %v2235_v26 = vadd.f32 %v2234_v35, %v2216_v53 }
 0x181   :  { %v2254_v61 = vadd.f32 %v2253_v14, %v2235_v26 }
 0x183   :  { %v2272_v42 = vpop.f32.mrf.mxu2  ;;  %v2291_v43 = vpop.f32.mrf.mxu3 }
 0x184   :  { %v2322_v0 = vpop.f32.mrf.mxu1  ;;  %v2273_v39 = vadd.f32 %v2272_v42, %v2254_v61 }
 0x186   :  { %v2303_v60 = vpop.f32.mrf.mxu0  ;;  %v2292_v31 = vadd.f32 %v2291_v43, %v2273_v39 }
 0x187   :  { %v2304_v52 = vadd.f32 %v2303_v60, %v2285_v15 }
 0x189   :  { %v2323_v2 = vadd.f32 %v2322_v0, %v2304_v52 }
 0x18b   :  { %v2341_v8 = vpop.f32.mrf.mxu2  ;;  %v2360_v51 = vpop.f32.mrf.mxu3 }
 0x18c   :  { %v2342_v29 = vadd.f32 %v2341_v8, %v2323_v2  ;;  %v2324_v1 = vpop.f32.mrf.mxu1 }
 0x18e   :  { %v2305_v3 = vpop.f32.mrf.mxu0  ;;  %v2361_v59 = vadd.f32 %v2360_v51, %v2342_v29 }
 0x18f   :  { %v2306_v7 = vadd.f32 %v2305_v3, %v2287_v25 }
 0x190   :  { %v2404_v38 = vadd.f32 %v2400_v48, %v2361_v59 }
 0x191   :  { %v2325_v54 = vadd.f32 %v2324_v1, %v2306_v7 }
 0x192   :  { %2412 = vst [vmem:[%s5863_s3 + $0x8] sm:$0xff] %v2404_v38 }
 0x193   :  { %v2343_v19 = vpop.f32.mrf.mxu2  ;;  %v2362_v34 = vpop.f32.mrf.mxu3 }
 0x194   :  { %v2344_v12 = vadd.f32 %v2343_v19, %v2325_v54  ;;  %v2327_v5 = vpop.f32.mrf.mxu1 }
 0x196   :  { %v2308_v27 = vpop.f32.mrf.mxu0  ;;  %v2363_v47 = vadd.f32 %v2362_v34, %v2344_v12 }
 0x197   :  { %v2309_v56 = vadd.f32 %v2308_v27, %v2290_v11 }
 0x198   :  { %v2406_v40 = vadd.f32 %v2400_v48, %v2363_v47 }
 0x199   :  { %v2328_v13 = vadd.f32 %v2327_v5, %v2309_v56 }
 0x19a   :  { %2414 = vst [vmem:[%s5863_s3 + $0x18] sm:$0xff] %v2406_v40 }
 0x19b   :  { %v2346_v6 = vpop.f32.mrf.mxu2  ;;  %v2365_v21 = vpop.f32.mrf.mxu3 }
 0x19c   :  { %v2347_v23 = vadd.f32 %v2346_v6, %v2328_v13  ;;  %v2329_v63 = vpop.f32.mrf.mxu1 }
 0x19e   :  { %v2310_v55 = vpop.f32.mrf.mxu0  ;;  %v2366_v24 = vadd.f32 %v2365_v21, %v2347_v23 }
 0x19f   :  { %v2311_v58 = vadd.f32 %v2310_v55, %v2292_v31 }
 0x1a0   :  { %v2408_v62 = vadd.f32 %v2400_v48, %v2366_v24 }
 0x1a1   :  { %v2330_v32 = vadd.f32 %v2329_v63, %v2311_v58 }
 0x1a2   :  { %2416 = vst [vmem:[%s5863_s3 + $0x28] sm:$0xff] %v2408_v62 }
 0x1a3   :  { %v2348_v30 = vpop.f32.mrf.mxu2  ;;  %v2367_v45 = vpop.f32.mrf.mxu3 }
 0x1a4   :  { %v2349_v33 = vadd.f32 %v2348_v30, %v2330_v32 }
 0x1a6   :  { %v2368_v46 = vadd.f32 %v2367_v45, %v2349_v33 }
 0x1a8   :  { %v2410_v35 = vadd.f32 %v2400_v48, %v2368_v46 }
 0x1aa   :  { %2418 = vst [vmem:[%s5863_s3 + $0x38] sm:$0xff] %v2410_v35 }

// kernel: discriminator_forward.14
= control target key start
LH: loop header
LB: loop body
LE: loop exit
PB: predicated region body
PF: predicated region fallthrough
CT: control target
= control target key end

     0   :  { %s499_s6 = smov 0   ;;  %s501_s7 = smov 0   ;;  %s602_s0 = inlined_call_operand.vmem [shape: f32[2,9,512], index: 0, kind: input, shape index: {}]   ;;  %s603_s1 = inlined_call_operand.vmem [shape: bf16[2,9,512], index: 1, kind: output, shape index: {}]  }
   0x1   :  { %s503_s8 = smov 0   ;;  %s505_s9 = smov 0  }
   0x2   :  { %s507_s10 = smov 0   ;;  %s509_s11 = smov 0  }
   0x3   :  { %s511_s12 = smov 0  }
   0x4 LB: > { %s20_s13 = sadd.s32 1, %s478_s10  ;;  %s23_s14 = sadd.s32 1, %s482_s11  ;;  %s486_s12 = sphi %s511_s12, %s11_s12   ;;  %s482_s11 = sphi %s509_s11, %s610_s11   ;;  %s478_s10 = sphi %s507_s10, %s609_s10   ;;  %s474_s9 = sphi %s505_s9, %s608_s9   ;;  %s470_s8 = sphi %s503_s8, %s607_s8   ;;  %s466_s7 = sphi %s501_s7, %s606_s7   ;;  %s462_s6 = sphi %s499_s6, %s605_s6  }
   0x5   : > { %p21_p0 = scmp.ge.s32.totalorder %s20_s13, 4  ;;  %s356_s15 = sadd.s32 4294967295, %s486_s12  }
   0x6   : > { %p39_p1 = scmp.ne.s32.totalorder %s466_s7, %s462_s6  ;;  %p40_p2 = scmp.eq.s32.totalorder %s486_s12, 0 }
   0x7   : > { %s612_s13 = smov (%p21_p0, %s20_s13), 0  ;;  %s614_s14 = smov (!%p21_p0, %s23_s14), %s482_s11 }
   0x8   : > { %p25_p3 = scmp.ge.s32.totalorder %s614_s14, 2  ;;  %p71_p4 = scmp.eq.s32.totalorder %s356_s15, 7 }
   0x9   : > { %s28_s16 = ssub.s32 %s478_s10, %s612_s13  ;;  %p41_p5 = por %p40_p2, %p39_p1 }
   0xa   : > { %s616_s14 = smov (%p25_p3, %s614_s14), 0  ;;  %p547_p6 = por %p71_p4, %p39_p1 }
   0xb   : > { %s27_s18 = ssub.s32 %s482_s11, %s616_s14  ;;  %s32_s20 = sadd.s32 1, %s466_s7 }
   0xc   : > { %s29_s19 = sor.u32 %s28_s16, %s27_s18  ;;  %p359_p8 = scmp.ge.s32.totalorder %s486_s12, 8 }
   0xd   : > { %p30_p7 = scmp.eq.s32.totalorder %s29_s19, 0 }
   0xe   : > { %93 = sbr.rel (%p359_p8) target bundleno = 27 (0x1b), region = 16 }
   0xf   : > { %s555_s21 = scalar_select %p30_p7, %s466_s7, %s32_s20  }
  0x13   : > { %96 = sbr.rel (!%p41_p5) target bundleno = 27 (0x1b), region = 20  ;;  %s98_s22 = sand.u32 (%p41_p5), 1, %s466_s7  }
  0x14   : > { %s361_s23 = sshll.u32 (%p41_p5), %s482_s11, 3  ;;  %s360_s24 = sshll.u32 (%p41_p5), %s98_s22, 4 }
  0x15   : > { %s102_s25 = sadd.s32 (%p41_p5), %s478_s10, %s361_s23  ;;  %s100_s30 = scalar_lea.vmem (%p41_p5), [#allocation2], %s360_s24 }
  0x16   : > { %s362_s26 = sshll.u32 (%p41_p5), %s102_s25, 3 }
  0x17   : > { %s104_s29 = scalar_lea.vmem (%p41_p5), %s602_s0, %s362_s26 }
  0x18   : > { %v135_v0 = vld [vmem:[%s104_s29] sm:$0xff] }
  0x19   : > { %v137_v1 = vld [vmem:[%s104_s29 + $0x20] sm:$0xff]  ;;  %136 = vst [vmem:[%s100_s30] sm:$0xff] %v135_v0 }
  0x1a   : > { %138 = vst [vmem:[%s100_s30 + $0x8] sm:$0xff] %v137_v1 }
  0x1b PF: > { %p363_p9 = scmp.ge.s32.totalorder %s486_s12, 1  ;;  %p143_p10 = scmp.lt.s32.totalorder %s486_s12, 9 }
  0x1d   : > { %p144_p11 = pnand %p363_p9, %p143_p10 }
  0x1e   : > { %s150_s2 = sand.u32 (!%p144_p11), 1, %s462_s6  }
  0x1f   : > { %147 = sbr.rel (%p144_p11) target bundleno = 113 (0x71), region = 58  ;;  %s364_s3 = sshll.u32 (!%p144_p11), %s150_s2, 4 }
  0x20   : > { %s152_s4 = scalar_lea.vmem (!%p144_p11), [#allocation2], %s364_s3  ;;  %s365_s5 = sshll.u32 (!%p144_p11), %s150_s2, 3 }
  0x21   : > { %s167_s15 = scalar_lea.vmem (!%p144_p11), [#allocation3], %s365_s5 }
  0x24   : > { %vm170_vm0 = vcmask 1040384   ;;  %v488_v2 = vmov 9.0   ;;  %v168_v3 = vld [vmem:[%s152_s4] sm:$0xff]  ;;  %v169_v4 = vld [vmem:[%s152_s4 + $0x8] sm:$0x1]  ;;  %s367_s6 = sshll.u32 (%p547_p6), %s474_s9, 3 }
  0x25   : > { %428 = vrcp.f32 %v488_v2  ;;  %v171_v5 = vsel %vm170_vm0, %v169_v4, 0.0  ;;  %vm223_vm5 = vsmask.f32 256  ;;  %v225_v47 = vld [vmem:[%s167_s15 + $0x4] sm:$0x1]  ;;  %s236_s16 = sadd.s32 (%p547_p6), %s470_s8, %s367_s6 }
  0x26   : > { %v172_v6 = vadd.f32 %v171_v5, %v168_v3  ;;  %vm224_vm8 = vmand %vm170_vm0, %vm223_vm5  ;;  %s368_s18 = sshll.u32 (%p547_p6), %s236_s16, 2 }
  0x27   : > { %s238_s22 = scalar_lea.vmem (%p547_p6), %s603_s1, %s368_s18 }
  0x28   : > { %v173_v8 = vrot.slane %v172_v6, 4 }
  0x2a   : > { %v174_v10 = vadd.f32 %v173_v8, %v172_v6 }
  0x2b   : > { %v429_v7 = vpop.eup %428 }
  0x2c   : > { %v180_v9 = vmul.f32 9.0, %v429_v7  ;;  %v175_v12 = vrot.slane %v174_v10, 2  ;;  %vm184_vm1 = vweird.f32 %v429_v7 }
  0x2e   : > { %v181_v11 = vsub.f32 1.0, %v180_v9  ;;  %v176_v14 = vadd.f32 %v175_v12, %v174_v10 }
  0x30   : > { %v182_v13 = vmul.f32 %v429_v7, %v181_v11  ;;  %v177_v16 = vrot.slane %v176_v14, 1 }
  0x32   : > { %v183_v15 = vadd.f32 %v429_v7, %v182_v13  ;;  %v178_v18 = vadd.f32 %v177_v16, %v176_v14 }
  0x34   : > { %v185_v17 = vsel %vm184_vm1, %v429_v7, %v183_v15 }
  0x35   : > { %v186_v19 = vmul.f32 %v185_v17, %v178_v18 }
  0x37   : > { %v187_v20 = vsub.f32 %v168_v3, %v186_v19  ;;  %v188_v21 = vsub.f32 %v169_v4, %v186_v19 }
  0x39   : > { %v189_v22 = vmul.f32 %v187_v20, %v187_v20  ;;  %v190_v23 = vmul.f32 %v188_v21, %v188_v21 }
  0x3b   : > { %v191_v24 = vsel %vm170_vm0, %v190_v23, 0.0 }
  0x3c   : > { %v192_v25 = vadd.f32 %v191_v24, %v189_v22 }
  0x3e   : > { %v193_v26 = vrot.slane %v192_v25, 4 }
  0x40   : > { %v194_v27 = vadd.f32 %v193_v26, %v192_v25 }
  0x42   : > { %v195_v28 = vrot.slane %v194_v27, 2 }
  0x44   : > { %v196_v29 = vadd.f32 %v195_v28, %v194_v27 }
  0x46   : > { %v197_v30 = vrot.slane %v196_v29, 1 }
  0x48   : > { %v198_v31 = vadd.f32 %v197_v30, %v196_v29 }
  0x4a   : > { %v199_v32 = vmul.f32 %v198_v31, %v185_v17 }
  0x4c   : > { %v200_v33 = vadd.f32 1e-05, %v199_v32 }
  0x4e   : > { %430 = vrsqrt.f32 %v200_v33  ;;  %vm207_vm2 = vweird.f32 %v200_v33 }
  0x54   : > { %v431_v34 = vpop.eup %430 }
  0x55   : > { %v202_v35 = vmul.f32 %v431_v34, %v200_v33  ;;  %vm208_vm3 = vweird.f32 %v431_v34 }
  0x56   : > { %vm209_vm4 = vmor %vm207_vm2, %vm208_vm3 }
  0x57   : > { %v203_v36 = vmul.f32 %v431_v34, %v202_v35 }
  0x59   : > { %v204_v37 = vmul.f32 0.5, %v203_v36 }
  0x5b   : > { %v205_v38 = vsub.f32 1.5, %v204_v37 }
  0x5d   : > { %v206_v39 = vmul.f32 %v431_v34, %v205_v38 }
  0x5f   : > { %v210_v40 = vsel %vm209_vm4, %v431_v34, %v206_v39 }
  0x60   : > { %v211_v41 = vmul.f32 %v210_v40, %v187_v20  ;;  %v212_v42 = vmul.f32 %v210_v40, %v188_v21 }
  0x62   : > { %vm213_vm6 = vcmp.gt.f32.partialorder %v211_v41, 0.0  ;;  %v215_v43 = vmul.f32 0.2, %v211_v41  ;;  %vm214_vm7 = vcmp.gt.f32.partialorder %v212_v42, 0.0  ;;  %v216_v44 = vmul.f32 0.2, %v212_v42 }
  0x64   : > { %v217_v45 = vsel %vm213_vm6, %v211_v41, %v215_v43  ;;  %v218_v46 = vsel %vm214_vm7, %v212_v42, %v216_v44  ;;  %234 = sbr.rel (!%p547_p6) target bundleno = 113 (0x71), region = 66 }
  0x65   : > { %v219_v48 = vpack.c.bf16 %v217_v45, %v217_v45  ;;  %v220_v49 = vpack.c.bf16 %v218_v46, %v218_v46 }
  0x67   : > { %221 = vst [vmem:[%s167_s15] sm:$0xf] %v219_v48  ;;  %v226_v50 = vsel %vm224_vm8, %v220_v49, %v225_v47 }
  0x68   : > { %227 = vst [vmem:[%s167_s15 + $0x4] sm:$0x1] %v226_v50 }
  0x6e   : > { %v255_v51 = vld [vmem:[%s167_s15] sm:$0xf] }
  0x6f   : > { %v257_v52 = vld [vmem:[%s167_s15 + $0x4] sm:$0xf]  ;;  %256 = vst [vmem:[%s238_s22] sm:$0xf] %v255_v51 }
  0x70   : > { %258 = vst [vmem:[%s238_s22 + $0x10] sm:$0xf] %v257_v52 }
  0x71 PF: > { %s11_s12 = sadd.s32 1, %s486_s12   ;;  %s605_s6 = smov %s466_s7 }
  0x72   : > { %p8_p12 = scmp.ge.s32.totalorder %s11_s12, 10   ;;  %s606_s7 = smov %s555_s21 }
  0x73   : > { %s607_s8 = smov %s478_s10  ;;  %s608_s9 = smov %s482_s11 }
  0x74   : > { %s609_s10 = smov %s612_s13  ;;  %s610_s11 = smov %s616_s14 }
  0x75   :  { %10 = sbr.rel (!%p8_p12) target bundleno = 4 (0x4), region = 138 }

// kernel: discriminator_forward.13
= control target key start
LH: loop header
LB: loop body
LE: loop exit
PB: predicated region body
PF: predicated region fallthrough
CT: control target
= control target key end

     0   :  { %s7708_s12 = smov 0   ;;  %s7710_s13 = smov 0   ;;  %s9360_s0 = inlined_call_operand.vmem [shape: bf16[24,4096], index: 0, kind: input, shape index: {}]   ;;  %s9361_s1 = inlined_call_operand.vmem [shape: bf16[4096,512], index: 1, kind: input, shape index: {}]   ;;  %s9362_s2 = inlined_call_operand.vmem [shape: f32[1,512], index: 2, kind: input, shape index: {}]   ;;  %s9363_s3 = inlined_call_operand.vmem [shape: f32[24,512], index: 3, kind: output, shape index: {}]  }
   0x1   :  { %s7712_s14 = smov 0   ;;  %s7714_s15 = smov 0  }
   0x2   :  { %s7716_s16 = smov 0  }
   0x3 LB: > { %s25_s17 = sadd.s32 1, %s7681_s15  ;;  %p48_p1 = scmp.ne.s32.totalorder %s7673_s13, %s7669_s12  ;;  %s7685_s16 = sphi %s7716_s16, %s13_s16   ;;  %s7681_s15 = sphi %s7714_s15, %s9441_s15   ;;  %s7677_s14 = sphi %s7712_s14, %s9440_s14   ;;  %s7673_s13 = sphi %s7710_s13, %s9439_s13   ;;  %s7669_s12 = sphi %s7708_s12, %s9438_s12  }
   0x4   : > { %p26_p0 = scmp.ge.s32.totalorder %s25_s17, 2  ;;  %p49_p2 = scmp.eq.s32.totalorder %s7685_s16, 0 }
   0x5   : > { %s41_s19 = sadd.s32 1, %s7673_s13  ;;  %p4949_p5 = scmp.ge.s32.totalorder %s7685_s16, 2 }
   0x6   : > { %s9443_s17 = smov (%p26_p0, %s25_s17), 0  ;;  %p50_p3 = por %p49_p2, %p48_p1 }
   0x7   : > { %s37_s18 = ssub.s32 %s7681_s15, %s9443_s17  ;;  %164 = sbr.rel (%p4949_p5) target bundleno = 40 (0x28), region = 20 }
   0x8   : > { %p39_p4 = scmp.eq.s32.totalorder %s37_s18, 0 }
   0xa   : > { %s7743_s20 = scalar_select %p39_p4, %s7673_s13, %s41_s19  }
   0xc   : > { %167 = sbr.rel (!%p50_p3) target bundleno = 40 (0x28), region = 24  ;;  %s169_s21 = sand.u32 (%p50_p3), 1, %s7673_s13  }
   0xd   : > { %s7074_s22 = sshll.u32 (%p50_p3), %s7681_s15, 6  ;;  %s7604_s23 = smul.u32 (%p50_p3), 192, %s169_s21 }
   0xe   : > { %s7751_s26 = scalar_lea.vmem (%p50_p3), %s9360_s0, %s7074_s22 }
   0xf   : > { %v190_v0 = vld [vmem:[%s7751_s26] sm:$0xff] (%p50_p3)  ;;  %v192_v1 = vld [vmem:[%s7751_s26 + $0x8] sm:$0xff] (%p50_p3)  ;;  %v194_v2 = vld [vmem:[%s7751_s26 + $0x10] sm:$0xff] (%p50_p3)  ;;  %s7756_s27 = scalar_lea.vmem (%p50_p3), [#allocation3], %s7604_s23 }
  0x10   : > { %191 = vst [vmem:[%s7756_s27] sm:$0xff] (%p50_p3), %v190_v0  ;;  %v196_v3 = vld [vmem:[%s7751_s26 + $0x18] sm:$0xff] (%p50_p3)  ;;  %v198_v4 = vld [vmem:[%s7751_s26 + $0x20] sm:$0xff] (%p50_p3)  ;;  %v200_v5 = vld [vmem:[%s7751_s26 + $0x28] sm:$0xff] (%p50_p3) }
  0x11   : > { %193 = vst [vmem:[%s7756_s27 + $0x8] sm:$0xff] %v192_v1  ;;  %v202_v6 = vld [vmem:[%s7751_s26 + $0x30] sm:$0xff]  ;;  %v204_v7 = vld [vmem:[%s7751_s26 + $0x38] sm:$0xff]  ;;  %v206_v8 = vld [vmem:[%s7751_s26 + $0x80] sm:$0xff] }
  0x12   : > { %195 = vst [vmem:[%s7756_s27 + $0x10] sm:$0xff] %v194_v2  ;;  %v208_v9 = vld [vmem:[%s7751_s26 + $0x88] sm:$0xff]  ;;  %v210_v10 = vld [vmem:[%s7751_s26 + $0x90] sm:$0xff]  ;;  %v212_v11 = vld [vmem:[%s7751_s26 + $0x98] sm:$0xff] }
  0x13   : > { %197 = vst [vmem:[%s7756_s27 + $0x18] sm:$0xff] %v196_v3  ;;  %v214_v12 = vld [vmem:[%s7751_s26 + $0xa0] sm:$0xff]  ;;  %v216_v13 = vld [vmem:[%s7751_s26 + $0xa8] sm:$0xff]  ;;  %v218_v14 = vld [vmem:[%s7751_s26 + $0xb0] sm:$0xff] }
  0x14   : > { %199 = vst [vmem:[%s7756_s27 + $0x20] sm:$0xff] %v198_v4  ;;  %v220_v15 = vld [vmem:[%s7751_s26 + $0xb8] sm:$0xff]  ;;  %v222_v16 = vld [vmem:[%s7751_s26 + $0x100] sm:$0xff]  ;;  %v224_v17 = vld [vmem:[%s7751_s26 + $0x108] sm:$0xff] }
  0x15   : > { %201 = vst [vmem:[%s7756_s27 + $0x28] sm:$0xff] %v200_v5  ;;  %v226_v18 = vld [vmem:[%s7751_s26 + $0x110] sm:$0xff]  ;;  %v228_v19 = vld [vmem:[%s7751_s26 + $0x118] sm:$0xff]  ;;  %v230_v20 = vld [vmem:[%s7751_s26 + $0x120] sm:$0xff] }
  0x16   : > { %203 = vst [vmem:[%s7756_s27 + $0x30] sm:$0xff] %v202_v6  ;;  %v232_v21 = vld [vmem:[%s7751_s26 + $0x128] sm:$0xff]  ;;  %v234_v22 = vld [vmem:[%s7751_s26 + $0x130] sm:$0xff]  ;;  %v236_v23 = vld [vmem:[%s7751_s26 + $0x138] sm:$0xff] }
  0x17   : > { %205 = vst [vmem:[%s7756_s27 + $0x38] sm:$0xff] %v204_v7 }
  0x18   : > { %207 = vst [vmem:[%s7756_s27 + $0x40] sm:$0xff] %v206_v8 }
  0x19   : > { %209 = vst [vmem:[%s7756_s27 + $0x48] sm:$0xff] %v208_v9 }
  0x1a   : > { %211 = vst [vmem:[%s7756_s27 + $0x50] sm:$0xff] %v210_v10 }
  0x1b   : > { %213 = vst [vmem:[%s7756_s27 + $0x58] sm:$0xff] %v212_v11 }
  0x1c   : > { %215 = vst [vmem:[%s7756_s27 + $0x60] sm:$0xff] %v214_v12 }
  0x1d   : > { %217 = vst [vmem:[%s7756_s27 + $0x68] sm:$0xff] %v216_v13 }
  0x1e   : > { %219 = vst [vmem:[%s7756_s27 + $0x70] sm:$0xff] %v218_v14 }
  0x1f   : > { %221 = vst [vmem:[%s7756_s27 + $0x78] sm:$0xff] %v220_v15 }
  0x20   : > { %223 = vst [vmem:[%s7756_s27 + $0x80] sm:$0xff] %v222_v16 }
  0x21   : > { %225 = vst [vmem:[%s7756_s27 + $0x88] sm:$0xff] %v224_v17 }
  0x22   : > { %227 = vst [vmem:[%s7756_s27 + $0x90] sm:$0xff] %v226_v18 }
  0x23   : > { %229 = vst [vmem:[%s7756_s27 + $0x98] sm:$0xff] %v228_v19 }
  0x24   : > { %231 = vst [vmem:[%s7756_s27 + $0xa0] sm:$0xff] %v230_v20 }
  0x25   : > { %233 = vst [vmem:[%s7756_s27 + $0xa8] sm:$0xff] %v232_v21 }
  0x26   : > { %235 = vst [vmem:[%s7756_s27 + $0xb0] sm:$0xff] %v234_v22 }
  0x27   : > { %237 = vst [vmem:[%s7756_s27 + $0xb8] sm:$0xff] %v236_v23 }
  0x28 PF: > { %p4952_p6 = scmp.ge.s32.totalorder %s7685_s16, 1  ;;  %p257_p7 = scmp.lt.s32.totalorder %s7685_s16, 3 }
  0x2a   : > { %p258_p8 = pnand %p4952_p6, %p257_p7 }
  0x2c   : > { %261 = sbr.rel (%p258_p8) target bundleno = 775 (0x307), region = 51 }
  0x31   : > { %s264_s28 = sand.u32 1, %s7669_s12   ;;  %s4953_s29 = sshll.u32 %s7677_s14, 8 }
  0x32   : > { %s7605_s30 = smul.u32 192, %s264_s28  ;;  %p310_p9 = scmp.lt.s32.totalorder %s4953_s29, 511 }
  0x33   : > { %p4956_p10 = scmp.ne.s32.totalorder %s7677_s14, 0 }
  0x34   : > { %s9445_s29 = smov (!%p310_p9, %s4953_s29), 511  ;;  %s7812_s8 = scalar_lea.vmem [#allocation3], %s7605_s30 }
  0x35   : > { %s7075_s4 = sshll.u32 %s9445_s29, 4  ;;  %340 = sbr.rel (%p4956_p10) target bundleno = 71 (0x47), region = 59 }
  0x36   : > { %s7810_s7 = scalar_lea.vmem %s9361_s1, %s7075_s4 }
  0x3a   : > { %v7687_v24 = vmov 0.0  }
  0x3b   : > { %341 = vst [vmem:[#allocation2 + $0x30] sm:$0xff] %v7687_v24 }
  0x3c   : > { %342 = vst [vmem:[#allocation2] sm:$0xff] %v7687_v24 }
  0x3d   : > { %343 = vst [vmem:[#allocation2 + $0x58] sm:$0xff] %v7687_v24 }
  0x3e   : > { %344 = vst [vmem:[#allocation2 + $0x18] sm:$0xff] %v7687_v24 }
  0x3f   : > { %345 = vst [vmem:[#allocation2 + $0x50] sm:$0xff] %v7687_v24 }
  0x40   : > { %346 = vst [vmem:[#allocation2 + $0x20] sm:$0xff] %v7687_v24 }
  0x41   : > { %347 = vst [vmem:[#allocation2 + $0x8] sm:$0xff] %v7687_v24 }
  0x42   : > { %348 = vst [vmem:[#allocation2 + $0x38] sm:$0xff] %v7687_v24 }
  0x43   : > { %349 = vst [vmem:[#allocation2 + $0x28] sm:$0xff] %v7687_v24 }
  0x44   : > { %350 = vst [vmem:[#allocation2 + $0x48] sm:$0xff] %v7687_v24 }
  0x45   : > { %351 = vst [vmem:[#allocation2 + $0x10] sm:$0xff] %v7687_v24 }
  0x46   : > { %352 = vst [vmem:[#allocation2 + $0x40] sm:$0xff] %v7687_v24 }
  0x47 PF: > { %v5135_v25 = vld [vmem:[%s7810_s7 + $0xe0] sm:$0xf]  ;;  %v7122_v26 = vld [vmem:[%s7810_s7 + $0xec] sm:$0xf0]  ;;  %p7069_p11 = scmp.ne.s32.totalorder %s7677_s14, 1 }
  0x48   : > { %v5263_v27 = vld [vmem:[%s7810_s7 + $0x1e0] sm:$0xf]  ;;  %v5136_v28 = vor.u32 %v7122_v26, %v5135_v25  ;;  %v7154_v29 = vld [vmem:[%s7810_s7 + $0x1ec] sm:$0xf0] }
  0x49   : > { %v5391_v30 = vld [vmem:[%s7810_s7 + $0x2e0] sm:$0xf]  ;;  %v7186_v31 = vld [vmem:[%s7810_s7 + $0x2ec] sm:$0xf0]  ;;  %v5264_v32 = vor.u32 %v7154_v29, %v5263_v27 }
  0x4a   : > { %v5392_v33 = vor.u32 %v7186_v31, %v5391_v30  ;;  %v5519_v34 = vld [vmem:[%s7810_s7 + $0x3e0] sm:$0xf]  ;;  %v7218_v35 = vld [vmem:[%s7810_s7 + $0x3ec] sm:$0xf0]  ;;  %3597 = vmatpush.bf16.msra.mxu0 %v5136_v28 }
  0x4b   : > { %v5119_v36 = vld [vmem:[%s7810_s7 + $0xc0] sm:$0xf]  ;;  %v5520_v37 = vor.u32 %v7218_v35, %v5519_v34  ;;  %v7118_v38 = vld [vmem:[%s7810_s7 + $0xcc] sm:$0xf0]  ;;  %3615 = vmatpush.bf16.msra.mxu1 %v5264_v32 }
  0x4c   : > { %v5247_v39 = vld [vmem:[%s7810_s7 + $0x1c0] sm:$0xf]  ;;  %v7150_v40 = vld [vmem:[%s7810_s7 + $0x1cc] sm:$0xf0]  ;;  %3633 = vmatpush.bf16.msra.mxu2 %v5392_v33  ;;  %v5120_v41 = vor.u32 %v7118_v38, %v5119_v36 }
  0x4d   : > { %v5248_v42 = vor.u32 %v7150_v40, %v5247_v39  ;;  %v5375_v43 = vld [vmem:[%s7810_s7 + $0x2c0] sm:$0xf]  ;;  %v7182_v44 = vld [vmem:[%s7810_s7 + $0x2cc] sm:$0xf0]  ;;  %3651 = vmatpush.bf16.msra.mxu3 %v5520_v37 }
  0x4e   : > { %v5503_v45 = vld [vmem:[%s7810_s7 + $0x3c0] sm:$0xf]  ;;  %v5376_v46 = vor.u32 %v7182_v44, %v5375_v43  ;;  %v7214_v47 = vld [vmem:[%s7810_s7 + $0x3cc] sm:$0xf0]  ;;  %3598 = vmatpush.bf16.msra.mxu0 %v5120_v41 }
  0x4f   : > { %v5103_v48 = vld [vmem:[%s7810_s7 + $0xa0] sm:$0xf]  ;;  %v7114_v49 = vld [vmem:[%s7810_s7 + $0xac] sm:$0xf0]  ;;  %v5504_v50 = vor.u32 %v7214_v47, %v5503_v45  ;;  %3616 = vmatpush.bf16.msra.mxu1 %v5248_v42 }
  0x50   : > { %v5231_v51 = vld [vmem:[%s7810_s7 + $0x1a0] sm:$0xf]  ;;  %v7146_v52 = vld [vmem:[%s7810_s7 + $0x1ac] sm:$0xf0]  ;;  %v5104_v54 = vor.u32 %v7114_v49, %v5103_v48  ;;  %3634 = vmatpush.bf16.msra.mxu2 %v5376_v46 }
  0x51   : > { %v5359_v53 = vld [vmem:[%s7810_s7 + $0x2a0] sm:$0xf]  ;;  %v7178_v55 = vld [vmem:[%s7810_s7 + $0x2ac] sm:$0xf0]  ;;  %v5232_v58 = vor.u32 %v7146_v52, %v5231_v51  ;;  %3652 = vmatpush.bf16.msra.mxu3 %v5504_v50 }
  0x52   : > { %v5487_v56 = vld [vmem:[%s7810_s7 + $0x3a0] sm:$0xf]  ;;  %v7210_v57 = vld [vmem:[%s7810_s7 + $0x3ac] sm:$0xf0]  ;;  %v5360_v59 = vor.u32 %v7178_v55, %v5359_v53  ;;  %3599 = vmatpush.bf16.msra.mxu0 %v5104_v54  ;;  %v7076_v55 = vld [vmem:[%s7812_s8 + $0x4] sm:$0xf] }
  0x53   : > { %v5087_v60 = vld [vmem:[%s7810_s7 + $0x80] sm:$0xf]  ;;  %v7110_v61 = vld [vmem:[%s7810_s7 + $0x8c] sm:$0xf0]  ;;  %v5488_v63 = vor.u32 %v7210_v57, %v5487_v56  ;;  %3617 = vmatpush.bf16.msra.mxu1 %v5232_v58  ;;  %v4961_v56 = vld [vmem:[%s7812_s8 + $0x40] sm:$0xf0] }
  0x54   : > { %v5215_v62 = vld [vmem:[%s7810_s7 + $0x180] sm:$0xf]  ;;  %v7142_v0 = vld [vmem:[%s7810_s7 + $0x18c] sm:$0xf0]  ;;  %v5088_v5 = vor.u32 %v7110_v61, %v5087_v60  ;;  %3635 = vmatpush.bf16.msra.mxu2 %v5360_v59  ;;  %v4967_v60 = vld [vmem:[%s7812_s8 + $0x8] sm:$0xf] }
  0x55   : > { %v5343_v1 = vld [vmem:[%s7810_s7 + $0x280] sm:$0xf]  ;;  %v7174_v2 = vld [vmem:[%s7810_s7 + $0x28c] sm:$0xf0]  ;;  %v5216_v6 = vor.u32 %v7142_v0, %v5215_v62  ;;  %3653 = vmatpush.bf16.msra.mxu3 %v5488_v63 }
  0x56   : > { %v5471_v3 = vld [vmem:[%s7810_s7 + $0x380] sm:$0xf]  ;;  %v7206_v4 = vld [vmem:[%s7810_s7 + $0x38c] sm:$0xf0]  ;;  %v5344_v7 = vor.u32 %v7174_v2, %v5343_v1  ;;  %3600 = vmatpush.bf16.msra.mxu0 %v5088_v5  ;;  %v7085_v1 = vld [vmem:[%s7812_s8 + $0x44] sm:$0xf0] }
  0x57   : > { %v5071_v8 = vld [vmem:[%s7810_s7 + $0x60] sm:$0xf]  ;;  %v7106_v9 = vld [vmem:[%s7810_s7 + $0x6c] sm:$0xf0]  ;;  %v5472_v11 = vor.u32 %v7206_v4, %v5471_v3  ;;  %3618 = vmatpush.bf16.msra.mxu1 %v5216_v6  ;;  %v7077_v2 = vld [vmem:[%s7812_s8 + $0xc] sm:$0xf] }
  0x58   : > { %v5199_v10 = vld [vmem:[%s7810_s7 + $0x160] sm:$0xf]  ;;  %v7138_v12 = vld [vmem:[%s7810_s7 + $0x16c] sm:$0xf0]  ;;  %v5072_v17 = vor.u32 %v7106_v9, %v5071_v8  ;;  %3636 = vmatpush.bf16.msra.mxu2 %v5344_v7  ;;  %v4969_v3 = vld [vmem:[%s7812_s8 + $0x48] sm:$0xf0] }
  0x59   : > { %v5327_v13 = vld [vmem:[%s7810_s7 + $0x260] sm:$0xf]  ;;  %v7170_v14 = vld [vmem:[%s7810_s7 + $0x26c] sm:$0xf0]  ;;  %v5200_v18 = vor.u32 %v7138_v12, %v5199_v10  ;;  %3654 = vmatpush.bf16.msra.mxu3 %v5472_v11 }
  0x5a   : > { %v5455_v15 = vld [vmem:[%s7810_s7 + $0x360] sm:$0xf]  ;;  %v7202_v16 = vld [vmem:[%s7810_s7 + $0x36c] sm:$0xf0]  ;;  %v5328_v19 = vor.u32 %v7170_v14, %v5327_v13  ;;  %3601 = vmatpush.bf16.msra.mxu0 %v5072_v17  ;;  %v7899_v14 = vor.u32 %v7076_v55, %v4961_v56 }
  0x5b   : > { %v5055_v20 = vld [vmem:[%s7810_s7 + $0x40] sm:$0xf]  ;;  %v7102_v21 = vld [vmem:[%s7810_s7 + $0x4c] sm:$0xf0]  ;;  %v5456_v23 = vor.u32 %v7202_v16, %v5455_v15  ;;  %3619 = vmatpush.bf16.msra.mxu1 %v5200_v18  ;;  %v7901_v15 = vor.u32 %v7085_v1, %v4967_v60  ;;  %v7905_v18 = vor.u32 %v7077_v2, %v4969_v3 }
  0x5c   : > { %v5183_v22 = vld [vmem:[%s7810_s7 + $0x140] sm:$0xf]  ;;  %v7134_v24 = vld [vmem:[%s7810_s7 + $0x14c] sm:$0xf0]  ;;  %v5056_v29 = vor.u32 %v7102_v21, %v5055_v20  ;;  %3637 = vmatpush.bf16.msra.mxu2 %v5328_v19 }
  0x5d   : > { %v5311_v25 = vld [vmem:[%s7810_s7 + $0x240] sm:$0xf]  ;;  %v7166_v26 = vld [vmem:[%s7810_s7 + $0x24c] sm:$0xf0]  ;;  %v5184_v30 = vor.u32 %v7134_v24, %v5183_v22  ;;  %3655 = vmatpush.bf16.msra.mxu3 %v5456_v23 }
  0x5e   : > { %v5439_v27 = vld [vmem:[%s7810_s7 + $0x340] sm:$0xf]  ;;  %v7198_v28 = vld [vmem:[%s7810_s7 + $0x34c] sm:$0xf0]  ;;  %v5312_v31 = vor.u32 %v7166_v26, %v5311_v25  ;;  %3602 = vmatpush.bf16.msra.mxu0 %v5056_v29 }
  0x5f   : > { %v5039_v32 = vld [vmem:[%s7810_s7 + $0x20] sm:$0xf]  ;;  %v7098_v33 = vld [vmem:[%s7810_s7 + $0x2c] sm:$0xf0]  ;;  %v5440_v35 = vor.u32 %v7198_v28, %v5439_v27  ;;  %3620 = vmatpush.bf16.msra.mxu1 %v5184_v30 }
  0x60   : > { %v5167_v34 = vld [vmem:[%s7810_s7 + $0x120] sm:$0xf]  ;;  %v7130_v36 = vld [vmem:[%s7810_s7 + $0x12c] sm:$0xf0]  ;;  %v5040_v42 = vor.u32 %v7098_v33, %v5039_v32  ;;  %3638 = vmatpush.bf16.msra.mxu2 %v5312_v31 }
  0x61   : > { %v5295_v37 = vld [vmem:[%s7810_s7 + $0x220] sm:$0xf]  ;;  %v7162_v38 = vld [vmem:[%s7810_s7 + $0x22c] sm:$0xf0]  ;;  %v5168_v46 = vor.u32 %v7130_v36, %v5167_v34  ;;  %3656 = vmatpush.bf16.msra.mxu3 %v5440_v35 }
  0x62   : > { %v5423_v39 = vld [vmem:[%s7810_s7 + $0x320] sm:$0xf]  ;;  %v7194_v40 = vld [vmem:[%s7810_s7 + $0x32c] sm:$0xf0]  ;;  %v5296_v47 = vor.u32 %v7162_v38, %v5295_v37  ;;  %3603 = vmatpush.bf16.msra.mxu0 %v5040_v42 }
  0x63   : > { %v5023_v41 = vld [vmem:[%s7810_s7] sm:$0xf]  ;;  %v7094_v43 = vld [vmem:[%s7810_s7 + $0xc] sm:$0xf0]  ;;  %v5424_v51 = vor.u32 %v7194_v40, %v5423_v39  ;;  %3621 = vmatpush.bf16.msra.mxu1 %v5168_v46 }
  0x64   : > { %v5151_v44 = vld [vmem:[%s7810_s7 + $0x100] sm:$0xf]  ;;  %v7126_v45 = vld [vmem:[%s7810_s7 + $0x10c] sm:$0xf0]  ;;  %v5024_v59 = vor.u32 %v7094_v43, %v5023_v41  ;;  %3639 = vmatpush.bf16.msra.mxu2 %v5296_v47 }
  0x65   : > { %v5279_v48 = vld [vmem:[%s7810_s7 + $0x200] sm:$0xf]  ;;  %v7158_v49 = vld [vmem:[%s7810_s7 + $0x20c] sm:$0xf0]  ;;  %v5152_v63 = vor.u32 %v7126_v45, %v5151_v44  ;;  %3657 = vmatpush.bf16.msra.mxu3 %v5424_v51  ;;  %v382_v45 = vld [vmem:[%s7812_s8 + $0x88] sm:$0xff] }
  0x66   : > { %v5407_v50 = vld [vmem:[%s7810_s7 + $0x300] sm:$0xf]  ;;  %v7190_v52 = vld [vmem:[%s7810_s7 + $0x30c] sm:$0xf0]  ;;  %v5280_v0 = vor.u32 %v7158_v49, %v5279_v48  ;;  %3604 = vmatpush.bf16.msra.mxu0 %v5024_v59 }
  0x67   : > { %v4959_v53 = vld [vmem:[%s7812_s8] sm:$0xf]  ;;  %v7314_v58 = vld [vmem:[%s7810_s7 + $0x6ec] sm:$0xf0]  ;;  %v5408_v4 = vor.u32 %v7190_v52, %v5407_v50  ;;  %3622 = vmatpush.bf16.msra.mxu1 %v5152_v63 }
  0x68   : > { %v7084_v54 = vld [vmem:[%s7812_s8 + $0x3c] sm:$0xf0]  ;;  %v7346_v62 = vld [vmem:[%s7810_s7 + $0x7ec] sm:$0xf0]  ;;  %3640 = vmatpush.bf16.msra.mxu2 %v5280_v0 }
  0x69   : > { %v5903_v57 = vld [vmem:[%s7810_s7 + $0x6e0] sm:$0xf]  ;;  %v7250_v7 = vld [vmem:[%s7810_s7 + $0x4ec] sm:$0xf0]  ;;  %v7894_v9 = vor.u32 %v7084_v54, %v4959_v53  ;;  %3658 = vmatpush.bf16.msra.mxu3 %v5408_v4 }
  0x6a   : > { %v6031_v61 = vld [vmem:[%s7810_s7 + $0x7e0] sm:$0xf]  ;;  %v5904_v5 = vor.u32 %v7314_v58, %v5903_v57  ;;  %v7282_v11 = vld [vmem:[%s7810_s7 + $0x5ec] sm:$0xf0]  ;;  %3623 = vmatmul.bf16.vlgmr.msra.gmra.mxu1 %v7899_v14  ;;  %v959_v57 = vunpack.c.l.b16 %v382_v45 }
  0x6b   : > { %v5647_v6 = vld [vmem:[%s7810_s7 + $0x4e0] sm:$0xf]  ;;  %v6032_v10 = vor.u32 %v7346_v62, %v6031_v61  ;;  %v7310_v13 = vld [vmem:[%s7810_s7 + $0x6cc] sm:$0xf0]  ;;  %3605 = vmatmul.bf16.vlgmr.msra.gmra.mxu0 %v7894_v9  ;;  %3641 = vmatmul.bf16.vlgmr.msra.gmra.mxu2 %v7901_v15  ;;  %v960_v61 = vunpack.c.h.b16 %v382_v45 }
  0x6c   : > { %v5775_v8 = vld [vmem:[%s7810_s7 + $0x5e0] sm:$0xf]  ;;  %v7342_v17 = vld [vmem:[%s7810_s7 + $0x7cc] sm:$0xf0]  ;;  %v5648_v19 = vor.u32 %v7250_v7, %v5647_v6  ;;  %3705 = vmatpush.bf16.msrb.mxu2 %v5904_v5  ;;  %3659 = vmatmul.bf16.vlgmr.msra.gmra.mxu3 %v7905_v18 }
  0x6d   : > { %v5887_v12 = vld [vmem:[%s7810_s7 + $0x6c0] sm:$0xf]  ;;  %v5776_v20 = vor.u32 %v7282_v11, %v5775_v8  ;;  %v7246_v23 = vld [vmem:[%s7810_s7 + $0x4cc] sm:$0xf0]  ;;  %3723 = vmatpush.bf16.msrb.mxu3 %v6032_v10  ;;  %v7947_v10 = vpack.c.b16 %v959_v57, %v959_v57 }
  0x6e   : > { %v6015_v16 = vld [vmem:[%s7810_s7 + $0x7c0] sm:$0xf]  ;;  %v5888_v21 = vor.u32 %v7310_v13, %v5887_v12  ;;  %v7278_v26 = vld [vmem:[%s7810_s7 + $0x5cc] sm:$0xf0]  ;;  %3669 = vmatpush.bf16.msrb.mxu0 %v5648_v19  ;;  %v7951_v13 = vpack.c.b16 %v960_v61, %v960_v61 }
  0x6f   : > { %v5631_v22 = vld [vmem:[%s7810_s7 + $0x4c0] sm:$0xf]  ;;  %v6016_v25 = vor.u32 %v7342_v17, %v6015_v16  ;;  %v7306_v28 = vld [vmem:[%s7810_s7 + $0x6ac] sm:$0xf0]  ;;  %3687 = vmatpush.bf16.msrb.mxu1 %v5776_v20  ;;  %9396 = vst [vmem:[#allocation6_spill] sm:$0xff] %v7947_v10 }
  0x70   : > { %v5759_v24 = vld [vmem:[%s7810_s7 + $0x5c0] sm:$0xf]  ;;  %v7338_v30 = vld [vmem:[%s7810_s7 + $0x7ac] sm:$0xf0]  ;;  %v5632_v31 = vor.u32 %v7246_v23, %v5631_v22  ;;  %3706 = vmatpush.bf16.msrb.mxu2 %v5888_v21  ;;  %9397 = vst [vmem:[#allocation7_spill] sm:$0xff] %v7951_v13 }
  0x71   : > { %v5871_v27 = vld [vmem:[%s7810_s7 + $0x6a0] sm:$0xf]  ;;  %v5760_v32 = vor.u32 %v7278_v26, %v5759_v24  ;;  %v7242_v35 = vld [vmem:[%s7810_s7 + $0x4ac] sm:$0xf0]  ;;  %3724 = vmatpush.bf16.msrb.mxu3 %v6016_v25 }
  0x72   : > { %v5999_v29 = vld [vmem:[%s7810_s7 + $0x7a0] sm:$0xf]  ;;  %v5872_v33 = vor.u32 %v7306_v28, %v5871_v27  ;;  %v7274_v38 = vld [vmem:[%s7810_s7 + $0x5ac] sm:$0xf0]  ;;  %3670 = vmatpush.bf16.msrb.mxu0 %v5632_v31 }
  0x73   : > { %v5615_v34 = vld [vmem:[%s7810_s7 + $0x4a0] sm:$0xf]  ;;  %v6000_v37 = vor.u32 %v7338_v30, %v5999_v29  ;;  %v7302_v40 = vld [vmem:[%s7810_s7 + $0x68c] sm:$0xf0]  ;;  %3688 = vmatpush.bf16.msrb.mxu1 %v5760_v32 }
  0x74   : > { %v5743_v36 = vld [vmem:[%s7810_s7 + $0x5a0] sm:$0xf]  ;;  %v7334_v42 = vld [vmem:[%s7810_s7 + $0x78c] sm:$0xf0]  ;;  %v5616_v44 = vor.u32 %v7242_v35, %v5615_v34  ;;  %3707 = vmatpush.bf16.msrb.mxu2 %v5872_v33 }
  0x75   : > { %v5855_v39 = vld [vmem:[%s7810_s7 + $0x680] sm:$0xf]  ;;  %v5744_v46 = vor.u32 %v7274_v38, %v5743_v36  ;;  %v7238_v49 = vld [vmem:[%s7810_s7 + $0x48c] sm:$0xf0]  ;;  %3725 = vmatpush.bf16.msrb.mxu3 %v6000_v37 }
  0x76   : > { %v5983_v41 = vld [vmem:[%s7810_s7 + $0x780] sm:$0xf]  ;;  %v5856_v47 = vor.u32 %v7302_v40, %v5855_v39  ;;  %v7270_v52 = vld [vmem:[%s7810_s7 + $0x58c] sm:$0xf0]  ;;  %3671 = vmatpush.bf16.msrb.mxu0 %v5616_v44 }
  0x77   : > { %v381_v43 = vld [vmem:[%s7812_s8 + $0x80] sm:$0xff]  ;;  %v5984_v51 = vor.u32 %v7334_v42, %v5983_v41  ;;  %v7298_v55 = vld [vmem:[%s7810_s7 + $0x66c] sm:$0xf0]  ;;  %3689 = vmatpush.bf16.msrb.mxu1 %v5744_v46 }
  0x78   : > { %v5599_v48 = vld [vmem:[%s7810_s7 + $0x480] sm:$0xf]  ;;  %v957_v53 = vunpack.c.l.b16 %v381_v43  ;;  %v958_v56 = vunpack.c.h.b16 %v381_v43  ;;  %v7330_v59 = vld [vmem:[%s7810_s7 + $0x76c] sm:$0xf0]  ;;  %3708 = vmatpush.bf16.msrb.mxu2 %v5856_v47 }
  0x79   : > { %v5727_v50 = vld [vmem:[%s7810_s7 + $0x580] sm:$0xf]  ;;  %v5600_v60 = vor.u32 %v7238_v49, %v5599_v48  ;;  %v7234_v1 = vld [vmem:[%s7810_s7 + $0x46c] sm:$0xf0]  ;;  %3726 = vmatpush.bf16.msrb.mxu3 %v5984_v51 }
  0x7a   : > { %v5839_v54 = vld [vmem:[%s7810_s7 + $0x660] sm:$0xf]  ;;  %v5728_v62 = vor.u32 %v7270_v52, %v5727_v50  ;;  %v7940_v3 = vpack.c.b16 %v957_v53, %v957_v53  ;;  %v7266_v5 = vld [vmem:[%s7810_s7 + $0x56c] sm:$0xf0]  ;;  %v7945_v8 = vpack.c.b16 %v958_v56, %v958_v56 }
  0x7b   : > { %v5967_v58 = vld [vmem:[%s7810_s7 + $0x760] sm:$0xf]  ;;  %v5840_v63 = vor.u32 %v7298_v55, %v5839_v54  ;;  %v7294_v7 = vld [vmem:[%s7810_s7 + $0x64c] sm:$0xf0]  ;;  %3672 = vmatpush.bf16.msrb.mxu0 %v5600_v60  ;;  %3646 = vmatmul.bf16.gmra.mxu2 %v7947_v10  ;;  %v4977_v60 = vld [vmem:[%s7812_s8 + $0x50] sm:$0xf0] }
  0x7c   : > { %v5583_v0 = vld [vmem:[%s7810_s7 + $0x460] sm:$0xf]  ;;  %9394 = vst [vmem:[#allocation4_spill] sm:$0xff] %v7940_v3  ;;  %v5968_v4 = vor.u32 %v7330_v59, %v5967_v58  ;;  %v7326_v12 = vld [vmem:[%s7810_s7 + $0x74c] sm:$0xf0]  ;;  %3690 = vmatpush.bf16.msrb.mxu1 %v5728_v62  ;;  %3610 = vmatmul.bf16.gmra.mxu0 %v7940_v3 }
  0x7d   : > { %v5711_v2 = vld [vmem:[%s7810_s7 + $0x560] sm:$0xf]  ;;  %9395 = vst [vmem:[#allocation5_spill] sm:$0xff] %v7945_v8  ;;  %v5584_v16 = vor.u32 %v7234_v1, %v5583_v0  ;;  %3709 = vmatpush.bf16.msrb.mxu2 %v5840_v63  ;;  %v7230_v21 = vld [vmem:[%s7810_s7 + $0x44c] sm:$0xf0]  ;;  %3628 = vmatmul.bf16.gmra.mxu1 %v7945_v8 }
  0x7e   : > { %v5823_v6 = vld [vmem:[%s7810_s7 + $0x640] sm:$0xf]  ;;  %v5712_v17 = vor.u32 %v7266_v5, %v5711_v2  ;;  %3727 = vmatpush.bf16.msrb.mxu3 %v5968_v4  ;;  %v7262_v24 = vld [vmem:[%s7810_s7 + $0x54c] sm:$0xf0]  ;;  %v7078_v59 = vld [vmem:[%s7812_s8 + $0x14] sm:$0xf] }
  0x7f   : > { %v5951_v11 = vld [vmem:[%s7810_s7 + $0x740] sm:$0xf]  ;;  %v5824_v19 = vor.u32 %v7294_v7, %v5823_v6  ;;  %v7290_v26 = vld [vmem:[%s7810_s7 + $0x62c] sm:$0xf0]  ;;  %3664 = vmatmul.bf16.gmra.mxu3 %v7951_v13  ;;  %3673 = vmatpush.bf16.msrb.mxu0 %v5584_v16  ;;  %v4983_v2 = vld [vmem:[%s7812_s8 + $0x18] sm:$0xf] }
  0x80   : > { %v5567_v20 = vld [vmem:[%s7810_s7 + $0x440] sm:$0xf]  ;;  %v5952_v23 = vor.u32 %v7326_v12, %v5951_v11  ;;  %v7322_v28 = vld [vmem:[%s7810_s7 + $0x72c] sm:$0xf0]  ;;  %3691 = vmatpush.bf16.msrb.mxu1 %v5712_v17  ;;  %v7087_v4 = vld [vmem:[%s7812_s8 + $0x54] sm:$0xf0] }
  0x81   : > { %v5695_v22 = vld [vmem:[%s7810_s7 + $0x540] sm:$0xf]  ;;  %v5568_v29 = vor.u32 %v7230_v21, %v5567_v20  ;;  %3710 = vmatpush.bf16.msrb.mxu2 %v5824_v19  ;;  %v7226_v33 = vld [vmem:[%s7810_s7 + $0x42c] sm:$0xf0]  ;;  %v7079_v5 = vld [vmem:[%s7812_s8 + $0x1c] sm:$0xf] }
  0x82   : > { %v5807_v25 = vld [vmem:[%s7810_s7 + $0x620] sm:$0xf]  ;;  %v5696_v31 = vor.u32 %v7262_v24, %v5695_v22  ;;  %v7258_v35 = vld [vmem:[%s7810_s7 + $0x52c] sm:$0xf0]  ;;  %3728 = vmatpush.bf16.msrb.mxu3 %v5952_v23  ;;  %v4985_v7 = vld [vmem:[%s7812_s8 + $0x58] sm:$0xf0]  ;;  %v8002_v24 = vor.u32 %v7087_v4, %v4983_v2 }
  0x83   : > { %v5935_v27 = vld [vmem:[%s7810_s7 + $0x720] sm:$0xf]  ;;  %v5808_v32 = vor.u32 %v7290_v26, %v5807_v25  ;;  %v7286_v38 = vld [vmem:[%s7810_s7 + $0x60c] sm:$0xf0]  ;;  %3674 = vmatpush.bf16.msrb.mxu0 %v5568_v29  ;;  %v8009_v29 = vor.u32 %v7079_v5, %v4985_v7 }
  0x84   : > { %v5551_v30 = vld [vmem:[%s7810_s7 + $0x420] sm:$0xf]  ;;  %v5936_v36 = vor.u32 %v7322_v28, %v5935_v27  ;;  %v7318_v40 = vld [vmem:[%s7810_s7 + $0x70c] sm:$0xf0]  ;;  %3692 = vmatpush.bf16.msrb.mxu1 %v5696_v31  ;;  %9399 = vst [vmem:[#allocation9_spill] sm:$0xff] %v8002_v24  ;;  %v8007_v28 = vor.u32 %v7078_v59, %v4977_v60 }
  0x85   : > { %v5679_v34 = vld [vmem:[%s7810_s7 + $0x520] sm:$0xf]  ;;  %v7442_v42 = vld [vmem:[%s7810_s7 + $0xaec] sm:$0xf0]  ;;  %v5552_v43 = vor.u32 %v7226_v33, %v5551_v30  ;;  %3711 = vmatpush.bf16.msrb.mxu2 %v5808_v32  ;;  %9401 = vst [vmem:[#allocation11_spill] sm:$0xff] %v8009_v29 }
  0x86   : > { %v5791_v37 = vld [vmem:[%s7810_s7 + $0x600] sm:$0xf]  ;;  %v7474_v46 = vld [vmem:[%s7810_s7 + $0xbec] sm:$0xf0]  ;;  %v5680_v47 = vor.u32 %v7258_v35, %v5679_v34  ;;  %3729 = vmatpush.bf16.msrb.mxu3 %v5936_v36  ;;  %9400 = vst [vmem:[#allocation10_spill] sm:$0xff] %v8007_v28 }
  0x87   : > { %v5919_v39 = vld [vmem:[%s7810_s7 + $0x700] sm:$0xf]  ;;  %v5792_v48 = vor.u32 %v7286_v38, %v5791_v37  ;;  %v7222_v49 = vld [vmem:[%s7810_s7 + $0x40c] sm:$0xf0]  ;;  %3675 = vmatpush.bf16.msrb.mxu0 %v5552_v43 }
  0x88   : > { %v6415_v41 = vld [vmem:[%s7810_s7 + $0xae0] sm:$0xf]  ;;  %v7254_v51 = vld [vmem:[%s7810_s7 + $0x50c] sm:$0xf0]  ;;  %v5920_v52 = vor.u32 %v7318_v40, %v5919_v39  ;;  %3693 = vmatpush.bf16.msrb.mxu1 %v5680_v47 }
  0x89   : > { %v5535_v44 = vld [vmem:[%s7810_s7 + $0x400] sm:$0xf]  ;;  %v4975_v53 = vld [vmem:[%s7812_s8 + $0x10] sm:$0xf]  ;;  %v6416_v55 = vor.u32 %v7442_v42, %v6415_v41  ;;  %3712 = vmatpush.bf16.msrb.mxu2 %v5792_v48 }
  0x8a   : > { %v6543_v45 = vld [vmem:[%s7810_s7 + $0xbe0] sm:$0xf]  ;;  %v7086_v54 = vld [vmem:[%s7812_s8 + $0x4c] sm:$0xf0]  ;;  %v5536_v1 = vor.u32 %v7222_v49, %v5535_v44  ;;  %3730 = vmatpush.bf16.msrb.mxu3 %v5920_v52 }
  0x8b   : > { %v5663_v50 = vld [vmem:[%s7810_s7 + $0x500] sm:$0xf]  ;;  %v7378_v57 = vld [vmem:[%s7810_s7 + $0x8ec] sm:$0xf0]  ;;  %v6544_v61 = vor.u32 %v7474_v46, %v6543_v45  ;;  %v8000_v23 = vor.u32 %v7086_v54, %v4975_v53 }
  0x8c   : > { %v6159_v56 = vld [vmem:[%s7810_s7 + $0x8e0] sm:$0xf]  ;;  %v7410_v62 = vld [vmem:[%s7810_s7 + $0x9ec] sm:$0xf0]  ;;  %v5664_v6 = vor.u32 %v7254_v51, %v5663_v50  ;;  %3676 = vmatpush.bf16.msrb.mxu0 %v5536_v1  ;;  %3713 = vmatmul.bf16.vlgmr.msrb.gmra.mxu2 %v8002_v24 }
  0x8d   : > { %v6287_v58 = vld [vmem:[%s7810_s7 + $0x9e0] sm:$0xf]  ;;  %v7438_v0 = vld [vmem:[%s7810_s7 + $0xacc] sm:$0xf0]  ;;  %v6160_v11 = vor.u32 %v7378_v57, %v6159_v56  ;;  %3777 = vmatpush.bf16.msra.mxu2 %v6416_v55  ;;  %9398 = vst [vmem:[#allocation8_spill] sm:$0xff] %v8000_v23  ;;  %v384_v55 = vld [vmem:[%s7812_s8 + $0x98] sm:$0xff] }
  0x8e   : > { %v6399_v63 = vld [vmem:[%s7810_s7 + $0xac0] sm:$0xf]  ;;  %v7470_v16 = vld [vmem:[%s7810_s7 + $0xbcc] sm:$0xf0]  ;;  %v6288_v17 = vor.u32 %v7410_v62, %v6287_v58  ;;  %3795 = vmatpush.bf16.msra.mxu3 %v6544_v61  ;;  %3694 = vmatpush.bf16.msrb.mxu1 %v5664_v6  ;;  %v963_v2 = vunpack.c.l.b16 %v384_v55 }
  0x8f   : > { %v6527_v12 = vld [vmem:[%s7810_s7 + $0xbc0] sm:$0xf]  ;;  %v6400_v19 = vor.u32 %v7438_v0, %v6399_v63  ;;  %v7374_v21 = vld [vmem:[%s7810_s7 + $0x8cc] sm:$0xf0]  ;;  %3677 = vmatmul.bf16.vlgmr.msrb.gmra.mxu0 %v8000_v23  ;;  %3731 = vmatmul.bf16.vlgmr.msrb.gmra.mxu3 %v8009_v29 }
  0x90   : > { %v6143_v20 = vld [vmem:[%s7810_s7 + $0x8c0] sm:$0xf]  ;;  %v7406_v25 = vld [vmem:[%s7810_s7 + $0x9cc] sm:$0xf0]  ;;  %3741 = vmatpush.bf16.msra.mxu0 %v6160_v11  ;;  %v6528_v30 = vor.u32 %v7470_v16, %v6527_v12  ;;  %v964_v11 = vunpack.c.h.b16 %v384_v55 }
  0x91   : > { %v6271_v22 = vld [vmem:[%s7810_s7 + $0x9c0] sm:$0xf]  ;;  %v7434_v27 = vld [vmem:[%s7810_s7 + $0xaac] sm:$0xf0]  ;;  %v6144_v31 = vor.u32 %v7374_v21, %v6143_v20  ;;  %3778 = vmatpush.bf16.msra.mxu2 %v6400_v19  ;;  %3695 = vmatmul.bf16.vlgmr.msrb.gmra.mxu1 %v8007_v28 }
  0x92   : > { %v6383_v26 = vld [vmem:[%s7810_s7 + $0xaa0] sm:$0xf]  ;;  %v7466_v33 = vld [vmem:[%s7810_s7 + $0xbac] sm:$0xf0]  ;;  %3759 = vmatpush.bf16.msra.mxu1 %v6288_v17  ;;  %v6272_v34 = vor.u32 %v7406_v25, %v6271_v22  ;;  %3796 = vmatpush.bf16.msra.mxu3 %v6528_v30  ;;  %v8048_v30 = vpack.c.b16 %v963_v2, %v963_v2 }
  0x93   : > { %v6511_v32 = vld [vmem:[%s7810_s7 + $0xba0] sm:$0xf]  ;;  %v6384_v35 = vor.u32 %v7434_v27, %v6383_v26  ;;  %v7370_v37 = vld [vmem:[%s7810_s7 + $0x8ac] sm:$0xf0] }
  0x94   : > { %v6127_v36 = vld [vmem:[%s7810_s7 + $0x8a0] sm:$0xf]  ;;  %v7402_v39 = vld [vmem:[%s7810_s7 + $0x9ac] sm:$0xf0]  ;;  %3742 = vmatpush.bf16.msra.mxu0 %v6144_v31  ;;  %v6512_v42 = vor.u32 %v7466_v33, %v6511_v32  ;;  %9403 = vst [vmem:[#allocation13_spill] sm:$0xff] %v8048_v30 }
  0x95   : > { %v6255_v38 = vld [vmem:[%s7810_s7 + $0x9a0] sm:$0xf]  ;;  %v7430_v41 = vld [vmem:[%s7810_s7 + $0xa8c] sm:$0xf0]  ;;  %v6128_v43 = vor.u32 %v7370_v37, %v6127_v36  ;;  %3779 = vmatpush.bf16.msra.mxu2 %v6384_v35  ;;  %v8055_v35 = vpack.c.b16 %v964_v11, %v964_v11 }
  0x96   : > { %v6367_v40 = vld [vmem:[%s7810_s7 + $0xa80] sm:$0xf]  ;;  %v7462_v45 = vld [vmem:[%s7810_s7 + $0xb8c] sm:$0xf0]  ;;  %3760 = vmatpush.bf16.msra.mxu1 %v6272_v34  ;;  %v6256_v46 = vor.u32 %v7402_v39, %v6255_v38  ;;  %3797 = vmatpush.bf16.msra.mxu3 %v6512_v42 }
  0x97   : > { %v6495_v44 = vld [vmem:[%s7810_s7 + $0xb80] sm:$0xf]  ;;  %v6368_v47 = vor.u32 %v7430_v41, %v6367_v40  ;;  %v7366_v49 = vld [vmem:[%s7810_s7 + $0x88c] sm:$0xf0]  ;;  %9405 = vst [vmem:[#allocation15_spill] sm:$0xff] %v8055_v35 }
  0x98   : > { %v6111_v48 = vld [vmem:[%s7810_s7 + $0x880] sm:$0xf]  ;;  %v7398_v51 = vld [vmem:[%s7810_s7 + $0x98c] sm:$0xf0]  ;;  %3743 = vmatpush.bf16.msra.mxu0 %v6128_v43  ;;  %v6496_v56 = vor.u32 %v7462_v45, %v6495_v44 }
  0x99   : > { %v6239_v50 = vld [vmem:[%s7810_s7 + $0x980] sm:$0xf]  ;;  %v7426_v53 = vld [vmem:[%s7810_s7 + $0xa6c] sm:$0xf0]  ;;  %v6112_v57 = vor.u32 %v7366_v49, %v6111_v48  ;;  %3780 = vmatpush.bf16.msra.mxu2 %v6368_v47 }
  0x9a   : > { %v6351_v52 = vld [vmem:[%s7810_s7 + $0xa60] sm:$0xf]  ;;  %v383_v54 = vld [vmem:[%s7812_s8 + $0x90] sm:$0xff]  ;;  %3761 = vmatpush.bf16.msra.mxu1 %v6256_v46  ;;  %v6240_v60 = vor.u32 %v7398_v51, %v6239_v50  ;;  %3798 = vmatpush.bf16.msra.mxu3 %v6496_v56 }
  0x9b   : > { %v6479_v58 = vld [vmem:[%s7810_s7 + $0xb60] sm:$0xf]  ;;  %v7458_v59 = vld [vmem:[%s7810_s7 + $0xb6c] sm:$0xf0]  ;;  %v6352_v61 = vor.u32 %v7426_v53, %v6351_v52  ;;  %v961_v1 = vunpack.c.l.b16 %v383_v54  ;;  %v962_v7 = vunpack.c.h.b16 %v383_v54 }
  0x9c   : > { %v6095_v62 = vld [vmem:[%s7810_s7 + $0x860] sm:$0xf]  ;;  %v7362_v63 = vld [vmem:[%s7810_s7 + $0x86c] sm:$0xf0]  ;;  %3744 = vmatpush.bf16.msra.mxu0 %v6112_v57  ;;  %v6480_v12 = vor.u32 %v7458_v59, %v6479_v58  ;;  %3718 = vmatmul.bf16.gmra.mxu2 %v8048_v30 }
  0x9d   : > { %v6223_v0 = vld [vmem:[%s7810_s7 + $0x960] sm:$0xf]  ;;  %v7394_v4 = vld [vmem:[%s7810_s7 + $0x96c] sm:$0xf0]  ;;  %v6096_v16 = vor.u32 %v7362_v63, %v6095_v62  ;;  %3781 = vmatpush.bf16.msra.mxu2 %v6352_v61  ;;  %v8046_v27 = vpack.c.b16 %v961_v1, %v961_v1  ;;  %v8053_v34 = vpack.c.b16 %v962_v7, %v962_v7 }
  0x9e   : > { %v6335_v5 = vld [vmem:[%s7810_s7 + $0xa40] sm:$0xf]  ;;  %v7422_v6 = vld [vmem:[%s7810_s7 + $0xa4c] sm:$0xf0]  ;;  %3762 = vmatpush.bf16.msra.mxu1 %v6240_v60  ;;  %v6224_v20 = vor.u32 %v7394_v4, %v6223_v0  ;;  %3799 = vmatpush.bf16.msra.mxu3 %v6480_v12 }
  0x9f   : > { %v6463_v17 = vld [vmem:[%s7810_s7 + $0xb40] sm:$0xf]  ;;  %v7454_v19 = vld [vmem:[%s7810_s7 + $0xb4c] sm:$0xf0]  ;;  %v6336_v21 = vor.u32 %v7422_v6, %v6335_v5  ;;  %9402 = vst [vmem:[#allocation12_spill] sm:$0xff] %v8046_v27  ;;  %3682 = vmatmul.bf16.gmra.mxu0 %v8046_v27  ;;  %3736 = vmatmul.bf16.gmra.mxu3 %v8055_v35 }
  0xa0   : > { %v6079_v22 = vld [vmem:[%s7810_s7 + $0x840] sm:$0xf]  ;;  %v7358_v25 = vld [vmem:[%s7810_s7 + $0x84c] sm:$0xf0]  ;;  %9404 = vst [vmem:[#allocation14_spill] sm:$0xff] %v8053_v34  ;;  %3745 = vmatpush.bf16.msra.mxu0 %v6096_v16  ;;  %v6464_v36 = vor.u32 %v7454_v19, %v6463_v17 }
  0xa1   : > { %v6207_v26 = vld [vmem:[%s7810_s7 + $0x940] sm:$0xf]  ;;  %v7390_v31 = vld [vmem:[%s7810_s7 + $0x94c] sm:$0xf0]  ;;  %v6080_v37 = vor.u32 %v7358_v25, %v6079_v22  ;;  %3782 = vmatpush.bf16.msra.mxu2 %v6336_v21  ;;  %3700 = vmatmul.bf16.gmra.mxu1 %v8053_v34  ;;  %v7080_v19 = vld [vmem:[%s7812_s8 + $0x24] sm:$0xf] }
  0xa2   : > { %v6319_v32 = vld [vmem:[%s7810_s7 + $0xa20] sm:$0xf]  ;;  %v7418_v33 = vld [vmem:[%s7810_s7 + $0xa2c] sm:$0xf0]  ;;  %3763 = vmatpush.bf16.msra.mxu1 %v6224_v20  ;;  %v6208_v40 = vor.u32 %v7390_v31, %v6207_v26  ;;  %3800 = vmatpush.bf16.msra.mxu3 %v6464_v36  ;;  %v4993_v20 = vld [vmem:[%s7812_s8 + $0x60] sm:$0xf0] }
  0xa3   : > { %v6447_v38 = vld [vmem:[%s7810_s7 + $0xb20] sm:$0xf]  ;;  %v7450_v39 = vld [vmem:[%s7810_s7 + $0xb2c] sm:$0xf0]  ;;  %v6320_v41 = vor.u32 %v7418_v33, %v6319_v32  ;;  %v4999_v31 = vld [vmem:[%s7812_s8 + $0x28] sm:$0xf] }
  0xa4   : > { %v6063_v42 = vld [vmem:[%s7810_s7 + $0x820] sm:$0xf]  ;;  %v7354_v43 = vld [vmem:[%s7810_s7 + $0x82c] sm:$0xf0]  ;;  %3746 = vmatpush.bf16.msra.mxu0 %v6080_v37  ;;  %v6448_v50 = vor.u32 %v7450_v39, %v6447_v38  ;;  %v7089_v32 = vld [vmem:[%s7812_s8 + $0x64] sm:$0xf0] }
  0xa5   : > { %v6191_v44 = vld [vmem:[%s7810_s7 + $0x920] sm:$0xf]  ;;  %v7386_v45 = vld [vmem:[%s7810_s7 + $0x92c] sm:$0xf0]  ;;  %v6064_v51 = vor.u32 %v7354_v43, %v6063_v42  ;;  %3783 = vmatpush.bf16.msra.mxu2 %v6320_v41  ;;  %v7081_v33 = vld [vmem:[%s7812_s8 + $0x2c] sm:$0xf] }
  0xa6   : > { %v6303_v46 = vld [vmem:[%s7810_s7 + $0xa00] sm:$0xf]  ;;  %v7414_v47 = vld [vmem:[%s7810_s7 + $0xa0c] sm:$0xf0]  ;;  %3764 = vmatpush.bf16.msra.mxu1 %v6208_v40  ;;  %v6192_v55 = vor.u32 %v7386_v45, %v6191_v44  ;;  %3801 = vmatpush.bf16.msra.mxu3 %v6448_v50  ;;  %v5001_v37 = vld [vmem:[%s7812_s8 + $0x68] sm:$0xf0]  ;;  %v8102_v45 = vor.u32 %v7089_v32, %v4999_v31 }
  0xa7   : > { %v6927_v48 = vld [vmem:[%s7810_s7 + $0xee0] sm:$0xf]  ;;  %v7570_v49 = vld [vmem:[%s7810_s7 + $0xeec] sm:$0xf0]  ;;  %v6304_v56 = vor.u32 %v7414_v47, %v6303_v46  ;;  %v8109_v50 = vor.u32 %v7081_v33, %v5001_v37 }
  0xa8   : > { %v6431_v52 = vld [vmem:[%s7810_s7 + $0xb00] sm:$0xf]  ;;  %v7446_v53 = vld [vmem:[%s7810_s7 + $0xb0c] sm:$0xf0]  ;;  %v6928_v60 = vor.u32 %v7570_v49, %v6927_v48  ;;  %3747 = vmatpush.bf16.msra.mxu0 %v6064_v51  ;;  %v8107_v49 = vor.u32 %v7080_v19, %v4993_v20  ;;  %v386_v20 = vld [vmem:[%s7812_s8 + $0xa8] sm:$0xff] }
  0xa9   : > { %v6047_v54 = vld [vmem:[%s7810_s7 + $0x800] sm:$0xf]  ;;  %v7350_v57 = vld [vmem:[%s7810_s7 + $0x80c] sm:$0xf0]  ;;  %v6432_v4 = vor.u32 %v7446_v53, %v6431_v52  ;;  %3784 = vmatpush.bf16.msra.mxu2 %v6304_v56 }
  0xaa   : > { %v6175_v58 = vld [vmem:[%s7810_s7 + $0x900] sm:$0xf]  ;;  %v7382_v59 = vld [vmem:[%s7810_s7 + $0x90c] sm:$0xf0]  ;;  %v6048_v5 = vor.u32 %v7350_v57, %v6047_v54  ;;  %3765 = vmatpush.bf16.msra.mxu1 %v6192_v55 }
  0xab   : > { %v7055_v61 = vld [vmem:[%s7810_s7 + $0xfe0] sm:$0xf]  ;;  %v7602_v62 = vld [vmem:[%s7810_s7 + $0xfec] sm:$0xf0]  ;;  %v6176_v11 = vor.u32 %v7382_v59, %v6175_v58  ;;  %3802 = vmatpush.bf16.msra.mxu3 %v6432_v4 }
  0xac   : > { %v6671_v63 = vld [vmem:[%s7810_s7 + $0xce0] sm:$0xf]  ;;  %v7506_v0 = vld [vmem:[%s7810_s7 + $0xcec] sm:$0xf0]  ;;  %v7056_v17 = vor.u32 %v7602_v62, %v7055_v61  ;;  %3748 = vmatpush.bf16.msra.mxu0 %v6048_v5  ;;  %3785 = vmatmul.bf16.vlgmr.msra.gmra.mxu2 %v8102_v45 }
  0xad   : > { %v6799_v1 = vld [vmem:[%s7810_s7 + $0xde0] sm:$0xf]  ;;  %v7538_v2 = vld [vmem:[%s7810_s7 + $0xdec] sm:$0xf0]  ;;  %3849 = vmatpush.bf16.msrb.mxu2 %v6928_v60  ;;  %v6672_v21 = vor.u32 %v7506_v0, %v6671_v63 }
  0xae   : > { %v6911_v6 = vld [vmem:[%s7810_s7 + $0xec0] sm:$0xf]  ;;  %v7566_v7 = vld [vmem:[%s7810_s7 + $0xecc] sm:$0xf0]  ;;  %v6800_v22 = vor.u32 %v7538_v2, %v6799_v1  ;;  %3766 = vmatpush.bf16.msra.mxu1 %v6176_v11 }
  0xaf   : > { %v4991_v12 = vld [vmem:[%s7812_s8 + $0x20] sm:$0xf]  ;;  %v7598_v26 = vld [vmem:[%s7810_s7 + $0xfcc] sm:$0xf0]  ;;  %v6912_v36 = vor.u32 %v7566_v7, %v6911_v6  ;;  %3867 = vmatpush.bf16.msrb.mxu3 %v7056_v17 }
  0xb0   : > { %v7088_v16 = vld [vmem:[%s7812_s8 + $0x5c] sm:$0xf0]  ;;  %v7502_v39 = vld [vmem:[%s7810_s7 + $0xccc] sm:$0xf0]  ;;  %3813 = vmatpush.bf16.msrb.mxu0 %v6672_v21  ;;  %3803 = vmatmul.bf16.vlgmr.msra.gmra.mxu3 %v8109_v50 }
  0xb1   : > { %v7039_v25 = vld [vmem:[%s7810_s7 + $0xfc0] sm:$0xf]  ;;  %v7534_v42 = vld [vmem:[%s7810_s7 + $0xdcc] sm:$0xf0]  ;;  %v8100_v44 = vor.u32 %v7088_v16, %v4991_v12  ;;  %3850 = vmatpush.bf16.msrb.mxu2 %v6912_v36  ;;  %3767 = vmatmul.bf16.vlgmr.msra.gmra.mxu1 %v8107_v49 }
  0xb2   : > { %v6655_v38 = vld [vmem:[%s7810_s7 + $0xcc0] sm:$0xf]  ;;  %v7040_v40 = vor.u32 %v7598_v26, %v7039_v25  ;;  %3831 = vmatpush.bf16.msrb.mxu1 %v6800_v22  ;;  %v7562_v46 = vld [vmem:[%s7810_s7 + $0xeac] sm:$0xf0] }
  0xb3   : > { %v6783_v41 = vld [vmem:[%s7810_s7 + $0xdc0] sm:$0xf]  ;;  %v7594_v48 = vld [vmem:[%s7810_s7 + $0xfac] sm:$0xf0]  ;;  %v6656_v51 = vor.u32 %v7502_v39, %v6655_v38  ;;  %3749 = vmatmul.bf16.vlgmr.msra.gmra.mxu0 %v8100_v44  ;;  %v967_v39 = vunpack.c.l.b16 %v386_v20 }
  0xb4   : > { %v6895_v43 = vld [vmem:[%s7810_s7 + $0xea0] sm:$0xf]  ;;  %v6784_v52 = vor.u32 %v7534_v42, %v6783_v41  ;;  %v7498_v54 = vld [vmem:[%s7810_s7 + $0xcac] sm:$0xf0]  ;;  %3868 = vmatpush.bf16.msrb.mxu3 %v7040_v40 }
  0xb5   : > { %v7023_v47 = vld [vmem:[%s7810_s7 + $0xfa0] sm:$0xf]  ;;  %v6896_v55 = vor.u32 %v7562_v46, %v6895_v43  ;;  %v7530_v58 = vld [vmem:[%s7810_s7 + $0xdac] sm:$0xf0]  ;;  %3814 = vmatpush.bf16.msrb.mxu0 %v6656_v51  ;;  %v968_v46 = vunpack.c.h.b16 %v386_v20 }
  0xb6   : > { %v6639_v53 = vld [vmem:[%s7810_s7 + $0xca0] sm:$0xf]  ;;  %v7024_v56 = vor.u32 %v7594_v48, %v7023_v47  ;;  %v7558_v60 = vld [vmem:[%s7810_s7 + $0xe8c] sm:$0xf0]  ;;  %3832 = vmatpush.bf16.msrb.mxu1 %v6784_v52 }
  0xb7   : > { %v6767_v57 = vld [vmem:[%s7810_s7 + $0xda0] sm:$0xf]  ;;  %v7590_v62 = vld [vmem:[%s7810_s7 + $0xf8c] sm:$0xf0]  ;;  %v6640_v63 = vor.u32 %v7498_v54, %v6639_v53  ;;  %3851 = vmatpush.bf16.msrb.mxu2 %v6896_v55 }
  0xb8   : > { %v6879_v59 = vld [vmem:[%s7810_s7 + $0xe80] sm:$0xf]  ;;  %v6768_v0 = vor.u32 %v7530_v58, %v6767_v57  ;;  %v7494_v2 = vld [vmem:[%s7810_s7 + $0xc8c] sm:$0xf0]  ;;  %3869 = vmatpush.bf16.msrb.mxu3 %v7024_v56 }
  0xb9   : > { %v7007_v61 = vld [vmem:[%s7810_s7 + $0xf80] sm:$0xf]  ;;  %v6880_v4 = vor.u32 %v7558_v60, %v6879_v59  ;;  %v7526_v7 = vld [vmem:[%s7810_s7 + $0xd8c] sm:$0xf0]  ;;  %3815 = vmatpush.bf16.msrb.mxu0 %v6640_v63  ;;  %v8148_v59 = vpack.c.b16 %v967_v39, %v967_v39 }
  0xba   : > { %v6623_v1 = vld [vmem:[%s7810_s7 + $0xc80] sm:$0xf]  ;;  %v7008_v5 = vor.u32 %v7590_v62, %v7007_v61  ;;  %v7554_v12 = vld [vmem:[%s7810_s7 + $0xe6c] sm:$0xf0]  ;;  %3833 = vmatpush.bf16.msrb.mxu1 %v6768_v0  ;;  %v8155_v0 = vpack.c.b16 %v968_v46, %v968_v46 }
  0xbb   : > { %v6751_v6 = vld [vmem:[%s7810_s7 + $0xd80] sm:$0xf]  ;;  %v7586_v17 = vld [vmem:[%s7810_s7 + $0xf6c] sm:$0xf0]  ;;  %v6624_v21 = vor.u32 %v7494_v2, %v6623_v1  ;;  %3852 = vmatpush.bf16.msrb.mxu2 %v6880_v4  ;;  %9407 = vst [vmem:[#allocation17_spill] sm:$0xff] %v8148_v59 }
  0xbc   : > { %v6863_v11 = vld [vmem:[%s7810_s7 + $0xe60] sm:$0xf]  ;;  %v6752_v22 = vor.u32 %v7526_v7, %v6751_v6  ;;  %v7490_v26 = vld [vmem:[%s7810_s7 + $0xc6c] sm:$0xf0]  ;;  %3870 = vmatpush.bf16.msrb.mxu3 %v7008_v5  ;;  %9409 = vst [vmem:[#allocation19_spill] sm:$0xff] %v8155_v0  ;;  %3790 = vmatmul.bf16.gmra.mxu2 %v8148_v59 }
  0xbd   : > { %v6991_v16 = vld [vmem:[%s7810_s7 + $0xf60] sm:$0xf]  ;;  %v6864_v31 = vor.u32 %v7554_v12, %v6863_v11  ;;  %v7522_v36 = vld [vmem:[%s7810_s7 + $0xd6c] sm:$0xf0]  ;;  %3816 = vmatpush.bf16.msrb.mxu0 %v6624_v21  ;;  %v7184_v21 = vld [vmem:[%s7810_s7 + $0x2e4] sm:$0xf] }
  0xbe   : > { %v385_v19 = vld [vmem:[%s7812_s8 + $0xa0] sm:$0xff]  ;;  %v6992_v32 = vor.u32 %v7586_v17, %v6991_v16  ;;  %v7550_v40 = vld [vmem:[%s7810_s7 + $0xe4c] sm:$0xf0]  ;;  %3834 = vmatpush.bf16.msrb.mxu1 %v6752_v22  ;;  %v5393_v22 = vld [vmem:[%s7810_s7 + $0x2f0] sm:$0xf0] }
  0xbf   : > { %v6607_v25 = vld [vmem:[%s7810_s7 + $0xc60] sm:$0xf]  ;;  %v965_v38 = vunpack.c.l.b16 %v385_v19  ;;  %v7582_v42 = vld [vmem:[%s7810_s7 + $0xf4c] sm:$0xf0]  ;;  %v966_v43 = vunpack.c.h.b16 %v385_v19  ;;  %3853 = vmatpush.bf16.msrb.mxu2 %v6864_v31 }
  0xc0   : > { %v6735_v33 = vld [vmem:[%s7810_s7 + $0xd60] sm:$0xf]  ;;  %v6608_v47 = vor.u32 %v7490_v26, %v6607_v25  ;;  %v7486_v52 = vld [vmem:[%s7810_s7 + $0xc4c] sm:$0xf0]  ;;  %3871 = vmatpush.bf16.msrb.mxu3 %v6992_v32  ;;  %v7216_v25 = vld [vmem:[%s7810_s7 + $0x3e4] sm:$0xf] }
  0xc1   : > { %v6847_v37 = vld [vmem:[%s7810_s7 + $0xe40] sm:$0xf]  ;;  %v6736_v48 = vor.u32 %v7522_v36, %v6735_v33  ;;  %v7518_v56 = vld [vmem:[%s7810_s7 + $0xd4c] sm:$0xf0]  ;;  %v8146_v58 = vpack.c.b16 %v965_v38, %v965_v38  ;;  %v8153_v63 = vpack.c.b16 %v966_v43, %v966_v43  ;;  %3808 = vmatmul.bf16.gmra.mxu3 %v8155_v0  ;;  %v5521_v26 = vld [vmem:[%s7810_s7 + $0x3f0] sm:$0xf0]  ;;  %v5396_v43 = vor.u32 %v7184_v21, %v5393_v22 }
  0xc2   : > { %v6975_v41 = vld [vmem:[%s7810_s7 + $0xf40] sm:$0xf]  ;;  %v6848_v53 = vor.u32 %v7550_v40, %v6847_v37  ;;  %v7546_v60 = vld [vmem:[%s7810_s7 + $0xe2c] sm:$0xf0]  ;;  %3817 = vmatpush.bf16.msrb.mxu0 %v6608_v47  ;;  %v5524_v46 = vor.u32 %v7216_v25, %v5521_v26  ;;  %v7152_v47 = vld [vmem:[%s7810_s7 + $0x1e4] sm:$0xf] }
  0xc3   : > { %v6591_v51 = vld [vmem:[%s7810_s7 + $0xc40] sm:$0xf]  ;;  %v6976_v54 = vor.u32 %v7582_v42, %v6975_v41  ;;  %9406 = vst [vmem:[#allocation16_spill] sm:$0xff] %v8146_v58  ;;  %v7578_v62 = vld [vmem:[%s7810_s7 + $0xf2c] sm:$0xf0]  ;;  %3835 = vmatpush.bf16.msrb.mxu1 %v6736_v48  ;;  %3754 = vmatmul.bf16.gmra.mxu0 %v8146_v58 }
  0xc4   : > { %v6719_v55 = vld [vmem:[%s7810_s7 + $0xd40] sm:$0xf]  ;;  %9408 = vst [vmem:[#allocation18_spill] sm:$0xff] %v8153_v63  ;;  %v6592_v1 = vor.u32 %v7486_v52, %v6591_v51  ;;  %v7482_v5 = vld [vmem:[%s7810_s7 + $0xc2c] sm:$0xf0]  ;;  %3854 = vmatpush.bf16.msrb.mxu2 %v6848_v53  ;;  %3772 = vmatmul.bf16.gmra.mxu1 %v8153_v63 }
  0xc5   : > { %v6831_v57 = vld [vmem:[%s7810_s7 + $0xe20] sm:$0xf]  ;;  %v6720_v2 = vor.u32 %v7518_v56, %v6719_v55  ;;  %3872 = vmatpush.bf16.msrb.mxu3 %v6976_v54  ;;  %v7514_v12 = vld [vmem:[%s7810_s7 + $0xd2c] sm:$0xf0]  ;;  %v7120_v41 = vld [vmem:[%s7810_s7 + $0xe4] sm:$0xf] }
  0xc6   : > { %v6959_v61 = vld [vmem:[%s7810_s7 + $0xf20] sm:$0xf]  ;;  %v6832_v7 = vor.u32 %v7546_v60, %v6831_v57  ;;  %v7542_v17 = vld [vmem:[%s7810_s7 + $0xe0c] sm:$0xf0]  ;;  %3818 = vmatpush.bf16.msrb.mxu0 %v6592_v1  ;;  %v5137_v42 = vld [vmem:[%s7810_s7 + $0xf0] sm:$0xf0] }
  0xc7   : > { %v6575_v4 = vld [vmem:[%s7810_s7 + $0xc20] sm:$0xf]  ;;  %v6960_v11 = vor.u32 %v7578_v62, %v6959_v61  ;;  %v7574_v20 = vld [vmem:[%s7810_s7 + $0xf0c] sm:$0xf0]  ;;  %3836 = vmatpush.bf16.msrb.mxu1 %v6720_v2  ;;  %v5265_v48 = vld [vmem:[%s7810_s7 + $0x1f0] sm:$0xf0]  ;;  %v5140_v61 = vor.u32 %v7120_v41, %v5137_v42 }
  0xc8   : > { %v6703_v6 = vld [vmem:[%s7810_s7 + $0xd20] sm:$0xf]  ;;  %v6576_v31 = vor.u32 %v7482_v5, %v6575_v4  ;;  %v7478_v36 = vld [vmem:[%s7810_s7 + $0xc0c] sm:$0xf0]  ;;  %3855 = vmatpush.bf16.msrb.mxu2 %v6832_v7  ;;  %v7180_v51 = vld [vmem:[%s7810_s7 + $0x2c4] sm:$0xf]  ;;  %v5268_v62 = vor.u32 %v7152_v47, %v5265_v48 }
  0xc9   : > { %v6815_v16 = vld [vmem:[%s7810_s7 + $0xe00] sm:$0xf]  ;;  %v6704_v32 = vor.u32 %v7514_v12, %v6703_v6  ;;  %3873 = vmatpush.bf16.msrb.mxu3 %v6960_v11  ;;  %v7510_v40 = vld [vmem:[%s7810_s7 + $0xd0c] sm:$0xf0]  ;;  %v5377_v52 = vld [vmem:[%s7810_s7 + $0x2d0] sm:$0xf0] }
  0xca   : > { %v6943_v19 = vld [vmem:[%s7810_s7 + $0xf00] sm:$0xf]  ;;  %v6816_v38 = vor.u32 %v7542_v17, %v6815_v16  ;;  %v7212_v53 = vld [vmem:[%s7810_s7 + $0x3c4] sm:$0xf]  ;;  %v5505_v54 = vld [vmem:[%s7810_s7 + $0x3d0] sm:$0xf0]  ;;  %3819 = vmatpush.bf16.msrb.mxu0 %v6576_v31  ;;  %v5380_v5 = vor.u32 %v7180_v51, %v5377_v52 }
  0xcb   : > { %v6559_v33 = vld [vmem:[%s7810_s7 + $0xc00] sm:$0xf]  ;;  %v6944_v39 = vor.u32 %v7574_v20, %v6943_v19  ;;  %3837 = vmatpush.bf16.msrb.mxu1 %v6704_v32  ;;  %v5007_v57 = vld [vmem:[%s7812_s8 + $0x30] sm:$0xf]  ;;  %v7116_v1 = vld [vmem:[%s7810_s7 + $0xc4] sm:$0xf]  ;;  %v5508_v6 = vor.u32 %v7212_v53, %v5505_v54 }
  0xcc   : > { %v6687_v37 = vld [vmem:[%s7810_s7 + $0xd00] sm:$0xf]  ;;  %v6560_v55 = vor.u32 %v7478_v36, %v6559_v33  ;;  %3856 = vmatpush.bf16.msrb.mxu2 %v6816_v38  ;;  %v7090_v60 = vld [vmem:[%s7812_s8 + $0x6c] sm:$0xf0]  ;;  %v7082_v2 = vld [vmem:[%s7812_s8 + $0x34] sm:$0xf] }
  0xcd   : > { %v6688_v56 = vor.u32 %v7510_v40, %v6687_v37  ;;  %3874 = vmatpush.bf16.msrb.mxu3 %v6944_v39  ;;  %v5009_v4 = vld [vmem:[%s7812_s8 + $0x70] sm:$0xf0]  ;;  %v7148_v11 = vld [vmem:[%s7810_s7 + $0x1c4] sm:$0xf]  ;;  %v5015_v16 = vld [vmem:[%s7812_s8 + $0x38] sm:$0xf]  ;;  %v8202_v36 = vor.u32 %v7090_v60, %v5007_v57 }
  0xce   : > { %v5121_v7 = vld [vmem:[%s7810_s7 + $0xd0] sm:$0xf0]  ;;  %v7091_v17 = vld [vmem:[%s7812_s8 + $0x74] sm:$0xf0]  ;;  %v7083_v19 = vld [vmem:[%s7812_s8 + $0x3c] sm:$0xf]  ;;  %3820 = vmatpush.bf16.msrb.mxu0 %v6560_v55  ;;  %v8209_v41 = vor.u32 %v7082_v2, %v5009_v4 }
  0xcf   : > { %v5249_v12 = vld [vmem:[%s7810_s7 + $0x1d0] sm:$0xf0]  ;;  %3838 = vmatpush.bf16.msrb.mxu1 %v6688_v56  ;;  %v5017_v20 = vld [vmem:[%s7812_s8 + $0x78] sm:$0xf0]  ;;  %v7176_v21 = vld [vmem:[%s7810_s7 + $0x2a4] sm:$0xf]  ;;  %v5124_v25 = vor.u32 %v7116_v1, %v5121_v7  ;;  %v8204_v37 = vor.u32 %v7091_v17, %v5015_v16 }
  0xd0   : > { %3921 = vmatpush.bf16.msra.mxu2 %v5396_v43  ;;  %v5361_v22 = vld [vmem:[%s7810_s7 + $0x2b0] sm:$0xf0]  ;;  %v5252_v26 = vor.u32 %v7148_v11, %v5249_v12  ;;  %v7208_v31 = vld [vmem:[%s7810_s7 + $0x3a4] sm:$0xf]  ;;  %v8211_v42 = vor.u32 %v7083_v19, %v5017_v20  ;;  %v388_v20 = vld [vmem:[%s7812_s8 + $0xb8] sm:$0xff] }
  0xd1   : > { %3939 = vmatpush.bf16.msra.mxu3 %v5524_v46  ;;  %v5489_v32 = vld [vmem:[%s7810_s7 + $0x3b0] sm:$0xf0]  ;;  %v7112_v33 = vld [vmem:[%s7810_s7 + $0xa4] sm:$0xf]  ;;  %v5364_v43 = vor.u32 %v7176_v21, %v5361_v22  ;;  %3857 = vmatmul.bf16.vlgmr.msrb.gmra.mxu2 %v8204_v37 }
  0xd2   : > { %3885 = vmatpush.bf16.msra.mxu0 %v5140_v61  ;;  %v5105_v38 = vld [vmem:[%s7810_s7 + $0xb0] sm:$0xf0]  ;;  %v7144_v39 = vld [vmem:[%s7810_s7 + $0x1a4] sm:$0xf]  ;;  %v5492_v46 = vor.u32 %v7208_v31, %v5489_v32  ;;  %3875 = vmatmul.bf16.vlgmr.msrb.gmra.mxu3 %v8211_v42 }
  0xd3   : > { %3903 = vmatpush.bf16.msra.mxu1 %v5268_v62  ;;  %v5233_v40 = vld [vmem:[%s7810_s7 + $0x1b0] sm:$0xf0]  ;;  %v7172_v47 = vld [vmem:[%s7810_s7 + $0x284] sm:$0xf]  ;;  %v5108_v51 = vor.u32 %v7112_v33, %v5105_v38  ;;  %3821 = vmatmul.bf16.vlgmr.msrb.gmra.mxu0 %v8202_v36 }
  0xd4   : > { %3922 = vmatpush.bf16.msra.mxu2 %v5380_v5  ;;  %v5345_v48 = vld [vmem:[%s7810_s7 + $0x290] sm:$0xf0]  ;;  %v5236_v52 = vor.u32 %v7144_v39, %v5233_v40  ;;  %v7204_v53 = vld [vmem:[%s7810_s7 + $0x384] sm:$0xf]  ;;  %3839 = vmatmul.bf16.vlgmr.msrb.gmra.mxu1 %v8209_v41 }
  0xd5   : > { %3940 = vmatpush.bf16.msra.mxu3 %v5508_v6  ;;  %v5473_v54 = vld [vmem:[%s7810_s7 + $0x390] sm:$0xf0]  ;;  %v7108_v55 = vld [vmem:[%s7810_s7 + $0x84] sm:$0xf]  ;;  %v5348_v61 = vor.u32 %v7172_v47, %v5345_v48 }
  0xd6   : > { %3886 = vmatpush.bf16.msra.mxu0 %v5124_v25  ;;  %v5089_v56 = vld [vmem:[%s7810_s7 + $0x90] sm:$0xf0]  ;;  %v7140_v57 = vld [vmem:[%s7810_s7 + $0x184] sm:$0xf]  ;;  %v5476_v62 = vor.u32 %v7204_v53, %v5473_v54 }
  0xd7   : > { %3904 = vmatpush.bf16.msra.mxu1 %v5252_v26  ;;  %v5217_v60 = vld [vmem:[%s7810_s7 + $0x190] sm:$0xf0]  ;;  %v7168_v1 = vld [vmem:[%s7810_s7 + $0x264] sm:$0xf]  ;;  %v5092_v4 = vor.u32 %v7108_v55, %v5089_v56 }
  0xd8   : > { %3923 = vmatpush.bf16.msra.mxu2 %v5364_v43  ;;  %v5329_v2 = vld [vmem:[%s7810_s7 + $0x270] sm:$0xf0]  ;;  %v5220_v5 = vor.u32 %v7140_v57, %v5217_v60  ;;  %v7200_v6 = vld [vmem:[%s7810_s7 + $0x364] sm:$0xf]  ;;  %v971_v43 = vunpack.c.l.b16 %v388_v20 }
  0xd9   : > { %3941 = vmatpush.bf16.msra.mxu3 %v5492_v46  ;;  %v5457_v7 = vld [vmem:[%s7810_s7 + $0x370] sm:$0xf0]  ;;  %v7104_v11 = vld [vmem:[%s7810_s7 + $0x64] sm:$0xf]  ;;  %v5332_v21 = vor.u32 %v7168_v1, %v5329_v2 }
  0xda   : > { %3887 = vmatpush.bf16.msra.mxu0 %v5108_v51  ;;  %v5073_v12 = vld [vmem:[%s7810_s7 + $0x70] sm:$0xf0]  ;;  %v7136_v16 = vld [vmem:[%s7810_s7 + $0x164] sm:$0xf]  ;;  %v5460_v22 = vor.u32 %v7200_v6, %v5457_v7 }
  0xdb   : > { %3905 = vmatpush.bf16.msra.mxu1 %v5236_v52  ;;  %v5201_v17 = vld [vmem:[%s7810_s7 + $0x170] sm:$0xf0]  ;;  %v7164_v25 = vld [vmem:[%s7810_s7 + $0x244] sm:$0xf]  ;;  %v5076_v31 = vor.u32 %v7104_v11, %v5073_v12  ;;  %v972_v52 = vunpack.c.h.b16 %v388_v20 }
  0xdc   : > { %v387_v19 = vld [vmem:[%s7812_s8 + $0xb0] sm:$0xff]  ;;  %3924 = vmatpush.bf16.msra.mxu2 %v5348_v61  ;;  %v5204_v32 = vor.u32 %v7136_v16, %v5201_v17  ;;  %v7196_v33 = vld [vmem:[%s7810_s7 + $0x344] sm:$0xf] }
  0xdd   : > { %3942 = vmatpush.bf16.msra.mxu3 %v5476_v62  ;;  %v5313_v26 = vld [vmem:[%s7810_s7 + $0x250] sm:$0xf0]  ;;  %v7100_v39 = vld [vmem:[%s7810_s7 + $0x44] sm:$0xf]  ;;  %v969_v40 = vunpack.c.l.b16 %v387_v19  ;;  %v970_v51 = vunpack.c.h.b16 %v387_v19  ;;  %v8257_v12 = vpack.c.b16 %v972_v52, %v972_v52 }
  0xde   : > { %3888 = vmatpush.bf16.msra.mxu0 %v5092_v4  ;;  %v5441_v38 = vld [vmem:[%s7810_s7 + $0x350] sm:$0xf0]  ;;  %v7132_v47 = vld [vmem:[%s7810_s7 + $0x144] sm:$0xf]  ;;  %v5316_v53 = vor.u32 %v7164_v25, %v5313_v26  ;;  %v8250_v4 = vpack.c.b16 %v971_v43, %v971_v43 }
  0xdf   : > { %3906 = vmatpush.bf16.msra.mxu1 %v5220_v5  ;;  %v5057_v46 = vld [vmem:[%s7810_s7 + $0x50] sm:$0xf0]  ;;  %v5444_v54 = vor.u32 %v7196_v33, %v5441_v38  ;;  %v7160_v55 = vld [vmem:[%s7810_s7 + $0x224] sm:$0xf]  ;;  %v8248_v2 = vpack.c.b16 %v969_v40, %v969_v40  ;;  %v8255_v11 = vpack.c.b16 %v970_v51, %v970_v51 }
  0xe0   : > { %v5185_v48 = vld [vmem:[%s7810_s7 + $0x150] sm:$0xf0]  ;;  %3925 = vmatpush.bf16.msra.mxu2 %v5332_v21  ;;  %v5060_v57 = vor.u32 %v7100_v39, %v5057_v46  ;;  %v7192_v61 = vld [vmem:[%s7810_s7 + $0x324] sm:$0xf] }
  0xe1   : > { %3943 = vmatpush.bf16.msra.mxu3 %v5460_v22  ;;  %v5297_v56 = vld [vmem:[%s7810_s7 + $0x230] sm:$0xf0]  ;;  %v5188_v60 = vor.u32 %v7132_v47, %v5185_v48  ;;  %v7096_v1 = vld [vmem:[%s7810_s7 + $0x24] sm:$0xf]  ;;  %3862 = vmatmul.bf16.gmra.mxu2 %v8250_v4 }
  0xe2   : > { %3889 = vmatpush.bf16.msra.mxu0 %v5076_v31  ;;  %v5425_v62 = vld [vmem:[%s7810_s7 + $0x330] sm:$0xf0]  ;;  %v7128_v6 = vld [vmem:[%s7810_s7 + $0x124] sm:$0xf]  ;;  %v5300_v17 = vor.u32 %v7160_v55, %v5297_v56  ;;  %3880 = vmatmul.bf16.gmra.mxu3 %v8257_v12 }
  0xe3   : > { %3907 = vmatpush.bf16.msra.mxu1 %v5204_v32  ;;  %v5041_v5 = vld [vmem:[%s7810_s7 + $0x30] sm:$0xf0]  ;;  %v7156_v16 = vld [vmem:[%s7810_s7 + $0x204] sm:$0xf]  ;;  %v5428_v19 = vor.u32 %v7192_v61, %v5425_v62  ;;  %3826 = vmatmul.bf16.gmra.mxu0 %v8248_v2 }
  0xe4   : > { %v5169_v7 = vld [vmem:[%s7810_s7 + $0x130] sm:$0xf0]  ;;  %3926 = vmatpush.bf16.msra.mxu2 %v5316_v53  ;;  %v7188_v21 = vld [vmem:[%s7810_s7 + $0x304] sm:$0xf]  ;;  %v5044_v25 = vor.u32 %v7096_v1, %v5041_v5  ;;  %3844 = vmatmul.bf16.gmra.mxu1 %v8255_v11 }
  0xe5   : > { %3944 = vmatpush.bf16.msra.mxu3 %v5444_v54  ;;  %v5281_v20 = vld [vmem:[%s7810_s7 + $0x210] sm:$0xf0]  ;;  %v5172_v26 = vor.u32 %v7128_v6, %v5169_v7  ;;  %v7092_v31 = vld [vmem:[%s7810_s7 + $0x4] sm:$0xf] }
  0xe6   : > { %v5409_v22 = vld [vmem:[%s7810_s7 + $0x310] sm:$0xf0]  ;;  %3890 = vmatpush.bf16.msra.mxu0 %v5060_v57  ;;  %v7124_v33 = vld [vmem:[%s7810_s7 + $0x104] sm:$0xf]  ;;  %v5284_v48 = vor.u32 %v7156_v16, %v5281_v20 }
  0xe7   : > { %3908 = vmatpush.bf16.msra.mxu1 %v5188_v60  ;;  %v5025_v32 = vld [vmem:[%s7810_s7 + $0x10] sm:$0xf0]  ;;  %v7312_v39 = vld [vmem:[%s7810_s7 + $0x6e4] sm:$0xf]  ;;  %v5412_v51 = vor.u32 %v7188_v21, %v5409_v22 }
  0xe8   : > { %v5153_v38 = vld [vmem:[%s7810_s7 + $0x110] sm:$0xf0]  ;;  %v7344_v43 = vld [vmem:[%s7810_s7 + $0x7e4] sm:$0xf]  ;;  %3927 = vmatpush.bf16.msra.mxu2 %v5300_v17  ;;  %v5028_v55 = vor.u32 %v7092_v31, %v5025_v32 }
  0xe9   : > { %v5905_v40 = vld [vmem:[%s7810_s7 + $0x6f0] sm:$0xf0]  ;;  %v7248_v47 = vld [vmem:[%s7810_s7 + $0x4e4] sm:$0xf]  ;;  %3945 = vmatpush.bf16.msra.mxu3 %v5428_v19  ;;  %v5156_v56 = vor.u32 %v7124_v33, %v5153_v38 }
  0xea   : > { %v6033_v46 = vld [vmem:[%s7810_s7 + $0x7f0] sm:$0xf0]  ;;  %v7280_v53 = vld [vmem:[%s7810_s7 + $0x5e4] sm:$0xf]  ;;  %3891 = vmatpush.bf16.msra.mxu0 %v5044_v25  ;;  %v5908_v57 = vor.u32 %v7312_v39, %v5905_v40  ;;  %v3606_v40 = vpop.f32.mrf.mxu0 }
  0xeb   : > { %v5649_v52 = vld [vmem:[%s7810_s7 + $0x4f0] sm:$0xf0]  ;;  %3909 = vmatpush.bf16.msra.mxu1 %v5172_v26  ;;  %v6036_v60 = vor.u32 %v7344_v43, %v6033_v46  ;;  %v7308_v61 = vld [vmem:[%s7810_s7 + $0x6c4] sm:$0xf] }
  0xec   : > { %v5777_v54 = vld [vmem:[%s7810_s7 + $0x5f0] sm:$0xf0]  ;;  %v5652_v1 = vor.u32 %v7248_v47, %v5649_v52  ;;  %v7340_v6 = vld [vmem:[%s7810_s7 + $0x7c4] sm:$0xf]  ;;  %3928 = vmatpush.bf16.msra.mxu2 %v5284_v48  ;;  %v3624_v48 = vpop.f32.mrf.mxu1 }
  0xed   : > { %v5889_v62 = vld [vmem:[%s7810_s7 + $0x6d0] sm:$0xf0]  ;;  %v5780_v5 = vor.u32 %v7280_v53, %v5777_v54  ;;  %v7244_v16 = vld [vmem:[%s7810_s7 + $0x4c4] sm:$0xf]  ;;  %3946 = vmatpush.bf16.msra.mxu3 %v5412_v51  ;;  %v3625_v51 = vadd.f32 %v3624_v48, %v3606_v40 }
  0xee   : > { %v6017_v7 = vld [vmem:[%s7810_s7 + $0x7d0] sm:$0xf0]  ;;  %v7276_v19 = vld [vmem:[%s7810_s7 + $0x5c4] sm:$0xf]  ;;  %3892 = vmatpush.bf16.msra.mxu0 %v5028_v55  ;;  %v5892_v21 = vor.u32 %v7308_v61, %v5889_v62 }
  0xef   : > { %v5633_v17 = vld [vmem:[%s7810_s7 + $0x4d0] sm:$0xf0]  ;;  %3910 = vmatpush.bf16.msra.mxu1 %v5156_v56  ;;  %v6020_v22 = vor.u32 %v7340_v6, %v6017_v7  ;;  %v7304_v31 = vld [vmem:[%s7810_s7 + $0x6a4] sm:$0xf] }
  0xf0   : > { %v5761_v20 = vld [vmem:[%s7810_s7 + $0x5d0] sm:$0xf0]  ;;  %3993 = vmatpush.bf16.msrb.mxu2 %v5908_v57  ;;  %v5636_v25 = vor.u32 %v7244_v16, %v5633_v17  ;;  %v7336_v33 = vld [vmem:[%s7810_s7 + $0x7a4] sm:$0xf] }
  0xf1   : > { %4011 = vmatpush.bf16.msrb.mxu3 %v6036_v60  ;;  %v5764_v26 = vor.u32 %v7276_v19, %v5761_v20  ;;  %v5873_v32 = vld [vmem:[%s7810_s7 + $0x6b0] sm:$0xf0]  ;;  %v7240_v39 = vld [vmem:[%s7810_s7 + $0x4a4] sm:$0xf]  ;;  %3929 = vmatmul.bf16.vlgmr.msra.gmra.mxu2 %v7901_v15  ;;  %v3642_v20 = vpop.f32.mrf.mxu2 }
  0xf2   : > { %3957 = vmatpush.bf16.msrb.mxu0 %v5652_v1  ;;  %v6001_v38 = vld [vmem:[%s7810_s7 + $0x7b0] sm:$0xf0]  ;;  %v7272_v46 = vld [vmem:[%s7810_s7 + $0x5a4] sm:$0xf]  ;;  %v5876_v52 = vor.u32 %v7304_v31, %v5873_v32  ;;  %3947 = vmatmul.bf16.vlgmr.msra.gmra.mxu3 %v7905_v18  ;;  %v3643_v32 = vadd.f32 %v3642_v20, %v3625_v51 }
  0xf3   : > { %3975 = vmatpush.bf16.msrb.mxu1 %v5780_v5  ;;  %v5617_v43 = vld [vmem:[%s7810_s7 + $0x4b0] sm:$0xf0]  ;;  %v6004_v53 = vor.u32 %v7336_v33, %v6001_v38  ;;  %v7300_v54 = vld [vmem:[%s7810_s7 + $0x684] sm:$0xf]  ;;  %3893 = vmatmul.bf16.vlgmr.msra.gmra.mxu0 %v7894_v9  ;;  %v3660_v33 = vpop.f32.mrf.mxu3  ;;  %v3608_v38 = vpop.f32.mrf.mxu0 }
  0xf4   : > { %3994 = vmatpush.bf16.msrb.mxu2 %v5892_v21  ;;  %v5745_v47 = vld [vmem:[%s7810_s7 + $0x5b0] sm:$0xf0]  ;;  %v5620_v56 = vor.u32 %v7240_v39, %v5617_v43  ;;  %v7332_v60 = vld [vmem:[%s7810_s7 + $0x784] sm:$0xf]  ;;  %3911 = vmatmul.bf16.vlgmr.msra.gmra.mxu1 %v7899_v14  ;;  %v8315_v48 = vadd.f32 %v3660_v33, %v3643_v32 }
  0xf5   : > { %4012 = vmatpush.bf16.msrb.mxu3 %v6020_v22  ;;  %v5857_v55 = vld [vmem:[%s7810_s7 + $0x690] sm:$0xf0]  ;;  %v5748_v57 = vor.u32 %v7272_v46, %v5745_v47  ;;  %v7236_v62 = vld [vmem:[%s7810_s7 + $0x484] sm:$0xf]  ;;  %v3626_v46 = vpop.f32.mrf.mxu1 }
  0xf6   : > { %3958 = vmatpush.bf16.msrb.mxu0 %v5636_v25  ;;  %v5985_v61 = vld [vmem:[%s7810_s7 + $0x790] sm:$0xf0]  ;;  %v7268_v5 = vld [vmem:[%s7810_s7 + $0x584] sm:$0xf]  ;;  %v5860_v7 = vor.u32 %v7300_v54, %v5857_v55 }
  0xf7   : > { %3976 = vmatpush.bf16.msrb.mxu1 %v5764_v26  ;;  %v5601_v1 = vld [vmem:[%s7810_s7 + $0x490] sm:$0xf0]  ;;  %v5988_v16 = vor.u32 %v7332_v60, %v5985_v61  ;;  %v7296_v17 = vld [vmem:[%s7810_s7 + $0x664] sm:$0xf] }
  0xf8   : > { %v5729_v6 = vld [vmem:[%s7810_s7 + $0x590] sm:$0xf0]  ;;  %3995 = vmatpush.bf16.msrb.mxu2 %v5876_v52  ;;  %v5604_v21 = vor.u32 %v7236_v62, %v5601_v1  ;;  %v7328_v25 = vld [vmem:[%s7810_s7 + $0x764] sm:$0xf]  ;;  %v3627_v52 = vadd.f32 %v3626_v46, %v3608_v38 }
  0xf9   : > { %4013 = vmatpush.bf16.msrb.mxu3 %v6004_v53  ;;  %v5841_v19 = vld [vmem:[%s7810_s7 + $0x670] sm:$0xf0]  ;;  %v5732_v22 = vor.u32 %v7268_v5, %v5729_v6  ;;  %v7232_v31 = vld [vmem:[%s7810_s7 + $0x464] sm:$0xf] }
  0xfa   : > { %3959 = vmatpush.bf16.msrb.mxu0 %v5620_v56  ;;  %v5969_v26 = vld [vmem:[%s7810_s7 + $0x770] sm:$0xf0]  ;;  %v7264_v40 = vld [vmem:[%s7810_s7 + $0x564] sm:$0xf]  ;;  %v5844_v47 = vor.u32 %v7296_v17, %v5841_v19  ;;  %v3644_v19 = vpop.f32.mrf.mxu2 }
  0xfb   : > { %3977 = vmatpush.bf16.msrb.mxu1 %v5748_v57  ;;  %v5585_v39 = vld [vmem:[%s7810_s7 + $0x470] sm:$0xf0]  ;;  %v5972_v53 = vor.u32 %v7328_v25, %v5969_v26  ;;  %v7292_v51 = vld [vmem:[%s7810_s7 + $0x644] sm:$0xf]  ;;  %v3662_v32 = vpop.f32.mrf.mxu3  ;;  %v3611_v33 = vpop.f32.mrf.mxu0 }
  0xfc   : > { %v5713_v43 = vld [vmem:[%s7810_s7 + $0x570] sm:$0xf0]  ;;  %3996 = vmatpush.bf16.msrb.mxu2 %v5860_v7  ;;  %v5588_v55 = vor.u32 %v7232_v31, %v5585_v39  ;;  %v7324_v57 = vld [vmem:[%s7810_s7 + $0x744] sm:$0xf]  ;;  %v3645_v31 = vadd.f32 %v3644_v19, %v3627_v52 }
  0xfd   : > { %4014 = vmatpush.bf16.msrb.mxu3 %v5988_v16  ;;  %v5825_v54 = vld [vmem:[%s7810_s7 + $0x650] sm:$0xf0]  ;;  %v5716_v56 = vor.u32 %v7264_v40, %v5713_v43  ;;  %v7228_v61 = vld [vmem:[%s7810_s7 + $0x444] sm:$0xf]  ;;  %v3629_v43 = vpop.f32.mrf.mxu1 }
  0xfe   : > { %3960 = vmatpush.bf16.msrb.mxu0 %v5604_v21  ;;  %v5953_v60 = vld [vmem:[%s7810_s7 + $0x750] sm:$0xf0]  ;;  %v7260_v1 = vld [vmem:[%s7810_s7 + $0x544] sm:$0xf]  ;;  %v5828_v6 = vor.u32 %v7292_v51, %v5825_v54  ;;  %v3630_v51 = vadd.f32 %v3629_v43, %v3611_v33 }
  0xff   : > { %3978 = vmatpush.bf16.msrb.mxu1 %v5732_v22  ;;  %v5569_v62 = vld [vmem:[%s7810_s7 + $0x450] sm:$0xf0]  ;;  %v5956_v7 = vor.u32 %v7324_v57, %v5953_v60  ;;  %v7288_v16 = vld [vmem:[%s7810_s7 + $0x624] sm:$0xf] }
 0x100   : > { %v5697_v5 = vld [vmem:[%s7810_s7 + $0x550] sm:$0xf0]  ;;  %3997 = vmatpush.bf16.msrb.mxu2 %v5844_v47  ;;  %v5572_v20 = vor.u32 %v7228_v61, %v5569_v62  ;;  %v7320_v22 = vld [vmem:[%s7810_s7 + $0x724] sm:$0xf] }
 0x101   : > { %4015 = vmatpush.bf16.msrb.mxu3 %v5972_v53  ;;  %v5809_v17 = vld [vmem:[%s7810_s7 + $0x630] sm:$0xf0]  ;;  %v5700_v21 = vor.u32 %v7260_v1, %v5697_v5  ;;  %v7224_v26 = vld [vmem:[%s7810_s7 + $0x424] sm:$0xf]  ;;  %v8334_v53 = vadd.f32 %v3662_v32, %v3645_v31  ;;  %3934 = vmatmul.bf16.gmra.mxu2 %v7947_v10 }
 0x102   : > { %3961 = vmatpush.bf16.msrb.mxu0 %v5588_v55  ;;  %v5937_v25 = vld [vmem:[%s7810_s7 + $0x730] sm:$0xf0]  ;;  %v7256_v39 = vld [vmem:[%s7810_s7 + $0x524] sm:$0xf]  ;;  %v5812_v46 = vor.u32 %v7288_v16, %v5809_v17  ;;  %3952 = vmatmul.bf16.gmra.mxu3 %v7951_v13  ;;  %v3647_v31 = vpop.f32.mrf.mxu2 }
 0x103   : > { %3979 = vmatpush.bf16.msrb.mxu1 %v5716_v56  ;;  %v5553_v38 = vld [vmem:[%s7810_s7 + $0x430] sm:$0xf0]  ;;  %v7284_v47 = vld [vmem:[%s7810_s7 + $0x604] sm:$0xf]  ;;  %v5940_v52 = vor.u32 %v7320_v22, %v5937_v25  ;;  %3898 = vmatmul.bf16.gmra.mxu0 %v7940_v3 }
 0x104   : > { %v5681_v40 = vld [vmem:[%s7810_s7 + $0x530] sm:$0xf0]  ;;  %3998 = vmatpush.bf16.msrb.mxu2 %v5828_v6  ;;  %v7316_v55 = vld [vmem:[%s7810_s7 + $0x704] sm:$0xf]  ;;  %v5556_v57 = vor.u32 %v7224_v26, %v5553_v38  ;;  %3916 = vmatmul.bf16.gmra.mxu1 %v7945_v8  ;;  %v3648_v38 = vadd.f32 %v3647_v31, %v3630_v51 }
 0x105   : > { %4016 = vmatpush.bf16.msrb.mxu3 %v5956_v7  ;;  %v5793_v54 = vld [vmem:[%s7810_s7 + $0x610] sm:$0xf0]  ;;  %v5684_v60 = vor.u32 %v7256_v39, %v5681_v40  ;;  %v7220_v61 = vld [vmem:[%s7810_s7 + $0x404] sm:$0xf]  ;;  %v3665_v39 = vpop.f32.mrf.mxu3  ;;  %v3613_v40 = vpop.f32.mrf.mxu0 }
 0x106   : > { %v5921_v56 = vld [vmem:[%s7810_s7 + $0x710] sm:$0xf0]  ;;  %3962 = vmatpush.bf16.msrb.mxu0 %v5572_v20  ;;  %v7252_v1 = vld [vmem:[%s7810_s7 + $0x504] sm:$0xf]  ;;  %v5796_v20 = vor.u32 %v7284_v47, %v5793_v54  ;;  %v3631_v54 = vpop.f32.mrf.mxu1  ;;  %v8360_v10 = vadd.f32 %v3665_v39, %v3648_v38 }
 0x107   : > { %3980 = vmatpush.bf16.msrb.mxu1 %v5700_v21  ;;  %v5537_v62 = vld [vmem:[%s7810_s7 + $0x410] sm:$0xf0]  ;;  %v7440_v6 = vld [vmem:[%s7810_s7 + $0xae4] sm:$0xf]  ;;  %v5924_v21 = vor.u32 %v7316_v55, %v5921_v56 }
 0x108   : > { %v5665_v5 = vld [vmem:[%s7810_s7 + $0x510] sm:$0xf0]  ;;  %v7472_v16 = vld [vmem:[%s7810_s7 + $0xbe4] sm:$0xf]  ;;  %3999 = vmatpush.bf16.msrb.mxu2 %v5812_v46  ;;  %v5540_v32 = vor.u32 %v7220_v61, %v5537_v62 }
 0x109   : > { %v6417_v7 = vld [vmem:[%s7810_s7 + $0xaf0] sm:$0xf0]  ;;  %v7376_v19 = vld [vmem:[%s7810_s7 + $0x8e4] sm:$0xf]  ;;  %4017 = vmatpush.bf16.msrb.mxu3 %v5940_v52  ;;  %v5668_v33 = vor.u32 %v7252_v1, %v5665_v5 }
 0x10a   : > { %v6545_v17 = vld [vmem:[%s7810_s7 + $0xbf0] sm:$0xf0]  ;;  %v7408_v25 = vld [vmem:[%s7810_s7 + $0x9e4] sm:$0xf]  ;;  %3963 = vmatpush.bf16.msrb.mxu0 %v5556_v57  ;;  %v6420_v43 = vor.u32 %v7440_v6, %v6417_v7 }
 0x10b   : > { %v6161_v22 = vld [vmem:[%s7810_s7 + $0x8f0] sm:$0xf0]  ;;  %3981 = vmatpush.bf16.msrb.mxu1 %v5684_v60  ;;  %v6548_v46 = vor.u32 %v7472_v16, %v6545_v17  ;;  %v7436_v47 = vld [vmem:[%s7810_s7 + $0xac4] sm:$0xf]  ;;  %v3649_v17 = vpop.f32.mrf.mxu2 }
 0x10c   : > { %v6289_v26 = vld [vmem:[%s7810_s7 + $0x9f0] sm:$0xf0]  ;;  %v6164_v55 = vor.u32 %v7376_v19, %v6161_v22  ;;  %v7468_v13 = vld [vmem:[%s7810_s7 + $0xbc4] sm:$0xf]  ;;  %4000 = vmatpush.bf16.msrb.mxu2 %v5796_v20 }
 0x10d   : > { %v6401_v52 = vld [vmem:[%s7810_s7 + $0xad0] sm:$0xf0]  ;;  %v6292_v56 = vor.u32 %v7408_v25, %v6289_v26  ;;  %v7372_v57 = vld [vmem:[%s7810_s7 + $0x8c4] sm:$0xf]  ;;  %4018 = vmatpush.bf16.msrb.mxu3 %v5924_v21  ;;  %v3667_v22 = vpop.f32.mrf.mxu3  ;;  %v8373_v26 = vpop.f32.mrf.mxu0 }
 0x10e   : > { %v6529_v8 = vld [vmem:[%s7810_s7 + $0xbd0] sm:$0xf0]  ;;  %v7404_v60 = vld [vmem:[%s7810_s7 + $0x9c4] sm:$0xf]  ;;  %3964 = vmatpush.bf16.msrb.mxu0 %v5540_v32  ;;  %v6404_v62 = vor.u32 %v7436_v47, %v6401_v52  ;;  %v8375_v31 = vpop.f32.mrf.mxu1 }
 0x10f   : > { %v6145_v51 = vld [vmem:[%s7810_s7 + $0x8d0] sm:$0xf0]  ;;  %3982 = vmatpush.bf16.msrb.mxu1 %v5668_v33  ;;  %v6532_v1 = vor.u32 %v7468_v13, %v6529_v8  ;;  %v7432_v7 = vld [vmem:[%s7810_s7 + $0xaa4] sm:$0xf] }
 0x110   : > { %v6273_v61 = vld [vmem:[%s7810_s7 + $0x9d0] sm:$0xf0]  ;;  %4065 = vmatpush.bf16.msra.mxu2 %v6420_v43  ;;  %v6148_v5 = vor.u32 %v7372_v57, %v6145_v51  ;;  %v7464_v19 = vld [vmem:[%s7810_s7 + $0xba4] sm:$0xf] }
 0x111   : > { %4083 = vmatpush.bf16.msra.mxu3 %v6548_v46  ;;  %v6276_v6 = vor.u32 %v7404_v60, %v6273_v61  ;;  %v6385_v16 = vld [vmem:[%s7810_s7 + $0xab0] sm:$0xf0]  ;;  %v7368_v21 = vld [vmem:[%s7810_s7 + $0x8a4] sm:$0xf]  ;;  %4001 = vmatmul.bf16.vlgmr.msrb.gmra.mxu2 %v8002_v24 }
 0x112   : > { %4029 = vmatpush.bf16.msra.mxu0 %v6164_v55  ;;  %v6513_v20 = vld [vmem:[%s7810_s7 + $0xbb0] sm:$0xf0]  ;;  %v7400_v13 = vld [vmem:[%s7810_s7 + $0x9a4] sm:$0xf]  ;;  %v6388_v32 = vor.u32 %v7432_v7, %v6385_v16  ;;  %4019 = vmatmul.bf16.vlgmr.msrb.gmra.mxu3 %v8009_v29 }
 0x113   : > { %4047 = vmatpush.bf16.msra.mxu1 %v6292_v56  ;;  %v6129_v8 = vld [vmem:[%s7810_s7 + $0x8b0] sm:$0xf0]  ;;  %v6516_v33 = vor.u32 %v7464_v19, %v6513_v20  ;;  %v7428_v38 = vld [vmem:[%s7810_s7 + $0xa84] sm:$0xf]  ;;  %3965 = vmatmul.bf16.vlgmr.msrb.gmra.mxu0 %v8000_v23 }
 0x114   : > { %4066 = vmatpush.bf16.msra.mxu2 %v6404_v62  ;;  %v6257_v25 = vld [vmem:[%s7810_s7 + $0x9b0] sm:$0xf0]  ;;  %v6132_v40 = vor.u32 %v7368_v21, %v6129_v8  ;;  %v7460_v46 = vld [vmem:[%s7810_s7 + $0xb84] sm:$0xf]  ;;  %3983 = vmatmul.bf16.vlgmr.msrb.gmra.mxu1 %v8007_v28  ;;  %v8391_v62 = vpop.f32.mrf.mxu2 }
 0x115   : > { %4084 = vmatpush.bf16.msra.mxu3 %v6532_v1  ;;  %v6369_v39 = vld [vmem:[%s7810_s7 + $0xa90] sm:$0xf0]  ;;  %v6260_v43 = vor.u32 %v7400_v13, %v6257_v25  ;;  %v7364_v52 = vld [vmem:[%s7810_s7 + $0x884] sm:$0xf]  ;;  %v8396_v17 = vpop.f32.mrf.mxu3  ;;  %v8401_v22 = vpop.f32.mrf.mxu0 }
 0x116   : > { %4030 = vmatpush.bf16.msra.mxu0 %v6148_v5  ;;  %v6497_v47 = vld [vmem:[%s7810_s7 + $0xb90] sm:$0xf0]  ;;  %v7396_v55 = vld [vmem:[%s7810_s7 + $0x984] sm:$0xf]  ;;  %v6372_v57 = vor.u32 %v7428_v38, %v6369_v39  ;;  %v8403_v8 = vpop.f32.mrf.mxu1 }
 0x117   : > { %4048 = vmatpush.bf16.msra.mxu1 %v6276_v6  ;;  %v6113_v54 = vld [vmem:[%s7810_s7 + $0x890] sm:$0xf0]  ;;  %v6500_v51 = vor.u32 %v7460_v46, %v6497_v47  ;;  %v7424_v60 = vld [vmem:[%s7810_s7 + $0xa64] sm:$0xf] }
 0x118   : > { %v6241_v56 = vld [vmem:[%s7810_s7 + $0x990] sm:$0xf0]  ;;  %4067 = vmatpush.bf16.msra.mxu2 %v6388_v32  ;;  %v6116_v1 = vor.u32 %v7364_v52, %v6113_v54  ;;  %v7456_v6 = vld [vmem:[%s7810_s7 + $0xb64] sm:$0xf] }
 0x119   : > { %4085 = vmatpush.bf16.msra.mxu3 %v6516_v33  ;;  %v6353_v61 = vld [vmem:[%s7810_s7 + $0xa70] sm:$0xf0]  ;;  %v6244_v5 = vor.u32 %v7396_v55, %v6241_v56  ;;  %v7360_v16 = vld [vmem:[%s7810_s7 + $0x864] sm:$0xf] }
 0x11a   : > { %4031 = vmatpush.bf16.msra.mxu0 %v6132_v40  ;;  %v6481_v7 = vld [vmem:[%s7810_s7 + $0xb70] sm:$0xf0]  ;;  %v7392_v20 = vld [vmem:[%s7810_s7 + $0x964] sm:$0xf]  ;;  %v6356_v13 = vor.u32 %v7424_v60, %v6353_v61 }
 0x11b   : > { %4049 = vmatpush.bf16.msra.mxu1 %v6260_v43  ;;  %v6097_v19 = vld [vmem:[%s7810_s7 + $0x870] sm:$0xf0]  ;;  %v6484_v25 = vor.u32 %v7456_v6, %v6481_v7  ;;  %v7420_v32 = vld [vmem:[%s7810_s7 + $0xa44] sm:$0xf] }
 0x11c   : > { %v6225_v21 = vld [vmem:[%s7810_s7 + $0x970] sm:$0xf0]  ;;  %4068 = vmatpush.bf16.msra.mxu2 %v6372_v57  ;;  %v6100_v38 = vor.u32 %v7360_v16, %v6097_v19  ;;  %v7452_v40 = vld [vmem:[%s7810_s7 + $0xb44] sm:$0xf]  ;;  %v8415_v60 = vpop.f32.mrf.mxu2 }
 0x11d   : > { %4086 = vmatpush.bf16.msra.mxu3 %v6500_v51  ;;  %v6337_v33 = vld [vmem:[%s7810_s7 + $0xa50] sm:$0xf0]  ;;  %v6228_v39 = vor.u32 %v7392_v20, %v6225_v21  ;;  %v7356_v46 = vld [vmem:[%s7810_s7 + $0x844] sm:$0xf]  ;;  %v8420_v16 = vpop.f32.mrf.mxu3 }
 0x11e   : > { %4032 = vmatpush.bf16.msra.mxu0 %v6116_v1  ;;  %v6465_v43 = vld [vmem:[%s7810_s7 + $0xb50] sm:$0xf0]  ;;  %v7388_v52 = vld [vmem:[%s7810_s7 + $0x944] sm:$0xf]  ;;  %v6340_v55 = vor.u32 %v7420_v32, %v6337_v33  ;;  %v8428_v32 = vpop.f32.mrf.mxu1 }
 0x11f   : > { %4050 = vmatpush.bf16.msra.mxu1 %v6244_v5  ;;  %v6081_v47 = vld [vmem:[%s7810_s7 + $0x850] sm:$0xf0]  ;;  %v6468_v56 = vor.u32 %v7452_v40, %v6465_v43  ;;  %v7416_v57 = vld [vmem:[%s7810_s7 + $0xa24] sm:$0xf] }
 0x120   : > { %v6209_v54 = vld [vmem:[%s7810_s7 + $0x950] sm:$0xf0]  ;;  %4069 = vmatpush.bf16.msra.mxu2 %v6356_v13  ;;  %v6084_v61 = vor.u32 %v7356_v46, %v6081_v47  ;;  %v7448_v5 = vld [vmem:[%s7810_s7 + $0xb24] sm:$0xf]  ;;  %v8425_v13 = vpop.f32.mrf.mxu0 }
 0x121   : > { %4087 = vmatpush.bf16.msra.mxu3 %v6484_v25  ;;  %v6321_v51 = vld [vmem:[%s7810_s7 + $0xa30] sm:$0xf0]  ;;  %v6212_v1 = vor.u32 %v7388_v52, %v6209_v54  ;;  %v7352_v7 = vld [vmem:[%s7810_s7 + $0x824] sm:$0xf]  ;;  %4006 = vmatmul.bf16.gmra.mxu2 %v8048_v30 }
 0x122   : > { %4033 = vmatpush.bf16.msra.mxu0 %v6100_v38  ;;  %v6449_v6 = vld [vmem:[%s7810_s7 + $0xb30] sm:$0xf0]  ;;  %v7384_v20 = vld [vmem:[%s7810_s7 + $0x924] sm:$0xf]  ;;  %v6324_v33 = vor.u32 %v7416_v57, %v6321_v51  ;;  %4024 = vmatmul.bf16.gmra.mxu3 %v8055_v35 }
 0x123   : > { %4051 = vmatpush.bf16.msra.mxu1 %v6228_v39  ;;  %v6065_v19 = vld [vmem:[%s7810_s7 + $0x830] sm:$0xf0]  ;;  %v7412_v25 = vld [vmem:[%s7810_s7 + $0xa04] sm:$0xf]  ;;  %v6452_v38 = vor.u32 %v7448_v5, %v6449_v6  ;;  %3970 = vmatmul.bf16.gmra.mxu0 %v8046_v27 }
 0x124   : > { %v6193_v21 = vld [vmem:[%s7810_s7 + $0x930] sm:$0xf0]  ;;  %4070 = vmatpush.bf16.msra.mxu2 %v6340_v55  ;;  %v7444_v40 = vld [vmem:[%s7810_s7 + $0xb04] sm:$0xf]  ;;  %v6068_v46 = vor.u32 %v7352_v7, %v6065_v19  ;;  %3988 = vmatmul.bf16.gmra.mxu1 %v8053_v34  ;;  %v8449_v30 = vpop.f32.mrf.mxu2 }
 0x125   : > { %4088 = vmatpush.bf16.msra.mxu3 %v6468_v56  ;;  %v6305_v39 = vld [vmem:[%s7810_s7 + $0xa10] sm:$0xf0]  ;;  %v6196_v47 = vor.u32 %v7384_v20, %v6193_v21  ;;  %v7348_v52 = vld [vmem:[%s7810_s7 + $0x804] sm:$0xf]  ;;  %v8451_v27 = vpop.f32.mrf.mxu3 }
 0x126   : > { %v6433_v43 = vld [vmem:[%s7810_s7 + $0xb10] sm:$0xf0]  ;;  %4034 = vmatpush.bf16.msra.mxu0 %v6084_v61  ;;  %v7380_v55 = vld [vmem:[%s7810_s7 + $0x904] sm:$0xf]  ;;  %v6308_v6 = vor.u32 %v7412_v25, %v6305_v39  ;;  %v3703_v3 = vpop.f32.mrf.mxu1 }
 0x127   : > { %4052 = vmatpush.bf16.msra.mxu1 %v6212_v1  ;;  %v6049_v54 = vld [vmem:[%s7810_s7 + $0x810] sm:$0xf0]  ;;  %v7568_v57 = vld [vmem:[%s7810_s7 + $0xee4] sm:$0xf]  ;;  %v6436_v7 = vor.u32 %v7444_v40, %v6433_v43 }
 0x128   : > { %v6177_v56 = vld [vmem:[%s7810_s7 + $0x910] sm:$0xf0]  ;;  %v7600_v61 = vld [vmem:[%s7810_s7 + $0xfe4] sm:$0xf]  ;;  %4071 = vmatpush.bf16.msra.mxu2 %v6324_v33  ;;  %v6052_v35 = vor.u32 %v7348_v52, %v6049_v54  ;;  %v3685_v40 = vpop.f32.mrf.mxu0 }
 0x129   : > { %v6929_v51 = vld [vmem:[%s7810_s7 + $0xef0] sm:$0xf0]  ;;  %v7504_v5 = vld [vmem:[%s7810_s7 + $0xce4] sm:$0xf]  ;;  %4089 = vmatpush.bf16.msra.mxu3 %v6452_v38  ;;  %v6180_v34 = vor.u32 %v7380_v55, %v6177_v56 }
 0x12a   : > { %v7057_v1 = vld [vmem:[%s7810_s7 + $0xff0] sm:$0xf0]  ;;  %v7536_v20 = vld [vmem:[%s7810_s7 + $0xde4] sm:$0xf]  ;;  %4035 = vmatpush.bf16.msra.mxu0 %v6068_v46  ;;  %v6932_v33 = vor.u32 %v7568_v57, %v6929_v51 }
 0x12b   : > { %v6673_v19 = vld [vmem:[%s7810_s7 + $0xcf0] sm:$0xf0]  ;;  %4053 = vmatpush.bf16.msra.mxu1 %v6196_v47  ;;  %v7060_v25 = vor.u32 %v7600_v61, %v7057_v1  ;;  %v7564_v38 = vld [vmem:[%s7810_s7 + $0xec4] sm:$0xf] }
 0x12c   : > { %v6801_v21 = vld [vmem:[%s7810_s7 + $0xdf0] sm:$0xf0]  ;;  %v6676_v43 = vor.u32 %v7504_v5, %v6673_v19  ;;  %v7596_v28 = vld [vmem:[%s7810_s7 + $0xfc4] sm:$0xf]  ;;  %4072 = vmatpush.bf16.msra.mxu2 %v6308_v6  ;;  %v3721_v61 = vpop.f32.mrf.mxu2 }
 0x12d   : > { %v6913_v39 = vld [vmem:[%s7810_s7 + $0xed0] sm:$0xf0]  ;;  %v6804_v29 = vor.u32 %v7536_v20, %v6801_v21  ;;  %v7500_v23 = vld [vmem:[%s7810_s7 + $0xcc4] sm:$0xf]  ;;  %4090 = vmatpush.bf16.msra.mxu3 %v6436_v7 }
 0x12e   : > { %v7041_v24 = vld [vmem:[%s7810_s7 + $0xfd0] sm:$0xf0]  ;;  %v7532_v47 = vld [vmem:[%s7810_s7 + $0xdc4] sm:$0xf]  ;;  %4036 = vmatpush.bf16.msra.mxu0 %v6052_v35  ;;  %v6916_v54 = vor.u32 %v7564_v38, %v6913_v39 }
 0x12f   : > { %v6657_v46 = vld [vmem:[%s7810_s7 + $0xcd0] sm:$0xf0]  ;;  %4054 = vmatpush.bf16.msra.mxu1 %v6180_v34  ;;  %v7044_v55 = vor.u32 %v7596_v28, %v7041_v24  ;;  %v7560_v57 = vld [vmem:[%s7810_s7 + $0xea4] sm:$0xf]  ;;  %v3739_v34 = vpop.f32.mrf.mxu3 }
 0x130   : > { %v6785_v52 = vld [vmem:[%s7810_s7 + $0xdd0] sm:$0xf0]  ;;  %4137 = vmatpush.bf16.msrb.mxu2 %v6932_v33  ;;  %v6660_v3 = vor.u32 %v7500_v23, %v6657_v46  ;;  %v7592_v1 = vld [vmem:[%s7810_s7 + $0xfa4] sm:$0xf]  ;;  %v8469_v23 = vpop.f32.mrf.mxu0 }
 0x131   : > { %4155 = vmatpush.bf16.msrb.mxu3 %v7060_v25  ;;  %v6788_v56 = vor.u32 %v7532_v47, %v6785_v52  ;;  %v6897_v51 = vld [vmem:[%s7810_s7 + $0xeb0] sm:$0xf0]  ;;  %v7496_v35 = vld [vmem:[%s7810_s7 + $0xca4] sm:$0xf]  ;;  %4073 = vmatmul.bf16.vlgmr.msra.gmra.mxu2 %v8102_v45 }
 0x132   : > { %4101 = vmatpush.bf16.msrb.mxu0 %v6676_v43  ;;  %v7025_v5 = vld [vmem:[%s7810_s7 + $0xfb0] sm:$0xf0]  ;;  %v7528_v28 = vld [vmem:[%s7810_s7 + $0xda4] sm:$0xf]  ;;  %v6900_v7 = vor.u32 %v7560_v57, %v6897_v51  ;;  %4091 = vmatmul.bf16.vlgmr.msra.gmra.mxu3 %v8109_v50 }
 0x133   : > { %4119 = vmatpush.bf16.msrb.mxu1 %v6804_v29  ;;  %v6641_v24 = vld [vmem:[%s7810_s7 + $0xcb0] sm:$0xf0]  ;;  %v8471_v29 = vpop.f32.mrf.mxu1  ;;  %v7028_v19 = vor.u32 %v7592_v1, %v7025_v5  ;;  %v7556_v20 = vld [vmem:[%s7810_s7 + $0xe84] sm:$0xf]  ;;  %4037 = vmatmul.bf16.vlgmr.msra.gmra.mxu0 %v8100_v44 }
 0x134   : > { %4138 = vmatpush.bf16.msrb.mxu2 %v6916_v54  ;;  %v6769_v6 = vld [vmem:[%s7810_s7 + $0xdb0] sm:$0xf0]  ;;  %v6644_v33 = vor.u32 %v7496_v35, %v6641_v24  ;;  %v7588_v38 = vld [vmem:[%s7810_s7 + $0xf84] sm:$0xf]  ;;  %4055 = vmatmul.bf16.vlgmr.msra.gmra.mxu1 %v8107_v49 }
 0x135   : > { %4156 = vmatpush.bf16.msrb.mxu3 %v7044_v55  ;;  %v6881_v21 = vld [vmem:[%s7810_s7 + $0xe90] sm:$0xf0]  ;;  %v6772_v25 = vor.u32 %v7528_v28, %v6769_v6  ;;  %v7492_v40 = vld [vmem:[%s7810_s7 + $0xc84] sm:$0xf] }
 0x136   : > { %4102 = vmatpush.bf16.msrb.mxu0 %v6660_v3  ;;  %v7009_v39 = vld [vmem:[%s7810_s7 + $0xf90] sm:$0xf0]  ;;  %v7524_v46 = vld [vmem:[%s7810_s7 + $0xd84] sm:$0xf]  ;;  %v6884_v52 = vor.u32 %v7556_v20, %v6881_v21 }
 0x137   : > { %4120 = vmatpush.bf16.msrb.mxu1 %v6788_v56  ;;  %v6625_v43 = vld [vmem:[%s7810_s7 + $0xc90] sm:$0xf0]  ;;  %v7012_v54 = vor.u32 %v7588_v38, %v7009_v39  ;;  %v7552_v55 = vld [vmem:[%s7810_s7 + $0xe64] sm:$0xf]  ;;  %v8487_v56 = vpop.f32.mrf.mxu2  ;;  %v8492_v35 = vpop.f32.mrf.mxu3 }
 0x138   : > { %v6753_v47 = vld [vmem:[%s7810_s7 + $0xd90] sm:$0xf0]  ;;  %4139 = vmatpush.bf16.msrb.mxu2 %v6900_v7  ;;  %v6628_v57 = vor.u32 %v7492_v40, %v6625_v43  ;;  %v7584_v61 = vld [vmem:[%s7810_s7 + $0xf64] sm:$0xf]  ;;  %v8497_v6 = vpop.f32.mrf.mxu0  ;;  %v3679_v7 = vadd.f32 %v8373_v26, %v8315_v48 }
 0x139   : > { %4157 = vmatpush.bf16.msrb.mxu3 %v7028_v19  ;;  %v6865_v3 = vld [vmem:[%s7810_s7 + $0xe70] sm:$0xf0]  ;;  %v6756_v51 = vor.u32 %v7524_v46, %v6753_v47  ;;  %v7488_v5 = vld [vmem:[%s7810_s7 + $0xc64] sm:$0xf] }
 0x13a   : > { %4103 = vmatpush.bf16.msrb.mxu0 %v6644_v33  ;;  %v6993_v1 = vld [vmem:[%s7810_s7 + $0xf70] sm:$0xf0]  ;;  %v7520_v24 = vld [vmem:[%s7810_s7 + $0xd64] sm:$0xf]  ;;  %v6868_v20 = vor.u32 %v7552_v55, %v6865_v3 }
 0x13b   : > { %4121 = vmatpush.bf16.msrb.mxu1 %v6772_v25  ;;  %v6609_v34 = vld [vmem:[%s7810_s7 + $0xc70] sm:$0xf0]  ;;  %v8501_v19 = vpop.f32.mrf.mxu1  ;;  %v6996_v21 = vor.u32 %v7584_v61, %v6993_v1  ;;  %v7548_v33 = vld [vmem:[%s7810_s7 + $0xe44] sm:$0xf] }
 0x13c   : > { %v6737_v28 = vld [vmem:[%s7810_s7 + $0xd70] sm:$0xf0]  ;;  %4140 = vmatpush.bf16.msrb.mxu2 %v6884_v52  ;;  %v6612_v38 = vor.u32 %v7488_v5, %v6609_v34  ;;  %v7580_v40 = vld [vmem:[%s7810_s7 + $0xf44] sm:$0xf]  ;;  %v3697_v52 = vadd.f32 %v8375_v31, %v3679_v7 }
 0x13d   : > { %4158 = vmatpush.bf16.msrb.mxu3 %v7012_v54  ;;  %v6849_v25 = vld [vmem:[%s7810_s7 + $0xe50] sm:$0xf0]  ;;  %v6740_v39 = vor.u32 %v7520_v24, %v6737_v28  ;;  %v7484_v46 = vld [vmem:[%s7810_s7 + $0xc44] sm:$0xf] }
 0x13e   : > { %4104 = vmatpush.bf16.msrb.mxu0 %v6628_v57  ;;  %v6977_v43 = vld [vmem:[%s7810_s7 + $0xf50] sm:$0xf0]  ;;  %v7516_v26 = vld [vmem:[%s7810_s7 + $0xd44] sm:$0xf]  ;;  %v6852_v54 = vor.u32 %v7548_v33, %v6849_v25  ;;  %v3715_v24 = vadd.f32 %v8391_v62, %v3697_v52  ;;  %v3681_v33 = vadd.f32 %v8401_v22, %v8334_v53 }
 0x13f   : > { %4122 = vmatpush.bf16.msrb.mxu1 %v6756_v51  ;;  %v6593_v48 = vld [vmem:[%s7810_s7 + $0xc50] sm:$0xf0]  ;;  %v6980_v55 = vor.u32 %v7580_v40, %v6977_v43  ;;  %v7544_v3 = vld [vmem:[%s7810_s7 + $0xe24] sm:$0xf]  ;;  %v8514_v51 = vpop.f32.mrf.mxu2  ;;  %v8520_v28 = vpop.f32.mrf.mxu3 }
 0x140   : > { %v6721_v47 = vld [vmem:[%s7810_s7 + $0xd50] sm:$0xf0]  ;;  %4141 = vmatpush.bf16.msrb.mxu2 %v6868_v20  ;;  %v6596_v61 = vor.u32 %v7484_v46, %v6593_v48  ;;  %v7576_v5 = vld [vmem:[%s7810_s7 + $0xf24] sm:$0xf]  ;;  %v8527_v25 = vpop.f32.mrf.mxu0 }
 0x141   : > { %4159 = vmatpush.bf16.msrb.mxu3 %v6996_v21  ;;  %v6833_v57 = vld [vmem:[%s7810_s7 + $0xe30] sm:$0xf0]  ;;  %v6724_v1 = vor.u32 %v7516_v26, %v6721_v47  ;;  %v7480_v31 = vld [vmem:[%s7810_s7 + $0xc24] sm:$0xf]  ;;  %4078 = vmatmul.bf16.gmra.mxu2 %v8148_v59 }
 0x142   : > { %4105 = vmatpush.bf16.msrb.mxu0 %v6612_v38  ;;  %v6961_v34 = vld [vmem:[%s7810_s7 + $0xf30] sm:$0xf0]  ;;  %v7512_v20 = vld [vmem:[%s7810_s7 + $0xd24] sm:$0xf]  ;;  %v6836_v62 = vor.u32 %v7544_v3, %v6833_v57  ;;  %v5399_v3 = vld [vmem:[%s7810_s7 + $0x2e8] sm:$0xf]  ;;  %4096 = vmatmul.bf16.gmra.mxu3 %v8155_v0 }
 0x143   : > { %4123 = vmatpush.bf16.msrb.mxu1 %v6740_v39  ;;  %v6577_v7 = vld [vmem:[%s7810_s7 + $0xc30] sm:$0xf0]  ;;  %v7540_v38 = vld [vmem:[%s7810_s7 + $0xe04] sm:$0xf]  ;;  %v8530_v39 = vpop.f32.mrf.mxu1  ;;  %v6964_v40 = vor.u32 %v7576_v5, %v6961_v34  ;;  %4042 = vmatmul.bf16.gmra.mxu0 %v8146_v58  ;;  %v7187_v57 = vld [vmem:[%s7810_s7 + $0x2f4] sm:$0xf0] }
 0x144   : > { %v6705_v21 = vld [vmem:[%s7810_s7 + $0xd30] sm:$0xf0]  ;;  %4142 = vmatpush.bf16.msrb.mxu2 %v6852_v54  ;;  %v7572_v46 = vld [vmem:[%s7810_s7 + $0xf04] sm:$0xf]  ;;  %v6580_v53 = vor.u32 %v7480_v31, %v6577_v7  ;;  %v3733_v54 = vadd.f32 %v8396_v17, %v3715_v24  ;;  %4060 = vmatmul.bf16.gmra.mxu1 %v8153_v63  ;;  %v7219_v5 = vld [vmem:[%s7810_s7 + $0x3f4] sm:$0xf0] }
 0x145   : > { %4160 = vmatpush.bf16.msrb.mxu3 %v6980_v55  ;;  %v6817_v43 = vld [vmem:[%s7810_s7 + $0xe10] sm:$0xf0]  ;;  %v6708_v22 = vor.u32 %v7512_v20, %v6705_v21  ;;  %v7476_v26 = vld [vmem:[%s7810_s7 + $0xc04] sm:$0xf]  ;;  %v5143_v34 = vld [vmem:[%s7810_s7 + $0xe8] sm:$0xf] }
 0x146   : > { %v6945_v48 = vld [vmem:[%s7810_s7 + $0xf10] sm:$0xf0]  ;;  %4106 = vmatpush.bf16.msrb.mxu0 %v6596_v61  ;;  %v7508_v52 = vld [vmem:[%s7810_s7 + $0xd04] sm:$0xf]  ;;  %v3699_v61 = vadd.f32 %v8403_v8, %v3681_v33  ;;  %v3751_v17 = vadd.f32 %v8469_v23, %v3733_v54  ;;  %v6820_v31 = vor.u32 %v7540_v38, %v6817_v43  ;;  %v7123_v7 = vld [vmem:[%s7810_s7 + $0xf4] sm:$0xf0] }
 0x147   : > { %4124 = vmatpush.bf16.msrb.mxu1 %v6724_v1  ;;  %v6561_v47 = vld [vmem:[%s7810_s7 + $0xc10] sm:$0xf0]  ;;  %v5527_v1 = vld [vmem:[%s7810_s7 + $0x3e8] sm:$0xf]  ;;  %v6948_v24 = vor.u32 %v7572_v46, %v6945_v48  ;;  %v7155_v21 = vld [vmem:[%s7810_s7 + $0x1f4] sm:$0xf0]  ;;  %v8555_v33 = vpop.f32.mrf.mxu2  ;;  %v5144_v54 = vor.u32 %v7123_v7, %v5143_v34 }
 0x148   : > { %v6689_v55 = vld [vmem:[%s7810_s7 + $0xd10] sm:$0xf0]  ;;  %4143 = vmatpush.bf16.msrb.mxu2 %v6836_v62  ;;  %v5271_v20 = vld [vmem:[%s7810_s7 + $0x1e8] sm:$0xf]  ;;  %v3717_v8 = vadd.f32 %v8415_v60, %v3699_v61  ;;  %v6564_v0 = vor.u32 %v7476_v26, %v6561_v47  ;;  %v8557_v62 = vpop.f32.mrf.mxu3  ;;  %v5528_v38 = vor.u32 %v7219_v5, %v5527_v1  ;;  %v7183_v46 = vld [vmem:[%s7810_s7 + $0x2d4] sm:$0xf0]  ;;  %v3684_v60 = vadd.f32 %v8425_v13, %v8360_v10  ;;  %v3757_v48 = vpop.f32.mrf.mxu0 }
 0x149   : > { %4161 = vmatpush.bf16.msrb.mxu3 %v6964_v40  ;;  %v6692_v23 = vor.u32 %v7508_v52, %v6689_v55  ;;  %v5400_v40 = vor.u32 %v7187_v57, %v5399_v3  ;;  %v5383_v43 = vld [vmem:[%s7810_s7 + $0x2c8] sm:$0xf]  ;;  %v5272_v61 = vor.u32 %v7155_v21, %v5271_v20  ;;  %v3769_v26 = vadd.f32 %v8471_v29, %v3751_v17  ;;  %v7119_v52 = vld [vmem:[%s7810_s7 + $0xd4] sm:$0xf0] }
 0x14a   : > { %4107 = vmatpush.bf16.msrb.mxu0 %v6580_v53  ;;  %v5511_v63 = vld [vmem:[%s7810_s7 + $0x3c8] sm:$0xf]  ;;  %v7215_v53 = vld [vmem:[%s7810_s7 + $0x3d4] sm:$0xf0]  ;;  %v3735_v57 = vadd.f32 %v8420_v16, %v3717_v8  ;;  %v5384_v13 = vor.u32 %v7183_v46, %v5383_v43  ;;  %v3702_v1 = vadd.f32 %v8428_v32, %v3684_v60 }
 0x14b   : > { %4125 = vmatpush.bf16.msrb.mxu1 %v6708_v22  ;;  %v5127_v22 = vld [vmem:[%s7810_s7 + $0xc8] sm:$0xf]  ;;  %v3775_v47 = vpop.f32.mrf.mxu1  ;;  %v7151_v3 = vld [vmem:[%s7810_s7 + $0x1d4] sm:$0xf0]  ;;  %v3787_v10 = vadd.f32 %v8487_v56, %v3769_v26  ;;  %v5512_v29 = vor.u32 %v7215_v53, %v5511_v63 }
 0x14c   : > { %4144 = vmatpush.bf16.msrb.mxu2 %v6820_v31  ;;  %v5255_v55 = vld [vmem:[%s7810_s7 + $0x1c8] sm:$0xf]  ;;  %v5128_v5 = vor.u32 %v7119_v52, %v5127_v22  ;;  %v7179_v17 = vld [vmem:[%s7810_s7 + $0x2b4] sm:$0xf0]  ;;  %v3720_v56 = vadd.f32 %v8449_v30, %v3702_v1 }
 0x14d   : > { %4162 = vmatpush.bf16.msrb.mxu3 %v6948_v24  ;;  %v5256_v16 = vor.u32 %v7151_v3, %v5255_v55  ;;  %v5367_v34 = vld [vmem:[%s7810_s7 + $0x2a8] sm:$0xf]  ;;  %v7211_v7 = vld [vmem:[%s7810_s7 + $0x3b4] sm:$0xf0]  ;;  %v3805_v63 = vadd.f32 %v8492_v35, %v3787_v10 }
 0x14e   : > { %4108 = vmatpush.bf16.msrb.mxu0 %v6564_v0  ;;  %v3753_v0 = vadd.f32 %v8497_v6, %v3735_v57  ;;  %v5495_v24 = vld [vmem:[%s7810_s7 + $0x3a8] sm:$0xf]  ;;  %v7115_v21 = vld [vmem:[%s7810_s7 + $0xb4] sm:$0xf0]  ;;  %v5368_v35 = vor.u32 %v7179_v17, %v5367_v34  ;;  %v3738_v48 = vadd.f32 %v8451_v27, %v3720_v56 }
 0x14f   : > { %4126 = vmatpush.bf16.msrb.mxu1 %v6692_v23  ;;  %v3793_v31 = vpop.f32.mrf.mxu2  ;;  %v5111_v20 = vld [vmem:[%s7810_s7 + $0xa8] sm:$0xf]  ;;  %v7147_v6 = vld [vmem:[%s7810_s7 + $0x1b4] sm:$0xf0]  ;;  %v5496_v43 = vor.u32 %v7211_v7, %v5495_v24 }
 0x150   : > { %4209 = vmatpush.bf16.msra.mxu2 %v5400_v40  ;;  %v3811_v32 = vpop.f32.mrf.mxu3  ;;  %v5239_v8 = vld [vmem:[%s7810_s7 + $0x1a8] sm:$0xf]  ;;  %v3822_v23 = vpop.f32.mrf.mxu0  ;;  %v3771_v30 = vadd.f32 %v8501_v19, %v3753_v0  ;;  %v7175_v60 = vld [vmem:[%s7810_s7 + $0x294] sm:$0xf0]  ;;  %v3756_v3 = vadd.f32 %v8527_v25, %v3738_v48 }
 0x151   : > { %4227 = vmatpush.bf16.msra.mxu3 %v5528_v38  ;;  %v3823_v40 = vadd.f32 %v3822_v23, %v3805_v63  ;;  %v5351_v46 = vld [vmem:[%s7810_s7 + $0x288] sm:$0xf]  ;;  %v7207_v22 = vld [vmem:[%s7810_s7 + $0x394] sm:$0xf0]  ;;  %4145 = vmatmul.bf16.vlgmr.msrb.gmra.mxu2 %v8204_v37  ;;  %v353_v63 = vld [vmem:[#allocation2 + $0x30] sm:$0xff] }
 0x152   : > { %4173 = vmatpush.bf16.msra.mxu0 %v5144_v54  ;;  %v5112_v54 = vor.u32 %v7115_v21, %v5111_v20  ;;  %v5479_v53 = vld [vmem:[%s7810_s7 + $0x388] sm:$0xf]  ;;  %v3789_v19 = vadd.f32 %v8514_v51, %v3771_v30  ;;  %v7111_v47 = vld [vmem:[%s7810_s7 + $0x94] sm:$0xf0]  ;;  %4163 = vmatmul.bf16.vlgmr.msrb.gmra.mxu3 %v8211_v42  ;;  %v5352_v51 = vor.u32 %v7175_v60, %v5351_v46 }
 0x153   : > { %4191 = vmatpush.bf16.msra.mxu1 %v5272_v61  ;;  %v3840_v38 = vpop.f32.mrf.mxu1  ;;  %v5240_v61 = vor.u32 %v7147_v6, %v5239_v8  ;;  %v5095_v26 = vld [vmem:[%s7810_s7 + $0x88] sm:$0xf]  ;;  %4109 = vmatmul.bf16.vlgmr.msrb.gmra.mxu0 %v8202_v36  ;;  %v7143_v55 = vld [vmem:[%s7810_s7 + $0x194] sm:$0xf0]  ;;  %v5480_v57 = vor.u32 %v7207_v22, %v5479_v53  ;;  %v3774_v20 = vadd.f32 %v8530_v39, %v3756_v3 }
 0x154   : > { %4210 = vmatpush.bf16.msra.mxu2 %v5384_v13  ;;  %v5223_v52 = vld [vmem:[%s7810_s7 + $0x188] sm:$0xf]  ;;  %4127 = vmatmul.bf16.vlgmr.msrb.gmra.mxu1 %v8209_v41  ;;  %v3841_v27 = vadd.f32 %v3840_v38, %v3823_v40  ;;  %v7171_v13 = vld [vmem:[%s7810_s7 + $0x274] sm:$0xf0]  ;;  %v5096_v25 = vor.u32 %v7111_v47, %v5095_v26  ;;  %v3807_v34 = vadd.f32 %v8520_v28, %v3789_v19 }
 0x155   : > { %4228 = vmatpush.bf16.msra.mxu3 %v5512_v29  ;;  %v5335_v10 = vld [vmem:[%s7810_s7 + $0x268] sm:$0xf]  ;;  %v5224_v1 = vor.u32 %v7143_v55, %v5223_v52  ;;  %v7107_v31 = vld [vmem:[%s7810_s7 + $0x74] sm:$0xf0]  ;;  %v3792_v60 = vadd.f32 %v8555_v33, %v3774_v20 }
 0x156   : > { %4174 = vmatpush.bf16.msra.mxu0 %v5128_v5  ;;  %v5463_v5 = vld [vmem:[%s7810_s7 + $0x368] sm:$0xf]  ;;  %v7139_v7 = vld [vmem:[%s7810_s7 + $0x174] sm:$0xf0]  ;;  %v5336_v21 = vor.u32 %v7171_v13, %v5335_v10 }
 0x157   : > { %4192 = vmatpush.bf16.msra.mxu1 %v5256_v16  ;;  %v3858_v29 = vpop.f32.mrf.mxu2  ;;  %v7203_v16 = vld [vmem:[%s7810_s7 + $0x374] sm:$0xf0]  ;;  %v5079_v0 = vld [vmem:[%s7810_s7 + $0x68] sm:$0xf]  ;;  %v3810_v10 = vadd.f32 %v8557_v62, %v3792_v60 }
 0x158   : > { %4211 = vmatpush.bf16.msra.mxu2 %v5368_v35  ;;  %v3859_v17 = vadd.f32 %v3858_v29, %v3841_v27  ;;  %v3876_v56 = vpop.f32.mrf.mxu3  ;;  %v5207_v24 = vld [vmem:[%s7810_s7 + $0x168] sm:$0xf]  ;;  %v3824_v32 = vpop.f32.mrf.mxu0  ;;  %v5464_v28 = vor.u32 %v7203_v16, %v5463_v5  ;;  %v7167_v40 = vld [vmem:[%s7810_s7 + $0x254] sm:$0xf0]  ;;  %v5080_v39 = vor.u32 %v7107_v31, %v5079_v0  ;;  %v357_v16 = vld [vmem:[#allocation2 + $0x50] sm:$0xff] }
 0x159   : > { %4229 = vmatpush.bf16.msra.mxu3 %v5496_v43  ;;  %v3825_v6 = vadd.f32 %v3824_v32, %v3807_v34  ;;  %v5319_v30 = vld [vmem:[%s7810_s7 + $0x248] sm:$0xf]  ;;  %v5208_v38 = vor.u32 %v7139_v7, %v5207_v24  ;;  %v7199_v43 = vld [vmem:[%s7810_s7 + $0x354] sm:$0xf0] }
 0x15a   : > { %4175 = vmatpush.bf16.msra.mxu0 %v5112_v54  ;;  %v3877_v8 = vadd.f32 %v3876_v56, %v3859_v17  ;;  %v5447_v35 = vld [vmem:[%s7810_s7 + $0x348] sm:$0xf]  ;;  %v7103_v54 = vld [vmem:[%s7810_s7 + $0x54] sm:$0xf0]  ;;  %v5320_v26 = vor.u32 %v7167_v40, %v5319_v30 }
 0x15b   : > { %4193 = vmatpush.bf16.msra.mxu1 %v5240_v61  ;;  %v3842_v23 = vpop.f32.mrf.mxu1  ;;  %v5063_v46 = vld [vmem:[%s7810_s7 + $0x48] sm:$0xf]  ;;  %v7135_v53 = vld [vmem:[%s7810_s7 + $0x154] sm:$0xf0]  ;;  %v5448_v19 = vor.u32 %v7199_v43, %v5447_v35 }
 0x15c   : > { %4212 = vmatpush.bf16.msra.mxu2 %v5352_v51  ;;  %v4749_v48 = vadd.f32 %v3877_v8, %v353_v63  ;;  %v5191_v61 = vld [vmem:[%s7810_s7 + $0x148] sm:$0xf]  ;;  %v3843_v22 = vadd.f32 %v3842_v23, %v3825_v6  ;;  %v7163_v52 = vld [vmem:[%s7810_s7 + $0x234] sm:$0xf0]  ;;  %v5064_v33 = vor.u32 %v7103_v54, %v5063_v46 }
 0x15d   : > { %4230 = vmatpush.bf16.msra.mxu3 %v5480_v57  ;;  %v5303_v47 = vld [vmem:[%s7810_s7 + $0x228] sm:$0xf]  ;;  %v5192_v3 = vor.u32 %v7135_v53, %v5191_v61  ;;  %v7195_v51 = vld [vmem:[%s7810_s7 + $0x334] sm:$0xf0] }
 0x15e   : > { %4176 = vmatpush.bf16.msra.mxu0 %v5096_v25  ;;  %4761 = vst [vmem:[#allocation2 + $0x30] sm:$0xff] %v4749_v48  ;;  %v5431_v27 = vld [vmem:[%s7810_s7 + $0x328] sm:$0xf]  ;;  %v7099_v25 = vld [vmem:[%s7810_s7 + $0x34] sm:$0xf0]  ;;  %v5304_v34 = vor.u32 %v7163_v52, %v5303_v47 }
 0x15f   : > { %4194 = vmatpush.bf16.msra.mxu1 %v5224_v1  ;;  %v3860_v55 = vpop.f32.mrf.mxu2  ;;  %v5047_v57 = vld [vmem:[%s7810_s7 + $0x28] sm:$0xf]  ;;  %v7131_v5 = vld [vmem:[%s7810_s7 + $0x134] sm:$0xf0]  ;;  %v5432_v62 = vor.u32 %v7195_v51, %v5431_v27 }
 0x160   : > { %4213 = vmatpush.bf16.msra.mxu2 %v5336_v21  ;;  %v3861_v13 = vadd.f32 %v3860_v55, %v3843_v22  ;;  %v3878_v29 = vpop.f32.mrf.mxu3  ;;  %v5175_v1 = vld [vmem:[%s7810_s7 + $0x128] sm:$0xf]  ;;  %v3827_v0 = vpop.f32.mrf.mxu0  ;;  %v7159_v56 = vld [vmem:[%s7810_s7 + $0x214] sm:$0xf0]  ;;  %v5048_v21 = vor.u32 %v7099_v25, %v5047_v57 }
 0x161   : > { %4231 = vmatpush.bf16.msra.mxu3 %v5464_v28  ;;  %v5287_v17 = vld [vmem:[%s7810_s7 + $0x208] sm:$0xf]  ;;  %v3828_v24 = vadd.f32 %v3827_v0, %v3810_v10  ;;  %v7191_v63 = vld [vmem:[%s7810_s7 + $0x314] sm:$0xf0]  ;;  %v5176_v8 = vor.u32 %v7131_v5, %v5175_v1  ;;  %4150 = vmatmul.bf16.gmra.mxu2 %v8250_v4 }
 0x162   : > { %4177 = vmatpush.bf16.msra.mxu0 %v5080_v39  ;;  %v3879_v31 = vadd.f32 %v3878_v29, %v3861_v13  ;;  %v5415_v20 = vld [vmem:[%s7810_s7 + $0x308] sm:$0xf]  ;;  %v7095_v6 = vld [vmem:[%s7810_s7 + $0x14] sm:$0xf0]  ;;  %4168 = vmatmul.bf16.gmra.mxu3 %v8257_v12  ;;  %v5288_v48 = vor.u32 %v7159_v56, %v5287_v17 }
 0x163   : > { %4195 = vmatpush.bf16.msra.mxu1 %v5208_v38  ;;  %v3845_v7 = vpop.f32.mrf.mxu1  ;;  %v5031_v32 = vld [vmem:[%s7810_s7 + $0x8] sm:$0xf]  ;;  %v7127_v28 = vld [vmem:[%s7810_s7 + $0x114] sm:$0xf0]  ;;  %4114 = vmatmul.bf16.gmra.mxu0 %v8248_v2  ;;  %v5416_v54 = vor.u32 %v7191_v63, %v5415_v20 }
 0x164   : > { %4214 = vmatpush.bf16.msra.mxu2 %v5320_v26  ;;  %v5159_v23 = vld [vmem:[%s7810_s7 + $0x108] sm:$0xf]  ;;  %v4753_v30 = vadd.f32 %v3879_v31, %v357_v16  ;;  %v7315_v39 = vld [vmem:[%s7810_s7 + $0x6f4] sm:$0xf0]  ;;  %4132 = vmatmul.bf16.gmra.mxu1 %v8255_v11  ;;  %v3846_v60 = vadd.f32 %v3845_v7, %v3828_v24  ;;  %v5032_v26 = vor.u32 %v7095_v6, %v5031_v32 }
 0x165   : > { %4232 = vmatpush.bf16.msra.mxu3 %v5448_v19  ;;  %v5911_v40 = vld [vmem:[%s7810_s7 + $0x6e8] sm:$0xf]  ;;  %v7347_v35 = vld [vmem:[%s7810_s7 + $0x7f4] sm:$0xf0]  ;;  %v5160_v19 = vor.u32 %v7127_v28, %v5159_v23 }
 0x166   : > { %4178 = vmatpush.bf16.msra.mxu0 %v5064_v33  ;;  %v6039_v38 = vld [vmem:[%s7810_s7 + $0x7e8] sm:$0xf]  ;;  %v7251_v46 = vld [vmem:[%s7810_s7 + $0x4f4] sm:$0xf0]  ;;  %4765 = vst [vmem:[#allocation2 + $0x50] sm:$0xff] %v4753_v30  ;;  %v5912_v33 = vor.u32 %v7315_v39, %v5911_v40 }
 0x167   : > { %4196 = vmatpush.bf16.msra.mxu1 %v5192_v3  ;;  %v5655_v43 = vld [vmem:[%s7810_s7 + $0x4e8] sm:$0xf]  ;;  %v7283_v53 = vld [vmem:[%s7810_s7 + $0x5f4] sm:$0xf0]  ;;  %v3863_v22 = vpop.f32.mrf.mxu2  ;;  %v6040_v3 = vor.u32 %v7347_v35, %v6039_v38 }
 0x168   : > { %4215 = vmatpush.bf16.msra.mxu2 %v5304_v34  ;;  %v5783_v61 = vld [vmem:[%s7810_s7 + $0x5e8] sm:$0xf]  ;;  %v3864_v47 = vadd.f32 %v3863_v22, %v3846_v60  ;;  %v3881_v55 = vpop.f32.mrf.mxu3  ;;  %v7311_v51 = vld [vmem:[%s7810_s7 + $0x6d4] sm:$0xf0]  ;;  %v3829_v57 = vpop.f32.mrf.mxu0  ;;  %v5656_v10 = vor.u32 %v7251_v46, %v5655_v43 }
 0x169   : > { %4233 = vmatpush.bf16.msra.mxu3 %v5432_v62  ;;  %v361_v52 = vld [vmem:[#allocation2 + $0x28] sm:$0xff]  ;;  %v5784_v13 = vor.u32 %v7283_v53, %v5783_v61  ;;  %v7343_v25 = vld [vmem:[%s7810_s7 + $0x7d4] sm:$0xf0] }
 0x16a   : > { %4179 = vmatpush.bf16.msra.mxu0 %v5048_v21  ;;  %v5895_v27 = vld [vmem:[%s7810_s7 + $0x6c8] sm:$0xf]  ;;  %v3882_v5 = vadd.f32 %v3881_v55, %v3864_v47  ;;  %v7247_v0 = vld [vmem:[%s7810_s7 + $0x4d4] sm:$0xf0] }
 0x16b   : > { %4197 = vmatpush.bf16.msra.mxu1 %v5176_v8  ;;  %v6023_v29 = vld [vmem:[%s7810_s7 + $0x7c8] sm:$0xf]  ;;  %v3847_v16 = vpop.f32.mrf.mxu1  ;;  %v7279_v17 = vld [vmem:[%s7810_s7 + $0x5d4] sm:$0xf0]  ;;  %v5896_v31 = vor.u32 %v7311_v51, %v5895_v27 }
 0x16c   : > { %v5639_v1 = vld [vmem:[%s7810_s7 + $0x4c8] sm:$0xf]  ;;  %4216 = vmatpush.bf16.msra.mxu2 %v5288_v48  ;;  %v4757_v56 = vadd.f32 %v3882_v5, %v361_v52  ;;  %v6024_v24 = vor.u32 %v7343_v25, %v6023_v29  ;;  %v7307_v63 = vld [vmem:[%s7810_s7 + $0x6b4] sm:$0xf0] }
 0x16d   : > { %4234 = vmatpush.bf16.msra.mxu3 %v5416_v54  ;;  %v5767_v34 = vld [vmem:[%s7810_s7 + $0x5c8] sm:$0xf]  ;;  %v5640_v7 = vor.u32 %v7247_v0, %v5639_v1  ;;  %v7339_v8 = vld [vmem:[%s7810_s7 + $0x7b4] sm:$0xf0] }
 0x16e   : > { %4180 = vmatpush.bf16.msra.mxu0 %v5032_v26  ;;  %v5768_v62 = vor.u32 %v7279_v17, %v5767_v34  ;;  %4769 = vst [vmem:[#allocation2 + $0x28] sm:$0xff] %v4757_v56  ;;  %v5879_v20 = vld [vmem:[%s7810_s7 + $0x6a8] sm:$0xf]  ;;  %v7243_v28 = vld [vmem:[%s7810_s7 + $0x4b4] sm:$0xf0] }
 0x16f   : > { %4198 = vmatpush.bf16.msra.mxu1 %v5160_v19  ;;  %v3865_v32 = vpop.f32.mrf.mxu2  ;;  %v6007_v21 = vld [vmem:[%s7810_s7 + $0x7a8] sm:$0xf]  ;;  %v7275_v40 = vld [vmem:[%s7810_s7 + $0x5b4] sm:$0xf0]  ;;  %v5880_v35 = vor.u32 %v7307_v63, %v5879_v20 }
 0x170   : > { %4281 = vmatpush.bf16.msrb.mxu2 %v5912_v33  ;;  %v5623_v6 = vld [vmem:[%s7810_s7 + $0x4a8] sm:$0xf]  ;;  %v3883_v23 = vpop.f32.mrf.mxu3  ;;  %v3894_v39 = vpop.f32.mrf.mxu0  ;;  %v6008_v43 = vor.u32 %v7339_v8, %v6007_v21  ;;  %v7303_v60 = vld [vmem:[%s7810_s7 + $0x694] sm:$0xf0] }
 0x171   : > { %4299 = vmatpush.bf16.msrb.mxu3 %v6040_v3  ;;  %v5751_v30 = vld [vmem:[%s7810_s7 + $0x5a8] sm:$0xf]  ;;  %v5624_v54 = vor.u32 %v7243_v28, %v5623_v6  ;;  %v7335_v22 = vld [vmem:[%s7810_s7 + $0x794] sm:$0xf0]  ;;  %4217 = vmatmul.bf16.vlgmr.msra.gmra.mxu2 %v7901_v15 }
 0x172   : > { %4245 = vmatpush.bf16.msrb.mxu0 %v5656_v10  ;;  %v5863_v46 = vld [vmem:[%s7810_s7 + $0x688] sm:$0xf]  ;;  %v5752_v61 = vor.u32 %v7275_v40, %v5751_v30  ;;  %v7239_v19 = vld [vmem:[%s7810_s7 + $0x494] sm:$0xf0]  ;;  %4235 = vmatmul.bf16.vlgmr.msra.gmra.mxu3 %v7905_v18 }
 0x173   : > { %4263 = vmatpush.bf16.msrb.mxu1 %v5784_v13  ;;  %v3912_v38 = vpop.f32.mrf.mxu1  ;;  %v5991_v53 = vld [vmem:[%s7810_s7 + $0x788] sm:$0xf]  ;;  %4181 = vmatmul.bf16.vlgmr.msra.gmra.mxu0 %v7894_v9  ;;  %v7271_v52 = vld [vmem:[%s7810_s7 + $0x594] sm:$0xf0]  ;;  %v5864_v55 = vor.u32 %v7303_v60, %v5863_v46 }
 0x174   : > { %4282 = vmatpush.bf16.msrb.mxu2 %v5896_v31  ;;  %v3913_v48 = vadd.f32 %v3912_v38, %v3894_v39  ;;  %v5607_v26 = vld [vmem:[%s7810_s7 + $0x488] sm:$0xf]  ;;  %4199 = vmatmul.bf16.vlgmr.msra.gmra.mxu1 %v7899_v14  ;;  %v5992_v33 = vor.u32 %v7335_v22, %v5991_v53  ;;  %v7299_v27 = vld [vmem:[%s7810_s7 + $0x674] sm:$0xf0] }
 0x175   : > { %4300 = vmatpush.bf16.msrb.mxu3 %v6024_v24  ;;  %v5735_v47 = vld [vmem:[%s7810_s7 + $0x588] sm:$0xf]  ;;  %v5608_v57 = vor.u32 %v7239_v19, %v5607_v26  ;;  %v7331_v29 = vld [vmem:[%s7810_s7 + $0x774] sm:$0xf0] }
 0x176   : > { %4246 = vmatpush.bf16.msrb.mxu0 %v5640_v7  ;;  %v5847_v3 = vld [vmem:[%s7810_s7 + $0x668] sm:$0xf]  ;;  %v5736_v10 = vor.u32 %v7271_v52, %v5735_v47  ;;  %v7235_v16 = vld [vmem:[%s7810_s7 + $0x474] sm:$0xf0] }
 0x177   : > { %4264 = vmatpush.bf16.msrb.mxu1 %v5768_v62  ;;  %v3930_v51 = vpop.f32.mrf.mxu2  ;;  %v5975_v13 = vld [vmem:[%s7810_s7 + $0x768] sm:$0xf]  ;;  %v7267_v34 = vld [vmem:[%s7810_s7 + $0x574] sm:$0xf0]  ;;  %v5848_v24 = vor.u32 %v7299_v27, %v5847_v3 }
 0x178   : > { %4283 = vmatpush.bf16.msrb.mxu2 %v5880_v35  ;;  %v5591_v25 = vld [vmem:[%s7810_s7 + $0x468] sm:$0xf]  ;;  %v3931_v1 = vadd.f32 %v3930_v51, %v3913_v48  ;;  %v3948_v5 = vpop.f32.mrf.mxu3  ;;  %v3896_v17 = vpop.f32.mrf.mxu0  ;;  %v5976_v7 = vor.u32 %v7331_v29, %v5975_v13  ;;  %v7295_v20 = vld [vmem:[%s7810_s7 + $0x654] sm:$0xf0] }
 0x179   : > { %4301 = vmatpush.bf16.msrb.mxu3 %v6008_v43  ;;  %v5719_v0 = vld [vmem:[%s7810_s7 + $0x568] sm:$0xf]  ;;  %v5592_v32 = vor.u32 %v7235_v16, %v5591_v25  ;;  %v7327_v6 = vld [vmem:[%s7810_s7 + $0x754] sm:$0xf0] }
 0x17a   : > { %4247 = vmatpush.bf16.msrb.mxu0 %v5624_v54  ;;  %v8684_v56 = vadd.f32 %v3948_v5, %v3931_v1  ;;  %v5831_v62 = vld [vmem:[%s7810_s7 + $0x648] sm:$0xf]  ;;  %v5720_v21 = vor.u32 %v7267_v34, %v5719_v0  ;;  %v7231_v28 = vld [vmem:[%s7810_s7 + $0x454] sm:$0xf0] }
 0x17b   : > { %4265 = vmatpush.bf16.msrb.mxu1 %v5752_v61  ;;  %v3914_v31 = vpop.f32.mrf.mxu1  ;;  %v5959_v8 = vld [vmem:[%s7810_s7 + $0x748] sm:$0xf]  ;;  %v7263_v40 = vld [vmem:[%s7810_s7 + $0x554] sm:$0xf0]  ;;  %v5832_v39 = vor.u32 %v7295_v20, %v5831_v62 }
 0x17c   : > { %4284 = vmatpush.bf16.msrb.mxu2 %v5864_v55  ;;  %v3915_v63 = vadd.f32 %v3914_v31, %v3896_v17  ;;  %v5575_v23 = vld [vmem:[%s7810_s7 + $0x448] sm:$0xf]  ;;  %v5960_v38 = vor.u32 %v7327_v6, %v5959_v8  ;;  %v7291_v43 = vld [vmem:[%s7810_s7 + $0x634] sm:$0xf0]  ;;  %v9410_v17 = vld [vmem:[#allocation4_spill] sm:$0xff] }
 0x17d   : > { %4302 = vmatpush.bf16.msrb.mxu3 %v5992_v33  ;;  %v5703_v30 = vld [vmem:[%s7810_s7 + $0x548] sm:$0xf]  ;;  %v5576_v60 = vor.u32 %v7231_v28, %v5575_v23  ;;  %v7323_v61 = vld [vmem:[%s7810_s7 + $0x734] sm:$0xf0]  ;;  %v9411_v31 = vld [vmem:[#allocation6_spill] sm:$0xff] }
 0x17e   : > { %4248 = vmatpush.bf16.msrb.mxu0 %v5608_v57  ;;  %v5815_v35 = vld [vmem:[%s7810_s7 + $0x628] sm:$0xf]  ;;  %v5704_v48 = vor.u32 %v7263_v40, %v5703_v30  ;;  %v7227_v19 = vld [vmem:[%s7810_s7 + $0x434] sm:$0xf0] }
 0x17f   : > { %4266 = vmatpush.bf16.msrb.mxu1 %v5736_v10  ;;  %v3932_v46 = vpop.f32.mrf.mxu2  ;;  %v5943_v54 = vld [vmem:[%s7810_s7 + $0x728] sm:$0xf]  ;;  %v7259_v52 = vld [vmem:[%s7810_s7 + $0x534] sm:$0xf0]  ;;  %v5816_v51 = vor.u32 %v7291_v43, %v5815_v35 }
 0x180   : > { %4285 = vmatpush.bf16.msrb.mxu2 %v5848_v24  ;;  %v5559_v53 = vld [vmem:[%s7810_s7 + $0x428] sm:$0xf]  ;;  %v3933_v22 = vadd.f32 %v3932_v46, %v3915_v63  ;;  %v3950_v26 = vpop.f32.mrf.mxu3  ;;  %v3899_v55 = vpop.f32.mrf.mxu0  ;;  %v5944_v57 = vor.u32 %v7323_v61, %v5943_v54  ;;  %v7287_v10 = vld [vmem:[%s7810_s7 + $0x614] sm:$0xf0] }
 0x181   : > { %4303 = vmatpush.bf16.msrb.mxu3 %v5976_v7  ;;  %v5687_v47 = vld [vmem:[%s7810_s7 + $0x528] sm:$0xf]  ;;  %v7319_v29 = vld [vmem:[%s7810_s7 + $0x714] sm:$0xf0]  ;;  %v5560_v1 = vor.u32 %v7227_v19, %v5559_v53  ;;  %4222 = vmatmul.bf16.gmra.mxu2 %v9411_v31 }
 0x182   : > { %4249 = vmatpush.bf16.msrb.mxu0 %v5592_v32  ;;  %v5799_v33 = vld [vmem:[%s7810_s7 + $0x608] sm:$0xf]  ;;  %v8703_v3 = vadd.f32 %v3950_v26, %v3933_v22  ;;  %v5688_v5 = vor.u32 %v7259_v52, %v5687_v47  ;;  %v7223_v0 = vld [vmem:[%s7810_s7 + $0x414] sm:$0xf0] }
 0x183   : > { %4267 = vmatpush.bf16.msrb.mxu1 %v5720_v21  ;;  %v3917_v27 = vpop.f32.mrf.mxu1  ;;  %v5927_v13 = vld [vmem:[%s7810_s7 + $0x708] sm:$0xf]  ;;  %4186 = vmatmul.bf16.gmra.mxu0 %v9410_v17  ;;  %v7255_v24 = vld [vmem:[%s7810_s7 + $0x514] sm:$0xf0]  ;;  %v5800_v6 = vor.u32 %v7287_v10, %v5799_v33 }
 0x184   : > { %4286 = vmatpush.bf16.msrb.mxu2 %v5832_v39  ;;  %v3918_v25 = vadd.f32 %v3917_v27, %v3899_v55  ;;  %v5543_v16 = vld [vmem:[%s7810_s7 + $0x408] sm:$0xf]  ;;  %v7443_v62 = vld [vmem:[%s7810_s7 + $0xaf4] sm:$0xf0]  ;;  %v5928_v23 = vor.u32 %v7319_v29, %v5927_v13 }
 0x185   : > { %4304 = vmatpush.bf16.msrb.mxu3 %v5960_v38  ;;  %v5671_v34 = vld [vmem:[%s7810_s7 + $0x508] sm:$0xf]  ;;  %v9413_v63 = vld [vmem:[#allocation7_spill] sm:$0xff]  ;;  %v5544_v38 = vor.u32 %v7223_v0, %v5543_v16 }
 0x186   : > { %4250 = vmatpush.bf16.msrb.mxu0 %v5576_v60  ;;  %v6423_v7 = vld [vmem:[%s7810_s7 + $0xae8] sm:$0xf]  ;;  %4240 = vmatmul.bf16.gmra.mxu3 %v9413_v63  ;;  %v7475_v21 = vld [vmem:[%s7810_s7 + $0xbf4] sm:$0xf0]  ;;  %v5672_v35 = vor.u32 %v7255_v24, %v5671_v34 }
 0x187   : > { %4268 = vmatpush.bf16.msrb.mxu1 %v5704_v48  ;;  %v9412_v20 = vld [vmem:[#allocation5_spill] sm:$0xff]  ;;  %v7379_v28 = vld [vmem:[%s7810_s7 + $0x8f4] sm:$0xf0]  ;;  %v3935_v39 = vpop.f32.mrf.mxu2  ;;  %v6424_v60 = vor.u32 %v7443_v62, %v6423_v7 }
 0x188   : > { %4204 = vmatmul.bf16.gmra.mxu1 %v9412_v20  ;;  %v6551_v32 = vld [vmem:[%s7810_s7 + $0xbe8] sm:$0xf]  ;;  %4287 = vmatpush.bf16.msrb.mxu2 %v5816_v51  ;;  %v7411_v40 = vld [vmem:[%s7810_s7 + $0x9f4] sm:$0xf0]  ;;  %v3936_v43 = vadd.f32 %v3935_v39, %v3918_v25  ;;  %v3953_v46 = vpop.f32.mrf.mxu3  ;;  %v3901_v53 = vpop.f32.mrf.mxu0 }
 0x189   : > { %v6167_v8 = vld [vmem:[%s7810_s7 + $0x8e8] sm:$0xf]  ;;  %4305 = vmatpush.bf16.msrb.mxu3 %v5944_v57  ;;  %v6552_v48 = vor.u32 %v7475_v21, %v6551_v32  ;;  %v7439_v61 = vld [vmem:[%s7810_s7 + $0xad4] sm:$0xf0] }
 0x18a   : > { %v6295_v30 = vld [vmem:[%s7810_s7 + $0x9e8] sm:$0xf]  ;;  %4251 = vmatpush.bf16.msrb.mxu0 %v5560_v1  ;;  %v6168_v22 = vor.u32 %v7379_v28, %v6167_v8  ;;  %v7471_v47 = vld [vmem:[%s7810_s7 + $0xbd4] sm:$0xf0]  ;;  %v8729_v55 = vadd.f32 %v3953_v46, %v3936_v43 }
 0x18b   : > { %4269 = vmatpush.bf16.msrb.mxu1 %v5688_v5  ;;  %v6407_v54 = vld [vmem:[%s7810_s7 + $0xac8] sm:$0xf]  ;;  %v6296_v26 = vor.u32 %v7411_v40, %v6295_v30  ;;  %v3919_v33 = vpop.f32.mrf.mxu1  ;;  %v7375_v27 = vld [vmem:[%s7810_s7 + $0x8d4] sm:$0xf0] }
 0x18c   : > { %v6535_v19 = vld [vmem:[%s7810_s7 + $0xbc8] sm:$0xf]  ;;  %4288 = vmatpush.bf16.msrb.mxu2 %v5800_v6  ;;  %v7407_v57 = vld [vmem:[%s7810_s7 + $0x9d4] sm:$0xf0]  ;;  %v6408_v10 = vor.u32 %v7439_v61, %v6407_v54 }
 0x18d   : > { %v6151_v52 = vld [vmem:[%s7810_s7 + $0x8c8] sm:$0xf]  ;;  %4306 = vmatpush.bf16.msrb.mxu3 %v5928_v23  ;;  %v6536_v13 = vor.u32 %v7471_v47, %v6535_v19  ;;  %v7435_v5 = vld [vmem:[%s7810_s7 + $0xab4] sm:$0xf0] }
 0x18e   : > { %v6279_v51 = vld [vmem:[%s7810_s7 + $0x9c8] sm:$0xf]  ;;  %4252 = vmatpush.bf16.msrb.mxu0 %v5544_v38  ;;  %v6152_v29 = vor.u32 %v7375_v27, %v6151_v52  ;;  %v7467_v34 = vld [vmem:[%s7810_s7 + $0xbb4] sm:$0xf0] }
 0x18f   : > { %4270 = vmatpush.bf16.msrb.mxu1 %v5672_v35  ;;  %v6280_v25 = vor.u32 %v7407_v57, %v6279_v51  ;;  %v6391_v1 = vld [vmem:[%s7810_s7 + $0xaa8] sm:$0xf]  ;;  %v3937_v16 = vpop.f32.mrf.mxu2  ;;  %v7371_v62 = vld [vmem:[%s7810_s7 + $0x8b4] sm:$0xf0] }
 0x190   : > { %4353 = vmatpush.bf16.msra.mxu2 %v6424_v60  ;;  %v6519_v0 = vld [vmem:[%s7810_s7 + $0xba8] sm:$0xf]  ;;  %v3955_v7 = vpop.f32.mrf.mxu3  ;;  %v7403_v21 = vld [vmem:[%s7810_s7 + $0x9b4] sm:$0xf0]  ;;  %v8742_v8 = vpop.f32.mrf.mxu0  ;;  %v6392_v23 = vor.u32 %v7435_v5, %v6391_v1  ;;  %v9414_v60 = vld [vmem:[#allocation8_spill] sm:$0xff] }
 0x191   : > { %4371 = vmatpush.bf16.msra.mxu3 %v6552_v48  ;;  %v6135_v24 = vld [vmem:[%s7810_s7 + $0x8a8] sm:$0xf]  ;;  %v6520_v28 = vor.u32 %v7467_v34, %v6519_v0  ;;  %v7431_v40 = vld [vmem:[%s7810_s7 + $0xa94] sm:$0xf0] }
 0x192   : > { %4317 = vmatpush.bf16.msra.mxu0 %v6168_v22  ;;  %v6263_v32 = vld [vmem:[%s7810_s7 + $0x9a8] sm:$0xf]  ;;  %v6136_v39 = vor.u32 %v7371_v62, %v6135_v24  ;;  %v7463_v43 = vld [vmem:[%s7810_s7 + $0xb94] sm:$0xf0]  ;;  %v9416_v22 = vld [vmem:[#allocation10_spill] sm:$0xff] }
 0x193   : > { %4335 = vmatpush.bf16.msra.mxu1 %v6296_v26  ;;  %v8744_v6 = vpop.f32.mrf.mxu1  ;;  %v6375_v30 = vld [vmem:[%s7810_s7 + $0xa88] sm:$0xf]  ;;  %v6264_v38 = vor.u32 %v7403_v21, %v6263_v32  ;;  %4253 = vmatmul.bf16.vlgmr.msrb.gmra.mxu0 %v9414_v60  ;;  %v7367_v54 = vld [vmem:[%s7810_s7 + $0x894] sm:$0xf0] }
 0x194   : > { %4354 = vmatpush.bf16.msra.mxu2 %v6408_v10  ;;  %v6503_v35 = vld [vmem:[%s7810_s7 + $0xb88] sm:$0xf]  ;;  %v7399_v53 = vld [vmem:[%s7810_s7 + $0x994] sm:$0xf0]  ;;  %v6376_v19 = vor.u32 %v7431_v40, %v6375_v30 }
 0x195   : > { %4372 = vmatpush.bf16.msra.mxu3 %v6536_v13  ;;  %v6119_v46 = vld [vmem:[%s7810_s7 + $0x888] sm:$0xf]  ;;  %v9417_v26 = vld [vmem:[#allocation11_spill] sm:$0xff]  ;;  %v6504_v47 = vor.u32 %v7463_v43, %v6503_v35 }
 0x196   : > { %4318 = vmatpush.bf16.msra.mxu0 %v6152_v29  ;;  %v9415_v48 = vld [vmem:[#allocation9_spill] sm:$0xff]  ;;  %4307 = vmatmul.bf16.vlgmr.msrb.gmra.mxu3 %v9417_v26  ;;  %v7427_v33 = vld [vmem:[%s7810_s7 + $0xa74] sm:$0xf0]  ;;  %v6120_v51 = vor.u32 %v7367_v54, %v6119_v46 }
 0x197   : > { %4336 = vmatpush.bf16.msra.mxu1 %v6280_v25  ;;  %4289 = vmatmul.bf16.vlgmr.msrb.gmra.mxu2 %v9415_v48  ;;  %v6247_v61 = vld [vmem:[%s7810_s7 + $0x988] sm:$0xf]  ;;  %v8760_v27 = vpop.f32.mrf.mxu2  ;;  %v7459_v13 = vld [vmem:[%s7810_s7 + $0xb74] sm:$0xf0] }
 0x198   : > { %4271 = vmatmul.bf16.vlgmr.msrb.gmra.mxu1 %v9416_v22  ;;  %4355 = vmatpush.bf16.msra.mxu2 %v6392_v23  ;;  %v6359_v52 = vld [vmem:[%s7810_s7 + $0xa68] sm:$0xf]  ;;  %v6248_v57 = vor.u32 %v7399_v53, %v6247_v61  ;;  %v8765_v25 = vpop.f32.mrf.mxu3  ;;  %v7363_v1 = vld [vmem:[%s7810_s7 + $0x874] sm:$0xf0]  ;;  %v8770_v0 = vpop.f32.mrf.mxu0 }
 0x199   : > { %4373 = vmatpush.bf16.msra.mxu3 %v6520_v28  ;;  %v6487_v10 = vld [vmem:[%s7810_s7 + $0xb68] sm:$0xf]  ;;  %v7395_v16 = vld [vmem:[%s7810_s7 + $0x974] sm:$0xf0]  ;;  %v6360_v24 = vor.u32 %v7427_v33, %v6359_v52 }
 0x19a   : > { %4319 = vmatpush.bf16.msra.mxu0 %v6136_v39  ;;  %v6103_v29 = vld [vmem:[%s7810_s7 + $0x868] sm:$0xf]  ;;  %v6488_v7 = vor.u32 %v7459_v13, %v6487_v10  ;;  %v7423_v32 = vld [vmem:[%s7810_s7 + $0xa54] sm:$0xf0] }
 0x19b   : > { %4337 = vmatpush.bf16.msra.mxu1 %v6264_v38  ;;  %v6231_v5 = vld [vmem:[%s7810_s7 + $0x968] sm:$0xf]  ;;  %v8772_v34 = vpop.f32.mrf.mxu1  ;;  %v6104_v21 = vor.u32 %v7363_v1, %v6103_v29  ;;  %v7455_v30 = vld [vmem:[%s7810_s7 + $0xb54] sm:$0xf0] }
 0x19c   : > { %4356 = vmatpush.bf16.msra.mxu2 %v6376_v19  ;;  %v6343_v62 = vld [vmem:[%s7810_s7 + $0xa48] sm:$0xf]  ;;  %v6232_v23 = vor.u32 %v7395_v16, %v6231_v5  ;;  %v7359_v39 = vld [vmem:[%s7810_s7 + $0x854] sm:$0xf0] }
 0x19d   : > { %4374 = vmatpush.bf16.msra.mxu3 %v6504_v47  ;;  %v6471_v28 = vld [vmem:[%s7810_s7 + $0xb48] sm:$0xf]  ;;  %v7391_v35 = vld [vmem:[%s7810_s7 + $0x954] sm:$0xf0]  ;;  %v6344_v43 = vor.u32 %v7423_v32, %v6343_v62 }
 0x19e   : > { %4320 = vmatpush.bf16.msra.mxu0 %v6120_v51  ;;  %v6087_v40 = vld [vmem:[%s7810_s7 + $0x848] sm:$0xf]  ;;  %v6472_v46 = vor.u32 %v7455_v30, %v6471_v28  ;;  %v7419_v61 = vld [vmem:[%s7810_s7 + $0xa34] sm:$0xf0] }
 0x19f   : > { %4338 = vmatpush.bf16.msra.mxu1 %v6248_v57  ;;  %v6215_v38 = vld [vmem:[%s7810_s7 + $0x948] sm:$0xf]  ;;  %v8784_v53 = vpop.f32.mrf.mxu2  ;;  %v6088_v19 = vor.u32 %v7359_v39, %v6087_v40  ;;  %v7451_v33 = vld [vmem:[%s7810_s7 + $0xb34] sm:$0xf0] }
 0x1a0   : > { %4357 = vmatpush.bf16.msra.mxu2 %v6360_v24  ;;  %v6327_v54 = vld [vmem:[%s7810_s7 + $0xa28] sm:$0xf]  ;;  %v6216_v47 = vor.u32 %v7391_v35, %v6215_v38  ;;  %v8789_v57 = vpop.f32.mrf.mxu3  ;;  %v7355_v10 = vld [vmem:[%s7810_s7 + $0x834] sm:$0xf0]  ;;  %v8794_v1 = vpop.f32.mrf.mxu0  ;;  %v9418_v38 = vld [vmem:[#allocation12_spill] sm:$0xff] }
 0x1a1   : > { %4375 = vmatpush.bf16.msra.mxu3 %v6488_v7  ;;  %v6455_v52 = vld [vmem:[%s7810_s7 + $0xb28] sm:$0xf]  ;;  %v7387_v29 = vld [vmem:[%s7810_s7 + $0x934] sm:$0xf0]  ;;  %v6328_v24 = vor.u32 %v7419_v61, %v6327_v54  ;;  %v9420_v61 = vld [vmem:[#allocation14_spill] sm:$0xff] }
 0x1a2   : > { %4321 = vmatpush.bf16.msra.mxu0 %v6104_v21  ;;  %v6071_v51 = vld [vmem:[%s7810_s7 + $0x828] sm:$0xf]  ;;  %v6456_v7 = vor.u32 %v7451_v33, %v6455_v52  ;;  %v7415_v62 = vld [vmem:[%s7810_s7 + $0xa14] sm:$0xf0] }
 0x1a3   : > { %4339 = vmatpush.bf16.msra.mxu1 %v6232_v23  ;;  %v6199_v13 = vld [vmem:[%s7810_s7 + $0x928] sm:$0xf]  ;;  %v8797_v16 = vpop.f32.mrf.mxu1  ;;  %v7447_v21 = vld [vmem:[%s7810_s7 + $0xb14] sm:$0xf0]  ;;  %v6072_v23 = vor.u32 %v7355_v10, %v6071_v51  ;;  %4258 = vmatmul.bf16.gmra.mxu0 %v9418_v38 }
 0x1a4   : > { %v6311_v5 = vld [vmem:[%s7810_s7 + $0xa08] sm:$0xf]  ;;  %4358 = vmatpush.bf16.msra.mxu2 %v6344_v43  ;;  %v6200_v28 = vor.u32 %v7387_v29, %v6199_v13  ;;  %v7351_v40 = vld [vmem:[%s7810_s7 + $0x814] sm:$0xf0] }
 0x1a5   : > { %4376 = vmatpush.bf16.msra.mxu3 %v6472_v46  ;;  %v6439_v32 = vld [vmem:[%s7810_s7 + $0xb08] sm:$0xf]  ;;  %v7383_v43 = vld [vmem:[%s7810_s7 + $0x914] sm:$0xf0]  ;;  %v6312_v51 = vor.u32 %v7415_v62, %v6311_v5 }
 0x1a6   : > { %4322 = vmatpush.bf16.msra.mxu0 %v6088_v19  ;;  %v6055_v30 = vld [vmem:[%s7810_s7 + $0x808] sm:$0xf]  ;;  %v7571_v54 = vld [vmem:[%s7810_s7 + $0xef4] sm:$0xf0]  ;;  %v6440_v10 = vor.u32 %v7447_v21, %v6439_v32 }
 0x1a7   : > { %4340 = vmatpush.bf16.msra.mxu1 %v6216_v47  ;;  %v6183_v39 = vld [vmem:[%s7810_s7 + $0x908] sm:$0xf]  ;;  %v9421_v19 = vld [vmem:[#allocation15_spill] sm:$0xff]  ;;  %v8818_v38 = vpop.f32.mrf.mxu2 }
 0x1a8   : > { %v9419_v35 = vld [vmem:[#allocation13_spill] sm:$0xff]  ;;  %4276 = vmatmul.bf16.gmra.mxu1 %v9420_v61  ;;  %4312 = vmatmul.bf16.gmra.mxu3 %v9421_v19  ;;  %v7603_v52 = vld [vmem:[%s7810_s7 + $0xff4] sm:$0xf0]  ;;  %v6056_v19 = vor.u32 %v7351_v40, %v6055_v30  ;;  %v6184_v61 = vor.u32 %v7383_v43, %v6183_v39  ;;  %v8820_v26 = vpop.f32.mrf.mxu3  ;;  %v3973_v32 = vpop.f32.mrf.mxu0 }
 0x1a9   : > { %4294 = vmatmul.bf16.gmra.mxu2 %v9419_v35  ;;  %v6935_v46 = vld [vmem:[%s7810_s7 + $0xee8] sm:$0xf]  ;;  %4377 = vmatpush.bf16.msra.mxu3 %v6456_v7  ;;  %v7507_v13 = vld [vmem:[%s7810_s7 + $0xcf4] sm:$0xf0] }
 0x1aa   : > { %v7063_v47 = vld [vmem:[%s7810_s7 + $0xfe8] sm:$0xf]  ;;  %4359 = vmatpush.bf16.msra.mxu2 %v6328_v24  ;;  %v7539_v35 = vld [vmem:[%s7810_s7 + $0xdf4] sm:$0xf0]  ;;  %4323 = vmatpush.bf16.msra.mxu0 %v6072_v23  ;;  %v6936_v24 = vor.u32 %v7571_v54, %v6935_v46 }
 0x1ab   : > { %v6679_v33 = vld [vmem:[%s7810_s7 + $0xce8] sm:$0xf]  ;;  %4341 = vmatpush.bf16.msra.mxu1 %v6200_v28  ;;  %v7064_v5 = vor.u32 %v7603_v52, %v7063_v47  ;;  %v7567_v62 = vld [vmem:[%s7810_s7 + $0xed4] sm:$0xf0]  ;;  %v3991_v20 = vpop.f32.mrf.mxu1 }
 0x1ac   : > { %v6807_v29 = vld [vmem:[%s7810_s7 + $0xde8] sm:$0xf]  ;;  %v6680_v21 = vor.u32 %v7507_v13, %v6679_v33  ;;  %v7599_v60 = vld [vmem:[%s7810_s7 + $0xfd4] sm:$0xf0] }
 0x1ad   : > { %v6919_v7 = vld [vmem:[%s7810_s7 + $0xec8] sm:$0xf]  ;;  %v6808_v22 = vor.u32 %v7539_v35, %v6807_v29  ;;  %4378 = vmatpush.bf16.msra.mxu3 %v6440_v10  ;;  %v7503_v23 = vld [vmem:[%s7810_s7 + $0xcd4] sm:$0xf0] }
 0x1ae   : > { %v7047_v48 = vld [vmem:[%s7810_s7 + $0xfc8] sm:$0xf]  ;;  %4360 = vmatpush.bf16.msra.mxu2 %v6312_v51  ;;  %v7535_v30 = vld [vmem:[%s7810_s7 + $0xdd4] sm:$0xf0]  ;;  %4324 = vmatpush.bf16.msra.mxu0 %v6056_v19  ;;  %v6920_v40 = vor.u32 %v7567_v62, %v6919_v7 }
 0x1af   : > { %v6663_v63 = vld [vmem:[%s7810_s7 + $0xcc8] sm:$0xf]  ;;  %4342 = vmatpush.bf16.msra.mxu1 %v6184_v61  ;;  %v7048_v39 = vor.u32 %v7599_v60, %v7047_v48  ;;  %v7563_v46 = vld [vmem:[%s7810_s7 + $0xeb4] sm:$0xf0]  ;;  %v4009_v54 = vpop.f32.mrf.mxu2 }
 0x1b0   : > { %v6791_v28 = vld [vmem:[%s7810_s7 + $0xdc8] sm:$0xf]  ;;  %v6664_v20 = vor.u32 %v7503_v23, %v6663_v63  ;;  %v7595_v52 = vld [vmem:[%s7810_s7 + $0xfb4] sm:$0xf0]  ;;  %v4027_v61 = vpop.f32.mrf.mxu3  ;;  %v8838_v63 = vpop.f32.mrf.mxu0 }
 0x1b1   : > { %4443 = vmatpush.bf16.msrb.mxu3 %v7064_v5  ;;  %v6792_v35 = vor.u32 %v7535_v30, %v6791_v28  ;;  %v6903_v43 = vld [vmem:[%s7810_s7 + $0xea8] sm:$0xf]  ;;  %v7499_v60 = vld [vmem:[%s7810_s7 + $0xcb4] sm:$0xf0] }
 0x1b2   : > { %4425 = vmatpush.bf16.msrb.mxu2 %v6936_v24  ;;  %4389 = vmatpush.bf16.msrb.mxu0 %v6680_v21  ;;  %v7031_v47 = vld [vmem:[%s7810_s7 + $0xfa8] sm:$0xf]  ;;  %v7531_v33 = vld [vmem:[%s7810_s7 + $0xdb4] sm:$0xf0]  ;;  %v6904_v51 = vor.u32 %v7563_v46, %v6903_v43 }
 0x1b3   : > { %4407 = vmatpush.bf16.msrb.mxu1 %v6808_v22  ;;  %v6647_v19 = vld [vmem:[%s7810_s7 + $0xca8] sm:$0xf]  ;;  %v8840_v22 = vpop.f32.mrf.mxu1  ;;  %v7032_v10 = vor.u32 %v7595_v52, %v7031_v47  ;;  %v7559_v29 = vld [vmem:[%s7810_s7 + $0xe94] sm:$0xf0]  ;;  %4325 = vmatmul.bf16.vlgmr.msra.gmra.mxu0 %v8100_v44 }
 0x1b4   : > { %v6775_v48 = vld [vmem:[%s7810_s7 + $0xda8] sm:$0xf]  ;;  %v6648_v24 = vor.u32 %v7499_v60, %v6647_v19  ;;  %v7591_v62 = vld [vmem:[%s7810_s7 + $0xf94] sm:$0xf0] }
 0x1b5   : > { %4444 = vmatpush.bf16.msrb.mxu3 %v7048_v39  ;;  %v6887_v13 = vld [vmem:[%s7810_s7 + $0xe88] sm:$0xf]  ;;  %v6776_v5 = vor.u32 %v7531_v33, %v6775_v48  ;;  %v7495_v21 = vld [vmem:[%s7810_s7 + $0xc94] sm:$0xf0] }
 0x1b6   : > { %4426 = vmatpush.bf16.msrb.mxu2 %v6920_v40  ;;  %4390 = vmatpush.bf16.msrb.mxu0 %v6664_v20  ;;  %v7015_v7 = vld [vmem:[%s7810_s7 + $0xf88] sm:$0xf]  ;;  %v7527_v28 = vld [vmem:[%s7810_s7 + $0xd94] sm:$0xf0]  ;;  %v6888_v30 = vor.u32 %v7559_v29, %v6887_v13 }
 0x1b7   : > { %4408 = vmatpush.bf16.msrb.mxu1 %v6792_v35  ;;  %v6631_v32 = vld [vmem:[%s7810_s7 + $0xc88] sm:$0xf]  ;;  %v7016_v40 = vor.u32 %v7591_v62, %v7015_v7  ;;  %v7555_v20 = vld [vmem:[%s7810_s7 + $0xe74] sm:$0xf0]  ;;  %v8856_v35 = vpop.f32.mrf.mxu2 }
 0x1b8   : > { %v6759_v23 = vld [vmem:[%s7810_s7 + $0xd88] sm:$0xf]  ;;  %4343 = vmatmul.bf16.vlgmr.msra.gmra.mxu1 %v8107_v49  ;;  %4379 = vmatmul.bf16.vlgmr.msra.gmra.mxu3 %v8109_v50  ;;  %v6632_v43 = vor.u32 %v7495_v21, %v6631_v32  ;;  %v7587_v47 = vld [vmem:[%s7810_s7 + $0xf74] sm:$0xf0]  ;;  %v8861_v19 = vpop.f32.mrf.mxu3  ;;  %v8866_v33 = vpop.f32.mrf.mxu0 }
 0x1b9   : > { %4361 = vmatmul.bf16.vlgmr.msra.gmra.mxu2 %v8102_v45  ;;  %4445 = vmatpush.bf16.msrb.mxu3 %v7032_v10  ;;  %v6871_v39 = vld [vmem:[%s7810_s7 + $0xe68] sm:$0xf]  ;;  %v6760_v46 = vor.u32 %v7527_v28, %v6759_v23  ;;  %v7491_v61 = vld [vmem:[%s7810_s7 + $0xc74] sm:$0xf0] }
 0x1ba   : > { %4427 = vmatpush.bf16.msrb.mxu2 %v6904_v51  ;;  %4391 = vmatpush.bf16.msrb.mxu0 %v6648_v24  ;;  %v6999_v54 = vld [vmem:[%s7810_s7 + $0xf68] sm:$0xf]  ;;  %v7523_v48 = vld [vmem:[%s7810_s7 + $0xd74] sm:$0xf0]  ;;  %v3967_v51 = vadd.f32 %v8742_v8, %v8684_v56  ;;  %v6872_v13 = vor.u32 %v7555_v20, %v6871_v39 }
 0x1bb   : > { %4409 = vmatpush.bf16.msrb.mxu1 %v6776_v5  ;;  %v6615_v52 = vld [vmem:[%s7810_s7 + $0xc68] sm:$0xf]  ;;  %v8870_v10 = vpop.f32.mrf.mxu1  ;;  %v7000_v29 = vor.u32 %v7587_v47, %v6999_v54  ;;  %v7551_v5 = vld [vmem:[%s7810_s7 + $0xe54] sm:$0xf0] }
 0x1bc   : > { %v6743_v60 = vld [vmem:[%s7810_s7 + $0xd68] sm:$0xf]  ;;  %v6616_v7 = vor.u32 %v7491_v61, %v6615_v52  ;;  %v7583_v21 = vld [vmem:[%s7810_s7 + $0xf54] sm:$0xf0] }
 0x1bd   : > { %4446 = vmatpush.bf16.msrb.mxu3 %v7016_v40  ;;  %v6855_v24 = vld [vmem:[%s7810_s7 + $0xe48] sm:$0xf]  ;;  %v6744_v62 = vor.u32 %v7523_v48, %v6743_v60  ;;  %v7487_v56 = vld [vmem:[%s7810_s7 + $0xc54] sm:$0xf0] }
 0x1be   : > { %4428 = vmatpush.bf16.msrb.mxu2 %v6888_v30  ;;  %4392 = vmatpush.bf16.msrb.mxu0 %v6632_v43  ;;  %v6983_v32 = vld [vmem:[%s7810_s7 + $0xf48] sm:$0xf]  ;;  %v7519_v28 = vld [vmem:[%s7810_s7 + $0xd54] sm:$0xf0]  ;;  %v3985_v30 = vadd.f32 %v8744_v6, %v3967_v51  ;;  %v6856_v40 = vor.u32 %v7551_v5, %v6855_v24  ;;  %v3969_v24 = vadd.f32 %v8770_v0, %v8703_v3 }
 0x1bf   : > { %4410 = vmatpush.bf16.msrb.mxu1 %v6760_v46  ;;  %v6599_v23 = vld [vmem:[%s7810_s7 + $0xc48] sm:$0xf]  ;;  %v6984_v39 = vor.u32 %v7583_v21, %v6983_v32  ;;  %v7547_v43 = vld [vmem:[%s7810_s7 + $0xe34] sm:$0xf0]  ;;  %v8883_v46 = vpop.f32.mrf.mxu2 }
 0x1c0   : > { %v6727_v8 = vld [vmem:[%s7810_s7 + $0xd48] sm:$0xf]  ;;  %v6600_v54 = vor.u32 %v7487_v56, %v6599_v23  ;;  %v7579_v61 = vld [vmem:[%s7810_s7 + $0xf34] sm:$0xf0]  ;;  %v4003_v60 = vadd.f32 %v8760_v27, %v3985_v30  ;;  %v8889_v48 = vpop.f32.mrf.mxu3  ;;  %v8896_v5 = vpop.f32.mrf.mxu0 }
 0x1c1   : > { %4447 = vmatpush.bf16.msrb.mxu3 %v7000_v29  ;;  %v6839_v20 = vld [vmem:[%s7810_s7 + $0xe28] sm:$0xf]  ;;  %v6728_v47 = vor.u32 %v7519_v28, %v6727_v8  ;;  %v7483_v51 = vld [vmem:[%s7810_s7 + $0xc34] sm:$0xf0] }
 0x1c2   : > { %4429 = vmatpush.bf16.msrb.mxu2 %v6872_v13  ;;  %4393 = vmatpush.bf16.msrb.mxu0 %v6616_v7  ;;  %v6967_v52 = vld [vmem:[%s7810_s7 + $0xf28] sm:$0xf]  ;;  %v7515_v29 = vld [vmem:[%s7810_s7 + $0xd34] sm:$0xf0]  ;;  %v6840_v27 = vor.u32 %v7547_v43, %v6839_v20  ;;  %v7185_v20 = vld [vmem:[%s7810_s7 + $0x2ec] sm:$0xf] }
 0x1c3   : > { %4411 = vmatpush.bf16.msrb.mxu1 %v6744_v62  ;;  %v6583_v6 = vld [vmem:[%s7810_s7 + $0xc28] sm:$0xf]  ;;  %v8899_v62 = vpop.f32.mrf.mxu1  ;;  %v6968_v32 = vor.u32 %v7579_v61, %v6967_v52  ;;  %v7543_v21 = vld [vmem:[%s7810_s7 + $0xe14] sm:$0xf0]  ;;  %4330 = vmatmul.bf16.gmra.mxu0 %v8146_v58  ;;  %v5401_v43 = vld [vmem:[%s7810_s7 + $0x2f8] sm:$0xf0] }
 0x1c4   : > { %v6711_v13 = vld [vmem:[%s7810_s7 + $0xd28] sm:$0xf]  ;;  %v7575_v56 = vld [vmem:[%s7810_s7 + $0xf14] sm:$0xf0]  ;;  %v6584_v3 = vor.u32 %v7483_v51, %v6583_v6  ;;  %v7217_v61 = vld [vmem:[%s7810_s7 + $0x3ec] sm:$0xf] }
 0x1c5   : > { %v6823_v7 = vld [vmem:[%s7810_s7 + $0xe08] sm:$0xf]  ;;  %4448 = vmatpush.bf16.msrb.mxu3 %v6984_v39  ;;  %v6712_v0 = vor.u32 %v7515_v29, %v6711_v13  ;;  %v7479_v28 = vld [vmem:[%s7810_s7 + $0xc14] sm:$0xf0]  ;;  %v5529_v6 = vld [vmem:[%s7810_s7 + $0x3f8] sm:$0xf0] }
 0x1c6   : > { %4430 = vmatpush.bf16.msrb.mxu2 %v6856_v40  ;;  %v6951_v23 = vld [vmem:[%s7810_s7 + $0xf08] sm:$0xf]  ;;  %4394 = vmatpush.bf16.msrb.mxu0 %v6600_v54  ;;  %v4021_v40 = vadd.f32 %v8765_v25, %v4003_v60  ;;  %v7511_v39 = vld [vmem:[%s7810_s7 + $0xd14] sm:$0xf0]  ;;  %v3987_v54 = vadd.f32 %v8772_v34, %v3969_v24  ;;  %v7121_v51 = vld [vmem:[%s7810_s7 + $0xec] sm:$0xf]  ;;  %v6824_v60 = vor.u32 %v7543_v21, %v6823_v7 }
 0x1c7   : > { %4412 = vmatpush.bf16.msrb.mxu1 %v6728_v47  ;;  %v6567_v8 = vld [vmem:[%s7810_s7 + $0xc08] sm:$0xf]  ;;  %v9422_v47 = vld [vmem:[#allocation18_spill] sm:$0xff]  ;;  %v9423_v52 = vld [vmem:[#allocation19_spill] sm:$0xff]  ;;  %v6952_v13 = vor.u32 %v7575_v56, %v6951_v23  ;;  %v8924_v24 = vpop.f32.mrf.mxu2  ;;  %v5532_v7 = vor.u32 %v7217_v61, %v5529_v6 }
 0x1c8   : > { %v6695_v30 = vld [vmem:[%s7810_s7 + $0xd08] sm:$0xf]  ;;  %4348 = vmatmul.bf16.gmra.mxu1 %v9422_v47  ;;  %4384 = vmatmul.bf16.gmra.mxu3 %v9423_v52  ;;  %v4039_v25 = vadd.f32 %v8838_v63, %v4021_v40  ;;  %v5145_v29 = vld [vmem:[%s7810_s7 + $0xf8] sm:$0xf0]  ;;  %v4005_v34 = vadd.f32 %v8784_v53, %v3987_v54  ;;  %v6568_v52 = vor.u32 %v7479_v28, %v6567_v8  ;;  %v7181_v21 = vld [vmem:[%s7810_s7 + $0x2cc] sm:$0xf]  ;;  %v4045_v56 = vpop.f32.mrf.mxu0 }
 0x1c9   : > { %4366 = vmatmul.bf16.gmra.mxu2 %v8148_v59  ;;  %4449 = vmatpush.bf16.msrb.mxu3 %v6968_v32  ;;  %v7153_v59 = vld [vmem:[%s7810_s7 + $0x1ec] sm:$0xf]  ;;  %v5273_v58 = vld [vmem:[%s7810_s7 + $0x1f8] sm:$0xf0]  ;;  %v6696_v63 = vor.u32 %v7511_v39, %v6695_v30  ;;  %v5404_v32 = vor.u32 %v7185_v20, %v5401_v43  ;;  %v3972_v53 = vadd.f32 %v8794_v1, %v8729_v55 }
 0x1ca   : > { %4431 = vmatpush.bf16.msrb.mxu2 %v6840_v27  ;;  %4395 = vmatpush.bf16.msrb.mxu0 %v6584_v3  ;;  %v8926_v27 = vpop.f32.mrf.mxu3  ;;  %v5385_v23 = vld [vmem:[%s7810_s7 + $0x2d8] sm:$0xf0]  ;;  %v5148_v40 = vor.u32 %v7121_v51, %v5145_v29  ;;  %v5276_v54 = vor.u32 %v7153_v59, %v5273_v58  ;;  %v7213_v47 = vld [vmem:[%s7810_s7 + $0x3cc] sm:$0xf]  ;;  %v4057_v8 = vadd.f32 %v8840_v22, %v4039_v25 }
 0x1cb   : > { %4413 = vmatpush.bf16.msrb.mxu1 %v6712_v0  ;;  %v5513_v3 = vld [vmem:[%s7810_s7 + $0x3d8] sm:$0xf0]  ;;  %v7117_v0 = vld [vmem:[%s7810_s7 + $0xcc] sm:$0xf]  ;;  %v4063_v28 = vpop.f32.mrf.mxu1  ;;  %v4023_v43 = vadd.f32 %v8789_v57, %v4005_v34  ;;  %v5388_v59 = vor.u32 %v7181_v21, %v5385_v23  ;;  %v3990_v1 = vadd.f32 %v8797_v16, %v3972_v53 }
 0x1cc   : > { %v5129_v30 = vld [vmem:[%s7810_s7 + $0xd8] sm:$0xf0]  ;;  %v7149_v39 = vld [vmem:[%s7810_s7 + $0x1cc] sm:$0xf]  ;;  %v4075_v58 = vadd.f32 %v8856_v35, %v4057_v8  ;;  %v5516_v55 = vor.u32 %v7213_v47, %v5513_v3 }
 0x1cd   : > { %4450 = vmatpush.bf16.msrb.mxu3 %v6952_v13  ;;  %v5257_v20 = vld [vmem:[%s7810_s7 + $0x1d8] sm:$0xf0]  ;;  %v5132_v22 = vor.u32 %v7117_v0, %v5129_v30  ;;  %v7177_v61 = vld [vmem:[%s7810_s7 + $0x2ac] sm:$0xf]  ;;  %v4008_v35 = vadd.f32 %v8818_v38, %v3990_v1 }
 0x1ce   : > { %4432 = vmatpush.bf16.msrb.mxu2 %v6824_v60  ;;  %4396 = vmatpush.bf16.msrb.mxu0 %v6568_v52  ;;  %v5260_v57 = vor.u32 %v7149_v39, %v5257_v20  ;;  %v4041_v52 = vadd.f32 %v8866_v33, %v4023_v43  ;;  %v5369_v6 = vld [vmem:[%s7810_s7 + $0x2b8] sm:$0xf0]  ;;  %v7209_v25 = vld [vmem:[%s7810_s7 + $0x3ac] sm:$0xf]  ;;  %v4093_v16 = vadd.f32 %v8861_v19, %v4075_v58 }
 0x1cf   : > { %4414 = vmatpush.bf16.msrb.mxu1 %v6696_v63  ;;  %v4081_v51 = vpop.f32.mrf.mxu2  ;;  %v5497_v60 = vld [vmem:[%s7810_s7 + $0x3b8] sm:$0xf0]  ;;  %v7113_v13 = vld [vmem:[%s7810_s7 + $0xac] sm:$0xf]  ;;  %v5372_v19 = vor.u32 %v7177_v61, %v5369_v6  ;;  %v4026_v56 = vadd.f32 %v8820_v26, %v4008_v35 }
 0x1d0   : > { %v5113_v29 = vld [vmem:[%s7810_s7 + $0xb8] sm:$0xf0]  ;;  %v7145_v34 = vld [vmem:[%s7810_s7 + $0x1ac] sm:$0xf]  ;;  %v4110_v63 = vpop.f32.mrf.mxu0  ;;  %v4059_v38 = vadd.f32 %v8870_v10, %v4041_v52  ;;  %v5500_v21 = vor.u32 %v7209_v25, %v5497_v60 }
 0x1d1   : > { %4515 = vmatpush.bf16.msra.mxu3 %v5532_v7  ;;  %v5241_v33 = vld [vmem:[%s7810_s7 + $0x1b8] sm:$0xf0]  ;;  %v7173_v23 = vld [vmem:[%s7810_s7 + $0x28c] sm:$0xf]  ;;  %v4044_v20 = vadd.f32 %v8896_v5, %v4026_v56 }
 0x1d2   : > { %4497 = vmatpush.bf16.msra.mxu2 %v5404_v32  ;;  %4461 = vmatpush.bf16.msra.mxu0 %v5148_v40  ;;  %v4099_v47 = vpop.f32.mrf.mxu3  ;;  %v4111_v32 = vadd.f32 %v4110_v63, %v4093_v16  ;;  %v5353_v53 = vld [vmem:[%s7810_s7 + $0x298] sm:$0xf0]  ;;  %v5116_v40 = vor.u32 %v7113_v13, %v5113_v29  ;;  %v7205_v3 = vld [vmem:[%s7810_s7 + $0x38c] sm:$0xf]  ;;  %v4077_v10 = vadd.f32 %v8883_v46, %v4059_v38  ;;  %v354_v16 = vld [vmem:[#allocation2] sm:$0xff] }
 0x1d3   : > { %4479 = vmatpush.bf16.msra.mxu1 %v5276_v54  ;;  %v4128_v7 = vpop.f32.mrf.mxu1  ;;  %v5244_v54 = vor.u32 %v7145_v34, %v5241_v33  ;;  %v5481_v0 = vld [vmem:[%s7810_s7 + $0x398] sm:$0xf0]  ;;  %v7109_v8 = vld [vmem:[%s7810_s7 + $0x8c] sm:$0xf]  ;;  %4397 = vmatmul.bf16.vlgmr.msrb.gmra.mxu0 %v8202_v36  ;;  %v5356_v46 = vor.u32 %v7173_v23, %v5353_v53  ;;  %v4062_v13 = vadd.f32 %v8899_v62, %v4044_v20 }
 0x1d4   : > { %v5097_v28 = vld [vmem:[%s7810_s7 + $0x98] sm:$0xf0]  ;;  %v7141_v30 = vld [vmem:[%s7810_s7 + $0x18c] sm:$0xf]  ;;  %v4129_v26 = vadd.f32 %v4128_v7, %v4111_v32  ;;  %v5484_v43 = vor.u32 %v7205_v3, %v5481_v0  ;;  %v4095_v61 = vadd.f32 %v8889_v48, %v4077_v10 }
 0x1d5   : > { %4516 = vmatpush.bf16.msra.mxu3 %v5516_v55  ;;  %v5225_v39 = vld [vmem:[%s7810_s7 + $0x198] sm:$0xf0]  ;;  %v7169_v58 = vld [vmem:[%s7810_s7 + $0x26c] sm:$0xf]  ;;  %v5100_v5 = vor.u32 %v7109_v8, %v5097_v28  ;;  %v4080_v53 = vadd.f32 %v8924_v24, %v4062_v13 }
 0x1d6   : > { %4498 = vmatpush.bf16.msra.mxu2 %v5388_v59  ;;  %4462 = vmatpush.bf16.msra.mxu0 %v5132_v22  ;;  %v5337_v59 = vld [vmem:[%s7810_s7 + $0x278] sm:$0xf0]  ;;  %v5228_v1 = vor.u32 %v7141_v30, %v5225_v39  ;;  %v7201_v22 = vld [vmem:[%s7810_s7 + $0x36c] sm:$0xf] }
 0x1d7   : > { %4480 = vmatpush.bf16.msra.mxu1 %v5260_v57  ;;  %v4146_v55 = vpop.f32.mrf.mxu2  ;;  %v5465_v57 = vld [vmem:[%s7810_s7 + $0x378] sm:$0xf0]  ;;  %v7105_v52 = vld [vmem:[%s7810_s7 + $0x6c] sm:$0xf]  ;;  %v5340_v29 = vor.u32 %v7169_v58, %v5337_v59  ;;  %v4098_v58 = vadd.f32 %v8926_v27, %v4080_v53 }
 0x1d8   : > { %4415 = vmatmul.bf16.vlgmr.msrb.gmra.mxu1 %v8209_v41  ;;  %4451 = vmatmul.bf16.vlgmr.msrb.gmra.mxu3 %v8211_v42  ;;  %v4147_v6 = vadd.f32 %v4146_v55, %v4129_v26  ;;  %v5081_v51 = vld [vmem:[%s7810_s7 + $0x78] sm:$0xf0]  ;;  %v7137_v25 = vld [vmem:[%s7810_s7 + $0x16c] sm:$0xf]  ;;  %v4112_v47 = vpop.f32.mrf.mxu0  ;;  %v5468_v48 = vor.u32 %v7201_v22, %v5465_v57  ;;  %v358_v57 = vld [vmem:[#allocation2 + $0x20] sm:$0xff] }
 0x1d9   : > { %4433 = vmatmul.bf16.vlgmr.msrb.gmra.mxu2 %v8204_v37  ;;  %4517 = vmatpush.bf16.msra.mxu3 %v5500_v21  ;;  %v5209_v60 = vld [vmem:[%s7810_s7 + $0x178] sm:$0xf0]  ;;  %v4113_v33 = vadd.f32 %v4112_v47, %v4095_v61  ;;  %v7165_v38 = vld [vmem:[%s7810_s7 + $0x24c] sm:$0xf]  ;;  %v5084_v62 = vor.u32 %v7105_v52, %v5081_v51 }
 0x1da   : > { %4499 = vmatpush.bf16.msra.mxu2 %v5372_v19  ;;  %4463 = vmatpush.bf16.msra.mxu0 %v5116_v40  ;;  %v4164_v35 = vpop.f32.mrf.mxu3  ;;  %v5321_v32 = vld [vmem:[%s7810_s7 + $0x258] sm:$0xf0]  ;;  %v5212_v7 = vor.u32 %v7137_v25, %v5209_v60  ;;  %v7197_v19 = vld [vmem:[%s7810_s7 + $0x34c] sm:$0xf] }
 0x1db   : > { %4481 = vmatpush.bf16.msra.mxu1 %v5244_v54  ;;  %v4165_v34 = vadd.f32 %v4164_v35, %v4147_v6  ;;  %v4130_v63 = vpop.f32.mrf.mxu1  ;;  %v5449_v21 = vld [vmem:[%s7810_s7 + $0x358] sm:$0xf0]  ;;  %v7101_v23 = vld [vmem:[%s7810_s7 + $0x4c] sm:$0xf]  ;;  %v5324_v8 = vor.u32 %v7165_v38, %v5321_v32 }
 0x1dc   : > { %v5065_v40 = vld [vmem:[%s7810_s7 + $0x58] sm:$0xf0]  ;;  %v7133_v54 = vld [vmem:[%s7810_s7 + $0x14c] sm:$0xf]  ;;  %v4131_v0 = vadd.f32 %v4130_v63, %v4113_v33  ;;  %v5452_v10 = vor.u32 %v7197_v19, %v5449_v21 }
 0x1dd   : > { %4518 = vmatpush.bf16.msra.mxu3 %v5484_v43  ;;  %v4750_v56 = vadd.f32 %v4165_v34, %v354_v16  ;;  %v5193_v3 = vld [vmem:[%s7810_s7 + $0x158] sm:$0xf0]  ;;  %v7161_v28 = vld [vmem:[%s7810_s7 + $0x22c] sm:$0xf]  ;;  %v5068_v24 = vor.u32 %v7101_v23, %v5065_v40 }
 0x1de   : > { %4500 = vmatpush.bf16.msra.mxu2 %v5356_v46  ;;  %4464 = vmatpush.bf16.msra.mxu0 %v5100_v5  ;;  %v5305_v30 = vld [vmem:[%s7810_s7 + $0x238] sm:$0xf0]  ;;  %v5196_v20 = vor.u32 %v7133_v54, %v5193_v3  ;;  %v7193_v26 = vld [vmem:[%s7810_s7 + $0x32c] sm:$0xf] }
 0x1df   : > { %4482 = vmatpush.bf16.msra.mxu1 %v5228_v1  ;;  %4762 = vst [vmem:[#allocation2] sm:$0xff] %v4750_v56  ;;  %v4148_v39 = vpop.f32.mrf.mxu2  ;;  %v5433_v46 = vld [vmem:[%s7810_s7 + $0x338] sm:$0xf0]  ;;  %v7097_v43 = vld [vmem:[%s7810_s7 + $0x2c] sm:$0xf]  ;;  %v5308_v61 = vor.u32 %v7161_v28, %v5305_v30 }
 0x1e0   : > { %v4149_v59 = vadd.f32 %v4148_v39, %v4131_v0  ;;  %v5049_v5 = vld [vmem:[%s7810_s7 + $0x38] sm:$0xf0]  ;;  %v7129_v1 = vld [vmem:[%s7810_s7 + $0x12c] sm:$0xf]  ;;  %v4115_v52 = vpop.f32.mrf.mxu0  ;;  %v5436_v27 = vor.u32 %v7193_v26, %v5433_v46 }
 0x1e1   : > { %4519 = vmatpush.bf16.msra.mxu3 %v5468_v48  ;;  %v5177_v22 = vld [vmem:[%s7810_s7 + $0x138] sm:$0xf0]  ;;  %v7157_v6 = vld [vmem:[%s7810_s7 + $0x20c] sm:$0xf]  ;;  %v4116_v25 = vadd.f32 %v4115_v52, %v4098_v58 }
 0x1e2   : > { %4501 = vmatpush.bf16.msra.mxu2 %v5340_v29  ;;  %4465 = vmatpush.bf16.msra.mxu0 %v5084_v62  ;;  %v4166_v55 = vpop.f32.mrf.mxu3  ;;  %v5289_v35 = vld [vmem:[%s7810_s7 + $0x218] sm:$0xf0]  ;;  %v7189_v13 = vld [vmem:[%s7810_s7 + $0x30c] sm:$0xf]  ;;  %v5052_v29 = vor.u32 %v7097_v43, %v5049_v5  ;;  %v5180_v34 = vor.u32 %v7129_v1, %v5177_v22 }
 0x1e3   : > { %4483 = vmatpush.bf16.msra.mxu1 %v5212_v7  ;;  %v4167_v51 = vadd.f32 %v4166_v55, %v4149_v59  ;;  %v4133_v60 = vpop.f32.mrf.mxu1  ;;  %v5417_v16 = vld [vmem:[%s7810_s7 + $0x318] sm:$0xf0]  ;;  %v7093_v47 = vld [vmem:[%s7810_s7 + $0xc] sm:$0xf]  ;;  %4402 = vmatmul.bf16.gmra.mxu0 %v8248_v2  ;;  %v5292_v56 = vor.u32 %v7157_v6, %v5289_v35 }
 0x1e4   : > { %v5033_v33 = vld [vmem:[%s7810_s7 + $0x18] sm:$0xf0]  ;;  %v7125_v63 = vld [vmem:[%s7810_s7 + $0x10c] sm:$0xf]  ;;  %v4134_v53 = vadd.f32 %v4133_v60, %v4116_v25  ;;  %v5420_v40 = vor.u32 %v7189_v13, %v5417_v16 }
 0x1e5   : > { %4520 = vmatpush.bf16.msra.mxu3 %v5452_v10  ;;  %v5161_v48 = vld [vmem:[%s7810_s7 + $0x118] sm:$0xf0]  ;;  %v4754_v38 = vadd.f32 %v4167_v51, %v358_v57  ;;  %v7313_v32 = vld [vmem:[%s7810_s7 + $0x6ec] sm:$0xf] }
 0x1e6   : > { %4502 = vmatpush.bf16.msra.mxu2 %v5324_v8  ;;  %4466 = vmatpush.bf16.msra.mxu0 %v5068_v24  ;;  %v5913_v62 = vld [vmem:[%s7810_s7 + $0x6f8] sm:$0xf0]  ;;  %v7345_v7 = vld [vmem:[%s7810_s7 + $0x7ec] sm:$0xf]  ;;  %v5036_v8 = vor.u32 %v7093_v47, %v5033_v33  ;;  %v5164_v10 = vor.u32 %v7125_v63, %v5161_v48 }
 0x1e7   : > { %4484 = vmatpush.bf16.msra.mxu1 %v5196_v20  ;;  %v6041_v19 = vld [vmem:[%s7810_s7 + $0x7f8] sm:$0xf0]  ;;  %v7249_v21 = vld [vmem:[%s7810_s7 + $0x4ec] sm:$0xf]  ;;  %4766 = vst [vmem:[#allocation2 + $0x20] sm:$0xff] %v4754_v38  ;;  %v4151_v0 = vpop.f32.mrf.mxu2  ;;  %v5916_v24 = vor.u32 %v7313_v32, %v5913_v62 }
 0x1e8   : > { %4420 = vmatmul.bf16.gmra.mxu1 %v8255_v11  ;;  %4456 = vmatmul.bf16.gmra.mxu3 %v8257_v12  ;;  %v5657_v23 = vld [vmem:[%s7810_s7 + $0x4f8] sm:$0xf0]  ;;  %v7281_v54 = vld [vmem:[%s7810_s7 + $0x5ec] sm:$0xf]  ;;  %v4152_v28 = vadd.f32 %v4151_v0, %v4134_v53  ;;  %v6044_v20 = vor.u32 %v7345_v7, %v6041_v19  ;;  %v4117_v43 = vpop.f32.mrf.mxu0 }
 0x1e9   : > { %4438 = vmatmul.bf16.gmra.mxu2 %v8250_v4  ;;  %4521 = vmatpush.bf16.msra.mxu3 %v5436_v27  ;;  %v5785_v3 = vld [vmem:[%s7810_s7 + $0x5f8] sm:$0xf0]  ;;  %v362_v30 = vld [vmem:[#allocation2 + $0x48] sm:$0xff]  ;;  %v5660_v58 = vor.u32 %v7249_v21, %v5657_v23 }
 0x1ea   : > { %4503 = vmatpush.bf16.msra.mxu2 %v5308_v61  ;;  %4467 = vmatpush.bf16.msra.mxu0 %v5052_v29  ;;  %v4169_v39 = vpop.f32.mrf.mxu3  ;;  %v7309_v26 = vld [vmem:[%s7810_s7 + $0x6cc] sm:$0xf]  ;;  %v5897_v46 = vld [vmem:[%s7810_s7 + $0x6d8] sm:$0xf0]  ;;  %v5788_v59 = vor.u32 %v7281_v54, %v5785_v3 }
 0x1eb   : > { %4485 = vmatpush.bf16.msra.mxu1 %v5180_v34  ;;  %v7341_v55 = vld [vmem:[%s7810_s7 + $0x7cc] sm:$0xf]  ;;  %v6025_v5 = vld [vmem:[%s7810_s7 + $0x7d8] sm:$0xf0]  ;;  %v4170_v22 = vadd.f32 %v4169_v39, %v4152_v28  ;;  %v4135_v57 = vpop.f32.mrf.mxu1  ;;  %v5900_v51 = vor.u32 %v7309_v26, %v5897_v46 }
 0x1ec   : > { %v7245_v1 = vld [vmem:[%s7810_s7 + $0x4cc] sm:$0xf]  ;;  %v5641_v52 = vld [vmem:[%s7810_s7 + $0x4d8] sm:$0xf0]  ;;  %v6028_v25 = vor.u32 %v7341_v55, %v6025_v5 }
 0x1ed   : > { %4522 = vmatpush.bf16.msra.mxu3 %v5420_v40  ;;  %v7277_v61 = vld [vmem:[%s7810_s7 + $0x5cc] sm:$0xf]  ;;  %v5769_v6 = vld [vmem:[%s7810_s7 + $0x5d8] sm:$0xf0]  ;;  %v4758_v35 = vadd.f32 %v4170_v22, %v362_v30  ;;  %v5644_v60 = vor.u32 %v7245_v1, %v5641_v52 }
 0x1ee   : > { %4504 = vmatpush.bf16.msra.mxu2 %v5292_v56  ;;  %4468 = vmatpush.bf16.msra.mxu0 %v5036_v8  ;;  %v5772_v27 = vor.u32 %v7277_v61, %v5769_v6  ;;  %v7305_v13 = vld [vmem:[%s7810_s7 + $0x6ac] sm:$0xf]  ;;  %v5881_v16 = vld [vmem:[%s7810_s7 + $0x6b8] sm:$0xf0] }
 0x1ef   : > { %4486 = vmatpush.bf16.msra.mxu1 %v5164_v10  ;;  %4770 = vst [vmem:[#allocation2 + $0x48] sm:$0xff] %v4758_v35  ;;  %v4153_v47 = vpop.f32.mrf.mxu2  ;;  %v7337_v29 = vld [vmem:[%s7810_s7 + $0x7ac] sm:$0xf]  ;;  %v6009_v34 = vld [vmem:[%s7810_s7 + $0x7b8] sm:$0xf0]  ;;  %v5884_v19 = vor.u32 %v7305_v13, %v5881_v16 }
 0x1f0   : > { %v7241_v33 = vld [vmem:[%s7810_s7 + $0x4ac] sm:$0xf]  ;;  %v5625_v48 = vld [vmem:[%s7810_s7 + $0x4b8] sm:$0xf0]  ;;  %v4182_v62 = vpop.f32.mrf.mxu0  ;;  %v6012_v21 = vor.u32 %v7337_v29, %v6009_v34 }
 0x1f1   : > { %4587 = vmatpush.bf16.msrb.mxu3 %v6044_v20  ;;  %v7273_v38 = vld [vmem:[%s7810_s7 + $0x5ac] sm:$0xf]  ;;  %v5753_v32 = vld [vmem:[%s7810_s7 + $0x5b8] sm:$0xf0]  ;;  %v5628_v40 = vor.u32 %v7241_v33, %v5625_v48 }
 0x1f2   : > { %4569 = vmatpush.bf16.msrb.mxu2 %v5916_v24  ;;  %4533 = vmatpush.bf16.msrb.mxu0 %v5660_v58  ;;  %v4171_v63 = vpop.f32.mrf.mxu3  ;;  %v7301_v23 = vld [vmem:[%s7810_s7 + $0x68c] sm:$0xf]  ;;  %v5865_v53 = vld [vmem:[%s7810_s7 + $0x698] sm:$0xf0]  ;;  %v5756_v54 = vor.u32 %v7273_v38, %v5753_v32 }
 0x1f3   : > { %4551 = vmatpush.bf16.msrb.mxu1 %v5788_v59  ;;  %v4200_v7 = vpop.f32.mrf.mxu1  ;;  %v7333_v3 = vld [vmem:[%s7810_s7 + $0x78c] sm:$0xf]  ;;  %v5993_v0 = vld [vmem:[%s7810_s7 + $0x798] sm:$0xf0]  ;;  %4469 = vmatmul.bf16.vlgmr.msra.gmra.mxu0 %v7894_v9  ;;  %v5868_v39 = vor.u32 %v7301_v23, %v5865_v53 }
 0x1f4   : > { %v4201_v56 = vadd.f32 %v4200_v7, %v4182_v62  ;;  %v7237_v8 = vld [vmem:[%s7810_s7 + $0x48c] sm:$0xf]  ;;  %v5609_v10 = vld [vmem:[%s7810_s7 + $0x498] sm:$0xf0]  ;;  %v5996_v24 = vor.u32 %v7333_v3, %v5993_v0 }
 0x1f5   : > { %4588 = vmatpush.bf16.msrb.mxu3 %v6028_v25  ;;  %v7269_v28 = vld [vmem:[%s7810_s7 + $0x58c] sm:$0xf]  ;;  %v5737_v30 = vld [vmem:[%s7810_s7 + $0x598] sm:$0xf0]  ;;  %v5612_v26 = vor.u32 %v7237_v8, %v5609_v10 }
 0x1f6   : > { %4570 = vmatpush.bf16.msrb.mxu2 %v5900_v51  ;;  %4534 = vmatpush.bf16.msrb.mxu0 %v5644_v60  ;;  %v7297_v9 = vld [vmem:[%s7810_s7 + $0x66c] sm:$0xf]  ;;  %v5849_v20 = vld [vmem:[%s7810_s7 + $0x678] sm:$0xf0]  ;;  %v5740_v46 = vor.u32 %v7269_v28, %v5737_v30 }
 0x1f7   : > { %4552 = vmatpush.bf16.msrb.mxu1 %v5772_v27  ;;  %v7329_v43 = vld [vmem:[%s7810_s7 + $0x76c] sm:$0xf]  ;;  %v5593_v55 = vld [vmem:[%s7810_s7 + $0x478] sm:$0xf0]  ;;  %v5852_v61 = vor.u32 %v7297_v9, %v5849_v20 }
 0x1f8   : > { %4487 = vmatmul.bf16.vlgmr.msra.gmra.mxu1 %v7899_v14  ;;  %4523 = vmatmul.bf16.vlgmr.msra.gmra.mxu3 %v7905_v18  ;;  %v5977_v14 = vld [vmem:[%s7810_s7 + $0x778] sm:$0xf0]  ;;  %v7233_v58 = vld [vmem:[%s7810_s7 + $0x46c] sm:$0xf]  ;;  %v4184_v22 = vpop.f32.mrf.mxu0 }
 0x1f9   : > { %4505 = vmatmul.bf16.vlgmr.msra.gmra.mxu2 %v7901_v15  ;;  %4589 = vmatpush.bf16.msrb.mxu3 %v6012_v21  ;;  %v4218_v15 = vpop.f32.mrf.mxu2  ;;  %v7265_v5 = vld [vmem:[%s7810_s7 + $0x56c] sm:$0xf]  ;;  %v5721_v1 = vld [vmem:[%s7810_s7 + $0x578] sm:$0xf0]  ;;  %v5980_v6 = vor.u32 %v7329_v43, %v5977_v14  ;;  %v5596_v60 = vor.u32 %v7233_v58, %v5593_v55 }
 0x1fa   : > { %4571 = vmatpush.bf16.msrb.mxu2 %v5884_v19  ;;  %4535 = vmatpush.bf16.msrb.mxu0 %v5628_v40  ;;  %v4219_v18 = vadd.f32 %v4218_v15, %v4201_v56  ;;  %v4236_v59 = vpop.f32.mrf.mxu3  ;;  %v7293_v35 = vld [vmem:[%s7810_s7 + $0x64c] sm:$0xf]  ;;  %v5833_v51 = vld [vmem:[%s7810_s7 + $0x658] sm:$0xf0]  ;;  %v5724_v27 = vor.u32 %v7265_v5, %v5721_v1 }
 0x1fb   : > { %4553 = vmatpush.bf16.msrb.mxu1 %v5756_v54  ;;  %v4202_v52 = vpop.f32.mrf.mxu1  ;;  %v7325_v13 = vld [vmem:[%s7810_s7 + $0x74c] sm:$0xf]  ;;  %v5961_v16 = vld [vmem:[%s7810_s7 + $0x758] sm:$0xf0]  ;;  %v5836_v63 = vor.u32 %v7293_v35, %v5833_v51 }
 0x1fc   : > { %v9053_v57 = vadd.f32 %v4236_v59, %v4219_v18  ;;  %v4203_v25 = vadd.f32 %v4202_v52, %v4184_v22  ;;  %v7229_v47 = vld [vmem:[%s7810_s7 + $0x44c] sm:$0xf]  ;;  %v5577_v29 = vld [vmem:[%s7810_s7 + $0x458] sm:$0xf0]  ;;  %v5964_v48 = vor.u32 %v7325_v13, %v5961_v16 }
 0x1fd   : > { %4590 = vmatpush.bf16.msrb.mxu3 %v5996_v24  ;;  %v7261_v34 = vld [vmem:[%s7810_s7 + $0x54c] sm:$0xf]  ;;  %v5705_v33 = vld [vmem:[%s7810_s7 + $0x558] sm:$0xf0]  ;;  %v5580_v7 = vor.u32 %v7229_v47, %v5577_v29 }
 0x1fe   : > { %4572 = vmatpush.bf16.msrb.mxu2 %v5868_v39  ;;  %4536 = vmatpush.bf16.msrb.mxu0 %v5612_v26  ;;  %v7289_v38 = vld [vmem:[%s7810_s7 + $0x62c] sm:$0xf]  ;;  %v5817_v32 = vld [vmem:[%s7810_s7 + $0x638] sm:$0xf0]  ;;  %v5708_v19 = vor.u32 %v7261_v34, %v5705_v33 }
 0x1ff   : > { %4554 = vmatpush.bf16.msrb.mxu1 %v5740_v46  ;;  %v7321_v21 = vld [vmem:[%s7810_s7 + $0x72c] sm:$0xf]  ;;  %v5945_v23 = vld [vmem:[%s7810_s7 + $0x738] sm:$0xf0]  ;;  %v5820_v39 = vor.u32 %v7289_v38, %v5817_v32 }
 0x200   : > { %v7225_v53 = vld [vmem:[%s7810_s7 + $0x42c] sm:$0xf]  ;;  %v5561_v54 = vld [vmem:[%s7810_s7 + $0x438] sm:$0xf0]  ;;  %v4187_v8 = vpop.f32.mrf.mxu0  ;;  %v5948_v24 = vor.u32 %v7321_v21, %v5945_v23 }
 0x201   : > { %4591 = vmatpush.bf16.msrb.mxu3 %v5980_v6  ;;  %v4220_v62 = vpop.f32.mrf.mxu2  ;;  %v7257_v3 = vld [vmem:[%s7810_s7 + $0x52c] sm:$0xf]  ;;  %v5689_v0 = vld [vmem:[%s7810_s7 + $0x538] sm:$0xf0]  ;;  %v5564_v46 = vor.u32 %v7225_v53, %v5561_v54 }
 0x202   : > { %4573 = vmatpush.bf16.msrb.mxu2 %v5852_v61  ;;  %4537 = vmatpush.bf16.msrb.mxu0 %v5596_v60  ;;  %v4221_v56 = vadd.f32 %v4220_v62, %v4203_v25  ;;  %v4238_v40 = vpop.f32.mrf.mxu3  ;;  %v7285_v10 = vld [vmem:[%s7810_s7 + $0x60c] sm:$0xf]  ;;  %v5801_v9 = vld [vmem:[%s7810_s7 + $0x618] sm:$0xf0]  ;;  %v5692_v43 = vor.u32 %v7257_v3, %v5689_v0 }
 0x203   : > { %4555 = vmatpush.bf16.msrb.mxu1 %v5724_v27  ;;  %v7317_v20 = vld [vmem:[%s7810_s7 + $0x70c] sm:$0xf]  ;;  %v5929_v15 = vld [vmem:[%s7810_s7 + $0x718] sm:$0xf0]  ;;  %4474 = vmatmul.bf16.gmra.mxu0 %v9410_v17  ;;  %v5804_v35 = vor.u32 %v7285_v10, %v5801_v9 }
 0x204   : > { %v9072_v28 = vadd.f32 %v4238_v40, %v4221_v56  ;;  %v7221_v14 = vld [vmem:[%s7810_s7 + $0x40c] sm:$0xf]  ;;  %v5545_v58 = vld [vmem:[%s7810_s7 + $0x418] sm:$0xf0]  ;;  %v5932_v51 = vor.u32 %v7317_v20, %v5929_v15 }
 0x205   : > { %v4205_v30 = vpop.f32.mrf.mxu1  ;;  %4592 = vmatpush.bf16.msrb.mxu3 %v5964_v48  ;;  %v7253_v18 = vld [vmem:[%s7810_s7 + $0x50c] sm:$0xf]  ;;  %v5673_v59 = vld [vmem:[%s7810_s7 + $0x518] sm:$0xf0]  ;;  %v5548_v27 = vor.u32 %v7221_v14, %v5545_v58 }
 0x206   : > { %4574 = vmatpush.bf16.msrb.mxu2 %v5836_v63  ;;  %v4206_v26 = vadd.f32 %v4205_v30, %v4187_v8  ;;  %4538 = vmatpush.bf16.msrb.mxu0 %v5580_v7  ;;  %v7441_v55 = vld [vmem:[%s7810_s7 + $0xaec] sm:$0xf]  ;;  %v6425_v5 = vld [vmem:[%s7810_s7 + $0xaf8] sm:$0xf0]  ;;  %v5676_v13 = vor.u32 %v7253_v18, %v5673_v59 }
 0x207   : > { %4556 = vmatpush.bf16.msrb.mxu1 %v5708_v19  ;;  %v9424_v1 = vld [vmem:[#allocation5_spill] sm:$0xff]  ;;  %v9425_v22 = vld [vmem:[#allocation7_spill] sm:$0xff]  ;;  %v6428_v29 = vor.u32 %v7441_v55, %v6425_v5 }
 0x208   : > { %4492 = vmatmul.bf16.gmra.mxu1 %v9424_v1  ;;  %4528 = vmatmul.bf16.gmra.mxu3 %v9425_v22  ;;  %v7473_v52 = vld [vmem:[%s7810_s7 + $0xbec] sm:$0xf]  ;;  %v6553_v61 = vld [vmem:[%s7810_s7 + $0xbf8] sm:$0xf0]  ;;  %v4189_v48 = vpop.f32.mrf.mxu0 }
 0x209   : > { %4510 = vmatmul.bf16.gmra.mxu2 %v9411_v31  ;;  %v7377_v6 = vld [vmem:[%s7810_s7 + $0x8ec] sm:$0xf]  ;;  %4593 = vmatpush.bf16.msrb.mxu3 %v5948_v24  ;;  %v6169_v17 = vld [vmem:[%s7810_s7 + $0x8f8] sm:$0xf0]  ;;  %v4223_v60 = vpop.f32.mrf.mxu2  ;;  %v6556_v34 = vor.u32 %v7473_v52, %v6553_v61 }
 0x20a   : > { %4575 = vmatpush.bf16.msrb.mxu2 %v5820_v39  ;;  %v7409_v25 = vld [vmem:[%s7810_s7 + $0x9ec] sm:$0xf]  ;;  %v6297_v31 = vld [vmem:[%s7810_s7 + $0x9f8] sm:$0xf0]  ;;  %4539 = vmatpush.bf16.msrb.mxu0 %v5564_v46  ;;  %v4224_v16 = vadd.f32 %v4223_v60, %v4206_v26  ;;  %v4241_v47 = vpop.f32.mrf.mxu3  ;;  %v6172_v38 = vor.u32 %v7377_v6, %v6169_v17  ;;  %v9428_v60 = vld [vmem:[#allocation10_spill] sm:$0xff] }
 0x20b   : > { %4557 = vmatpush.bf16.msrb.mxu1 %v5692_v43  ;;  %v7437_v33 = vld [vmem:[%s7810_s7 + $0xacc] sm:$0xf]  ;;  %v6409_v63 = vld [vmem:[%s7810_s7 + $0xad8] sm:$0xf0]  ;;  %v6300_v32 = vor.u32 %v7409_v25, %v6297_v31 }
 0x20c   : > { %v7469_v62 = vld [vmem:[%s7810_s7 + $0xbcc] sm:$0xf]  ;;  %v6537_v7 = vld [vmem:[%s7810_s7 + $0xbd8] sm:$0xf0]  ;;  %v9098_v21 = vadd.f32 %v4241_v47, %v4224_v16  ;;  %v6412_v54 = vor.u32 %v7437_v33, %v6409_v63 }
 0x20d   : > { %v7373_v19 = vld [vmem:[%s7810_s7 + $0x8cc] sm:$0xf]  ;;  %v4207_v23 = vpop.f32.mrf.mxu1  ;;  %4594 = vmatpush.bf16.msrb.mxu3 %v5932_v51  ;;  %v6153_v53 = vld [vmem:[%s7810_s7 + $0x8d8] sm:$0xf0]  ;;  %v6540_v3 = vor.u32 %v7469_v62, %v6537_v7 }
 0x20e   : > { %4576 = vmatpush.bf16.msrb.mxu2 %v5804_v35  ;;  %v7405_v56 = vld [vmem:[%s7810_s7 + $0x9cc] sm:$0xf]  ;;  %v6281_v40 = vld [vmem:[%s7810_s7 + $0x9d8] sm:$0xf0]  ;;  %4540 = vmatpush.bf16.msrb.mxu0 %v5548_v27  ;;  %v6156_v0 = vor.u32 %v7373_v19, %v6153_v53  ;;  %v9426_v35 = vld [vmem:[#allocation8_spill] sm:$0xff] }
 0x20f   : > { %4558 = vmatpush.bf16.msrb.mxu1 %v5676_v13  ;;  %v6284_v8 = vor.u32 %v7405_v56, %v6281_v40  ;;  %v7433_v10 = vld [vmem:[%s7810_s7 + $0xaac] sm:$0xf]  ;;  %v6393_v30 = vld [vmem:[%s7810_s7 + $0xab8] sm:$0xf0] }
 0x210   : > { %v7465_v24 = vld [vmem:[%s7810_s7 + $0xbac] sm:$0xf]  ;;  %v6521_v9 = vld [vmem:[%s7810_s7 + $0xbb8] sm:$0xf0]  ;;  %v9111_v14 = vpop.f32.mrf.mxu0  ;;  %v6396_v18 = vor.u32 %v7433_v10, %v6393_v30 }
 0x211   : > { %4659 = vmatpush.bf16.msra.mxu3 %v6556_v34  ;;  %v4225_v39 = vpop.f32.mrf.mxu2  ;;  %v7369_v20 = vld [vmem:[%s7810_s7 + $0x8ac] sm:$0xf]  ;;  %v6137_v26 = vld [vmem:[%s7810_s7 + $0x8b8] sm:$0xf0]  ;;  %v6524_v59 = vor.u32 %v7465_v24, %v6521_v9 }
 0x212   : > { %4641 = vmatpush.bf16.msra.mxu2 %v6428_v29  ;;  %4605 = vmatpush.bf16.msra.mxu0 %v6172_v38  ;;  %v4243_v15 = vpop.f32.mrf.mxu3  ;;  %v7401_v46 = vld [vmem:[%s7810_s7 + $0x9ac] sm:$0xf]  ;;  %v6265_v43 = vld [vmem:[%s7810_s7 + $0x9b8] sm:$0xf0]  ;;  %v6140_v1 = vor.u32 %v7369_v20, %v6137_v26 }
 0x213   : > { %4623 = vmatpush.bf16.msra.mxu1 %v6300_v32  ;;  %v7429_v55 = vld [vmem:[%s7810_s7 + $0xa8c] sm:$0xf]  ;;  %v6377_v5 = vld [vmem:[%s7810_s7 + $0xa98] sm:$0xf0]  ;;  %v6268_v22 = vor.u32 %v7401_v46, %v6265_v43  ;;  %4541 = vmatmul.bf16.vlgmr.msrb.gmra.mxu0 %v9426_v35 }
 0x214   : > { %v7461_v52 = vld [vmem:[%s7810_s7 + $0xb8c] sm:$0xf]  ;;  %v6505_v61 = vld [vmem:[%s7810_s7 + $0xb98] sm:$0xf0]  ;;  %v6380_v13 = vor.u32 %v7429_v55, %v6377_v5 }
 0x215   : > { %4660 = vmatpush.bf16.msra.mxu3 %v6540_v3  ;;  %v9113_v58 = vpop.f32.mrf.mxu1  ;;  %v7365_v6 = vld [vmem:[%s7810_s7 + $0x88c] sm:$0xf]  ;;  %v6121_v17 = vld [vmem:[%s7810_s7 + $0x898] sm:$0xf0]  ;;  %v6508_v16 = vor.u32 %v7461_v52, %v6505_v61 }
 0x216   : > { %4642 = vmatpush.bf16.msra.mxu2 %v6412_v54  ;;  %4606 = vmatpush.bf16.msra.mxu0 %v6156_v0  ;;  %v9427_v51 = vld [vmem:[#allocation9_spill] sm:$0xff]  ;;  %v6249_v31 = vld [vmem:[%s7810_s7 + $0x998] sm:$0xf0]  ;;  %v6124_v33 = vor.u32 %v7365_v6, %v6121_v17 }
 0x217   : > { %4624 = vmatpush.bf16.msra.mxu1 %v6284_v8  ;;  %v7397_v25 = vld [vmem:[%s7810_s7 + $0x98c] sm:$0xf]  ;;  %v9429_v27 = vld [vmem:[#allocation11_spill] sm:$0xff] }
 0x218   : > { %4559 = vmatmul.bf16.vlgmr.msrb.gmra.mxu1 %v9428_v60  ;;  %4595 = vmatmul.bf16.vlgmr.msrb.gmra.mxu3 %v9429_v27  ;;  %v7425_v47 = vld [vmem:[%s7810_s7 + $0xa6c] sm:$0xf]  ;;  %v6361_v29 = vld [vmem:[%s7810_s7 + $0xa78] sm:$0xf0]  ;;  %v6252_v63 = vor.u32 %v7397_v25, %v6249_v31  ;;  %v9139_v53 = vpop.f32.mrf.mxu0 }
 0x219   : > { %4577 = vmatmul.bf16.vlgmr.msrb.gmra.mxu2 %v9427_v51  ;;  %4661 = vmatpush.bf16.msra.mxu3 %v6524_v59  ;;  %v7457_v48 = vld [vmem:[%s7810_s7 + $0xb6c] sm:$0xf]  ;;  %v6489_v38 = vld [vmem:[%s7810_s7 + $0xb78] sm:$0xf0]  ;;  %v6364_v40 = vor.u32 %v7425_v47, %v6361_v29 }
 0x21a   : > { %4643 = vmatpush.bf16.msra.mxu2 %v6396_v18  ;;  %v9129_v34 = vpop.f32.mrf.mxu2  ;;  %4607 = vmatpush.bf16.msra.mxu0 %v6140_v1  ;;  %v7361_v32 = vld [vmem:[%s7810_s7 + $0x86c] sm:$0xf]  ;;  %v9134_v62 = vpop.f32.mrf.mxu3  ;;  %v6105_v7 = vld [vmem:[%s7810_s7 + $0x878] sm:$0xf0]  ;;  %v6492_v54 = vor.u32 %v7457_v48, %v6489_v38 }
 0x21b   : > { %4625 = vmatpush.bf16.msra.mxu1 %v6268_v22  ;;  %v7393_v19 = vld [vmem:[%s7810_s7 + $0x96c] sm:$0xf]  ;;  %v6233_v23 = vld [vmem:[%s7810_s7 + $0x978] sm:$0xf0]  ;;  %v6108_v8 = vor.u32 %v7361_v32, %v6105_v7  ;;  %v9430_v32 = vld [vmem:[#allocation12_spill] sm:$0xff] }
 0x21c   : > { %v7421_v3 = vld [vmem:[%s7810_s7 + $0xa4c] sm:$0xf]  ;;  %v6345_v0 = vld [vmem:[%s7810_s7 + $0xa58] sm:$0xf0]  ;;  %v6236_v10 = vor.u32 %v7393_v19, %v6233_v23 }
 0x21d   : > { %v9141_v56 = vpop.f32.mrf.mxu1  ;;  %4662 = vmatpush.bf16.msra.mxu3 %v6508_v16  ;;  %v7453_v30 = vld [vmem:[%s7810_s7 + $0xb4c] sm:$0xf]  ;;  %v6473_v39 = vld [vmem:[%s7810_s7 + $0xb58] sm:$0xf0]  ;;  %v6348_v26 = vor.u32 %v7421_v3, %v6345_v0 }
 0x21e   : > { %4644 = vmatpush.bf16.msra.mxu2 %v6380_v13  ;;  %4608 = vmatpush.bf16.msra.mxu0 %v6124_v33  ;;  %v7357_v24 = vld [vmem:[%s7810_s7 + $0x84c] sm:$0xf]  ;;  %v6089_v9 = vld [vmem:[%s7810_s7 + $0x858] sm:$0xf0]  ;;  %v6476_v46 = vor.u32 %v7453_v30, %v6473_v39 }
 0x21f   : > { %4626 = vmatpush.bf16.msra.mxu1 %v6252_v63  ;;  %v7389_v20 = vld [vmem:[%s7810_s7 + $0x94c] sm:$0xf]  ;;  %v6217_v15 = vld [vmem:[%s7810_s7 + $0x958] sm:$0xf0]  ;;  %v6092_v55 = vor.u32 %v7357_v24, %v6089_v9 }
 0x220   : > { %v7417_v43 = vld [vmem:[%s7810_s7 + $0xa2c] sm:$0xf]  ;;  %v6329_v18 = vld [vmem:[%s7810_s7 + $0xa38] sm:$0xf0]  ;;  %v6220_v5 = vor.u32 %v7389_v20, %v6217_v15  ;;  %v9163_v17 = vpop.f32.mrf.mxu0 }
 0x221   : > { %4663 = vmatpush.bf16.msra.mxu3 %v6492_v54  ;;  %v7449_v1 = vld [vmem:[%s7810_s7 + $0xb2c] sm:$0xf]  ;;  %v6457_v22 = vld [vmem:[%s7810_s7 + $0xb38] sm:$0xf0]  ;;  %v6332_v60 = vor.u32 %v7417_v43, %v6329_v18  ;;  %v9432_v54 = vld [vmem:[#allocation14_spill] sm:$0xff] }
 0x222   : > { %4645 = vmatpush.bf16.msra.mxu2 %v6364_v40  ;;  %v9153_v59 = vpop.f32.mrf.mxu2  ;;  %4609 = vmatpush.bf16.msra.mxu0 %v6108_v8  ;;  %v7353_v52 = vld [vmem:[%s7810_s7 + $0x82c] sm:$0xf]  ;;  %v9158_v61 = vpop.f32.mrf.mxu3  ;;  %v6073_v6 = vld [vmem:[%s7810_s7 + $0x838] sm:$0xf0]  ;;  %v6460_v27 = vor.u32 %v7449_v1, %v6457_v22 }
 0x223   : > { %4627 = vmatpush.bf16.msra.mxu1 %v6236_v10  ;;  %v7385_v35 = vld [vmem:[%s7810_s7 + $0x92c] sm:$0xf]  ;;  %v6201_v51 = vld [vmem:[%s7810_s7 + $0x938] sm:$0xf0]  ;;  %v6076_v29 = vor.u32 %v7353_v52, %v6073_v6  ;;  %4546 = vmatmul.bf16.gmra.mxu0 %v9430_v32 }
 0x224   : > { %v7413_v25 = vld [vmem:[%s7810_s7 + $0xa0c] sm:$0xf]  ;;  %v6313_v13 = vld [vmem:[%s7810_s7 + $0xa18] sm:$0xf0]  ;;  %v6204_v33 = vor.u32 %v7385_v35, %v6201_v51 }
 0x225   : > { %v9166_v31 = vpop.f32.mrf.mxu1  ;;  %4664 = vmatpush.bf16.msra.mxu3 %v6476_v46  ;;  %v7445_v16 = vld [vmem:[%s7810_s7 + $0xb0c] sm:$0xf]  ;;  %v6441_v47 = vld [vmem:[%s7810_s7 + $0xb18] sm:$0xf0]  ;;  %v6316_v30 = vor.u32 %v7413_v25, %v6313_v13 }
 0x226   : > { %4646 = vmatpush.bf16.msra.mxu2 %v6348_v26  ;;  %4610 = vmatpush.bf16.msra.mxu0 %v6092_v55  ;;  %v7349_v63 = vld [vmem:[%s7810_s7 + $0x80c] sm:$0xf]  ;;  %v6057_v48 = vld [vmem:[%s7810_s7 + $0x818] sm:$0xf0]  ;;  %v6444_v39 = vor.u32 %v7445_v16, %v6441_v47 }
 0x227   : > { %4628 = vmatpush.bf16.msra.mxu1 %v6220_v5  ;;  %v7381_v38 = vld [vmem:[%s7810_s7 + $0x90c] sm:$0xf]  ;;  %v6185_v19 = vld [vmem:[%s7810_s7 + $0x918] sm:$0xf0]  ;;  %v6060_v26 = vor.u32 %v7349_v63, %v6057_v48 }
 0x228   : > { %v9431_v7 = vld [vmem:[#allocation13_spill] sm:$0xff]  ;;  %v6937_v40 = vld [vmem:[%s7810_s7 + $0xef8] sm:$0xf0]  ;;  %4564 = vmatmul.bf16.gmra.mxu1 %v9432_v54  ;;  %v6188_v46 = vor.u32 %v7381_v38, %v6185_v19  ;;  %v4261_v22 = vpop.f32.mrf.mxu0 }
 0x229   : > { %4582 = vmatmul.bf16.gmra.mxu2 %v9431_v7  ;;  %v7569_v23 = vld [vmem:[%s7810_s7 + $0xeec] sm:$0xf]  ;;  %v9433_v3 = vld [vmem:[#allocation15_spill] sm:$0xff]  ;;  %4665 = vmatpush.bf16.msra.mxu3 %v6460_v27 }
 0x22a   : > { %4600 = vmatmul.bf16.gmra.mxu3 %v9433_v3  ;;  %v7601_v0 = vld [vmem:[%s7810_s7 + $0xfec] sm:$0xf]  ;;  %v7065_v8 = vld [vmem:[%s7810_s7 + $0xff8] sm:$0xf0]  ;;  %4647 = vmatpush.bf16.msra.mxu2 %v6332_v60  ;;  %v6940_v18 = vor.u32 %v7569_v23, %v6937_v40 }
 0x22b   : > { %v7505_v10 = vld [vmem:[%s7810_s7 + $0xcec] sm:$0xf]  ;;  %v6681_v24 = vld [vmem:[%s7810_s7 + $0xcf8] sm:$0xf0]  ;;  %4611 = vmatpush.bf16.msra.mxu0 %v6076_v29  ;;  %4629 = vmatpush.bf16.msra.mxu1 %v6204_v33  ;;  %v9189_v43 = vpop.f32.mrf.mxu3  ;;  %v7068_v55 = vor.u32 %v7601_v0, %v7065_v8 }
 0x22c   : > { %v7537_v9 = vld [vmem:[%s7810_s7 + $0xdec] sm:$0xf]  ;;  %v6809_v20 = vld [vmem:[%s7810_s7 + $0xdf8] sm:$0xf0]  ;;  %v9187_v15 = vpop.f32.mrf.mxu2  ;;  %v6684_v52 = vor.u32 %v7505_v10, %v6681_v24 }
 0x22d   : > { %v7565_v5 = vld [vmem:[%s7810_s7 + $0xecc] sm:$0xf]  ;;  %v6921_v1 = vld [vmem:[%s7810_s7 + $0xed8] sm:$0xf0]  ;;  %v6812_v6 = vor.u32 %v7537_v9, %v6809_v20  ;;  %v4279_v60 = vpop.f32.mrf.mxu1  ;;  %4666 = vmatpush.bf16.msra.mxu3 %v6444_v39 }
 0x22e   : > { %v7597_v35 = vld [vmem:[%s7810_s7 + $0xfcc] sm:$0xf]  ;;  %v7049_v51 = vld [vmem:[%s7810_s7 + $0xfd8] sm:$0xf0]  ;;  %4648 = vmatpush.bf16.msra.mxu2 %v6316_v30  ;;  %v6924_v47 = vor.u32 %v7565_v5, %v6921_v1 }
 0x22f   : > { %v7501_v25 = vld [vmem:[%s7810_s7 + $0xccc] sm:$0xf]  ;;  %v6665_v27 = vld [vmem:[%s7810_s7 + $0xcd8] sm:$0xf0]  ;;  %4612 = vmatpush.bf16.msra.mxu0 %v6060_v26  ;;  %4630 = vmatpush.bf16.msra.mxu1 %v6188_v46  ;;  %v7052_v29 = vor.u32 %v7597_v35, %v7049_v51 }
 0x230   : > { %v7533_v13 = vld [vmem:[%s7810_s7 + $0xdcc] sm:$0xf]  ;;  %v6793_v16 = vld [vmem:[%s7810_s7 + $0xdd8] sm:$0xf0]  ;;  %v6668_v33 = vor.u32 %v7501_v25, %v6665_v27  ;;  %v9207_v8 = vpop.f32.mrf.mxu0 }
 0x231   : > { %4731 = vmatpush.bf16.msrb.mxu3 %v7068_v55  ;;  %v6796_v63 = vor.u32 %v7533_v13, %v6793_v16  ;;  %v7561_v48 = vld [vmem:[%s7810_s7 + $0xeac] sm:$0xf]  ;;  %v6905_v38 = vld [vmem:[%s7810_s7 + $0xeb8] sm:$0xf0] }
 0x232   : > { %4713 = vmatpush.bf16.msrb.mxu2 %v6940_v18  ;;  %v7593_v7 = vld [vmem:[%s7810_s7 + $0xfac] sm:$0xf]  ;;  %v7033_v19 = vld [vmem:[%s7810_s7 + $0xfb8] sm:$0xf0]  ;;  %v6908_v30 = vor.u32 %v7561_v48, %v6905_v38 }
 0x233   : > { %4677 = vmatpush.bf16.msrb.mxu0 %v6684_v52  ;;  %4695 = vmatpush.bf16.msrb.mxu1 %v6812_v6  ;;  %v7497_v23 = vld [vmem:[%s7810_s7 + $0xcac] sm:$0xf]  ;;  %v4315_v40 = vpop.f32.mrf.mxu3  ;;  %v6649_v54 = vld [vmem:[%s7810_s7 + $0xcb8] sm:$0xf0]  ;;  %v7036_v39 = vor.u32 %v7593_v7, %v7033_v19 }
 0x234   : > { %v4297_v32 = vpop.f32.mrf.mxu2  ;;  %v7529_v3 = vld [vmem:[%s7810_s7 + $0xdac] sm:$0xf]  ;;  %v6777_v0 = vld [vmem:[%s7810_s7 + $0xdb8] sm:$0xf0]  ;;  %v6652_v20 = vor.u32 %v7497_v23, %v6649_v54  ;;  %4613 = vmatmul.bf16.vlgmr.msra.gmra.mxu0 %v8100_v44 }
 0x235   : > { %4732 = vmatpush.bf16.msrb.mxu3 %v7052_v29  ;;  %v9209_v10 = vpop.f32.mrf.mxu1  ;;  %v7557_v24 = vld [vmem:[%s7810_s7 + $0xe8c] sm:$0xf]  ;;  %v6889_v9 = vld [vmem:[%s7810_s7 + $0xe98] sm:$0xf0]  ;;  %v6780_v26 = vor.u32 %v7529_v3, %v6777_v0 }
 0x236   : > { %4714 = vmatpush.bf16.msrb.mxu2 %v6924_v47  ;;  %v7589_v46 = vld [vmem:[%s7810_s7 + $0xf8c] sm:$0xf]  ;;  %v7017_v18 = vld [vmem:[%s7810_s7 + $0xf98] sm:$0xf0]  ;;  %v6892_v52 = vor.u32 %v7557_v24, %v6889_v9 }
 0x237   : > { %4678 = vmatpush.bf16.msrb.mxu0 %v6668_v33  ;;  %4696 = vmatpush.bf16.msrb.mxu1 %v6796_v63  ;;  %v7493_v55 = vld [vmem:[%s7810_s7 + $0xc8c] sm:$0xf]  ;;  %v6633_v5 = vld [vmem:[%s7810_s7 + $0xc98] sm:$0xf0]  ;;  %v7020_v6 = vor.u32 %v7589_v46, %v7017_v18  ;;  %v4255_v33 = vadd.f32 %v9111_v14, %v9053_v57 }
 0x238   : > { %v7525_v1 = vld [vmem:[%s7810_s7 + $0xd8c] sm:$0xf]  ;;  %v6761_v22 = vld [vmem:[%s7810_s7 + $0xd98] sm:$0xf0]  ;;  %4631 = vmatmul.bf16.vlgmr.msra.gmra.mxu1 %v8107_v49  ;;  %v6636_v51 = vor.u32 %v7493_v55, %v6633_v5  ;;  %v9235_v29 = vpop.f32.mrf.mxu0 }
 0x239   : > { %4649 = vmatmul.bf16.vlgmr.msra.gmra.mxu2 %v8102_v45  ;;  %4733 = vmatpush.bf16.msrb.mxu3 %v7036_v39  ;;  %v7553_v44 = vld [vmem:[%s7810_s7 + $0xe6c] sm:$0xf]  ;;  %v6873_v35 = vld [vmem:[%s7810_s7 + $0xe78] sm:$0xf0]  ;;  %v6764_v25 = vor.u32 %v7525_v1, %v6761_v22 }
 0x23a   : > { %4667 = vmatmul.bf16.vlgmr.msra.gmra.mxu3 %v8109_v50  ;;  %4715 = vmatpush.bf16.msrb.mxu2 %v6908_v30  ;;  %v7585_v49 = vld [vmem:[%s7810_s7 + $0xf6c] sm:$0xf]  ;;  %v7001_v60 = vld [vmem:[%s7810_s7 + $0xf78] sm:$0xf0]  ;;  %v6876_v48 = vor.u32 %v7553_v44, %v6873_v35  ;;  %v4273_v30 = vadd.f32 %v9113_v58, %v4255_v33  ;;  %v4257_v35 = vadd.f32 %v9139_v53, %v9072_v28  ;;  %v9434_v53 = vld [vmem:[#allocation16_spill] sm:$0xff] }
 0x23b   : > { %4679 = vmatpush.bf16.msrb.mxu0 %v6652_v20  ;;  %4697 = vmatpush.bf16.msrb.mxu1 %v6780_v26  ;;  %v7489_v50 = vld [vmem:[%s7810_s7 + $0xc6c] sm:$0xf]  ;;  %v9230_v27 = vpop.f32.mrf.mxu3  ;;  %v6617_v13 = vld [vmem:[%s7810_s7 + $0xc78] sm:$0xf0]  ;;  %v7004_v38 = vor.u32 %v7585_v49, %v7001_v60 }
 0x23c   : > { %v9225_v45 = vpop.f32.mrf.mxu2  ;;  %v7521_v16 = vld [vmem:[%s7810_s7 + $0xd6c] sm:$0xf]  ;;  %v6745_v47 = vld [vmem:[%s7810_s7 + $0xd78] sm:$0xf0]  ;;  %v6620_v19 = vor.u32 %v7489_v50, %v6617_v13  ;;  %v4291_v1 = vadd.f32 %v9129_v34, %v4273_v30 }
 0x23d   : > { %v9239_v63 = vpop.f32.mrf.mxu1  ;;  %4734 = vmatpush.bf16.msrb.mxu3 %v7020_v6  ;;  %v7549_v32 = vld [vmem:[%s7810_s7 + $0xe4c] sm:$0xf]  ;;  %v6857_v7 = vld [vmem:[%s7810_s7 + $0xe58] sm:$0xf0]  ;;  %v6748_v23 = vor.u32 %v7521_v16, %v6745_v47 }
 0x23e   : > { %4716 = vmatpush.bf16.msrb.mxu2 %v6892_v52  ;;  %v7581_v40 = vld [vmem:[%s7810_s7 + $0xf4c] sm:$0xf]  ;;  %v6985_v54 = vld [vmem:[%s7810_s7 + $0xf58] sm:$0xf0]  ;;  %v6860_v39 = vor.u32 %v7549_v32, %v6857_v7  ;;  %v4309_v28 = vadd.f32 %v9134_v62, %v4291_v1 }
 0x23f   : > { %4680 = vmatpush.bf16.msrb.mxu0 %v6636_v51  ;;  %4698 = vmatpush.bf16.msrb.mxu1 %v6764_v25  ;;  %v7485_v3 = vld [vmem:[%s7810_s7 + $0xc4c] sm:$0xf]  ;;  %v6601_v57 = vld [vmem:[%s7810_s7 + $0xc58] sm:$0xf0]  ;;  %v6988_v24 = vor.u32 %v7581_v40, %v6985_v54  ;;  %v9436_v40 = vld [vmem:[#allocation18_spill] sm:$0xff] }
 0x240   : > { %v7517_v14 = vld [vmem:[%s7810_s7 + $0xd4c] sm:$0xf]  ;;  %v6729_v0 = vld [vmem:[%s7810_s7 + $0xd58] sm:$0xf0]  ;;  %v6604_v46 = vor.u32 %v7485_v3, %v6601_v57  ;;  %v4331_v51 = vpop.f32.mrf.mxu0  ;;  %v4327_v3 = vadd.f32 %v9207_v8, %v4309_v28 }
 0x241   : > { %4735 = vmatpush.bf16.msrb.mxu3 %v7004_v38  ;;  %v7545_v9 = vld [vmem:[%s7810_s7 + $0xe2c] sm:$0xf]  ;;  %v6841_v20 = vld [vmem:[%s7810_s7 + $0xe38] sm:$0xf0]  ;;  %v6732_v18 = vor.u32 %v7517_v14, %v6729_v0 }
 0x242   : > { %4717 = vmatpush.bf16.msrb.mxu2 %v6876_v48  ;;  %v7577_v55 = vld [vmem:[%s7810_s7 + $0xf2c] sm:$0xf]  ;;  %v6969_v5 = vld [vmem:[%s7810_s7 + $0xf38] sm:$0xf0]  ;;  %v6844_v49 = vor.u32 %v7545_v9, %v6841_v20  ;;  %v4345_v20 = vadd.f32 %v9209_v10, %v4327_v3 }
 0x243   : > { %4681 = vmatpush.bf16.msrb.mxu0 %v6620_v19  ;;  %4699 = vmatpush.bf16.msrb.mxu1 %v6748_v23  ;;  %v7481_v58 = vld [vmem:[%s7810_s7 + $0xc2c] sm:$0xf]  ;;  %v9258_v22 = vpop.f32.mrf.mxu3  ;;  %v6585_v52 = vld [vmem:[%s7810_s7 + $0xc38] sm:$0xf0]  ;;  %v6972_v34 = vor.u32 %v7577_v55, %v6969_v5  ;;  %v4275_v23 = vadd.f32 %v9141_v56, %v4257_v35  ;;  %v4260_v56 = vadd.f32 %v9163_v17, %v9098_v21 }
 0x244   : > { %v9252_v26 = vpop.f32.mrf.mxu2  ;;  %v7513_v6 = vld [vmem:[%s7810_s7 + $0xd2c] sm:$0xf]  ;;  %v6713_v44 = vld [vmem:[%s7810_s7 + $0xd38] sm:$0xf0]  ;;  %v6588_v13 = vor.u32 %v7481_v58, %v6585_v52  ;;  %4618 = vmatmul.bf16.gmra.mxu0 %v9434_v53 }
 0x245   : > { %v9265_v25 = vpop.f32.mrf.mxu1  ;;  %4736 = vmatpush.bf16.msrb.mxu3 %v6988_v24  ;;  %v7541_v60 = vld [vmem:[%s7810_s7 + $0xe0c] sm:$0xf]  ;;  %v6825_v50 = vld [vmem:[%s7810_s7 + $0xe18] sm:$0xf0]  ;;  %v6716_v16 = vor.u32 %v7513_v6, %v6713_v44  ;;  %v4278_v55 = vadd.f32 %v9166_v31, %v4260_v56 }
 0x246   : > { %4718 = vmatpush.bf16.msrb.mxu2 %v6860_v39  ;;  %v7573_v47 = vld [vmem:[%s7810_s7 + $0xf0c] sm:$0xf]  ;;  %v6953_v33 = vld [vmem:[%s7810_s7 + $0xf18] sm:$0xf0]  ;;  %v6828_v57 = vor.u32 %v7541_v60, %v6825_v50  ;;  %v4293_v39 = vadd.f32 %v9153_v59, %v4275_v23 }
 0x247   : > { %4682 = vmatpush.bf16.msrb.mxu0 %v6604_v46  ;;  %4700 = vmatpush.bf16.msrb.mxu1 %v6732_v18  ;;  %v7477_v48 = vld [vmem:[%s7810_s7 + $0xc0c] sm:$0xf]  ;;  %v6569_v32 = vld [vmem:[%s7810_s7 + $0xc18] sm:$0xf0]  ;;  %v6956_v14 = vor.u32 %v7573_v47, %v6953_v33  ;;  %v4363_v18 = vadd.f32 %v9225_v45, %v4345_v20  ;;  %v4296_v58 = vadd.f32 %v9187_v15, %v4278_v55 }
 0x248   : > { %v9435_v38 = vld [vmem:[#allocation17_spill] sm:$0xff]  ;;  %v6697_v19 = vld [vmem:[%s7810_s7 + $0xd18] sm:$0xf0]  ;;  %4636 = vmatmul.bf16.gmra.mxu1 %v9436_v40  ;;  %v6572_v0 = vor.u32 %v7477_v48, %v6569_v32  ;;  %v4333_v9 = vpop.f32.mrf.mxu0  ;;  %v4311_v8 = vadd.f32 %v9158_v61, %v4293_v39 }
 0x249   : > { %4654 = vmatmul.bf16.gmra.mxu2 %v9435_v38  ;;  %v7509_v7 = vld [vmem:[%s7810_s7 + $0xd0c] sm:$0xf]  ;;  %v9437_v54 = vld [vmem:[#allocation19_spill] sm:$0xff]  ;;  %4737 = vmatpush.bf16.msrb.mxu3 %v6972_v34  ;;  %v4381_v21 = vadd.f32 %v9230_v27, %v4363_v18  ;;  %v4314_v44 = vadd.f32 %v9189_v43, %v4296_v58 }
 0x24a   : > { %4672 = vmatmul.bf16.gmra.mxu3 %v9437_v54  ;;  %4719 = vmatpush.bf16.msrb.mxu2 %v6844_v49  ;;  %v6700_v30 = vor.u32 %v7509_v7, %v6697_v19  ;;  %v4329_v59 = vadd.f32 %v9235_v29, %v4311_v8  ;;  %v355_v35 = vld [vmem:[#allocation2 + $0x58] sm:$0xff]  ;;  %v363_v7 = vld [vmem:[#allocation2 + $0x10] sm:$0xff] }
 0x24b   : > { %4683 = vmatpush.bf16.msrb.mxu0 %v6588_v13  ;;  %4701 = vmatpush.bf16.msrb.mxu1 %v6716_v16  ;;  %v4385_v24 = vpop.f32.mrf.mxu3  ;;  %v4332_v31 = vadd.f32 %v4331_v51, %v4314_v44  ;;  %v359_v16 = vld [vmem:[#allocation2 + $0x8] sm:$0xff] }
 0x24c   : > { %v4367_v62 = vpop.f32.mrf.mxu2  ;;  %v4347_v1 = vadd.f32 %v9239_v63, %v4329_v59 }
 0x24d   : > { %v4351_v46 = vpop.f32.mrf.mxu1  ;;  %4738 = vmatpush.bf16.msrb.mxu3 %v6956_v14  ;;  %v4350_v43 = vadd.f32 %v9265_v25, %v4332_v31 }
 0x24e   : > { %4720 = vmatpush.bf16.msrb.mxu2 %v6828_v57  ;;  %v4365_v61 = vadd.f32 %v9252_v26, %v4347_v1 }
 0x24f   : > { %4684 = vmatpush.bf16.msrb.mxu0 %v6572_v0  ;;  %4702 = vmatpush.bf16.msrb.mxu1 %v6700_v30  ;;  %v4368_v60 = vadd.f32 %v4367_v62, %v4350_v43 }
 0x250   : > { %v4398_v10 = vpop.f32.mrf.mxu0  ;;  %v4383_v27 = vadd.f32 %v9258_v22, %v4365_v61 }
 0x251   : > { %v4399_v52 = vadd.f32 %v4398_v10, %v4381_v21 }
 0x253   : > { %v4387_v17 = vpop.f32.mrf.mxu3 }
 0x254   : > { %v4369_v5 = vpop.f32.mrf.mxu2  ;;  %4685 = vmatmul.bf16.vlgmr.msrb.gmra.mxu0 %v8202_v36 }
 0x255   : > { %v4416_v6 = vpop.f32.mrf.mxu1 }
 0x256   : > { %v4417_v15 = vadd.f32 %v4416_v6, %v4399_v52 }
 0x258   : > { %4703 = vmatmul.bf16.vlgmr.msrb.gmra.mxu1 %v8209_v41  ;;  %v4400_v49 = vpop.f32.mrf.mxu0 }
 0x259   : > { %4721 = vmatmul.bf16.vlgmr.msrb.gmra.mxu2 %v8204_v37  ;;  %v4401_v34 = vadd.f32 %v4400_v49, %v4383_v27 }
 0x25a   : > { %4739 = vmatmul.bf16.vlgmr.msrb.gmra.mxu3 %v8211_v42  ;;  %v4386_v42 = vadd.f32 %v4385_v24, %v4368_v60 }
 0x25b   : > { %v4452_v63 = vpop.f32.mrf.mxu3 }
 0x25c   : > { %v4434_v45 = vpop.f32.mrf.mxu2 }
 0x25d   : > { %v4435_v29 = vadd.f32 %v4434_v45, %v4417_v15  ;;  %v4418_v36 = vpop.f32.mrf.mxu1 }
 0x25e   : > { %v4419_v41 = vadd.f32 %v4418_v36, %v4401_v34 }
 0x25f   : > { %v4453_v26 = vadd.f32 %v4452_v63, %v4435_v29 }
 0x260   : > { %v4403_v47 = vpop.f32.mrf.mxu0 }
 0x261   : > { %v4751_v37 = vadd.f32 %v4453_v26, %v355_v35  ;;  %v4404_v33 = vadd.f32 %v4403_v47, %v4386_v42 }
 0x263   : > { %4763 = vst [vmem:[#allocation2 + $0x58] sm:$0xff] %v4751_v37  ;;  %v4454_v13 = vpop.f32.mrf.mxu3 }
 0x264   : > { %v4436_v50 = vpop.f32.mrf.mxu2  ;;  %4690 = vmatmul.bf16.gmra.mxu0 %v8248_v2 }
 0x265   : > { %v4437_v51 = vadd.f32 %v4436_v50, %v4419_v41  ;;  %v4421_v48 = vpop.f32.mrf.mxu1 }
 0x266   : > { %v4422_v25 = vadd.f32 %v4421_v48, %v4404_v33 }
 0x267   : > { %v4455_v22 = vadd.f32 %v4454_v13, %v4437_v51 }
 0x268   : > { %4708 = vmatmul.bf16.gmra.mxu1 %v8255_v11  ;;  %v4405_v19 = vpop.f32.mrf.mxu0 }
 0x269   : > { %v4755_v28 = vadd.f32 %v4455_v22, %v359_v16  ;;  %4726 = vmatmul.bf16.gmra.mxu2 %v8250_v4 }
 0x26a   : > { %4744 = vmatmul.bf16.gmra.mxu3 %v8257_v12 }
 0x26b   : > { %4767 = vst [vmem:[#allocation2 + $0x8] sm:$0xff] %v4755_v28  ;;  %v4457_v32 = vpop.f32.mrf.mxu3 }
 0x26c   : > { %v4439_v53 = vpop.f32.mrf.mxu2 }
 0x26d   : > { %v4440_v38 = vadd.f32 %v4439_v53, %v4422_v25  ;;  %v4423_v40 = vpop.f32.mrf.mxu1 }
 0x26f   : > { %v4458_v23 = vadd.f32 %v4457_v32, %v4440_v38 }
 0x270   : > { %v4470_v2 = vpop.f32.mrf.mxu0 }
 0x271   : > { %v4759_v54 = vadd.f32 %v4458_v23, %v363_v7 }
 0x273   : > { %4771 = vst [vmem:[#allocation2 + $0x10] sm:$0xff] %v4759_v54  ;;  %v4459_v57 = vpop.f32.mrf.mxu3 }
 0x274   : > { %v4441_v3 = vpop.f32.mrf.mxu2 }
 0x275   : > { %v4488_v14 = vpop.f32.mrf.mxu1 }
 0x276   : > { %v4489_v4 = vadd.f32 %v4488_v14, %v4470_v2 }
 0x278   : > { %v4472_v12 = vpop.f32.mrf.mxu0 }
 0x27b   : > { %v4524_v0 = vpop.f32.mrf.mxu3 }
 0x27c   : > { %v4506_v62 = vpop.f32.mrf.mxu2 }
 0x27d   : > { %v4507_v11 = vadd.f32 %v4506_v62, %v4489_v4  ;;  %v4490_v39 = vpop.f32.mrf.mxu1 }
 0x27e   : > { %v4491_v24 = vadd.f32 %v4490_v39, %v4472_v12 }
 0x27f   : > { %v4525_v30 = vadd.f32 %v4524_v0, %v4507_v11 }
 0x280   : > { %v4475_v46 = vpop.f32.mrf.mxu0 }
 0x283   : > { %v4526_v20 = vpop.f32.mrf.mxu3 }
 0x284   : > { %v4508_v9 = vpop.f32.mrf.mxu2 }
 0x285   : > { %v4509_v56 = vadd.f32 %v4508_v9, %v4491_v24  ;;  %v4493_v18 = vpop.f32.mrf.mxu1 }
 0x286   : > { %v4494_v55 = vadd.f32 %v4493_v18, %v4475_v46 }
 0x287   : > { %v4527_v8 = vadd.f32 %v4526_v20, %v4509_v56 }
 0x288   : > { %v4477_v21 = vpop.f32.mrf.mxu0 }
 0x28b   : > { %v4529_v58 = vpop.f32.mrf.mxu3 }
 0x28c   : > { %v4511_v59 = vpop.f32.mrf.mxu2 }
 0x28d   : > { %v4512_v5 = vadd.f32 %v4511_v59, %v4494_v55  ;;  %v4495_v10 = vpop.f32.mrf.mxu1 }
 0x28f   : > { %v4530_v17 = vadd.f32 %v4529_v58, %v4512_v5 }
 0x290   : > { %v4542_v6 = vpop.f32.mrf.mxu0 }
 0x291   : > { %v4543_v13 = vadd.f32 %v4542_v6, %v4525_v30 }
 0x293   : > { %v4531_v52 = vpop.f32.mrf.mxu3 }
 0x294   : > { %v4513_v1 = vpop.f32.mrf.mxu2 }
 0x295   : > { %v4560_v44 = vpop.f32.mrf.mxu1 }
 0x296   : > { %v4561_v47 = vadd.f32 %v4560_v44, %v4543_v13 }
 0x298   : > { %v4544_v15 = vpop.f32.mrf.mxu0 }
 0x299   : > { %v4545_v25 = vadd.f32 %v4544_v15, %v4527_v8 }
 0x29b   : > { %v4596_v31 = vpop.f32.mrf.mxu3 }
 0x29c   : > { %v4578_v61 = vpop.f32.mrf.mxu2 }
 0x29d   : > { %v4562_v45 = vpop.f32.mrf.mxu1  ;;  %v4579_v33 = vadd.f32 %v4578_v61, %v4561_v47 }
 0x29e   : > { %v4563_v32 = vadd.f32 %v4562_v45, %v4545_v25 }
 0x29f   : > { %v4597_v38 = vadd.f32 %v4596_v31, %v4579_v33 }
 0x2a0   : > { %v4547_v63 = vpop.f32.mrf.mxu0 }
 0x2a1   : > { %v4548_v3 = vadd.f32 %v4547_v63, %v4530_v17  ;;  %v356_v17 = vld [vmem:[#allocation2 + $0x18] sm:$0xff] }
 0x2a3   : > { %v4598_v29 = vpop.f32.mrf.mxu3 }
 0x2a4   : > { %v4580_v27 = vpop.f32.mrf.mxu2 }
 0x2a5   : > { %v4565_v35 = vpop.f32.mrf.mxu1  ;;  %v4581_v23 = vadd.f32 %v4580_v27, %v4563_v32 }
 0x2a6   : > { %v4566_v62 = vadd.f32 %v4565_v35, %v4548_v3  ;;  %v360_v35 = vld [vmem:[#allocation2 + $0x38] sm:$0xff] }
 0x2a7   : > { %v4599_v14 = vadd.f32 %v4598_v29, %v4581_v23 }
 0x2a8   : > { %v4549_v26 = vpop.f32.mrf.mxu0 }
 0x2ac   : > { %v4583_v49 = vpop.f32.mrf.mxu2 }
 0x2ad   : > { %v4601_v43 = vpop.f32.mrf.mxu3  ;;  %v4567_v34 = vpop.f32.mrf.mxu1  ;;  %v4584_v12 = vadd.f32 %v4583_v49, %v4566_v62 }
 0x2af   : > { %v4602_v46 = vadd.f32 %v4601_v43, %v4584_v12 }
 0x2b1   : > { %v4614_v37 = vpop.f32.mrf.mxu0 }
 0x2b2   : > { %v4615_v7 = vadd.f32 %v4614_v37, %v4597_v38 }
 0x2b4   : > { %v4585_v36 = vpop.f32.mrf.mxu2 }
 0x2b5   : > { %v4603_v60 = vpop.f32.mrf.mxu3  ;;  %v4632_v41 = vpop.f32.mrf.mxu1 }
 0x2b6   : > { %v4633_v57 = vadd.f32 %v4632_v41, %v4615_v7 }
 0x2b9   : > { %v4616_v51 = vpop.f32.mrf.mxu0 }
 0x2ba   : > { %v4617_v11 = vadd.f32 %v4616_v51, %v4599_v14 }
 0x2bc   : > { %v4650_v50 = vpop.f32.mrf.mxu2 }
 0x2bd   : > { %v4668_v42 = vpop.f32.mrf.mxu3  ;;  %v4634_v16 = vpop.f32.mrf.mxu1  ;;  %v4651_v4 = vadd.f32 %v4650_v50, %v4633_v57 }
 0x2be   : > { %v4635_v9 = vadd.f32 %v4634_v16, %v4617_v11 }
 0x2bf   : > { %v4669_v30 = vadd.f32 %v4668_v42, %v4651_v4  ;;  %v364_v42 = vld [vmem:[#allocation2 + $0x40] sm:$0xff] }
 0x2c1   : > { %v4619_v28 = vpop.f32.mrf.mxu0 }
 0x2c2   : > { %v4620_v18 = vadd.f32 %v4619_v28, %v4602_v46 }
 0x2c4   : > { %v4652_v22 = vpop.f32.mrf.mxu2 }
 0x2c5   : > { %v4670_v48 = vpop.f32.mrf.mxu3  ;;  %v4637_v53 = vpop.f32.mrf.mxu1  ;;  %v4653_v8 = vadd.f32 %v4652_v22, %v4635_v9 }
 0x2c6   : > { %v4638_v1 = vadd.f32 %v4637_v53, %v4620_v18 }
 0x2c7   : > { %v4671_v5 = vadd.f32 %v4670_v48, %v4653_v8 }
 0x2c9   : > { %v4621_v54 = vpop.f32.mrf.mxu0 }
 0x2cc   : > { %v4655_v19 = vpop.f32.mrf.mxu2 }
 0x2cd   : > { %v4673_v40 = vpop.f32.mrf.mxu3  ;;  %v4639_v2 = vpop.f32.mrf.mxu1  ;;  %v4656_v61 = vadd.f32 %v4655_v19, %v4638_v1 }
 0x2cf   : > { %v4674_v27 = vadd.f32 %v4673_v40, %v4656_v61 }
 0x2d1   : > { %v4686_v24 = vpop.f32.mrf.mxu0 }
 0x2d2   : > { %v4687_v56 = vadd.f32 %v4686_v24, %v4669_v30 }
 0x2d4   : > { %v4657_v0 = vpop.f32.mrf.mxu2 }
 0x2d5   : > { %v4675_v39 = vpop.f32.mrf.mxu3  ;;  %v4704_v20 = vpop.f32.mrf.mxu1 }
 0x2d6   : > { %v4705_v55 = vadd.f32 %v4704_v20, %v4687_v56 }
 0x2d9   : > { %v4688_v10 = vpop.f32.mrf.mxu0 }
 0x2da   : > { %v4689_v6 = vadd.f32 %v4688_v10, %v4671_v5 }
 0x2dc   : > { %v4722_v59 = vpop.f32.mrf.mxu2 }
 0x2dd   : > { %v4723_v58 = vadd.f32 %v4722_v59, %v4705_v55  ;;  %v4740_v21 = vpop.f32.mrf.mxu3  ;;  %v4706_v44 = vpop.f32.mrf.mxu1 }
 0x2de   : > { %v4707_v15 = vadd.f32 %v4706_v44, %v4689_v6 }
 0x2df   : > { %v4741_v52 = vadd.f32 %v4740_v21, %v4723_v58 }
 0x2e1   : > { %v4752_v31 = vadd.f32 %v4741_v52, %v356_v17  ;;  %v4691_v49 = vpop.f32.mrf.mxu0 }
 0x2e2   : > { %v4692_v26 = vadd.f32 %v4691_v49, %v4674_v27 }
 0x2e3   : > { %4764 = vst [vmem:[#allocation2 + $0x18] sm:$0xff] %v4752_v31 }
 0x2e4   : > { %v4724_v45 = vpop.f32.mrf.mxu2 }
 0x2e5   : > { %v4725_v29 = vadd.f32 %v4724_v45, %v4707_v15  ;;  %v4742_v63 = vpop.f32.mrf.mxu3  ;;  %v4709_v34 = vpop.f32.mrf.mxu1 }
 0x2e6   : > { %v4710_v60 = vadd.f32 %v4709_v34, %v4692_v26 }
 0x2e7   : > { %v4743_v43 = vadd.f32 %v4742_v63, %v4725_v29 }
 0x2e9   : > { %v4756_v36 = vadd.f32 %v4743_v43, %v360_v35  ;;  %v4693_v51 = vpop.f32.mrf.mxu0 }
 0x2eb   : > { %4768 = vst [vmem:[#allocation2 + $0x38] sm:$0xff] %v4756_v36 }
 0x2ec   : > { %v4727_v37 = vpop.f32.mrf.mxu2 }
 0x2ed   : > { %v4728_v41 = vadd.f32 %v4727_v37, %v4710_v60  ;;  %v4745_v50 = vpop.f32.mrf.mxu3  ;;  %v4711_v16 = vpop.f32.mrf.mxu1 }
 0x2ef   : > { %v4746_v13 = vadd.f32 %v4745_v50, %v4728_v41 }
 0x2f1   : > { %v4760_v47 = vadd.f32 %v4746_v13, %v364_v42  ;;  %4776 = sbr.rel (%p7069_p11) target bundleno = 775 (0x307), region = 63 }
 0x2f3   : > { %4772 = vst [vmem:[#allocation2 + $0x40] sm:$0xff] %v4760_v47 }
 0x2f4   : > { %v4729_v22 = vpop.f32.mrf.mxu2 }
 0x2f5   : > { %v4747_v33 = vpop.f32.mrf.mxu3 }
 0x2f6   : > { %v4777_v48 = vld [vmem:[#allocation2 + $0x30] sm:$0xff]  ;;  %v4789_v28 = vld [vmem:[%s9362_s2] sm:$0xf]  ;;  %v4779_v32 = vld [vmem:[#allocation2 + $0x58] sm:$0xff] }
 0x2f7   : > { %v4778_v25 = vld [vmem:[#allocation2] sm:$0xff]  ;;  %v4791_v53 = vperm.slane %v4789_v28, 0  ;;  %v4792_v38 = vperm.slane %v4789_v28, 1  ;;  %v4793_v7 = vperm.slane %v4789_v28, 2  ;;  %v4780_v19 = vld [vmem:[#allocation2 + $0x18] sm:$0xff]  ;;  %v4794_v23 = vperm.slane %v4789_v28, 3 }
 0x2f8   : > { %v4781_v40 = vld [vmem:[#allocation2 + $0x50] sm:$0xff]  ;;  %v4782_v2 = vld [vmem:[#allocation2 + $0x20] sm:$0xff]  ;;  %v4783_v4 = vld [vmem:[#allocation2 + $0x8] sm:$0xff] }
 0x2f9   : > { %v4799_v54 = vadd.f32 %v4791_v53, %v4777_v48  ;;  %v4800_v3 = vadd.f32 %v4792_v38, %v4778_v25  ;;  %v4801_v57 = vadd.f32 %v4793_v7, %v4779_v32  ;;  %v4802_v14 = vadd.f32 %v4794_v23, %v4780_v19  ;;  %v4784_v11 = vld [vmem:[#allocation2 + $0x38] sm:$0xff]  ;;  %v4785_v12 = vld [vmem:[#allocation2 + $0x28] sm:$0xff]  ;;  %v4787_v9 = vld [vmem:[#allocation2 + $0x10] sm:$0xff] }
 0x2fa   : > { %v4803_v62 = vadd.f32 %v4791_v53, %v4781_v40  ;;  %v4804_v0 = vadd.f32 %v4792_v38, %v4782_v2  ;;  %v4805_v30 = vadd.f32 %v4793_v7, %v4783_v4  ;;  %v4786_v39 = vld [vmem:[#allocation2 + $0x48] sm:$0xff]  ;;  %v4806_v24 = vadd.f32 %v4794_v23, %v4784_v11  ;;  %v4788_v20 = vld [vmem:[#allocation2 + $0x40] sm:$0xff] }
 0x2fb   : > { %4811 = vst [vmem:[%s9363_s3] sm:$0xff] %v4799_v54  ;;  %v4807_v56 = vadd.f32 %v4791_v53, %v4785_v12  ;;  %v4808_v46 = vadd.f32 %v4792_v38, %v4786_v39  ;;  %v4809_v8 = vadd.f32 %v4793_v7, %v4787_v9  ;;  %v4810_v18 = vadd.f32 %v4794_v23, %v4788_v20 }
 0x2fc   : > { %4812 = vst [vmem:[%s9363_s3 + $0x8] sm:$0xff] %v4800_v3 }
 0x2fd   : > { %4813 = vst [vmem:[%s9363_s3 + $0x10] sm:$0xff] %v4801_v57 }
 0x2fe   : > { %4814 = vst [vmem:[%s9363_s3 + $0x18] sm:$0xff] %v4802_v14 }
 0x2ff   : > { %4815 = vst [vmem:[%s9363_s3 + $0x20] sm:$0xff] %v4803_v62 }
 0x300   : > { %4816 = vst [vmem:[%s9363_s3 + $0x28] sm:$0xff] %v4804_v0 }
 0x301   : > { %4817 = vst [vmem:[%s9363_s3 + $0x30] sm:$0xff] %v4805_v30 }
 0x302   : > { %4818 = vst [vmem:[%s9363_s3 + $0x38] sm:$0xff] %v4806_v24 }
 0x303   : > { %4819 = vst [vmem:[%s9363_s3 + $0x40] sm:$0xff] %v4807_v56 }
 0x304   : > { %4820 = vst [vmem:[%s9363_s3 + $0x48] sm:$0xff] %v4808_v46 }
 0x305   : > { %4821 = vst [vmem:[%s9363_s3 + $0x50] sm:$0xff] %v4809_v8 }
 0x306   : > { %4822 = vst [vmem:[%s9363_s3 + $0x58] sm:$0xff] %v4810_v18 }
 0x307 PF: > { %s13_s16 = sadd.s32 1, %s7685_s16   ;;  %s9438_s12 = smov %s7673_s13 }
 0x308   : > { %p10_p12 = scmp.ge.s32.totalorder %s13_s16, 4   ;;  %s9439_s13 = smov %s7743_s20 }
 0x309   : > { %s9440_s14 = smov %s7681_s15  ;;  %s9441_s15 = smov %s9443_s17 }
 0x30a   :  { %12 = sbr.rel (!%p10_p12) target bundleno = 3 (0x3), region = 104 }

// kernel: discriminator_forward.15
= control target key start
LH: loop header
LB: loop body
LE: loop exit
PB: predicated region body
PF: predicated region fallthrough
CT: control target
= control target key end

     0   :  { %s2404_s12 = smov 0   ;;  %s2406_s13 = smov 0   ;;  %s2589_s0 = inlined_call_operand.vmem [shape: bf16[8,8192], index: 0, kind: input, shape index: {}]   ;;  %s2590_s1 = inlined_call_operand.vmem [shape: bf16[8192,128], index: 1, kind: input, shape index: {}]   ;;  %s2591_s2 = inlined_call_operand.vmem [shape: f32[1,128], index: 2, kind: input, shape index: {}]   ;;  %s2592_s3 = inlined_call_operand.vmem [shape: f32[8,128], index: 3, kind: output, shape index: {}]  }
   0x1   :  { %s2408_s14 = smov 0  }
   0x2 LB: > { %s25_s15 = sadd.s32 1, %s2377_s13  ;;  %p1683_p0 = scmp.ge.s32.totalorder %s2381_s14, 1  ;;  %s2381_s14 = sphi %s2408_s14, %s13_s14   ;;  %s2377_s13 = sphi %s2406_s13, %s2594_s13   ;;  %s2373_s12 = sphi %s2404_s12, %s2593_s12  }
   0x3   : > { %p26_p1 = scmp.ge.s32.totalorder %s25_s15, 4  ;;  %p189_p2 = scmp.lt.s32.totalorder %s2381_s14, 5 }
   0x5   : > { %s2596_s15 = smov (%p26_p1, %s25_s15), 0  ;;  %p190_p3 = pnand %p1683_p0, %p189_p2 }
   0x6   : > { %s1684_s16 = sshll.u32 (!%p190_p3), %s2373_s12, 4  ;;  %s1686_s17 = sshll.u32 (!%p190_p3), %s2373_s12, 8 }
   0x7   : > { %193 = sbr.rel (%p190_p3) target bundleno = 301 (0x12d), region = 32  ;;  %p233_p4 = scmp.lt.s32.totalorder (!%p190_p3), %s1684_s16, 63 }
   0x8   : > { %p241_p5 = scmp.lt.s32.totalorder (!%p190_p3), %s1686_s17, 1023  ;;  %p1688_p6 = scmp.ne.s32.totalorder (!%p190_p3), %s2373_s12, 0 }
   0xc   : > { %s2598_s16 = smov (!%p233_p4, %s1684_s16), 63  ;;  %s2600_s17 = smov (!%p241_p5, %s1686_s17), 1023 }
   0xd   : > { %s1685_s18 = sshll.u32 %s2598_s16, 2  ;;  %s1687_s22 = sshll.u32 %s2600_s17, 2 }
   0xe   : > { %s2429_s21 = scalar_lea.vmem %s2589_s0, %s1685_s18  ;;  %s2434_s25 = scalar_lea.vmem %s2590_s1, %s1687_s22 }
   0xf   : > { %262 = sbr.rel (%p1688_p6) target bundleno = 22 (0x16), region = 36 }
  0x14   : > { %v2383_v0 = vmov 0.0  }
  0x15   : > { %263 = vst [vmem:[#allocation2] sm:$0xff] %v2383_v0 }
  0x16 PF: > { %v2212_v1 = vld [vmem:[%s2434_s25 + $0x38] sm:$0xff]  ;;  %v2211_v5 = vld [vmem:[%s2434_s25 + $0x30] sm:$0xff]  ;;  %v2210_v9 = vld [vmem:[%s2434_s25 + $0x28] sm:$0xff]  ;;  %p2201_p7 = scmp.ne.s32.totalorder %s2373_s12, 3 }
  0x17   : > { %v2220_v2 = vld [vmem:[%s2434_s25 + $0x78] sm:$0xff]  ;;  %1353 = vmatpush.bf16.msra.mxu0 %v2212_v1  ;;  %v2219_v6 = vld [vmem:[%s2434_s25 + $0x70] sm:$0xff]  ;;  %v2218_v10 = vld [vmem:[%s2434_s25 + $0x68] sm:$0xff] }
  0x18   : > { %v2228_v3 = vld [vmem:[%s2434_s25 + $0xb8] sm:$0xff]  ;;  %1366 = vmatpush.bf16.msra.mxu1 %v2220_v2  ;;  %v2227_v7 = vld [vmem:[%s2434_s25 + $0xb0] sm:$0xff]  ;;  %v2226_v11 = vld [vmem:[%s2434_s25 + $0xa8] sm:$0xff] }
  0x19   : > { %v2236_v4 = vld [vmem:[%s2434_s25 + $0xf8] sm:$0xff]  ;;  %1379 = vmatpush.bf16.msra.mxu2 %v2228_v3  ;;  %v2235_v8 = vld [vmem:[%s2434_s25 + $0xf0] sm:$0xff]  ;;  %v2234_v12 = vld [vmem:[%s2434_s25 + $0xe8] sm:$0xff] }
  0x1a   : > { %1392 = vmatpush.bf16.msra.mxu3 %v2236_v4  ;;  %v2209_v13 = vld [vmem:[%s2434_s25 + $0x20] sm:$0xff]  ;;  %v2208_v17 = vld [vmem:[%s2434_s25 + $0x18] sm:$0xff]  ;;  %v2207_v21 = vld [vmem:[%s2434_s25 + $0x10] sm:$0xff] }
  0x1b   : > { %1354 = vmatpush.bf16.msra.mxu0 %v2211_v5  ;;  %v2217_v14 = vld [vmem:[%s2434_s25 + $0x60] sm:$0xff]  ;;  %v2216_v18 = vld [vmem:[%s2434_s25 + $0x58] sm:$0xff]  ;;  %v2215_v22 = vld [vmem:[%s2434_s25 + $0x50] sm:$0xff] }
  0x1c   : > { %1367 = vmatpush.bf16.msra.mxu1 %v2219_v6  ;;  %v2225_v15 = vld [vmem:[%s2434_s25 + $0xa0] sm:$0xff]  ;;  %v2224_v19 = vld [vmem:[%s2434_s25 + $0x98] sm:$0xff]  ;;  %v2223_v23 = vld [vmem:[%s2434_s25 + $0x90] sm:$0xff] }
  0x1d   : > { %1380 = vmatpush.bf16.msra.mxu2 %v2227_v7  ;;  %v2233_v16 = vld [vmem:[%s2434_s25 + $0xe0] sm:$0xff]  ;;  %v2232_v20 = vld [vmem:[%s2434_s25 + $0xd8] sm:$0xff]  ;;  %v2231_v24 = vld [vmem:[%s2434_s25 + $0xd0] sm:$0xff] }
  0x1e   : > { %1393 = vmatpush.bf16.msra.mxu3 %v2235_v8  ;;  %v2206_v25 = vld [vmem:[%s2434_s25 + $0x8] sm:$0xff]  ;;  %v265_v30 = vld [vmem:[%s2429_s21] sm:$0xff]  ;;  %v2244_v39 = vld [vmem:[%s2434_s25 + $0x138] sm:$0xff] }
  0x1f   : > { %1355 = vmatpush.bf16.msra.mxu0 %v2210_v9  ;;  %v2214_v26 = vld [vmem:[%s2434_s25 + $0x48] sm:$0xff]  ;;  %v2205_v31 = vld [vmem:[%s2434_s25] sm:$0xff]  ;;  %v537_v34 = vunpack.c.l.b16 %v265_v30  ;;  %v538_v38 = vunpack.c.h.b16 %v265_v30  ;;  %v2252_v40 = vld [vmem:[%s2434_s25 + $0x178] sm:$0xff] }
  0x20   : > { %1368 = vmatpush.bf16.msra.mxu1 %v2218_v10  ;;  %v2222_v27 = vld [vmem:[%s2434_s25 + $0x88] sm:$0xff]  ;;  %v2213_v32 = vld [vmem:[%s2434_s25 + $0x40] sm:$0xff]  ;;  %v2260_v41 = vld [vmem:[%s2434_s25 + $0x1b8] sm:$0xff] }
  0x21   : > { %1381 = vmatpush.bf16.msra.mxu2 %v2226_v11  ;;  %v2230_v28 = vld [vmem:[%s2434_s25 + $0xc8] sm:$0xff]  ;;  %v2221_v35 = vld [vmem:[%s2434_s25 + $0x80] sm:$0xff]  ;;  %v2268_v42 = vld [vmem:[%s2434_s25 + $0x1f8] sm:$0xff]  ;;  %v553_v44 = vpack.c.b16 %v537_v34, %v537_v34  ;;  %v554_v46 = vpack.c.b16 %v538_v38, %v538_v38 }
  0x22   : > { %1394 = vmatpush.bf16.msra.mxu3 %v2234_v12  ;;  %v266_v29 = vld [vmem:[%s2429_s21 + $0x8] sm:$0xff]  ;;  %v2229_v36 = vld [vmem:[%s2434_s25 + $0xc0] sm:$0xff]  ;;  %v2243_v47 = vld [vmem:[%s2434_s25 + $0x130] sm:$0xff] }
  0x23   : > { %1356 = vmatpush.bf16.msra.mxu0 %v2209_v13  ;;  %v539_v33 = vunpack.c.l.b16 %v266_v29  ;;  %v540_v37 = vunpack.c.h.b16 %v266_v29  ;;  %v2251_v48 = vld [vmem:[%s2434_s25 + $0x170] sm:$0xff]  ;;  %v2242_v51 = vld [vmem:[%s2434_s25 + $0x128] sm:$0xff]  ;;  %v2241_v55 = vld [vmem:[%s2434_s25 + $0x120] sm:$0xff] }
  0x24   : > { %1369 = vmatpush.bf16.msra.mxu1 %v2217_v14  ;;  %v2259_v49 = vld [vmem:[%s2434_s25 + $0x1b0] sm:$0xff]  ;;  %v2250_v52 = vld [vmem:[%s2434_s25 + $0x168] sm:$0xff]  ;;  %v2249_v56 = vld [vmem:[%s2434_s25 + $0x160] sm:$0xff] }
  0x25   : > { %1382 = vmatpush.bf16.msra.mxu2 %v2225_v15  ;;  %v555_v43 = vpack.c.b16 %v539_v33, %v539_v33  ;;  %v556_v45 = vpack.c.b16 %v540_v37, %v540_v37  ;;  %v2267_v50 = vld [vmem:[%s2434_s25 + $0x1f0] sm:$0xff]  ;;  %v2258_v53 = vld [vmem:[%s2434_s25 + $0x1a8] sm:$0xff]  ;;  %v2257_v57 = vld [vmem:[%s2434_s25 + $0x1a0] sm:$0xff] }
  0x26   : > { %1395 = vmatpush.bf16.msra.mxu3 %v2233_v16  ;;  %v2266_v54 = vld [vmem:[%s2434_s25 + $0x1e8] sm:$0xff]  ;;  %v2265_v58 = vld [vmem:[%s2434_s25 + $0x1e0] sm:$0xff]  ;;  %v2240_v59 = vld [vmem:[%s2434_s25 + $0x118] sm:$0xff] }
  0x27   : > { %1357 = vmatpush.bf16.msra.mxu0 %v2208_v17  ;;  %v2248_v60 = vld [vmem:[%s2434_s25 + $0x158] sm:$0xff]  ;;  %v2239_v63 = vld [vmem:[%s2434_s25 + $0x110] sm:$0xff]  ;;  %v2238_v3 = vld [vmem:[%s2434_s25 + $0x108] sm:$0xff] }
  0x28   : > { %1370 = vmatpush.bf16.msra.mxu1 %v2216_v18  ;;  %v2256_v61 = vld [vmem:[%s2434_s25 + $0x198] sm:$0xff]  ;;  %v2247_v0 = vld [vmem:[%s2434_s25 + $0x150] sm:$0xff]  ;;  %v2246_v4 = vld [vmem:[%s2434_s25 + $0x148] sm:$0xff] }
  0x29   : > { %1383 = vmatpush.bf16.msra.mxu2 %v2224_v19  ;;  %v2264_v62 = vld [vmem:[%s2434_s25 + $0x1d8] sm:$0xff]  ;;  %v2255_v1 = vld [vmem:[%s2434_s25 + $0x190] sm:$0xff]  ;;  %v2254_v5 = vld [vmem:[%s2434_s25 + $0x188] sm:$0xff] }
  0x2a   : > { %1396 = vmatpush.bf16.msra.mxu3 %v2232_v20  ;;  %v2263_v2 = vld [vmem:[%s2434_s25 + $0x1d0] sm:$0xff]  ;;  %v2262_v6 = vld [vmem:[%s2434_s25 + $0x1c8] sm:$0xff]  ;;  %v268_v7 = vld [vmem:[%s2429_s21 + $0x18] sm:$0xff] }
  0x2b   : > { %1358 = vmatpush.bf16.msra.mxu0 %v2207_v21  ;;  %v267_v8 = vld [vmem:[%s2429_s21 + $0x10] sm:$0xff]  ;;  %v2237_v9 = vld [vmem:[%s2434_s25 + $0x100] sm:$0xff]  ;;  %v543_v11 = vunpack.c.l.b16 %v268_v7  ;;  %v544_v15 = vunpack.c.h.b16 %v268_v7  ;;  %v2276_v17 = vld [vmem:[%s2434_s25 + $0x238] sm:$0xff] }
  0x2c   : > { %1371 = vmatpush.bf16.msra.mxu1 %v2215_v22  ;;  %v2245_v10 = vld [vmem:[%s2434_s25 + $0x140] sm:$0xff]  ;;  %v541_v12 = vunpack.c.l.b16 %v267_v8  ;;  %v542_v16 = vunpack.c.h.b16 %v267_v8  ;;  %v2284_v18 = vld [vmem:[%s2434_s25 + $0x278] sm:$0xff]  ;;  %v2274_v29 = vld [vmem:[%s2434_s25 + $0x228] sm:$0xff] }
  0x2d   : > { %1384 = vmatpush.bf16.msra.mxu2 %v2223_v23  ;;  %v2253_v13 = vld [vmem:[%s2434_s25 + $0x180] sm:$0xff]  ;;  %v2292_v19 = vld [vmem:[%s2434_s25 + $0x2b8] sm:$0xff]  ;;  %v559_v21 = vpack.c.b16 %v543_v11, %v543_v11  ;;  %v560_v23 = vpack.c.b16 %v544_v15, %v544_v15  ;;  %v2282_v30 = vld [vmem:[%s2434_s25 + $0x268] sm:$0xff] }
  0x2e   : > { %1397 = vmatpush.bf16.msra.mxu3 %v2231_v24  ;;  %v2261_v14 = vld [vmem:[%s2434_s25 + $0x1c0] sm:$0xff]  ;;  %v2300_v20 = vld [vmem:[%s2434_s25 + $0x2f8] sm:$0xff]  ;;  %v557_v22 = vpack.c.b16 %v541_v12, %v541_v12  ;;  %v558_v24 = vpack.c.b16 %v542_v16, %v542_v16  ;;  %v2306_v7 = vld [vmem:[%s2434_s25 + $0x328] sm:$0xff] }
  0x2f   : > { %1359 = vmatpush.bf16.msra.mxu0 %v2206_v25  ;;  %v2275_v25 = vld [vmem:[%s2434_s25 + $0x230] sm:$0xff]  ;;  %v2273_v33 = vld [vmem:[%s2434_s25 + $0x220] sm:$0xff]  ;;  %v2272_v37 = vld [vmem:[%s2434_s25 + $0x218] sm:$0xff] }
  0x30   : > { %1372 = vmatpush.bf16.msra.mxu1 %v2214_v26  ;;  %v2283_v26 = vld [vmem:[%s2434_s25 + $0x270] sm:$0xff]  ;;  %v2281_v34 = vld [vmem:[%s2434_s25 + $0x260] sm:$0xff]  ;;  %v2280_v38 = vld [vmem:[%s2434_s25 + $0x258] sm:$0xff] }
  0x31   : > { %1385 = vmatpush.bf16.msra.mxu2 %v2222_v27  ;;  %v2291_v27 = vld [vmem:[%s2434_s25 + $0x2b0] sm:$0xff]  ;;  %v2314_v8 = vld [vmem:[%s2434_s25 + $0x368] sm:$0xff]  ;;  %v2305_v11 = vld [vmem:[%s2434_s25 + $0x320] sm:$0xff] }
  0x32   : > { %1398 = vmatpush.bf16.msra.mxu3 %v2230_v28  ;;  %v2299_v28 = vld [vmem:[%s2434_s25 + $0x2f0] sm:$0xff]  ;;  %v2313_v12 = vld [vmem:[%s2434_s25 + $0x360] sm:$0xff]  ;;  %v2304_v15 = vld [vmem:[%s2434_s25 + $0x318] sm:$0xff] }
  0x33   : > { %1360 = vmatpush.bf16.msra.mxu0 %v2205_v31  ;;  %v2290_v31 = vld [vmem:[%s2434_s25 + $0x2a8] sm:$0xff]  ;;  %v2312_v16 = vld [vmem:[%s2434_s25 + $0x358] sm:$0xff] }
  0x34   : > { %1373 = vmatpush.bf16.msra.mxu1 %v2213_v32  ;;  %v2298_v32 = vld [vmem:[%s2434_s25 + $0x2e8] sm:$0xff] }
  0x35   : > { %1386 = vmatpush.bf16.msra.mxu2 %v2221_v35  ;;  %v2289_v35 = vld [vmem:[%s2434_s25 + $0x2a0] sm:$0xff] }
  0x36   : > { %1399 = vmatpush.bf16.msra.mxu3 %v2229_v36  ;;  %1361 = vmatmul.bf16.vlgmr.msra.gmra.mxu0 %v553_v44  ;;  %v2297_v36 = vld [vmem:[%s2434_s25 + $0x2e0] sm:$0xff]  ;;  %v2295_v44 = vld [vmem:[%s2434_s25 + $0x2d0] sm:$0xff] }
  0x37   : > { %1405 = vmatpush.bf16.msrb.mxu0 %v2244_v39  ;;  %1374 = vmatmul.bf16.vlgmr.msra.gmra.mxu1 %v554_v46  ;;  %v2288_v39 = vld [vmem:[%s2434_s25 + $0x298] sm:$0xff]  ;;  %v2278_v46 = vld [vmem:[%s2434_s25 + $0x248] sm:$0xff] }
  0x38   : > { %1418 = vmatpush.bf16.msrb.mxu1 %v2252_v40  ;;  %1387 = vmatmul.bf16.vlgmr.msra.gmra.mxu2 %v555_v43  ;;  %v2296_v40 = vld [vmem:[%s2434_s25 + $0x2d8] sm:$0xff]  ;;  %v2287_v43 = vld [vmem:[%s2434_s25 + $0x290] sm:$0xff] }
  0x39   : > { %1431 = vmatpush.bf16.msrb.mxu2 %v2260_v41  ;;  %1400 = vmatmul.bf16.vlgmr.msra.gmra.mxu3 %v556_v45  ;;  %v2271_v41 = vld [vmem:[%s2434_s25 + $0x210] sm:$0xff]  ;;  %v2270_v45 = vld [vmem:[%s2434_s25 + $0x208] sm:$0xff] }
  0x3a   : > { %1444 = vmatpush.bf16.msrb.mxu3 %v2268_v42  ;;  %v2279_v42 = vld [vmem:[%s2434_s25 + $0x250] sm:$0xff] }
  0x3b   : > { %1406 = vmatpush.bf16.msrb.mxu0 %v2243_v47  ;;  %v2286_v47 = vld [vmem:[%s2434_s25 + $0x288] sm:$0xff] }
  0x3c   : > { %1419 = vmatpush.bf16.msrb.mxu1 %v2251_v48  ;;  %v2294_v48 = vld [vmem:[%s2434_s25 + $0x2c8] sm:$0xff] }
  0x3d   : > { %1432 = vmatpush.bf16.msrb.mxu2 %v2259_v49  ;;  %v269_v49 = vld [vmem:[%s2429_s21 + $0x20] sm:$0xff] }
  0x3e   : > { %1445 = vmatpush.bf16.msrb.mxu3 %v2267_v50  ;;  %v270_v50 = vld [vmem:[%s2429_s21 + $0x28] sm:$0xff] }
  0x3f   : > { %1407 = vmatpush.bf16.msrb.mxu0 %v2242_v51  ;;  %v2269_v51 = vld [vmem:[%s2434_s25 + $0x200] sm:$0xff] }
  0x40   : > { %1420 = vmatpush.bf16.msrb.mxu1 %v2250_v52  ;;  %v2277_v52 = vld [vmem:[%s2434_s25 + $0x240] sm:$0xff] }
  0x41   : > { %1433 = vmatpush.bf16.msrb.mxu2 %v2258_v53  ;;  %v545_v53 = vunpack.c.l.b16 %v269_v49 }
  0x42   : > { %1446 = vmatpush.bf16.msrb.mxu3 %v2266_v54  ;;  %v547_v54 = vunpack.c.l.b16 %v270_v50 }
  0x43   : > { %1408 = vmatpush.bf16.msrb.mxu0 %v2241_v55  ;;  %v2285_v55 = vld [vmem:[%s2434_s25 + $0x280] sm:$0xff] }
  0x44   : > { %1421 = vmatpush.bf16.msrb.mxu1 %v2249_v56  ;;  %v2293_v56 = vld [vmem:[%s2434_s25 + $0x2c0] sm:$0xff] }
  0x45   : > { %1434 = vmatpush.bf16.msrb.mxu2 %v2257_v57  ;;  %v546_v57 = vunpack.c.h.b16 %v269_v49 }
  0x46   : > { %1447 = vmatpush.bf16.msrb.mxu3 %v2265_v58  ;;  %v548_v58 = vunpack.c.h.b16 %v270_v50 }
  0x47   : > { %1409 = vmatpush.bf16.msrb.mxu0 %v2240_v59  ;;  %v2308_v59 = vld [vmem:[%s2434_s25 + $0x338] sm:$0xff] }
  0x48   : > { %1422 = vmatpush.bf16.msrb.mxu1 %v2248_v60  ;;  %v2316_v60 = vld [vmem:[%s2434_s25 + $0x378] sm:$0xff] }
  0x49   : > { %1435 = vmatpush.bf16.msrb.mxu2 %v2256_v61  ;;  %v2324_v61 = vld [vmem:[%s2434_s25 + $0x3b8] sm:$0xff] }
  0x4a   : > { %1448 = vmatpush.bf16.msrb.mxu3 %v2264_v62  ;;  %v2332_v62 = vld [vmem:[%s2434_s25 + $0x3f8] sm:$0xff] }
  0x4b   : > { %1410 = vmatpush.bf16.msrb.mxu0 %v2239_v63  ;;  %v561_v63 = vpack.c.b16 %v545_v53, %v545_v53 }
  0x4c   : > { %1423 = vmatpush.bf16.msrb.mxu1 %v2247_v0  ;;  %v563_v0 = vpack.c.b16 %v547_v54, %v547_v54 }
  0x4d   : > { %1436 = vmatpush.bf16.msrb.mxu2 %v2255_v1  ;;  %v562_v1 = vpack.c.b16 %v546_v57, %v546_v57 }
  0x4e   : > { %1449 = vmatpush.bf16.msrb.mxu3 %v2263_v2  ;;  %v564_v2 = vpack.c.b16 %v548_v58, %v548_v58 }
  0x4f   : > { %1411 = vmatpush.bf16.msrb.mxu0 %v2238_v3  ;;  %v2307_v3 = vld [vmem:[%s2434_s25 + $0x330] sm:$0xff] }
  0x50   : > { %1424 = vmatpush.bf16.msrb.mxu1 %v2246_v4  ;;  %v2315_v4 = vld [vmem:[%s2434_s25 + $0x370] sm:$0xff] }
  0x51   : > { %1437 = vmatpush.bf16.msrb.mxu2 %v2254_v5  ;;  %v2323_v5 = vld [vmem:[%s2434_s25 + $0x3b0] sm:$0xff] }
  0x52   : > { %1450 = vmatpush.bf16.msrb.mxu3 %v2262_v6  ;;  %v2331_v6 = vld [vmem:[%s2434_s25 + $0x3f0] sm:$0xff] }
  0x53   : > { %1412 = vmatpush.bf16.msrb.mxu0 %v2237_v9  ;;  %v2322_v9 = vld [vmem:[%s2434_s25 + $0x3a8] sm:$0xff] }
  0x54   : > { %1425 = vmatpush.bf16.msrb.mxu1 %v2245_v10  ;;  %v2330_v10 = vld [vmem:[%s2434_s25 + $0x3e8] sm:$0xff] }
  0x55   : > { %1438 = vmatpush.bf16.msrb.mxu2 %v2253_v13  ;;  %v2321_v13 = vld [vmem:[%s2434_s25 + $0x3a0] sm:$0xff] }
  0x56   : > { %1451 = vmatpush.bf16.msrb.mxu3 %v2261_v14  ;;  %1413 = vmatmul.bf16.vlgmr.msrb.gmra.mxu0 %v557_v22  ;;  %v2329_v14 = vld [vmem:[%s2434_s25 + $0x3e0] sm:$0xff]  ;;  %v2327_v22 = vld [vmem:[%s2434_s25 + $0x3d0] sm:$0xff] }
  0x57   : > { %1457 = vmatpush.bf16.msra.mxu0 %v2276_v17  ;;  %1426 = vmatmul.bf16.vlgmr.msrb.gmra.mxu1 %v558_v24  ;;  %v2320_v17 = vld [vmem:[%s2434_s25 + $0x398] sm:$0xff]  ;;  %v2310_v24 = vld [vmem:[%s2434_s25 + $0x348] sm:$0xff] }
  0x58   : > { %1470 = vmatpush.bf16.msra.mxu1 %v2284_v18  ;;  %1439 = vmatmul.bf16.vlgmr.msrb.gmra.mxu2 %v559_v21  ;;  %v2328_v18 = vld [vmem:[%s2434_s25 + $0x3d8] sm:$0xff]  ;;  %v2319_v21 = vld [vmem:[%s2434_s25 + $0x390] sm:$0xff] }
  0x59   : > { %1483 = vmatpush.bf16.msra.mxu2 %v2292_v19  ;;  %1452 = vmatmul.bf16.vlgmr.msrb.gmra.mxu3 %v560_v23  ;;  %v2303_v19 = vld [vmem:[%s2434_s25 + $0x310] sm:$0xff]  ;;  %v2302_v23 = vld [vmem:[%s2434_s25 + $0x308] sm:$0xff] }
  0x5a   : > { %1496 = vmatpush.bf16.msra.mxu3 %v2300_v20  ;;  %v2311_v20 = vld [vmem:[%s2434_s25 + $0x350] sm:$0xff] }
  0x5b   : > { %1458 = vmatpush.bf16.msra.mxu0 %v2275_v25  ;;  %v271_v25 = vld [vmem:[%s2429_s21 + $0x30] sm:$0xff] }
  0x5c   : > { %1471 = vmatpush.bf16.msra.mxu1 %v2283_v26  ;;  %v2318_v26 = vld [vmem:[%s2434_s25 + $0x388] sm:$0xff] }
  0x5d   : > { %1484 = vmatpush.bf16.msra.mxu2 %v2291_v27  ;;  %v2326_v27 = vld [vmem:[%s2434_s25 + $0x3c8] sm:$0xff] }
  0x5e   : > { %1497 = vmatpush.bf16.msra.mxu3 %v2299_v28  ;;  %v272_v28 = vld [vmem:[%s2429_s21 + $0x38] sm:$0xff] }
  0x5f   : > { %1459 = vmatpush.bf16.msra.mxu0 %v2274_v29  ;;  %v549_v29 = vunpack.c.l.b16 %v271_v25 }
  0x60   : > { %1472 = vmatpush.bf16.msra.mxu1 %v2282_v30  ;;  %v550_v30 = vunpack.c.h.b16 %v271_v25 }
  0x61   : > { %1485 = vmatpush.bf16.msra.mxu2 %v2290_v31  ;;  %v2301_v31 = vld [vmem:[%s2434_s25 + $0x300] sm:$0xff] }
  0x62   : > { %1498 = vmatpush.bf16.msra.mxu3 %v2298_v32  ;;  %v2309_v32 = vld [vmem:[%s2434_s25 + $0x340] sm:$0xff] }
  0x63   : > { %1460 = vmatpush.bf16.msra.mxu0 %v2273_v33  ;;  %v551_v33 = vunpack.c.l.b16 %v272_v28 }
  0x64   : > { %1473 = vmatpush.bf16.msra.mxu1 %v2281_v34  ;;  %v552_v34 = vunpack.c.h.b16 %v272_v28 }
  0x65   : > { %1486 = vmatpush.bf16.msra.mxu2 %v2289_v35  ;;  %v2317_v35 = vld [vmem:[%s2434_s25 + $0x380] sm:$0xff] }
  0x66   : > { %1499 = vmatpush.bf16.msra.mxu3 %v2297_v36  ;;  %v2325_v36 = vld [vmem:[%s2434_s25 + $0x3c0] sm:$0xff] }
  0x67   : > { %1461 = vmatpush.bf16.msra.mxu0 %v2272_v37  ;;  %v565_v37 = vpack.c.b16 %v549_v29, %v549_v29 }
  0x68   : > { %1474 = vmatpush.bf16.msra.mxu1 %v2280_v38  ;;  %v566_v38 = vpack.c.b16 %v550_v30, %v550_v30 }
  0x69   : > { %1487 = vmatpush.bf16.msra.mxu2 %v2288_v39  ;;  %v567_v39 = vpack.c.b16 %v551_v33, %v551_v33 }
  0x6a   : > { %1500 = vmatpush.bf16.msra.mxu3 %v2296_v40  ;;  %v568_v40 = vpack.c.b16 %v552_v34, %v552_v34 }
  0x6b   : > { %1462 = vmatpush.bf16.msra.mxu0 %v2271_v41 }
  0x6c   : > { %1475 = vmatpush.bf16.msra.mxu1 %v2279_v42 }
  0x6d   : > { %1488 = vmatpush.bf16.msra.mxu2 %v2287_v43 }
  0x6e   : > { %1501 = vmatpush.bf16.msra.mxu3 %v2295_v44 }
  0x6f   : > { %1463 = vmatpush.bf16.msra.mxu0 %v2270_v45 }
  0x70   : > { %1476 = vmatpush.bf16.msra.mxu1 %v2278_v46 }
  0x71   : > { %1489 = vmatpush.bf16.msra.mxu2 %v2286_v47 }
  0x72   : > { %1502 = vmatpush.bf16.msra.mxu3 %v2294_v48 }
  0x73   : > { %1464 = vmatpush.bf16.msra.mxu0 %v2269_v51 }
  0x74   : > { %1477 = vmatpush.bf16.msra.mxu1 %v2277_v52 }
  0x75   : > { %1490 = vmatpush.bf16.msra.mxu2 %v2285_v55 }
  0x76   : > { %1503 = vmatpush.bf16.msra.mxu3 %v2293_v56  ;;  %1465 = vmatmul.bf16.vlgmr.msra.gmra.mxu0 %v561_v63 }
  0x77   : > { %1509 = vmatpush.bf16.msrb.mxu0 %v2308_v59  ;;  %1478 = vmatmul.bf16.vlgmr.msra.gmra.mxu1 %v562_v1 }
  0x78   : > { %1522 = vmatpush.bf16.msrb.mxu1 %v2316_v60  ;;  %1491 = vmatmul.bf16.vlgmr.msra.gmra.mxu2 %v563_v0 }
  0x79   : > { %1535 = vmatpush.bf16.msrb.mxu2 %v2324_v61  ;;  %1504 = vmatmul.bf16.vlgmr.msra.gmra.mxu3 %v564_v2 }
  0x7a   : > { %1548 = vmatpush.bf16.msrb.mxu3 %v2332_v62 }
  0x7b   : > { %1510 = vmatpush.bf16.msrb.mxu0 %v2307_v3 }
  0x7c   : > { %1523 = vmatpush.bf16.msrb.mxu1 %v2315_v4 }
  0x7d   : > { %1536 = vmatpush.bf16.msrb.mxu2 %v2323_v5 }
  0x7e   : > { %1549 = vmatpush.bf16.msrb.mxu3 %v2331_v6 }
  0x7f   : > { %1511 = vmatpush.bf16.msrb.mxu0 %v2306_v7 }
  0x80   : > { %1524 = vmatpush.bf16.msrb.mxu1 %v2314_v8 }
  0x81   : > { %1537 = vmatpush.bf16.msrb.mxu2 %v2322_v9 }
  0x82   : > { %1550 = vmatpush.bf16.msrb.mxu3 %v2330_v10 }
  0x83   : > { %1512 = vmatpush.bf16.msrb.mxu0 %v2305_v11 }
  0x84   : > { %1525 = vmatpush.bf16.msrb.mxu1 %v2313_v12 }
  0x85   : > { %1538 = vmatpush.bf16.msrb.mxu2 %v2321_v13 }
  0x86   : > { %1551 = vmatpush.bf16.msrb.mxu3 %v2329_v14 }
  0x87   : > { %1513 = vmatpush.bf16.msrb.mxu0 %v2304_v15 }
  0x88   : > { %1526 = vmatpush.bf16.msrb.mxu1 %v2312_v16 }
  0x89   : > { %1539 = vmatpush.bf16.msrb.mxu2 %v2320_v17 }
  0x8a   : > { %1552 = vmatpush.bf16.msrb.mxu3 %v2328_v18 }
  0x8b   : > { %1514 = vmatpush.bf16.msrb.mxu0 %v2303_v19 }
  0x8c   : > { %1527 = vmatpush.bf16.msrb.mxu1 %v2311_v20 }
  0x8d   : > { %1540 = vmatpush.bf16.msrb.mxu2 %v2319_v21  ;;  %v264_v21 = vld [vmem:[#allocation2] sm:$0xff] }
  0x8e   : > { %1553 = vmatpush.bf16.msrb.mxu3 %v2327_v22 }
  0x8f   : > { %1515 = vmatpush.bf16.msrb.mxu0 %v2302_v23 }
  0x90   : > { %1528 = vmatpush.bf16.msrb.mxu1 %v2310_v24 }
  0x91   : > { %1541 = vmatpush.bf16.msrb.mxu2 %v2318_v26 }
  0x92   : > { %1554 = vmatpush.bf16.msrb.mxu3 %v2326_v27 }
  0x93   : > { %1516 = vmatpush.bf16.msrb.mxu0 %v2301_v31 }
  0x94   : > { %1529 = vmatpush.bf16.msrb.mxu1 %v2309_v32 }
  0x95   : > { %1542 = vmatpush.bf16.msrb.mxu2 %v2317_v35 }
  0x96   : > { %1555 = vmatpush.bf16.msrb.mxu3 %v2325_v36  ;;  %1517 = vmatmul.bf16.vlgmr.msrb.gmra.mxu0 %v565_v37 }
  0x97   : > { %1530 = vmatmul.bf16.vlgmr.msrb.gmra.mxu1 %v566_v38 }
  0x98   : > { %1543 = vmatmul.bf16.vlgmr.msrb.gmra.mxu2 %v567_v39 }
  0x99   : > { %1556 = vmatmul.bf16.vlgmr.msrb.gmra.mxu3 %v568_v40 }
  0xb3   : > { %v1362_v41 = vpop.f32.mrf.mxu0 }
  0xb4   : > { %v1375_v42 = vpop.f32.mrf.mxu1 }
  0xb5   : > { %v1376_v43 = vadd.f32 %v1375_v42, %v1362_v41 }
  0xbb   : > { %v1388_v44 = vpop.f32.mrf.mxu2  ;;  %v1364_v47 = vpop.f32.mrf.mxu0 }
  0xbc   : > { %v1389_v45 = vadd.f32 %v1388_v44, %v1376_v43  ;;  %v1401_v46 = vpop.f32.mrf.mxu3  ;;  %v1377_v49 = vpop.f32.mrf.mxu1 }
  0xbe   : > { %v1402_v48 = vadd.f32 %v1401_v46, %v1389_v45 }
  0xc3   : > { %v1390_v50 = vpop.f32.mrf.mxu2 }
  0xc4   : > { %v1403_v51 = vpop.f32.mrf.mxu3 }
  0xd3   : > { %v1414_v52 = vpop.f32.mrf.mxu0 }
  0xd4   : > { %v1427_v53 = vpop.f32.mrf.mxu1  ;;  %v1415_v62 = vadd.f32 %v1414_v52, %v1402_v48 }
  0xd6   : > { %v1428_v2 = vadd.f32 %v1427_v53, %v1415_v62 }
  0xdb   : > { %v1440_v54 = vpop.f32.mrf.mxu2  ;;  %v1416_v56 = vpop.f32.mrf.mxu0 }
  0xdc   : > { %v1453_v55 = vpop.f32.mrf.mxu3  ;;  %v1429_v57 = vpop.f32.mrf.mxu1  ;;  %v1441_v4 = vadd.f32 %v1440_v54, %v1428_v2 }
  0xde   : > { %v1454_v7 = vadd.f32 %v1453_v55, %v1441_v4 }
  0xe3   : > { %v1442_v58 = vpop.f32.mrf.mxu2 }
  0xe4   : > { %v1455_v59 = vpop.f32.mrf.mxu3 }
  0xf3   : > { %v1466_v60 = vpop.f32.mrf.mxu0 }
  0xf4   : > { %v1479_v61 = vpop.f32.mrf.mxu1  ;;  %v1467_v8 = vadd.f32 %v1466_v60, %v1454_v7 }
  0xf6   : > { %v1480_v9 = vadd.f32 %v1479_v61, %v1467_v8 }
  0xfb   : > { %v1492_v63 = vpop.f32.mrf.mxu2  ;;  %v1468_v1 = vpop.f32.mrf.mxu0 }
  0xfc   : > { %v1505_v0 = vpop.f32.mrf.mxu3  ;;  %v1481_v3 = vpop.f32.mrf.mxu1  ;;  %v1493_v10 = vadd.f32 %v1492_v63, %v1480_v9 }
  0xfe   : > { %v1506_v11 = vadd.f32 %v1505_v0, %v1493_v10 }
 0x103   : > { %v1494_v5 = vpop.f32.mrf.mxu2 }
 0x104   : > { %v1507_v6 = vpop.f32.mrf.mxu3 }
 0x113   : > { %v1518_v12 = vpop.f32.mrf.mxu0 }
 0x114   : > { %v1531_v13 = vpop.f32.mrf.mxu1  ;;  %v1519_v14 = vadd.f32 %v1518_v12, %v1506_v11 }
 0x116   : > { %v1532_v15 = vadd.f32 %v1531_v13, %v1519_v14 }
 0x11b   : > { %v1544_v16 = vpop.f32.mrf.mxu2  ;;  %v1520_v19 = vpop.f32.mrf.mxu0 }
 0x11c   : > { %v1557_v17 = vpop.f32.mrf.mxu3  ;;  %v1545_v18 = vadd.f32 %v1544_v16, %v1532_v15  ;;  %v1533_v20 = vpop.f32.mrf.mxu1 }
 0x11e   : > { %v1558_v22 = vadd.f32 %v1557_v17, %v1545_v18 }
 0x120   : > { %v1561_v23 = vadd.f32 %v1558_v22, %v264_v21  ;;  %1566 = sbr.rel (%p2201_p7) target bundleno = 301 (0x12d), region = 40 }
 0x122   : > { %1562 = vst [vmem:[#allocation2] sm:$0xff] %v1561_v23 }
 0x123   : > { %v1546_v24 = vpop.f32.mrf.mxu2 }
 0x124   : > { %v1559_v25 = vpop.f32.mrf.mxu3 }
 0x125   : > { %v2358_v27 = vld [vmem:[%s2591_s2] ss:$0 sm:$0xff] }
 0x129   : > { %v1567_v26 = vld [vmem:[#allocation2] sm:$0xff] }
 0x12a   : > { %v1572_v28 = vadd.f32 %v2358_v27, %v1567_v26 }
 0x12c   : > { %1573 = vst [vmem:[%s2592_s3] sm:$0xff] %v1572_v28 }
 0x12d PF: > { %s13_s14 = sadd.s32 1, %s2381_s14   ;;  %s2593_s12 = smov %s2377_s13 }
 0x12e   : > { %p10_p8 = scmp.ge.s32.totalorder %s13_s14, 6   ;;  %s2594_s13 = smov %s2596_s15 }
 0x130   :  { %12 = sbr.rel (!%p10_p8) target bundleno = 2 (0x2), region = 76 }

</bundles_post_ra>
